<compile_context>
chip_gen: v5e
topology: v5e:2x2
jax: 0.10.0
libtpu: 0.0.40
codegen_flags: <defaults>
</compile_context>

<pallas_src>
import jax
import jax.numpy as jnp
from jax.experimental import pallas as pl
from jax.experimental.pallas import tpu as pltpu

IN_DIM = 28 * 28          # 784
HID = 1200
HID_PAD = 1280            # 10 * 128 lanes
OUT_DIM = 10
OUT_PAD = 128             # lane-dense logits tile
BN_EPS = 1e-5
DROP_P = 0.8
KEEP_SCALE = 1.0 / (1.0 - DROP_P)   # 5.0


def teacher_kernel(x_ref,
                   w1_ref, g1_ref, be1_ref, m1_ref,
                   w2_ref, g2_ref, be2_ref, m2_ref,
                   w3_ref, b3_ref,
                   out_ref):
    def bn_relu_drop(h, gamma, beta, mask_bf16):
        # Training-mode BatchNorm1d: batch mean + biased batch variance (one pass).
        mu = jnp.mean(h, axis=0, keepdims=True)
        ex2 = jnp.mean(h * h, axis=0, keepdims=True)
        var = jnp.maximum(ex2 - mu * mu, 0.0)
        inv = jax.lax.rsqrt(var + BN_EPS)
        # Fold dropout inverted scaling (x5) into per-feature scale/shift rows:
        #   5*relu((h-mu)*g*inv + b) == relu(h*scale + shift)
        scale = gamma * inv * KEEP_SCALE                    # [1, HID_PAD] f32
        shift = beta * KEEP_SCALE - mu * scale              # [1, HID_PAD] f32
        h = jnp.maximum(h * scale + shift, 0.0)
        # Dropout keep-mask is {0,1} bf16; inverted scaling already folded above.
        return h.astype(jnp.bfloat16) * mask_bf16

    # fc1 (bf16 MXU, f32 accumulate). b1 omitted: cancelled by BN mean subtraction.
    h = jnp.dot(x_ref[...], w1_ref[...], preferred_element_type=jnp.float32)
    h = bn_relu_drop(h, g1_ref[...], be1_ref[...], m1_ref[...])

    # fc2. b2 omitted for the same reason.
    h = jnp.dot(h, w2_ref[...], preferred_element_type=jnp.float32)
    h = bn_relu_drop(h, g2_ref[...], be2_ref[...], m2_ref[...])

    # fc3 into a lane-dense 128-wide padded output (unmasked vst).
    out_ref[...] = (jnp.dot(h, w3_ref[...], preferred_element_type=jnp.float32)
                    + b3_ref[...])


def teacher_forward(x_nchw, packed_params, key):
    """x_nchw: [B, 1, 28, 28] float32.  Returns logits [B, 10] float32."""
    B = x_nchw.shape[0]
    x2 = x_nchw.reshape(B, IN_DIM).astype(jnp.bfloat16)

    (w1, g1, be1, w2, g2, be2, w3, b3) = packed_params

    # Dropout keep-masks (p_keep = 0.2), generated host-side so no TPU-only PRNG
    # primitives are needed inside the kernel.  Stored as {0,1} bf16.
    k1, k2 = jax.random.split(key)
    m1 = jax.random.bernoulli(k1, 1.0 - DROP_P, (B, HID_PAD)).astype(jnp.bfloat16)
    m2 = jax.random.bernoulli(k2, 1.0 - DROP_P, (B, HID_PAD)).astype(jnp.bfloat16)

    out_padded = pl.pallas_call(
        teacher_kernel,
        out_shape=jax.ShapeDtypeStruct((B, OUT_PAD), jnp.float32),
        in_specs=[pl.BlockSpec(memory_space=pltpu.MemorySpace.VMEM)] * 11,
        out_specs=pl.BlockSpec(memory_space=pltpu.MemorySpace.VMEM),
        compiler_params=pltpu.CompilerParams(vmem_limit_bytes=32 * 1024 * 1024),
    )(x2, w1, g1, be1, m1, w2, g2, be2, m2, w3, b3)

    return out_padded[:, :OUT_DIM]


def init_params(key):
    """Synthetic parameters matching the PyTorch module's shapes.
    Linear weights stored already transposed to [in, out] for x @ W."""
    k1, k2, k3 = jax.random.split(key, 3)

    def lin(k, fan_in, fan_out):
        bound = 1.0 / (fan_in ** 0.5)
        kw, kb = jax.random.split(k)
        w = jax.random.uniform(kw, (fan_in, fan_out), jnp.float32, -bound, bound)
        b = jax.random.uniform(kb, (1, fan_out), jnp.float32, -bound, bound)
        return w, b

    w1, b1 = lin(k1, IN_DIM, HID)
    w2, b2 = lin(k2, HID, HID)
    w3, b3 = lin(k3, HID, OUT_DIM)
    g1 = jnp.ones((1, HID), jnp.float32)
    be1 = jnp.zeros((1, HID), jnp.float32)
    g2 = jnp.ones((1, HID), jnp.float32)
    be2 = jnp.zeros((1, HID), jnp.float32)
    return (w1, b1, g1, be1, w2, b2, g2, be2, w3, b3)


def pack_params(params):
    """Pad hidden dim 1200->1280 and output 10->128 (zero-fill), cast weights to
    bf16.  b1/b2 are dropped: biases before training-mode BN cancel exactly."""
    (w1, _b1, g1, be1, w2, _b2, g2, be2, w3, b3) = params

    w1p = jnp.zeros((IN_DIM, HID_PAD), jnp.float32).at[:, :HID].set(w1)
    w2p = jnp.zeros((HID_PAD, HID_PAD), jnp.float32).at[:HID, :HID].set(w2)
    w3p = jnp.zeros((HID_PAD, OUT_PAD), jnp.float32).at[:HID, :OUT_DIM].set(w3)
    b3p = jnp.zeros((1, OUT_PAD), jnp.float32).at[:, :OUT_DIM].set(b3)

    g1p = jnp.zeros((1, HID_PAD), jnp.float32).at[:, :HID].set(g1)
    be1p = jnp.zeros((1, HID_PAD), jnp.float32).at[:, :HID].set(be1)
    g2p = jnp.zeros((1, HID_PAD), jnp.float32).at[:, :HID].set(g2)
    be2p = jnp.zeros((1, HID_PAD), jnp.float32).at[:, :HID].set(be2)

    return (w1p.astype(jnp.bfloat16), g1p, be1p,
            w2p.astype(jnp.bfloat16), g2p, be2p,
            w3p.astype(jnp.bfloat16), b3p)


if __name__ == "__main__":
    key = jax.random.PRNGKey(0)
    kx, kp, kd = jax.random.split(key, 3)

    B = 8
    x = jax.random.normal(kx, (B, 1, 28, 28), jnp.float32)   # NCHW like PyTorch
    params = init_params(kp)
    packed = pack_params(params)

    out = teacher_forward(x, packed, kd)
    out = jax.block_until_ready(out)
    assert out.shape == (B, OUT_DIM) and out.dtype == jnp.float32
    assert bool(jnp.all(jnp.isfinite(out)))
    print("KERNEL_OK")
</pallas_src>

<mosaic_0001>
module attributes {stable_mosaic.version = 11 : i64} {
  func.func @teacher_kernel(%arg0: memref<8x784xbf16, #tpu.memory_space<vmem>>, %arg1: memref<784x1280xbf16, #tpu.memory_space<vmem>>, %arg2: memref<1x1280xf32, #tpu.memory_space<vmem>>, %arg3: memref<1x1280xf32, #tpu.memory_space<vmem>>, %arg4: memref<8x1280xbf16, #tpu.memory_space<vmem>>, %arg5: memref<1280x1280xbf16, #tpu.memory_space<vmem>>, %arg6: memref<1x1280xf32, #tpu.memory_space<vmem>>, %arg7: memref<1x1280xf32, #tpu.memory_space<vmem>>, %arg8: memref<8x1280xbf16, #tpu.memory_space<vmem>>, %arg9: memref<1280x128xbf16, #tpu.memory_space<vmem>>, %arg10: memref<1x128xf32, #tpu.memory_space<vmem>>, %arg11: memref<8x128xf32, #tpu.memory_space<vmem>>) attributes {dimension_semantics = [], scalar_prefetch = 0 : i64, scratch_operands = 0 : i64, tpu.core_type = #tpu.core_type<tc>} {
    %c0 = arith.constant 0 : index
    %c0_0 = arith.constant 0 : index
    %0 = vector.load %arg0[%c0, %c0_0] : memref<8x784xbf16, #tpu.memory_space<vmem>>, vector<8x784xbf16>
    %c0_1 = arith.constant 0 : index
    %c0_2 = arith.constant 0 : index
    %1 = vector.load %arg1[%c0_1, %c0_2] : memref<784x1280xbf16, #tpu.memory_space<vmem>>, vector<784x1280xbf16>
    %cst = arith.constant dense<0.000000e+00> : vector<8x1280xf32>
    %2 = tpu.matmul %0, %1, %cst {dimension_numbers = #tpu.dot_dimension_numbers<[1], [0], [0], [1], [0, 0, 1, 1], [], []>} : vector<8x784xbf16>, vector<784x1280xbf16>, vector<8x1280xf32> -> vector<8x1280xf32>
    %c0_3 = arith.constant 0 : index
    %c0_4 = arith.constant 0 : index
    %3 = vector.load %arg2[%c0_3, %c0_4] : memref<1x1280xf32, #tpu.memory_space<vmem>>, vector<1x1280xf32>
    %c0_5 = arith.constant 0 : index
    %c0_6 = arith.constant 0 : index
    %4 = vector.load %arg3[%c0_5, %c0_6] : memref<1x1280xf32, #tpu.memory_space<vmem>>, vector<1x1280xf32>
    %c0_7 = arith.constant 0 : index
    %c0_8 = arith.constant 0 : index
    %5 = vector.load %arg4[%c0_7, %c0_8] : memref<8x1280xbf16, #tpu.memory_space<vmem>>, vector<8x1280xbf16>
    %cst_9 = arith.constant dense<0.000000e+00> : vector<1280xf32>
    %6 = vector.multi_reduction <add>, %2, %cst_9 [0] : vector<8x1280xf32> to vector<1280xf32>
    %7 = vector.shape_cast %6 : vector<1280xf32> to vector<1x1280xf32>
    %cst_10 = arith.constant 8.000000e+00 : f32
    %8 = vector.broadcast %cst_10 : f32 to vector<1x1280xf32>
    %9 = arith.divf %7, %8 : vector<1x1280xf32>
    %10 = arith.mulf %2, %2 : vector<8x1280xf32>
    %cst_11 = arith.constant dense<0.000000e+00> : vector<1280xf32>
    %11 = vector.multi_reduction <add>, %10, %cst_11 [0] : vector<8x1280xf32> to vector<1280xf32>
    %12 = vector.shape_cast %11 : vector<1280xf32> to vector<1x1280xf32>
    %cst_12 = arith.constant 8.000000e+00 : f32
    %13 = vector.broadcast %cst_12 : f32 to vector<1x1280xf32>
    %14 = arith.divf %12, %13 : vector<1x1280xf32>
    %15 = arith.mulf %9, %9 : vector<1x1280xf32>
    %16 = arith.subf %14, %15 : vector<1x1280xf32>
    %cst_13 = arith.constant 0.000000e+00 : f32
    %17 = vector.broadcast %cst_13 : f32 to vector<1x1280xf32>
    %18 = arith.maximumf %16, %17 : vector<1x1280xf32>
    %cst_14 = arith.constant 9.99999974E-6 : f32
    %19 = vector.broadcast %cst_14 : f32 to vector<1x1280xf32>
    %20 = arith.addf %18, %19 : vector<1x1280xf32>
    %21 = math.rsqrt %20 : vector<1x1280xf32>
    %22 = arith.mulf %3, %21 : vector<1x1280xf32>
    %cst_15 = arith.constant 5.000000e+00 : f32
    %23 = vector.broadcast %cst_15 : f32 to vector<1x1280xf32>
    %24 = arith.mulf %22, %23 : vector<1x1280xf32>
    %cst_16 = arith.constant 5.000000e+00 : f32
    %25 = vector.broadcast %cst_16 : f32 to vector<1x1280xf32>
    %26 = arith.mulf %4, %25 : vector<1x1280xf32>
    %27 = arith.mulf %9, %24 : vector<1x1280xf32>
    %28 = arith.subf %26, %27 : vector<1x1280xf32>
    %29 = vector.broadcast %24 : vector<1x1280xf32> to vector<8x1280xf32>
    %30 = arith.mulf %2, %29 : vector<8x1280xf32>
    %31 = vector.broadcast %28 : vector<1x1280xf32> to vector<8x1280xf32>
    %32 = arith.addf %30, %31 : vector<8x1280xf32>
    %cst_17 = arith.constant 0.000000e+00 : f32
    %33 = vector.broadcast %cst_17 : f32 to vector<8x1280xf32>
    %34 = arith.maximumf %32, %33 : vector<8x1280xf32>
    %35 = arith.truncf %34 : vector<8x1280xf32> to vector<8x1280xbf16>
    %36 = arith.mulf %35, %5 : vector<8x1280xbf16>
    %c0_18 = arith.constant 0 : index
    %c0_19 = arith.constant 0 : index
    %37 = vector.load %arg5[%c0_18, %c0_19] : memref<1280x1280xbf16, #tpu.memory_space<vmem>>, vector<1280x1280xbf16>
    %cst_20 = arith.constant dense<0.000000e+00> : vector<8x1280xf32>
    %38 = tpu.matmul %36, %37, %cst_20 {dimension_numbers = #tpu.dot_dimension_numbers<[1], [0], [0], [1], [0, 0, 1, 1], [], []>} : vector<8x1280xbf16>, vector<1280x1280xbf16>, vector<8x1280xf32> -> vector<8x1280xf32>
    %c0_21 = arith.constant 0 : index
    %c0_22 = arith.constant 0 : index
    %39 = vector.load %arg6[%c0_21, %c0_22] : memref<1x1280xf32, #tpu.memory_space<vmem>>, vector<1x1280xf32>
    %c0_23 = arith.constant 0 : index
    %c0_24 = arith.constant 0 : index
    %40 = vector.load %arg7[%c0_23, %c0_24] : memref<1x1280xf32, #tpu.memory_space<vmem>>, vector<1x1280xf32>
    %c0_25 = arith.constant 0 : index
    %c0_26 = arith.constant 0 : index
    %41 = vector.load %arg8[%c0_25, %c0_26] : memref<8x1280xbf16, #tpu.memory_space<vmem>>, vector<8x1280xbf16>
    %cst_27 = arith.constant dense<0.000000e+00> : vector<1280xf32>
    %42 = vector.multi_reduction <add>, %38, %cst_27 [0] : vector<8x1280xf32> to vector<1280xf32>
    %43 = vector.shape_cast %42 : vector<1280xf32> to vector<1x1280xf32>
    %cst_28 = arith.constant 8.000000e+00 : f32
    %44 = vector.broadcast %cst_28 : f32 to vector<1x1280xf32>
    %45 = arith.divf %43, %44 : vector<1x1280xf32>
    %46 = arith.mulf %38, %38 : vector<8x1280xf32>
    %cst_29 = arith.constant dense<0.000000e+00> : vector<1280xf32>
    %47 = vector.multi_reduction <add>, %46, %cst_29 [0] : vector<8x1280xf32> to vector<1280xf32>
    %48 = vector.shape_cast %47 : vector<1280xf32> to vector<1x1280xf32>
    %cst_30 = arith.constant 8.000000e+00 : f32
    %49 = vector.broadcast %cst_30 : f32 to vector<1x1280xf32>
    %50 = arith.divf %48, %49 : vector<1x1280xf32>
    %51 = arith.mulf %45, %45 : vector<1x1280xf32>
    %52 = arith.subf %50, %51 : vector<1x1280xf32>
    %cst_31 = arith.constant 0.000000e+00 : f32
    %53 = vector.broadcast %cst_31 : f32 to vector<1x1280xf32>
    %54 = arith.maximumf %52, %53 : vector<1x1280xf32>
    %cst_32 = arith.constant 9.99999974E-6 : f32
    %55 = vector.broadcast %cst_32 : f32 to vector<1x1280xf32>
    %56 = arith.addf %54, %55 : vector<1x1280xf32>
    %57 = math.rsqrt %56 : vector<1x1280xf32>
    %58 = arith.mulf %39, %57 : vector<1x1280xf32>
    %cst_33 = arith.constant 5.000000e+00 : f32
    %59 = vector.broadcast %cst_33 : f32 to vector<1x1280xf32>
    %60 = arith.mulf %58, %59 : vector<1x1280xf32>
    %cst_34 = arith.constant 5.000000e+00 : f32
    %61 = vector.broadcast %cst_34 : f32 to vector<1x1280xf32>
    %62 = arith.mulf %40, %61 : vector<1x1280xf32>
    %63 = arith.mulf %45, %60 : vector<1x1280xf32>
    %64 = arith.subf %62, %63 : vector<1x1280xf32>
    %65 = vector.broadcast %60 : vector<1x1280xf32> to vector<8x1280xf32>
    %66 = arith.mulf %38, %65 : vector<8x1280xf32>
    %67 = vector.broadcast %64 : vector<1x1280xf32> to vector<8x1280xf32>
    %68 = arith.addf %66, %67 : vector<8x1280xf32>
    %cst_35 = arith.constant 0.000000e+00 : f32
    %69 = vector.broadcast %cst_35 : f32 to vector<8x1280xf32>
    %70 = arith.maximumf %68, %69 : vector<8x1280xf32>
    %71 = arith.truncf %70 : vector<8x1280xf32> to vector<8x1280xbf16>
    %72 = arith.mulf %71, %41 : vector<8x1280xbf16>
    %c0_36 = arith.constant 0 : index
    %c0_37 = arith.constant 0 : index
    %73 = vector.load %arg9[%c0_36, %c0_37] : memref<1280x128xbf16, #tpu.memory_space<vmem>>, vector<1280x128xbf16>
    %cst_38 = arith.constant dense<0.000000e+00> : vector<8x128xf32>
    %74 = tpu.matmul %72, %73, %cst_38 {dimension_numbers = #tpu.dot_dimension_numbers<[1], [0], [0], [1], [0, 0, 1, 1], [], []>} : vector<8x1280xbf16>, vector<1280x128xbf16>, vector<8x128xf32> -> vector<8x128xf32>
    %c0_39 = arith.constant 0 : index
    %c0_40 = arith.constant 0 : index
    %75 = vector.load %arg10[%c0_39, %c0_40] : memref<1x128xf32, #tpu.memory_space<vmem>>, vector<1x128xf32>
    %76 = vector.broadcast %75 : vector<1x128xf32> to vector<8x128xf32>
    %77 = arith.addf %74, %76 : vector<8x128xf32>
    %c0_41 = arith.constant 0 : index
    %c0_42 = arith.constant 0 : index
    %78 = vector.load %arg11[%c0_41, %c0_42] : memref<8x128xf32, #tpu.memory_space<vmem>>, vector<8x128xf32>
    tpu.vector_store %arg11[%c0_41, %c0_42], %77 {strides = array<i32>} : memref<8x128xf32, #tpu.memory_space<vmem>>, vector<8x128xf32>,
    return
  }
}

</mosaic_0001>

<bundles_post_ra>
// kernel: tpu_custom_call.1
= control target key start
LH: loop header
LB: loop body
LE: loop exit
PB: predicated region body
PF: predicated region fallthrough
CT: control target
= control target key end

     0   :  { %16 = vsyncpa [#allocation3], 0  ;;  %s20386_s0 = inlined_call_operand.hbm [shape: bf16[8,784], index: 0, kind: input, shape index: {}]   ;;  %s20387_s1 = inlined_call_operand.hbm [shape: bf16[784,1280], index: 1, kind: input, shape index: {}]   ;;  %s20388_s2 = inlined_call_operand.hbm [shape: f32[1,1280], index: 2, kind: input, shape index: {}]   ;;  %s20389_s3 = inlined_call_operand.hbm [shape: f32[1,1280], index: 3, kind: input, shape index: {}]   ;;  %s20390_s4 = inlined_call_operand.hbm [shape: bf16[8,1280], index: 4, kind: input, shape index: {}]   ;;  %s20391_s5 = inlined_call_operand.hbm [shape: bf16[1280,1280], index: 5, kind: input, shape index: {}]   ;;  %s20392_s6 = inlined_call_operand.hbm [shape: f32[1,1280], index: 6, kind: input, shape index: {}]   ;;  %s20393_s7 = inlined_call_operand.hbm [shape: f32[1,1280], index: 7, kind: input, shape index: {}]   ;;  %s20394_s8 = inlined_call_operand.hbm [shape: bf16[8,1280], index: 8, kind: input, shape index: {}]   ;;  %s20395_s9 = inlined_call_operand.hbm [shape: bf16[1280,128], index: 9, kind: input, shape index: {}]   ;;  %s20396_s10 = inlined_call_operand.hbm [shape: f32[1,128], index: 10, kind: input, shape index: {}]   ;;  %s20397_s11 = inlined_call_operand.hbm [shape: f32[8,128], index: 11, kind: output, shape index: {}]  }
   0x1   :  { %17 = vsyncpa [#allocation6], 0 }
   0x2   :  { %18 = vsyncpa [#allocation9], 0 }
   0x3   :  { %19 = vsyncpa [#allocation12], 0 }
   0x4   :  { %20 = vsyncpa [#allocation15], 0 }
   0x5   :  { %21 = vsyncpa [#allocation18], 0  ;;  %s38_s19 = sshll.u32 %s20387_s1, 4  ;;  %s39_s19 = int_to_ptr.hbm [resolvable:$true] %s38_s19 }
   0x6   :  { %22 = vsyncpa [#allocation4], 0  ;;  %s19194_s20 = smov [#allocation5]   ;;  %s63_s24 = sshll.u32 %s20389_s3, 4  ;;  %s64_s24 = int_to_ptr.hbm [resolvable:$true] %s63_s24 }
   0x7   :  { %s40_s21 = sshll.u32 %s19194_s20, 4  ;;  %s19195_s25 = smov 640   ;;  %s41_s21 = int_to_ptr.vmem [resolvable:$true] %s40_s21 }
   0x8   :  { %s19196_s26 = smov 40   ;;  %s19197_s27 = smov [#allocation8]  }
   0x9   :  { %46 = dma.hbm_to_vmem [thread:$0]  %s39_s19, 62720, %s41_s21, [#allocation6], %s19195_s25, %s19195_s25, %s19196_s26  }
   0xa   :  { %s65_s28 = sshll.u32 %s19197_s27, 4  ;;  %s84_s12 = sshll.u32 %s20391_s5, 4  ;;  %s66_s28 = int_to_ptr.vmem [resolvable:$true] %s65_s28  ;;  %s85_s12 = int_to_ptr.hbm [resolvable:$true] %s84_s12 }
   0xb   :  { %68 = dma.hbm_to_vmem [thread:$0]  %s64_s24, 160, %s66_s28, [#allocation9]  }
   0xc   :  { %s109_s14 = sshll.u32 %s20393_s7, 4  ;;  %s19198_s15 = smov [#allocation11]   ;;  %s110_s14 = int_to_ptr.hbm [resolvable:$true] %s109_s14 }
   0xd   :  { %s86_s16 = sshll.u32 %s19198_s15, 4  ;;  %s19199_s3 = smov [#allocation14]   ;;  %s87_s16 = int_to_ptr.vmem [resolvable:$true] %s86_s16 }
   0xe   :  { %92 = dma.hbm_to_vmem [thread:$0]  %s85_s12, 102400, %s87_s16, [#allocation12], %s19195_s25, %s19195_s25, %s19196_s26  }
   0xf   :  { %s111_s17 = sshll.u32 %s19199_s3, 4  ;;  %s130_s20 = sshll.u32 %s20395_s9, 4  ;;  %s112_s17 = int_to_ptr.vmem [resolvable:$true] %s111_s17  ;;  %s131_s20 = int_to_ptr.hbm [resolvable:$true] %s130_s20 }
  0x10   :  { %114 = dma.hbm_to_vmem [thread:$0]  %s110_s14, 160, %s112_s17, [#allocation15]  }
  0x11   :  { %s19200_s5 = smov [#allocation17]   ;;  %s28_s7 = sshll.u32 %s20386_s0, 4  ;;  %s29_s7 = int_to_ptr.hbm [resolvable:$true] %s28_s7 }
  0x12   :  { %s132_s21 = sshll.u32 %s19200_s5, 4  ;;  %s19201_s24 = smov 64   ;;  %s133_s21 = int_to_ptr.vmem [resolvable:$true] %s132_s21 }
  0x13   :  { %s19202_s27 = smov 4   ;;  %s19203_s25 = smov [#allocation2]  }
  0x14   :  { %138 = dma.hbm_to_vmem [thread:$0]  %s131_s20, 10240, %s133_s21, [#allocation18], %s19201_s24, %s19201_s24, %s19202_s27  }
  0x15   :  { %s30_s26 = sshll.u32 %s19203_s25, 4  ;;  %s52_s9 = sshll.u32 %s20388_s2, 4  ;;  %s31_s26 = int_to_ptr.vmem [resolvable:$true] %s30_s26  ;;  %s53_s9 = int_to_ptr.hbm [resolvable:$true] %s52_s9 }
  0x16   :  { %33 = dma.hbm_to_vmem [thread:$0]  %s29_s7, 448, %s31_s26, [#allocation3]  }
  0x17   :  { %s74_s1 = sshll.u32 %s20390_s4, 4  ;;  %s19204_s13 = smov [#allocation7]   ;;  %s75_s1 = int_to_ptr.hbm [resolvable:$true] %s74_s1 }
  0x18   :  { %s54_s14 = sshll.u32 %s19204_s13, 4  ;;  %s19205_s0 = smov [#allocation10]   ;;  %s55_s14 = int_to_ptr.vmem [resolvable:$true] %s54_s14 }
  0x19   :  { %57 = dma.hbm_to_vmem [thread:$0]  %s53_s9, 160, %s55_s14, [#allocation6]  }
  0x1a   :  { %s76_s15 = sshll.u32 %s19205_s0, 4  ;;  %s98_s17 = sshll.u32 %s20392_s6, 4  ;;  %s77_s15 = int_to_ptr.vmem [resolvable:$true] %s76_s15  ;;  %s99_s17 = int_to_ptr.hbm [resolvable:$true] %s98_s17 }
  0x1b   :  { %79 = dma.hbm_to_vmem [thread:$0]  %s75_s1, 640, %s77_s15, [#allocation9]  }
  0x1c   :  { %s120_s19 = sshll.u32 %s20394_s8, 4  ;;  %s19206_s20 = smov [#allocation13]   ;;  %s121_s19 = int_to_ptr.hbm [resolvable:$true] %s120_s19 }
  0x1d   :  { %s100_s4 = sshll.u32 %s19206_s20, 4  ;;  %s19207_s5 = smov [#allocation16]   ;;  %s101_s4 = int_to_ptr.vmem [resolvable:$true] %s100_s4 }
  0x1e   :  { %103 = dma.hbm_to_vmem [thread:$0]  %s99_s17, 160, %s101_s4, [#allocation12]  }
  0x1f   :  { %s122_s21 = sshll.u32 %s19207_s5, 4  ;;  %s144_s7 = sshll.u32 %s20396_s10, 4  ;;  %s123_s21 = int_to_ptr.vmem [resolvable:$true] %s122_s21  ;;  %s145_s7 = int_to_ptr.hbm [resolvable:$true] %s144_s7 }
  0x20   :  { %125 = dma.hbm_to_vmem [thread:$0]  %s121_s19, 640, %s123_s21, [#allocation15]  }
  0x21   :  { %s19208_s6 = smov [#allocation19]  }
  0x22   :  { %s146_s24 = sshll.u32 %s19208_s6, 4  ;;  %s147_s24 = int_to_ptr.vmem [resolvable:$true] %s146_s24 }
  0x23   :  { %149 = dma.hbm_to_vmem [thread:$0]  %s145_s7, 16, %s147_s24, [#allocation18]  }
  0x24   :  { %19180 = dma.done.wait [#allocation3], 448  }
  0x25   :  { %19181 = vsyncadd [#allocation3], 4294966848 }
  0x26   :  { %19182 = dma.done.wait [#allocation6], 62880  }
  0x27   :  { %19183 = vsyncadd [#allocation6], 4294904416 }
  0x28   :  { %19184 = dma.done.wait [#allocation9], 800  }
  0x29   :  { %19185 = vsyncadd [#allocation9], 4294966496 }
  0x2a   :  { %19186 = dma.done.wait [#allocation12], 102560  }
  0x2b   :  { %19187 = vsyncadd [#allocation12], 4294864736 }
  0x2c   :  { %19188 = dma.done.wait [#allocation15], 800  }
  0x2d   :  { %19189 = vsyncadd [#allocation15], 4294966496 }
  0x2e   :  { %19190 = dma.done.wait [#allocation18], 10256  }
  0x2f   :  { %19191 = vsyncadd [#allocation18], 4294957040  ;;  %v12254_v0 = vld [vmem:[#allocation5 + $0x230] sm:$0xf]  ;;  %v17537_v1 = vld [vmem:[#allocation5 + $0x254] sm:$0xf0] }
  0x30   :  { %v12574_v2 = vld [vmem:[#allocation5 + $0x4b0] sm:$0xf]  ;;  %v12255_v3 = vor.u32 %v17537_v1, %v12254_v0  ;;  %v17617_v4 = vld [vmem:[#allocation5 + $0x4d4] sm:$0xf0]  ;;  %v12214_v11 = vld [vmem:[#allocation5 + $0x1e0] sm:$0xf] }
  0x31   :  { %v12894_v5 = vld [vmem:[#allocation5 + $0x730] sm:$0xf]  ;;  %v17697_v6 = vld [vmem:[#allocation5 + $0x754] sm:$0xf0]  ;;  %v12575_v7 = vor.u32 %v17617_v4, %v12574_v2  ;;  %v17527_v13 = vld [vmem:[#allocation5 + $0x204] sm:$0xf0] }
  0x32   :  { %v12895_v8 = vor.u32 %v17697_v6, %v12894_v5  ;;  %v13214_v9 = vld [vmem:[#allocation5 + $0x9b0] sm:$0xf]  ;;  %v17777_v10 = vld [vmem:[#allocation5 + $0x9d4] sm:$0xf0]  ;;  %3167 = vmatpush.bf16.msra.mxu0 %v12255_v3  ;;  %v12534_v14 = vld [vmem:[#allocation5 + $0x460] sm:$0xf]  ;;  %v12215_v16 = vor.u32 %v17527_v13, %v12214_v11 }
  0x33   :  { %v13215_v12 = vor.u32 %v17777_v10, %v13214_v9  ;;  %v17607_v15 = vld [vmem:[#allocation5 + $0x484] sm:$0xf0]  ;;  %3180 = vmatpush.bf16.msra.mxu1 %v12575_v7  ;;  %v12854_v18 = vld [vmem:[#allocation5 + $0x6e0] sm:$0xf]  ;;  %v12174_v23 = vld [vmem:[#allocation5 + $0x190] sm:$0xf] }
  0x34   :  { %3193 = vmatpush.bf16.msra.mxu2 %v12895_v8  ;;  %v12535_v17 = vor.u32 %v17607_v15, %v12534_v14  ;;  %v17687_v19 = vld [vmem:[#allocation5 + $0x704] sm:$0xf0]  ;;  %v13174_v20 = vld [vmem:[#allocation5 + $0x960] sm:$0xf]  ;;  %v17517_v24 = vld [vmem:[#allocation5 + $0x1b4] sm:$0xf0] }
  0x35   :  { %3206 = vmatpush.bf16.msra.mxu3 %v13215_v12  ;;  %v12855_v21 = vor.u32 %v17687_v19, %v12854_v18  ;;  %v17767_v22 = vld [vmem:[#allocation5 + $0x984] sm:$0xf0]  ;;  %v12494_v26 = vld [vmem:[#allocation5 + $0x410] sm:$0xf]  ;;  %v17597_v27 = vld [vmem:[#allocation5 + $0x434] sm:$0xf0]  ;;  %v12175_v29 = vor.u32 %v17517_v24, %v12174_v23 }
  0x36   :  { %v13175_v25 = vor.u32 %v17767_v22, %v13174_v20  ;;  %v12814_v28 = vld [vmem:[#allocation5 + $0x690] sm:$0xf]  ;;  %3168 = vmatpush.bf16.msra.mxu0 %v12215_v16  ;;  %v17677_v30 = vld [vmem:[#allocation5 + $0x6b4] sm:$0xf0]  ;;  %v12495_v33 = vor.u32 %v17597_v27, %v12494_v26  ;;  %v12134_v35 = vld [vmem:[#allocation5 + $0x140] sm:$0xf] }
  0x37   :  { %v13134_v31 = vld [vmem:[#allocation5 + $0x910] sm:$0xf]  ;;  %v17757_v32 = vld [vmem:[#allocation5 + $0x934] sm:$0xf0]  ;;  %3181 = vmatpush.bf16.msra.mxu1 %v12535_v17  ;;  %v12815_v34 = vor.u32 %v17677_v30, %v12814_v28  ;;  %v17507_v36 = vld [vmem:[#allocation5 + $0x164] sm:$0xf0] }
  0x38   :  { %3194 = vmatpush.bf16.msra.mxu2 %v12855_v21  ;;  %v12454_v37 = vld [vmem:[#allocation5 + $0x3c0] sm:$0xf]  ;;  %v13135_v38 = vor.u32 %v17757_v32, %v13134_v31  ;;  %v17587_v39 = vld [vmem:[#allocation5 + $0x3e4] sm:$0xf0]  ;;  %v12135_v44 = vor.u32 %v17507_v36, %v12134_v35  ;;  %v12094_v47 = vld [vmem:[#allocation5 + $0xf0] sm:$0xf] }
  0x39   :  { %3207 = vmatpush.bf16.msra.mxu3 %v13175_v25  ;;  %v12774_v40 = vld [vmem:[#allocation5 + $0x640] sm:$0xf]  ;;  %v17667_v41 = vld [vmem:[#allocation5 + $0x664] sm:$0xf0]  ;;  %v12455_v45 = vor.u32 %v17587_v39, %v12454_v37  ;;  %v17497_v48 = vld [vmem:[#allocation5 + $0x114] sm:$0xf0] }
  0x3a   :  { %v13094_v42 = vld [vmem:[#allocation5 + $0x8c0] sm:$0xf]  ;;  %v17747_v43 = vld [vmem:[#allocation5 + $0x8e4] sm:$0xf0]  ;;  %3169 = vmatpush.bf16.msra.mxu0 %v12175_v29  ;;  %v12775_v46 = vor.u32 %v17667_v41, %v12774_v40  ;;  %v12414_v49 = vld [vmem:[#allocation5 + $0x370] sm:$0xf]  ;;  %v12095_v56 = vor.u32 %v17497_v48, %v12094_v47 }
  0x3b   :  { %3182 = vmatpush.bf16.msra.mxu1 %v12495_v33  ;;  %v13095_v50 = vor.u32 %v17747_v43, %v13094_v42  ;;  %v17577_v51 = vld [vmem:[#allocation5 + $0x394] sm:$0xf0]  ;;  %v12734_v52 = vld [vmem:[#allocation5 + $0x5f0] sm:$0xf]  ;;  %v12054_v59 = vld [vmem:[#allocation5 + $0xa0] sm:$0xf] }
  0x3c   :  { %3195 = vmatpush.bf16.msra.mxu2 %v12815_v34  ;;  %v17657_v53 = vld [vmem:[#allocation5 + $0x614] sm:$0xf0]  ;;  %v13054_v54 = vld [vmem:[#allocation5 + $0x870] sm:$0xf]  ;;  %v12415_v57 = vor.u32 %v17577_v51, %v12414_v49  ;;  %v17487_v60 = vld [vmem:[#allocation5 + $0xc4] sm:$0xf0] }
  0x3d   :  { %3208 = vmatpush.bf16.msra.mxu3 %v13135_v38  ;;  %v17737_v55 = vld [vmem:[#allocation5 + $0x894] sm:$0xf0]  ;;  %v12735_v58 = vor.u32 %v17657_v53, %v12734_v52  ;;  %v12374_v61 = vld [vmem:[#allocation5 + $0x320] sm:$0xf]  ;;  %v17567_v63 = vld [vmem:[#allocation5 + $0x344] sm:$0xf0]  ;;  %v12055_v4 = vor.u32 %v17487_v60, %v12054_v59 }
  0x3e   :  { %3170 = vmatpush.bf16.msra.mxu0 %v12135_v44  ;;  %v13055_v62 = vor.u32 %v17737_v55, %v13054_v54  ;;  %v12694_v0 = vld [vmem:[#allocation5 + $0x5a0] sm:$0xf]  ;;  %v17647_v1 = vld [vmem:[#allocation5 + $0x5c4] sm:$0xf0]  ;;  %v12375_v5 = vor.u32 %v17567_v63, %v12374_v61  ;;  %v12014_v7 = vld [vmem:[#allocation5 + $0x50] sm:$0xf] }
  0x3f   :  { %3183 = vmatpush.bf16.msra.mxu1 %v12455_v45  ;;  %v13014_v2 = vld [vmem:[#allocation5 + $0x820] sm:$0xf]  ;;  %v17727_v3 = vld [vmem:[#allocation5 + $0x844] sm:$0xf0]  ;;  %v12695_v6 = vor.u32 %v17647_v1, %v12694_v0  ;;  %v17477_v8 = vld [vmem:[#allocation5 + $0x74] sm:$0xf0] }
  0x40   :  { %3196 = vmatpush.bf16.msra.mxu2 %v12775_v46  ;;  %v12334_v9 = vld [vmem:[#allocation5 + $0x2d0] sm:$0xf]  ;;  %v13015_v10 = vor.u32 %v17727_v3, %v13014_v2  ;;  %v17557_v11 = vld [vmem:[#allocation5 + $0x2f4] sm:$0xf0]  ;;  %v12015_v16 = vor.u32 %v17477_v8, %v12014_v7  ;;  %v11974_v17 = vld [vmem:[#allocation5] sm:$0xf] }
  0x41   :  { %3209 = vmatpush.bf16.msra.mxu3 %v13095_v50  ;;  %v12654_v12 = vld [vmem:[#allocation5 + $0x550] sm:$0xf]  ;;  %v17637_v13 = vld [vmem:[#allocation5 + $0x574] sm:$0xf0]  ;;  %v17467_v18 = vld [vmem:[#allocation5 + $0x24] sm:$0xf0]  ;;  %v12335_v20 = vor.u32 %v17557_v11, %v12334_v9 }
  0x42   :  { %3171 = vmatpush.bf16.msra.mxu0 %v12095_v56  ;;  %v12974_v14 = vld [vmem:[#allocation5 + $0x7d0] sm:$0xf]  ;;  %v17717_v15 = vld [vmem:[#allocation5 + $0x7f4] sm:$0xf0]  ;;  %v12294_v19 = vld [vmem:[#allocation5 + $0x280] sm:$0xf]  ;;  %v12655_v21 = vor.u32 %v17637_v13, %v12654_v12  ;;  %v11975_v32 = vor.u32 %v17467_v18, %v11974_v17 }
  0x43   :  { %3184 = vmatpush.bf16.msra.mxu1 %v12415_v57  ;;  %v17547_v22 = vld [vmem:[#allocation5 + $0x2a4] sm:$0xf0]  ;;  %v12614_v23 = vld [vmem:[#allocation5 + $0x500] sm:$0xf]  ;;  %v12975_v25 = vor.u32 %v17717_v15, %v12974_v14  ;;  %v196_v28 = vld [vmem:[#allocation2 + $0x8] sm:$0xff]  ;;  %vm3163_vm0 = vcmask 130048  }
  0x44   :  { %3197 = vmatpush.bf16.msra.mxu2 %v12735_v58  ;;  %v17627_v24 = vld [vmem:[#allocation5 + $0x524] sm:$0xf0]  ;;  %v12934_v26 = vld [vmem:[#allocation5 + $0x780] sm:$0xf]  ;;  %v13534_v29 = vld [vmem:[#allocation5 + $0xc30] sm:$0xf]  ;;  %v12295_v36 = vor.u32 %v17547_v22, %v12294_v19  ;;  %v695_v40 = vunpack.c.l.b16 %v196_v28  ;;  %v696_v41 = vunpack.c.h.b16 %v196_v28 }
  0x45   :  { %3210 = vmatpush.bf16.msra.mxu3 %v13055_v62  ;;  %v17707_v27 = vld [vmem:[#allocation5 + $0x7a4] sm:$0xf0]  ;;  %v17857_v30 = vld [vmem:[#allocation5 + $0xc54] sm:$0xf0]  ;;  %v13854_v31 = vld [vmem:[#allocation5 + $0xeb0] sm:$0xf]  ;;  %v12615_v37 = vor.u32 %v17627_v24, %v12614_v23 }
  0x46   :  { %3172 = vmatpush.bf16.msra.mxu0 %v12055_v4  ;;  %v17937_v33 = vld [vmem:[#allocation5 + $0xed4] sm:$0xf0]  ;;  %v17532_v34 = vld [vmem:[#allocation5 + $0x234] sm:$0xf]  ;;  %v12256_v35 = vld [vmem:[#allocation5 + $0x258] sm:$0xf0]  ;;  %v12935_v42 = vor.u32 %v17707_v27, %v12934_v26  ;;  %v13535_v43 = vor.u32 %v17857_v30, %v13534_v29  ;;  %v19304_v55 = vpack.c.b16 %v695_v40, %v695_v40  ;;  %v19306_v56 = vpack.c.b16 %v696_v41, %v696_v41 }
  0x47   :  { %3185 = vmatpush.bf16.msra.mxu1 %v12375_v5  ;;  %v13894_v38 = vld [vmem:[#allocation5 + $0xf00] sm:$0xf]  ;;  %v17947_v39 = vld [vmem:[#allocation5 + $0xf24] sm:$0xf0]  ;;  %v17612_v44 = vld [vmem:[#allocation5 + $0x4b4] sm:$0xf]  ;;  %v13855_v46 = vor.u32 %v17937_v33, %v13854_v31  ;;  %v12259_v47 = vor.u32 %v17532_v34, %v12256_v35 }
  0x48   :  { %3198 = vmatpush.bf16.msra.mxu2 %v12695_v6  ;;  %v12576_v45 = vld [vmem:[#allocation5 + $0x4d8] sm:$0xf0]  ;;  %v13494_v48 = vld [vmem:[#allocation5 + $0xbe0] sm:$0xf]  ;;  %v17847_v49 = vld [vmem:[#allocation5 + $0xc04] sm:$0xf0]  ;;  %v13895_v51 = vor.u32 %v17947_v39, %v13894_v38 }
  0x49   :  { %3211 = vmatpush.bf16.msra.mxu3 %v13015_v10  ;;  %v13814_v50 = vld [vmem:[#allocation5 + $0xe60] sm:$0xf]  ;;  %v17927_v52 = vld [vmem:[#allocation5 + $0xe84] sm:$0xf0]  ;;  %v17522_v53 = vld [vmem:[#allocation5 + $0x1e4] sm:$0xf]  ;;  %v12579_v58 = vor.u32 %v17612_v44, %v12576_v45  ;;  %v13495_v59 = vor.u32 %v17847_v49, %v13494_v48 }
  0x4a   :  { %3173 = vmatpush.bf16.msra.mxu0 %v12015_v16  ;;  %v12216_v54 = vld [vmem:[#allocation5 + $0x208] sm:$0xf0]  ;;  %v195_v57 = vld [vmem:[#allocation2] sm:$0xff]  ;;  %v13815_v0 = vor.u32 %v17927_v52, %v13814_v50  ;;  %v13454_v2 = vld [vmem:[#allocation5 + $0xb90] sm:$0xf]  ;;  %vm4401_vm7 = vcmask 1040384  }
  0x4b   :  { %3186 = vmatpush.bf16.msra.mxu1 %v12335_v20  ;;  %v17602_v60 = vld [vmem:[#allocation5 + $0x464] sm:$0xf]  ;;  %v12536_v61 = vld [vmem:[#allocation5 + $0x488] sm:$0xf0]  ;;  %v693_v62 = vunpack.c.l.b16 %v195_v57  ;;  %v694_v63 = vunpack.c.h.b16 %v195_v57  ;;  %v12219_v1 = vor.u32 %v17522_v53, %v12216_v54  ;;  %v17837_v3 = vld [vmem:[#allocation5 + $0xbb4] sm:$0xf0] }
  0x4c   :  { %3199 = vmatpush.bf16.msra.mxu2 %v12655_v21  ;;  %v13774_v4 = vld [vmem:[#allocation5 + $0xe10] sm:$0xf]  ;;  %v17917_v5 = vld [vmem:[#allocation5 + $0xe34] sm:$0xf0]  ;;  %v17512_v6 = vld [vmem:[#allocation5 + $0x194] sm:$0xf]  ;;  %v12539_v10 = vor.u32 %v17602_v60, %v12536_v61  ;;  %v13455_v11 = vor.u32 %v17837_v3, %v13454_v2 }
  0x4d   :  { %3212 = vmatpush.bf16.msra.mxu3 %v12975_v25  ;;  %v12176_v7 = vld [vmem:[#allocation5 + $0x1b8] sm:$0xf0]  ;;  %v19308_v8 = vpack.c.b16 %v693_v62, %v693_v62  ;;  %v19310_v9 = vpack.c.b16 %v694_v63, %v694_v63  ;;  %v17592_v12 = vld [vmem:[#allocation5 + $0x414] sm:$0xf]  ;;  %v13775_v14 = vor.u32 %v17917_v5, %v13774_v4  ;;  %v13414_v16 = vld [vmem:[#allocation5 + $0xb40] sm:$0xf] }
  0x4e   :  { %3174 = vmatpush.bf16.msra.mxu0 %v11975_v32  ;;  %v12496_v13 = vld [vmem:[#allocation5 + $0x438] sm:$0xf0]  ;;  %v12179_v15 = vor.u32 %v17512_v6, %v12176_v7  ;;  %v17827_v17 = vld [vmem:[#allocation5 + $0xb64] sm:$0xf0]  ;;  %v13734_v18 = vld [vmem:[#allocation5 + $0xdc0] sm:$0xf] }
  0x4f   :  { %3187 = vmatpush.bf16.msra.mxu1 %v12295_v36  ;;  %v17907_v19 = vld [vmem:[#allocation5 + $0xde4] sm:$0xf0]  ;;  %v17502_v20 = vld [vmem:[#allocation5 + $0x144] sm:$0xf]  ;;  %v12136_v21 = vld [vmem:[#allocation5 + $0x168] sm:$0xf0]  ;;  %v12499_v22 = vor.u32 %v17592_v12, %v12496_v13  ;;  %v13415_v23 = vor.u32 %v17827_v17, %v13414_v16 }
  0x50   :  { %3200 = vmatpush.bf16.msra.mxu2 %v12615_v37  ;;  %v17582_v24 = vld [vmem:[#allocation5 + $0x3c4] sm:$0xf]  ;;  %v12456_v25 = vld [vmem:[#allocation5 + $0x3e8] sm:$0xf0]  ;;  %v13374_v26 = vld [vmem:[#allocation5 + $0xaf0] sm:$0xf]  ;;  %v13735_v27 = vor.u32 %v17907_v19, %v13734_v18  ;;  %v12139_v28 = vor.u32 %v17502_v20, %v12136_v21 }
  0x51   :  { %3213 = vmatpush.bf16.msra.mxu3 %v12935_v42  ;;  %3175 = vmatmul.bf16.vlgmr.msra.gmra.mxu0 %v19308_v8  ;;  %v17817_v29 = vld [vmem:[#allocation5 + $0xb14] sm:$0xf0]  ;;  %v13694_v30 = vld [vmem:[#allocation5 + $0xd70] sm:$0xf]  ;;  %v17492_v32 = vld [vmem:[#allocation5 + $0xf4] sm:$0xf]  ;;  %v12459_v36 = vor.u32 %v17582_v24, %v12456_v25 }
  0x52   :  { %3219 = vmatpush.bf16.msrb.mxu0 %v13535_v43  ;;  %3188 = vmatmul.bf16.vlgmr.msra.gmra.mxu1 %v19310_v9  ;;  %v17897_v31 = vld [vmem:[#allocation5 + $0xd94] sm:$0xf0]  ;;  %v12096_v33 = vld [vmem:[#allocation5 + $0x118] sm:$0xf0]  ;;  %v13375_v37 = vor.u32 %v17817_v29, %v13374_v26  ;;  %v17572_v38 = vld [vmem:[#allocation5 + $0x374] sm:$0xf] }
  0x53   :  { %3232 = vmatpush.bf16.msrb.mxu1 %v13855_v46  ;;  %3201 = vmatmul.bf16.vlgmr.msra.gmra.mxu2 %v19304_v55  ;;  %v198_v34 = vld [vmem:[#allocation2 + $0x18] sm:$0xf]  ;;  %v13695_v40 = vor.u32 %v17897_v31, %v13694_v30  ;;  %v12099_v41 = vor.u32 %v17492_v32, %v12096_v33  ;;  %v13334_v42 = vld [vmem:[#allocation5 + $0xaa0] sm:$0xf]  ;;  %v17807_v43 = vld [vmem:[#allocation5 + $0xac4] sm:$0xf0] }
  0x54   :  { %3252 = vmatpush.bf16.msrb.mxu2 %v13895_v51  ;;  %3214 = vmatmul.bf16.vlgmr.msra.gmra.mxu3 %v19306_v56  ;;  %v699_v35 = vunpack.c.l.b16 %v198_v34  ;;  %v12416_v39 = vld [vmem:[#allocation5 + $0x398] sm:$0xf0]  ;;  %v13654_v44 = vld [vmem:[#allocation5 + $0xd20] sm:$0xf]  ;;  %v17887_v45 = vld [vmem:[#allocation5 + $0xd44] sm:$0xf0]  ;;  %v13335_v50 = vor.u32 %v17807_v43, %v13334_v42 }
  0x55   :  { %3258 = vmatpush.bf16.msrb.mxu3 %v12259_v47  ;;  %v17482_v46 = vld [vmem:[#allocation5 + $0xa4] sm:$0xf]  ;;  %v12056_v47 = vld [vmem:[#allocation5 + $0xc8] sm:$0xf0]  ;;  %v12419_v49 = vor.u32 %v17572_v38, %v12416_v39  ;;  %v13655_v53 = vor.u32 %v17887_v45, %v13654_v44  ;;  %v13294_v57 = vld [vmem:[#allocation5 + $0xa50] sm:$0xf] }
  0x56   :  { %3220 = vmatpush.bf16.msrb.mxu0 %v13495_v59  ;;  %v19316_v48 = vpack.c.b16 %v699_v35, %v699_v35  ;;  %v17562_v51 = vld [vmem:[#allocation5 + $0x324] sm:$0xf]  ;;  %v12376_v52 = vld [vmem:[#allocation5 + $0x348] sm:$0xf0]  ;;  %v12059_v54 = vor.u32 %v17482_v46, %v12056_v47  ;;  %v13614_v59 = vld [vmem:[#allocation5 + $0xcd0] sm:$0xf] }
  0x57   :  { %3233 = vmatpush.bf16.msrb.mxu1 %v13815_v0  ;;  %v17877_v60 = vld [vmem:[#allocation5 + $0xcf4] sm:$0xf0]  ;;  %v17472_v61 = vld [vmem:[#allocation5 + $0x54] sm:$0xf]  ;;  %v12016_v62 = vld [vmem:[#allocation5 + $0x78] sm:$0xf0]  ;;  %v12379_v0 = vor.u32 %v17562_v51, %v12376_v52 }
  0x58   :  { %3271 = vmatpush.bf16.msra.mxu2 %v12579_v58  ;;  %v17797_v58 = vld [vmem:[#allocation5 + $0xa74] sm:$0xf0]  ;;  %v17552_v63 = vld [vmem:[#allocation5 + $0x2d4] sm:$0xf]  ;;  %v12336_v2 = vld [vmem:[#allocation5 + $0x2f8] sm:$0xf0]  ;;  %v13615_v5 = vor.u32 %v17877_v60, %v13614_v59  ;;  %v12019_v6 = vor.u32 %v17472_v61, %v12016_v62 }
  0x59   :  { %3259 = vmatpush.bf16.msrb.mxu3 %v12219_v1  ;;  %v13295_v1 = vor.u32 %v17797_v58, %v13294_v57  ;;  %v13254_v3 = vld [vmem:[#allocation5 + $0xa00] sm:$0xf]  ;;  %v197_v4 = vld [vmem:[#allocation2 + $0x10] sm:$0xff]  ;;  %v17787_v7 = vld [vmem:[#allocation5 + $0xa24] sm:$0xf0]  ;;  %v12339_v19 = vor.u32 %v17552_v63, %v12336_v2  ;;  %vm4403_vm15 = vcmask 1042434  }
  0x5a   :  { %3221 = vmatpush.bf16.msrb.mxu0 %v13455_v11  ;;  %v17867_v11 = vld [vmem:[#allocation5 + $0xca4] sm:$0xf0]  ;;  %v17462_v12 = vld [vmem:[#allocation5 + $0x4] sm:$0xf]  ;;  %v11976_v13 = vld [vmem:[#allocation5 + $0x28] sm:$0xf0]  ;;  %v697_v18 = vunpack.c.l.b16 %v197_v4  ;;  %v13255_v20 = vor.u32 %v17787_v7, %v13254_v3 }
  0x5b   :  { %3234 = vmatpush.bf16.msrb.mxu1 %v13775_v14  ;;  %v17692_v14 = vld [vmem:[#allocation5 + $0x734] sm:$0xf]  ;;  %v13216_v17 = vld [vmem:[#allocation5 + $0x9d8] sm:$0xf0]  ;;  %v11979_v25 = vor.u32 %v17462_v12, %v11976_v13  ;;  %v17542_v26 = vld [vmem:[#allocation5 + $0x284] sm:$0xf] }
  0x5c   :  { %3272 = vmatpush.bf16.msra.mxu2 %v12539_v10  ;;  %v13574_v10 = vld [vmem:[#allocation5 + $0xc80] sm:$0xf]  ;;  %v17772_v16 = vld [vmem:[#allocation5 + $0x9b4] sm:$0xf]  ;;  %v13856_v31 = vld [vmem:[#allocation5 + $0xed8] sm:$0xf0]  ;;  %v19320_v34 = vpack.c.b16 %v697_v18, %v697_v18 }
  0x5d   :  { %3260 = vmatpush.bf16.msrb.mxu3 %v12179_v15  ;;  %v12896_v15 = vld [vmem:[#allocation5 + $0x758] sm:$0xf0]  ;;  %v17852_v21 = vld [vmem:[#allocation5 + $0xc34] sm:$0xf]  ;;  %v13575_v24 = vor.u32 %v17867_v11, %v13574_v10  ;;  %v13219_v29 = vor.u32 %v17772_v16, %v13216_v17  ;;  %v17682_v32 = vld [vmem:[#allocation5 + $0x6e4] sm:$0xf] }
  0x5e   :  { %3222 = vmatpush.bf16.msrb.mxu0 %v13415_v23  ;;  %v698_v23 = vunpack.c.h.b16 %v197_v4  ;;  %v17932_v30 = vld [vmem:[#allocation5 + $0xeb4] sm:$0xf]  ;;  %v12856_v35 = vld [vmem:[#allocation5 + $0x708] sm:$0xf0]  ;;  %v17922_v45 = vld [vmem:[#allocation5 + $0xe64] sm:$0xf] }
  0x5f   :  { %3235 = vmatpush.bf16.msrb.mxu1 %v13735_v27  ;;  %v12296_v27 = vld [vmem:[#allocation5 + $0x2a8] sm:$0xf0]  ;;  %v13859_v42 = vor.u32 %v17932_v30, %v13856_v31  ;;  %v12859_v43 = vor.u32 %v17682_v32, %v12856_v35  ;;  %v17672_v47 = vld [vmem:[#allocation5 + $0x694] sm:$0xf]  ;;  %v13136_v52 = vld [vmem:[#allocation5 + $0x938] sm:$0xf0] }
  0x60   :  { %3273 = vmatpush.bf16.msra.mxu2 %v12499_v22  ;;  %v13536_v22 = vld [vmem:[#allocation5 + $0xc58] sm:$0xf0]  ;;  %v12299_v38 = vor.u32 %v17542_v26, %v12296_v27  ;;  %v19322_v39 = vpack.c.b16 %v698_v23, %v698_v23  ;;  %v13816_v46 = vld [vmem:[#allocation5 + $0xe88] sm:$0xf0]  ;;  %v17752_v51 = vld [vmem:[#allocation5 + $0x914] sm:$0xf] }
  0x61   :  { %3261 = vmatpush.bf16.msrb.mxu3 %v12139_v28  ;;  %v12899_v28 = vor.u32 %v17692_v14, %v12896_v15  ;;  %v13539_v33 = vor.u32 %v17852_v21, %v13536_v22  ;;  %v13819_v57 = vor.u32 %v17922_v45, %v13816_v46  ;;  %v13139_v59 = vor.u32 %v17752_v51, %v13136_v52  ;;  %v17912_v60 = vld [vmem:[#allocation5 + $0xe14] sm:$0xf]  ;;  %v13776_v61 = vld [vmem:[#allocation5 + $0xe38] sm:$0xf0]  ;;  %v17662_v62 = vld [vmem:[#allocation5 + $0x644] sm:$0xf] }
  0x62   :  { %3223 = vmatpush.bf16.msrb.mxu0 %v13375_v37  ;;  %v13176_v37 = vld [vmem:[#allocation5 + $0x988] sm:$0xf0]  ;;  %v17822_v3 = vld [vmem:[#allocation5 + $0xb44] sm:$0xf]  ;;  %v17652_v12 = vld [vmem:[#allocation5 + $0x5f4] sm:$0xf] }
  0x63   :  { %3236 = vmatpush.bf16.msrb.mxu1 %v13695_v40  ;;  %13932 = vmatmul.msk.bf16.vlgmr.msrb.gmra.mxu2 %vm3163_vm0, %v19316_v48  ;;  %v17842_v40 = vld [vmem:[#allocation5 + $0xbe4] sm:$0xf]  ;;  %v13096_v2 = vld [vmem:[#allocation5 + $0x8e8] sm:$0xf0]  ;;  %v12736_v14 = vld [vmem:[#allocation5 + $0x618] sm:$0xf0] }
  0x64   :  { %3274 = vmatpush.bf16.msra.mxu2 %v12459_v36  ;;  %v17762_v36 = vld [vmem:[#allocation5 + $0x964] sm:$0xf]  ;;  %v13416_v4 = vld [vmem:[#allocation5 + $0xb68] sm:$0xf0]  ;;  %v17732_v15 = vld [vmem:[#allocation5 + $0x874] sm:$0xf] }
  0x65   :  { %3262 = vmatpush.bf16.msrb.mxu3 %v12099_v41  ;;  %v13496_v41 = vld [vmem:[#allocation5 + $0xc08] sm:$0xf0]  ;;  %v13179_v44 = vor.u32 %v17762_v36, %v13176_v37  ;;  %v17902_v10 = vld [vmem:[#allocation5 + $0xdc4] sm:$0xf]  ;;  %v13419_v13 = vor.u32 %v17822_v3, %v13416_v4  ;;  %v13056_v16 = vld [vmem:[#allocation5 + $0x898] sm:$0xf0] }
  0x66   :  { %3224 = vmatpush.bf16.msrb.mxu0 %v13335_v50  ;;  %v12816_v50 = vld [vmem:[#allocation5 + $0x6b8] sm:$0xf0]  ;;  %v13736_v11 = vld [vmem:[#allocation5 + $0xde8] sm:$0xf0]  ;;  %v17812_v17 = vld [vmem:[#allocation5 + $0xaf4] sm:$0xf]  ;;  %v13059_v21 = vor.u32 %v17732_v15, %v13056_v16 }
  0x67   :  { %3237 = vmatpush.bf16.msrb.mxu1 %v13655_v53  ;;  %v17832_v53 = vld [vmem:[#allocation5 + $0xb94] sm:$0xf]  ;;  %v12819_v58 = vor.u32 %v17672_v47, %v12816_v50  ;;  %v13376_v18 = vld [vmem:[#allocation5 + $0xb18] sm:$0xf0]  ;;  %v12696_v26 = vld [vmem:[#allocation5 + $0x5c8] sm:$0xf0] }
  0x68   :  { %3275 = vmatpush.bf16.msra.mxu2 %v12419_v49  ;;  %v13499_v49 = vor.u32 %v17842_v40, %v13496_v41  ;;  %v17892_v22 = vld [vmem:[#allocation5 + $0xd74] sm:$0xf]  ;;  %v13696_v23 = vld [vmem:[#allocation5 + $0xd98] sm:$0xf0]  ;;  %v17722_v27 = vld [vmem:[#allocation5 + $0x824] sm:$0xf] }
  0x69   :  { %3263 = vmatpush.bf16.msrb.mxu3 %v12059_v54  ;;  %v13456_v54 = vld [vmem:[#allocation5 + $0xbb8] sm:$0xf0]  ;;  %v13336_v30 = vld [vmem:[#allocation5 + $0xac8] sm:$0xf0]  ;;  %v13699_v31 = vor.u32 %v17892_v22, %v13696_v23  ;;  %v17882_v32 = vld [vmem:[#allocation5 + $0xd24] sm:$0xf] }
  0x6a   :  { %3225 = vmatpush.bf16.msrb.mxu0 %v13295_v1  ;;  %v13459_v63 = vor.u32 %v17832_v53, %v13456_v54  ;;  %v17742_v1 = vld [vmem:[#allocation5 + $0x8c4] sm:$0xf]  ;;  %v13656_v36 = vld [vmem:[#allocation5 + $0xd48] sm:$0xf0]  ;;  %v17632_v37 = vld [vmem:[#allocation5 + $0x554] sm:$0xf] }
  0x6b   :  { %3238 = vmatpush.bf16.msrb.mxu1 %v13615_v5  ;;  %v13779_v5 = vor.u32 %v17912_v60, %v13776_v61  ;;  %v13099_v7 = vor.u32 %v17742_v1, %v13096_v2  ;;  %v17712_v41 = vld [vmem:[#allocation5 + $0x7d4] sm:$0xf]  ;;  %v13659_v45 = vor.u32 %v17882_v32, %v13656_v36  ;;  %v13616_v47 = vld [vmem:[#allocation5 + $0xcf8] sm:$0xf0]  ;;  %v17622_v51 = vld [vmem:[#allocation5 + $0x504] sm:$0xf] }
  0x6c   :  { %3276 = vmatpush.bf16.msra.mxu2 %v12379_v0  ;;  %v12776_v0 = vld [vmem:[#allocation5 + $0x668] sm:$0xf0]  ;;  %v17872_v46 = vld [vmem:[#allocation5 + $0xcd4] sm:$0xf]  ;;  %v17702_v53 = vld [vmem:[#allocation5 + $0x784] sm:$0xf] }
  0x6d   :  { %3264 = vmatpush.bf16.msrb.mxu3 %v12019_v6  ;;  %v12779_v6 = vor.u32 %v17662_v62, %v12776_v0  ;;  %v12616_v52 = vld [vmem:[#allocation5 + $0x528] sm:$0xf0]  ;;  %v12262_v60 = vld [vmem:[#allocation5 + $0x238] sm:$0xf]  ;;  %v17538_v61 = vld [vmem:[#allocation5 + $0x25c] sm:$0xf0] }
  0x6e   :  { %3226 = vmatpush.bf16.msrb.mxu0 %v13255_v20  ;;  %v12739_v20 = vor.u32 %v17652_v12, %v12736_v14  ;;  %v12582_v62 = vld [vmem:[#allocation5 + $0x4b8] sm:$0xf]  ;;  %v17618_v0 = vld [vmem:[#allocation5 + $0x4dc] sm:$0xf0]  ;;  %v17942_v1 = vld [vmem:[#allocation5 + $0xf04] sm:$0xf]  ;;  %v12619_v3 = vor.u32 %v17622_v51, %v12616_v52 }
  0x6f   :  { %3239 = vmatpush.bf16.msrb.mxu1 %v13575_v24  ;;  %v17642_v24 = vld [vmem:[#allocation5 + $0x5a4] sm:$0xf]  ;;  %v13896_v2 = vld [vmem:[#allocation5 + $0xf28] sm:$0xf0]  ;;  %v17778_v12 = vld [vmem:[#allocation5 + $0x9dc] sm:$0xf0]  ;;  %v12583_v14 = vor.u32 %v17618_v0, %v12582_v62 }
  0x70   :  { %3277 = vmatpush.bf16.msra.mxu2 %v12339_v19  ;;  %v13739_v19 = vor.u32 %v17902_v10, %v13736_v11  ;;  %v12263_v10 = vor.u32 %v17538_v61, %v12262_v60  ;;  %v13222_v11 = vld [vmem:[#allocation5 + $0x9b8] sm:$0xf]  ;;  %v17528_v15 = vld [vmem:[#allocation5 + $0x20c] sm:$0xf0]  ;;  %v13899_v16 = vor.u32 %v17942_v1, %v13896_v2  ;;  %v13102_v52 = vld [vmem:[#allocation5 + $0x8c8] sm:$0xf] }
  0x71   :  { %3265 = vmatpush.bf16.msrb.mxu3 %v11979_v25  ;;  %3227 = vmatmul.bf16.vlgmr.msrb.gmra.mxu0 %v19320_v34  ;;  %v13379_v25 = vor.u32 %v17812_v17, %v13376_v18  ;;  %v12902_v17 = vld [vmem:[#allocation5 + $0x738] sm:$0xf]  ;;  %v17698_v18 = vld [vmem:[#allocation5 + $0x75c] sm:$0xf0]  ;;  %v13223_v22 = vor.u32 %v17778_v12, %v13222_v11  ;;  %v17668_v60 = vld [vmem:[#allocation5 + $0x66c] sm:$0xf0] }
  0x72   :  { %3284 = vmatpush.bf16.msra.mxu0 %v12899_v28  ;;  %3240 = vmatmul.bf16.vlgmr.msrb.gmra.mxu1 %v19322_v39  ;;  %v13016_v28 = vld [vmem:[#allocation5 + $0x848] sm:$0xf0]  ;;  %v12502_v32 = vld [vmem:[#allocation5 + $0x418] sm:$0xf]  ;;  %v17578_v62 = vld [vmem:[#allocation5 + $0x39c] sm:$0xf0] }
  0x73   :  { %3297 = vmatpush.bf16.msra.mxu1 %v13219_v29  ;;  %v17802_v29 = vld [vmem:[#allocation5 + $0xaa4] sm:$0xf]  ;;  %v13019_v35 = vor.u32 %v17722_v27, %v13016_v28  ;;  %v12182_v27 = vld [vmem:[#allocation5 + $0x198] sm:$0xf]  ;;  %v12382_v11 = vld [vmem:[#allocation5 + $0x328] sm:$0xf] }
  0x74   :  { %3278 = vmatpush.bf16.msra.mxu2 %v12299_v38  ;;  %3266 = vmatmul.bf16.vlgmr.msrb.gmra.mxu3 %v19308_v8  ;;  %v12656_v38 = vld [vmem:[#allocation5 + $0x578] sm:$0xf0]  ;;  %v13339_v40 = vor.u32 %v17802_v29, %v13336_v30  ;;  %v17518_v29 = vld [vmem:[#allocation5 + $0x1bc] sm:$0xf0]  ;;  %v12862_v30 = vld [vmem:[#allocation5 + $0x6e8] sm:$0xf] }
  0x75   :  { %3310 = vmatpush.bf16.msra.mxu3 %v13539_v33  ;;  %v12699_v33 = vor.u32 %v17642_v24, %v12696_v26  ;;  %v12903_v24 = vor.u32 %v17698_v18, %v12902_v17  ;;  %v17768_v26 = vld [vmem:[#allocation5 + $0x98c] sm:$0xf0]  ;;  %v12183_v36 = vor.u32 %v17518_v29, %v12182_v27  ;;  %v12422_v61 = vld [vmem:[#allocation5 + $0x378] sm:$0xf]  ;;  %v17718_v29 = vld [vmem:[#allocation5 + $0x7fc] sm:$0xf0] }
  0x76   :  { %3285 = vmatpush.bf16.msra.mxu0 %v12859_v43  ;;  %v17792_v43 = vld [vmem:[#allocation5 + $0xa54] sm:$0xf]  ;;  %v13062_v2 = vld [vmem:[#allocation5 + $0x878] sm:$0xf]  ;;  %v17568_v12 = vld [vmem:[#allocation5 + $0x34c] sm:$0xf0] }
  0x77   :  { %3298 = vmatpush.bf16.msra.mxu1 %v13179_v44  ;;  %3279 = vmatmul.bf16.vlgmr.msra.gmra.mxu2 %v19310_v9  ;;  %v13296_v44 = vld [vmem:[#allocation5 + $0xa78] sm:$0xf0]  ;;  %v17728_v17 = vld [vmem:[#allocation5 + $0x84c] sm:$0xf0]  ;;  %v12022_v18 = vld [vmem:[#allocation5 + $0x58] sm:$0xf] }
  0x78   :  { %3323 = vmatpush.bf16.msrb.mxu2 %v13859_v42  ;;  %v12976_v42 = vld [vmem:[#allocation5 + $0x7f8] sm:$0xf0]  ;;  %v13299_v54 = vor.u32 %v17792_v43, %v13296_v44  ;;  %v17508_v43 = vld [vmem:[#allocation5 + $0x16c] sm:$0xf0]  ;;  %v12822_v44 = vld [vmem:[#allocation5 + $0x698] sm:$0xf] }
  0x79   :  { %3311 = vmatpush.bf16.msra.mxu3 %v13499_v49  ;;  %v12659_v49 = vor.u32 %v17632_v37, %v12656_v38  ;;  %v12979_v50 = vor.u32 %v17712_v41, %v12976_v42  ;;  %v13142_v38 = vld [vmem:[#allocation5 + $0x918] sm:$0xf]  ;;  %v12142_v41 = vld [vmem:[#allocation5 + $0x148] sm:$0xf]  ;;  %s19210_s8 = smov [#allocation20]   ;;  %s11957_s26 = sshll.u32 %s20397_s11, 4  ;;  %s11958_s26 = int_to_ptr.hbm [resolvable:$true] %s11957_s26 }
  0x7a   :  { %3286 = vmatpush.bf16.msra.mxu0 %v12819_v58  ;;  %v17782_v58 = vld [vmem:[#allocation5 + $0xa04] sm:$0xf]  ;;  %s11955_s10 = sshll.u32 %s19210_s8, 4  ;;  %s11956_s10 = int_to_ptr.vmem [resolvable:$true] %s11955_s10 }
  0x7b   :  { %3299 = vmatpush.bf16.msra.mxu1 %v13139_v59  ;;  %v13256_v59 = vld [vmem:[#allocation5 + $0xa28] sm:$0xf0] }
  0x7c   :  { %3324 = vmatpush.bf16.msrb.mxu2 %v13819_v57  ;;  %v12936_v57 = vld [vmem:[#allocation5 + $0x7a8] sm:$0xf0] }
  0x7d   :  { %3312 = vmatpush.bf16.msra.mxu3 %v13459_v63  ;;  %v13619_v63 = vor.u32 %v17872_v46, %v13616_v47  ;;  %v12939_v4 = vor.u32 %v17702_v53, %v12936_v57  ;;  %v12462_v46 = vld [vmem:[#allocation5 + $0x3c8] sm:$0xf]  ;;  %v17588_v47 = vld [vmem:[#allocation5 + $0x3ec] sm:$0xf0] }
  0x7e   :  { %3287 = vmatpush.bf16.msra.mxu0 %v12779_v6  ;;  %v13576_v6 = vld [vmem:[#allocation5 + $0xca8] sm:$0xf0]  ;;  %v17748_v53 = vld [vmem:[#allocation5 + $0x8ec] sm:$0xf0]  ;;  %v12463_v57 = vor.u32 %v17588_v47, %v12462_v46 }
  0x7f   :  { %3300 = vmatpush.bf16.msra.mxu1 %v13099_v7  ;;  %v13259_v7 = vor.u32 %v17782_v58, %v13256_v59  ;;  %v17498_v58 = vld [vmem:[#allocation5 + $0x11c] sm:$0xf0]  ;;  %v12782_v59 = vld [vmem:[#allocation5 + $0x648] sm:$0xf]  ;;  %v17708_v47 = vld [vmem:[#allocation5 + $0x7ac] sm:$0xf0] }
  0x80   :  { %3325 = vmatpush.bf16.msrb.mxu2 %v13779_v5  ;;  %v17862_v5 = vld [vmem:[#allocation5 + $0xc84] sm:$0xf]  ;;  %v12783_v1 = vor.u32 %v17668_v60, %v12782_v59  ;;  %v17848_v59 = vld [vmem:[#allocation5 + $0xc0c] sm:$0xf0]  ;;  %v13902_v60 = vld [vmem:[#allocation5 + $0xf08] sm:$0xf] }
  0x81   :  { %3313 = vmatpush.bf16.msra.mxu3 %v13419_v13  ;;  %v12222_v13 = vld [vmem:[#allocation5 + $0x1e8] sm:$0xf] }
  0x82   :  { %3288 = vmatpush.bf16.msra.mxu0 %v12739_v20  ;;  %v12542_v20 = vld [vmem:[#allocation5 + $0x468] sm:$0xf]  ;;  %v12223_v23 = vor.u32 %v17528_v15, %v12222_v13 }
  0x83   :  { %3301 = vmatpush.bf16.msra.mxu1 %v13059_v21  ;;  %v17608_v21 = vld [vmem:[#allocation5 + $0x48c] sm:$0xf0] }
  0x84   :  { %3326 = vmatpush.bf16.msrb.mxu2 %v13739_v19  ;;  %v13579_v19 = vor.u32 %v17862_v5, %v13576_v6  ;;  %v12543_v28 = vor.u32 %v17608_v21, %v12542_v20  ;;  %v12423_v5 = vor.u32 %v17578_v62, %v12422_v61  ;;  %v17488_v6 = vld [vmem:[#allocation5 + $0xcc] sm:$0xf0]  ;;  %v17478_v20 = vld [vmem:[#allocation5 + $0x7c] sm:$0xf0]  ;;  %v12702_v21 = vld [vmem:[#allocation5 + $0x5a8] sm:$0xf] }
  0x85   :  { %3314 = vmatpush.bf16.msra.mxu3 %v13379_v25  ;;  %v13182_v25 = vld [vmem:[#allocation5 + $0x968] sm:$0xf]  ;;  %v12023_v27 = vor.u32 %v17478_v20, %v12022_v18  ;;  %v17948_v61 = vld [vmem:[#allocation5 + $0xf2c] sm:$0xf0]  ;;  %v17513_v18 = vld [vmem:[#allocation5 + $0x19c] sm:$0xf] }
  0x86   :  { %3289 = vmatpush.bf16.msra.mxu0 %v12699_v33  ;;  %v17598_v33 = vld [vmem:[#allocation5 + $0x43c] sm:$0xf0]  ;;  %v12184_v20 = vld [vmem:[#allocation5 + $0x1c0] sm:$0xf0] }
  0x87   :  { %3302 = vmatpush.bf16.msra.mxu1 %v13019_v35  ;;  %v13183_v35 = vor.u32 %v17768_v26, %v13182_v25  ;;  %v12503_v42 = vor.u32 %v17598_v33, %v12502_v32  ;;  %v12982_v26 = vld [vmem:[#allocation5 + $0x7d8] sm:$0xf]  ;;  %v12302_v33 = vld [vmem:[#allocation5 + $0x288] sm:$0xf] }
  0x88   :  { %3327 = vmatpush.bf16.msrb.mxu2 %v13699_v31  ;;  %v17688_v31 = vld [vmem:[#allocation5 + $0x70c] sm:$0xf0] }
  0x89   :  { %3315 = vmatpush.bf16.msra.mxu3 %v13339_v40  ;;  %v12863_v37 = vor.u32 %v17688_v31, %v12862_v30  ;;  %v17758_v40 = vld [vmem:[#allocation5 + $0x93c] sm:$0xf0]  ;;  %v11982_v30 = vld [vmem:[#allocation5 + $0x8] sm:$0xf]  ;;  %v17468_v31 = vld [vmem:[#allocation5 + $0x2c] sm:$0xf0] }
  0x8a   :  { %3290 = vmatpush.bf16.msra.mxu0 %v12659_v49  ;;  %v13143_v49 = vor.u32 %v17758_v40, %v13142_v38  ;;  %v13542_v38 = vld [vmem:[#allocation5 + $0xc38] sm:$0xf]  ;;  %v17858_v40 = vld [vmem:[#allocation5 + $0xc5c] sm:$0xf0] }
  0x8b   :  { %3303 = vmatpush.bf16.msra.mxu1 %v12979_v50  ;;  %v12143_v50 = vor.u32 %v17508_v43, %v12142_v41  ;;  %v12983_v41 = vor.u32 %v17718_v29, %v12982_v26  ;;  %v17938_v43 = vld [vmem:[#allocation5 + $0xedc] sm:$0xf0]  ;;  %v13742_v26 = vld [vmem:[#allocation5 + $0xdc8] sm:$0xf] }
  0x8c   :  { %3328 = vmatpush.bf16.msrb.mxu2 %v13659_v45  ;;  %v17678_v45 = vld [vmem:[#allocation5 + $0x6bc] sm:$0xf0] }
  0x8d   :  { %3316 = vmatpush.bf16.msra.mxu3 %v13299_v54  ;;  %v12823_v51 = vor.u32 %v17678_v45, %v12822_v44  ;;  %v12102_v54 = vld [vmem:[#allocation5 + $0xf8] sm:$0xf]  ;;  %v12942_v44 = vld [vmem:[#allocation5 + $0x788] sm:$0xf]  ;;  %v11983_v45 = vor.u32 %v17468_v31, %v11982_v30  ;;  %v17503_v30 = vld [vmem:[#allocation5 + $0x14c] sm:$0xf] }
  0x8e   :  { %3291 = vmatpush.bf16.msra.mxu0 %v12619_v3  ;;  %v12103_v0 = vor.u32 %v17498_v58, %v12102_v54  ;;  %v17738_v3 = vld [vmem:[#allocation5 + $0x89c] sm:$0xf0]  ;;  %v12622_v54 = vld [vmem:[#allocation5 + $0x508] sm:$0xf]  ;;  %v12943_v62 = vor.u32 %v17708_v47, %v12942_v44  ;;  %v17493_v44 = vld [vmem:[#allocation5 + $0xfc] sm:$0xf] }
  0x8f   :  { %3304 = vmatpush.bf16.msra.mxu1 %v12939_v4  ;;  %v12062_v4 = vld [vmem:[#allocation5 + $0xa8] sm:$0xf]  ;;  %v13063_v13 = vor.u32 %v17738_v3, %v13062_v2  ;;  %v17523_v3 = vld [vmem:[#allocation5 + $0x1ec] sm:$0xf] }
  0x90   :  { %3329 = vmatpush.bf16.msrb.mxu2 %v13619_v63  ;;  %v13103_v63 = vor.u32 %v17748_v53, %v13102_v52  ;;  %v13543_v52 = vor.u32 %v17858_v40, %v13542_v38  ;;  %v13502_v53 = vld [vmem:[#allocation5 + $0xbe8] sm:$0xf]  ;;  %v17818_v38 = vld [vmem:[#allocation5 + $0xb1c] sm:$0xf0]  ;;  %v13702_v40 = vld [vmem:[#allocation5 + $0xd78] sm:$0xf] }
  0x91   :  { %3317 = vmatpush.bf16.msra.mxu3 %v13259_v7  ;;  %3292 = vmatmul.bf16.vlgmr.msra.gmra.mxu0 %v19304_v55  ;;  %v12742_v7 = vld [vmem:[#allocation5 + $0x5f8] sm:$0xf]  ;;  %v17583_v47 = vld [vmem:[#allocation5 + $0x3cc] sm:$0xf] }
  0x92   :  { %3343 = vmatpush.bf16.msrb.mxu0 %v13899_v16  ;;  %3305 = vmatmul.bf16.vlgmr.msra.gmra.mxu1 %v19306_v56  ;;  %v13022_v16 = vld [vmem:[#allocation5 + $0x828] sm:$0xf] }
  0x93   :  { %3349 = vmatpush.bf16.msrb.mxu1 %v12263_v10  ;;  %v17658_v10 = vld [vmem:[#allocation5 + $0x61c] sm:$0xf0]  ;;  %v13023_v25 = vor.u32 %v17728_v17, %v13022_v16 }
  0x94   :  { %3330 = vmatpush.bf16.msrb.mxu2 %v13579_v19  ;;  %3318 = vmatmul.bf16.vlgmr.msra.gmra.mxu3 %v19320_v34  ;;  %v12743_v15 = vor.u32 %v17658_v10, %v12742_v7  ;;  %v12383_v19 = vor.u32 %v17568_v12, %v12382_v11  ;;  %v17613_v7 = vld [vmem:[#allocation5 + $0x4bc] sm:$0xf]  ;;  %v12584_v10 = vld [vmem:[#allocation5 + $0x4e0] sm:$0xf0]  ;;  %v13462_v12 = vld [vmem:[#allocation5 + $0xb98] sm:$0xf] }
  0x95   :  { %3362 = vmatpush.bf16.msrb.mxu3 %v12583_v14  ;;  %v12063_v14 = vor.u32 %v17488_v6, %v12062_v4  ;;  %v13503_v4 = vor.u32 %v17848_v59, %v13502_v53  ;;  %v13903_v6 = vor.u32 %v17948_v61, %v13902_v60  ;;  %v12587_v17 = vor.u32 %v17613_v7, %v12584_v10  ;;  %v13662_v53 = vld [vmem:[#allocation5 + $0xd28] sm:$0xf]  ;;  %v17483_v59 = vld [vmem:[#allocation5 + $0xac] sm:$0xf]  ;;  %v12064_v61 = vld [vmem:[#allocation5 + $0xd0] sm:$0xf0] }
  0x96   :  { %3375 = vmatpush.bf16.msra.mxu0 %v12903_v24  ;;  %v17558_v24 = vld [vmem:[#allocation5 + $0x2fc] sm:$0xf0]  ;;  %v17473_v7 = vld [vmem:[#allocation5 + $0x5c] sm:$0xf] }
  0x97   :  { %3350 = vmatpush.bf16.msrb.mxu1 %v12223_v23  ;;  %3331 = vmatmul.bf16.vlgmr.msrb.gmra.mxu2 %v19322_v39  ;;  %v12342_v23 = vld [vmem:[#allocation5 + $0x2d8] sm:$0xf] }
  0x98   :  { %3388 = vmatpush.bf16.msra.mxu2 %v13223_v22  ;;  %v17648_v22 = vld [vmem:[#allocation5 + $0x5cc] sm:$0xf0]  ;;  %v12343_v32 = vor.u32 %v17558_v24, %v12342_v23  ;;  %v13422_v24 = vld [vmem:[#allocation5 + $0xb48] sm:$0xf] }
  0x99   :  { %3363 = vmatpush.bf16.msrb.mxu3 %v12543_v28  ;;  %v12703_v28 = vor.u32 %v17648_v22, %v12702_v21  ;;  %v17603_v21 = vld [vmem:[#allocation5 + $0x46c] sm:$0xf]  ;;  %v12544_v22 = vld [vmem:[#allocation5 + $0x490] sm:$0xf0] }
  0x9a   :  { %3376 = vmatpush.bf16.msra.mxu0 %v12863_v37  ;;  %v17548_v37 = vld [vmem:[#allocation5 + $0x2ac] sm:$0xf0]  ;;  %v12547_v29 = vor.u32 %v17603_v21, %v12544_v22  ;;  %v17773_v22 = vld [vmem:[#allocation5 + $0x9bc] sm:$0xf] }
  0x9b   :  { %3351 = vmatpush.bf16.msrb.mxu1 %v12183_v36  ;;  %v17638_v36 = vld [vmem:[#allocation5 + $0x57c] sm:$0xf0] }
  0x9c   :  { %3389 = vmatpush.bf16.msra.mxu2 %v13183_v35  ;;  %v12662_v35 = vld [vmem:[#allocation5 + $0x558] sm:$0xf] }
  0x9d   :  { %3364 = vmatpush.bf16.msrb.mxu3 %v12503_v42  ;;  %v13862_v42 = vld [vmem:[#allocation5 + $0xeb8] sm:$0xf]  ;;  %v12663_v46 = vor.u32 %v17638_v36, %v12662_v35  ;;  %v12504_v35 = vld [vmem:[#allocation5 + $0x440] sm:$0xf0] }
  0x9e   :  { %3377 = vmatpush.bf16.msra.mxu0 %v12823_v51  ;;  %v12303_v51 = vor.u32 %v17548_v37, %v12302_v33  ;;  %v13863_v58 = vor.u32 %v17938_v43, %v13862_v42  ;;  %v17593_v33 = vld [vmem:[#allocation5 + $0x41c] sm:$0xf]  ;;  %v13382_v37 = vld [vmem:[#allocation5 + $0xaf8] sm:$0xf] }
  0x9f   :  { %3352 = vmatpush.bf16.msrb.mxu1 %v12143_v50  ;;  %v12264_v50 = vld [vmem:[#allocation5 + $0x260] sm:$0xf0]  ;;  %v12507_v43 = vor.u32 %v17593_v33, %v12504_v35  ;;  %v12864_v35 = vld [vmem:[#allocation5 + $0x710] sm:$0xf0] }
  0xa0   :  { %3390 = vmatpush.bf16.msra.mxu2 %v13143_v49  ;;  %v17533_v49 = vld [vmem:[#allocation5 + $0x23c] sm:$0xf] }
  0xa1   :  { %3365 = vmatpush.bf16.msrb.mxu3 %v12463_v57  ;;  %13933 = vmatmul.msk.bf16.vlgmr.msrb.gmra.mxu0 %vm3163_vm0, %v19316_v48  ;;  %v17628_v57 = vld [vmem:[#allocation5 + $0x52c] sm:$0xf0] }
  0xa2   :  { %3378 = vmatpush.bf16.msra.mxu0 %v12783_v1  ;;  %v12267_v1 = vor.u32 %v17533_v49, %v12264_v50  ;;  %v12623_v2 = vor.u32 %v17628_v57, %v12622_v54  ;;  %v12464_v49 = vld [vmem:[#allocation5 + $0x3f0] sm:$0xf0]  ;;  %v17888_v54 = vld [vmem:[#allocation5 + $0xd4c] sm:$0xf0] }
  0xa3   :  { %3353 = vmatpush.bf16.msrb.mxu1 %v12103_v0  ;;  %v17928_v0 = vld [vmem:[#allocation5 + $0xe8c] sm:$0xf0] }
  0xa4   :  { %3391 = vmatpush.bf16.msra.mxu2 %v13103_v63  ;;  %v13822_v63 = vld [vmem:[#allocation5 + $0xe68] sm:$0xf] }
  0xa5   :  { %3366 = vmatpush.bf16.msrb.mxu3 %v12423_v5  ;;  %v12224_v5 = vld [vmem:[#allocation5 + $0x210] sm:$0xf0]  ;;  %v13823_v11 = vor.u32 %v17928_v0, %v13822_v63  ;;  %v12424_v63 = vld [vmem:[#allocation5 + $0x3a0] sm:$0xf0]  ;;  %v13663_v0 = vor.u32 %v17888_v54, %v13662_v53 }
  0xa6   :  { %3379 = vmatpush.bf16.msra.mxu0 %v12743_v15  ;;  %v17918_v15 = vld [vmem:[#allocation5 + $0xe3c] sm:$0xf0]  ;;  %v12227_v16 = vor.u32 %v17523_v3, %v12224_v5  ;;  %v13622_v3 = vld [vmem:[#allocation5 + $0xcd8] sm:$0xf]  ;;  %v12067_v5 = vor.u32 %v17483_v59, %v12064_v61  ;;  %v12304_v53 = vld [vmem:[#allocation5 + $0x2b0] sm:$0xf0] }
  0xa7   :  { %3354 = vmatpush.bf16.msrb.mxu1 %v12063_v14  ;;  %v13782_v14 = vld [vmem:[#allocation5 + $0xe18] sm:$0xf]  ;;  %v13144_v54 = vld [vmem:[#allocation5 + $0x940] sm:$0xf0] }
  0xa8   :  { %3392 = vmatpush.bf16.msra.mxu2 %v13063_v13  ;;  %v17838_v13 = vld [vmem:[#allocation5 + $0xbbc] sm:$0xf0]  ;;  %v13783_v23 = vor.u32 %v17918_v15, %v13782_v14  ;;  %v13262_v15 = vld [vmem:[#allocation5 + $0xa08] sm:$0xf] }
  0xa9   :  { %3367 = vmatpush.bf16.msrb.mxu3 %v12383_v19  ;;  %v13463_v19 = vor.u32 %v17838_v13, %v13462_v12  ;;  %v17563_v12 = vld [vmem:[#allocation5 + $0x32c] sm:$0xf]  ;;  %v12384_v13 = vld [vmem:[#allocation5 + $0x350] sm:$0xf0] }
  0xaa   :  { %3380 = vmatpush.bf16.msra.mxu0 %v12703_v28  ;;  %v12187_v28 = vor.u32 %v17513_v18, %v12184_v20  ;;  %v17868_v18 = vld [vmem:[#allocation5 + $0xcac] sm:$0xf0]  ;;  %v12904_v20 = vld [vmem:[#allocation5 + $0x760] sm:$0xf0] }
  0xab   :  { %3355 = vmatpush.bf16.msrb.mxu1 %v12023_v27  ;;  %v17908_v27 = vld [vmem:[#allocation5 + $0xdec] sm:$0xf0] }
  0xac   :  { %3393 = vmatpush.bf16.msra.mxu2 %v13023_v25  ;;  %v17828_v25 = vld [vmem:[#allocation5 + $0xb6c] sm:$0xf0]  ;;  %v13743_v36 = vor.u32 %v17908_v27, %v13742_v26  ;;  %v17463_v26 = vld [vmem:[#allocation5 + $0xc] sm:$0xf]  ;;  %v11984_v27 = vld [vmem:[#allocation5 + $0x30] sm:$0xf0] }
  0xad   :  { %3368 = vmatpush.bf16.msrb.mxu3 %v12343_v32  ;;  %v13423_v31 = vor.u32 %v17828_v25, %v13422_v24  ;;  %v12144_v32 = vld [vmem:[#allocation5 + $0x170] sm:$0xf0]  ;;  %v12387_v24 = vor.u32 %v17563_v12, %v12384_v13  ;;  %v17823_v12 = vld [vmem:[#allocation5 + $0xb4c] sm:$0xf] }
  0xae   :  { %3381 = vmatpush.bf16.msra.mxu0 %v12663_v46  ;;  %v12147_v42 = vor.u32 %v17503_v30, %v12144_v32  ;;  %v12104_v46 = vld [vmem:[#allocation5 + $0x120] sm:$0xf0]  ;;  %v17853_v30 = vld [vmem:[#allocation5 + $0xc3c] sm:$0xf]  ;;  %v17683_v32 = vld [vmem:[#allocation5 + $0x6ec] sm:$0xf] }
  0xaf   :  { %3356 = vmatpush.bf16.msrb.mxu1 %v11983_v45  ;;  %v13383_v45 = vor.u32 %v17818_v38, %v13382_v37  ;;  %v12107_v57 = vor.u32 %v17493_v44, %v12104_v46  ;;  %v12344_v37 = vld [vmem:[#allocation5 + $0x300] sm:$0xf0]  ;;  %v11987_v38 = vor.u32 %v17463_v26, %v11984_v27  ;;  %v12867_v44 = vor.u32 %v17683_v32, %v12864_v35  ;;  %v13504_v46 = vld [vmem:[#allocation5 + $0xc10] sm:$0xf0]  ;;  %v17903_v32 = vld [vmem:[#allocation5 + $0xdcc] sm:$0xf] }
  0xb0   :  { %3394 = vmatpush.bf16.msra.mxu2 %v12983_v41  ;;  %v17898_v41 = vld [vmem:[#allocation5 + $0xd9c] sm:$0xf0]  ;;  %v13424_v13 = vld [vmem:[#allocation5 + $0xb70] sm:$0xf0] }
  0xb1   :  { %3369 = vmatpush.bf16.msrb.mxu3 %v12303_v51  ;;  %v13703_v50 = vor.u32 %v17898_v41, %v13702_v40  ;;  %v13342_v51 = vld [vmem:[#allocation5 + $0xaa8] sm:$0xf]  ;;  %v17763_v40 = vld [vmem:[#allocation5 + $0x96c] sm:$0xf]  ;;  %v13184_v41 = vld [vmem:[#allocation5 + $0x990] sm:$0xf0] }
  0xb2   :  { %3357 = vmatmul.bf16.vlgmr.msrb.gmra.mxu1 %v19308_v8  ;;  %3382 = vmatpush.bf16.msra.mxu0 %v12623_v2  ;;  %v17798_v2 = vld [vmem:[#allocation5 + $0xa7c] sm:$0xf0] }
  0xb3   :  { %3401 = vmatpush.bf16.msra.mxu1 %v13543_v52  ;;  %v17808_v52 = vld [vmem:[#allocation5 + $0xacc] sm:$0xf0] }
  0xb4   :  { %3395 = vmatpush.bf16.msra.mxu2 %v12943_v62  ;;  %3370 = vmatmul.bf16.vlgmr.msrb.gmra.mxu3 %v19310_v9  ;;  %v13343_v60 = vor.u32 %v17808_v52, %v13342_v51  ;;  %v17573_v62 = vld [vmem:[#allocation5 + $0x37c] sm:$0xf]  ;;  %v17543_v52 = vld [vmem:[#allocation5 + $0x28c] sm:$0xf] }
  0xb5   :  { %3414 = vmatpush.bf16.msra.mxu3 %v13863_v58  ;;  %3383 = vmatmul.bf16.vlgmr.msra.gmra.mxu0 %v19304_v55  ;;  %v12467_v58 = vor.u32 %v17583_v47, %v12464_v49  ;;  %v17673_v47 = vld [vmem:[#allocation5 + $0x69c] sm:$0xf]  ;;  %v12824_v49 = vld [vmem:[#allocation5 + $0x6c0] sm:$0xf0]  ;;  %v12307_v61 = vor.u32 %v17543_v52, %v12304_v53 }
  0xb6   :  { %3434 = vmatpush.bf16.msrb.mxu0 %v13903_v6  ;;  %v12427_v6 = vor.u32 %v17573_v62, %v12424_v63  ;;  %v17753_v51 = vld [vmem:[#allocation5 + $0x91c] sm:$0xf]  ;;  %v13464_v63 = vld [vmem:[#allocation5 + $0xbc0] sm:$0xf0] }
  0xb7   :  { %3402 = vmatpush.bf16.msra.mxu1 %v13503_v4  ;;  %3396 = vmatmul.bf16.vlgmr.msra.gmra.mxu2 %v19306_v56  ;;  %v17878_v4 = vld [vmem:[#allocation5 + $0xcfc] sm:$0xf0]  ;;  %v17833_v62 = vld [vmem:[#allocation5 + $0xb9c] sm:$0xf]  ;;  %v13704_v53 = vld [vmem:[#allocation5 + $0xda0] sm:$0xf0] }
  0xb8   :  { %3440 = vmatpush.bf16.msrb.mxu2 %v12267_v1  ;;  %v13302_v1 = vld [vmem:[#allocation5 + $0xa58] sm:$0xf]  ;;  %v13623_v14 = vor.u32 %v17878_v4, %v13622_v3  ;;  %v12784_v3 = vld [vmem:[#allocation5 + $0x670] sm:$0xf0]  ;;  %v17743_v4 = vld [vmem:[#allocation5 + $0x8cc] sm:$0xf] }
  0xb9   :  { %3415 = vmatpush.bf16.msra.mxu3 %v13823_v11  ;;  %v13303_v10 = vor.u32 %v17798_v2, %v13302_v1  ;;  %v12024_v11 = vld [vmem:[#allocation5 + $0x80] sm:$0xf0]  ;;  %v17663_v2 = vld [vmem:[#allocation5 + $0x64c] sm:$0xf]  ;;  %v17893_v52 = vld [vmem:[#allocation5 + $0xd7c] sm:$0xf] }
  0xba   :  { %3453 = vmatpush.bf16.msra.mxu0 %v12587_v17  ;;  %v13582_v17 = vld [vmem:[#allocation5 + $0xc88] sm:$0xf]  ;;  %v12027_v21 = vor.u32 %v17473_v7, %v12024_v11  ;;  %v13824_v7 = vld [vmem:[#allocation5 + $0xe90] sm:$0xf0]  ;;  %v12787_v11 = vor.u32 %v17663_v2, %v12784_v3  ;;  %v17703_v2 = vld [vmem:[#allocation5 + $0x78c] sm:$0xf] }
  0xbb   :  { %3403 = vmatpush.bf16.msra.mxu1 %v13463_v19  ;;  %v17693_v19 = vld [vmem:[#allocation5 + $0x73c] sm:$0xf]  ;;  %v12944_v3 = vld [vmem:[#allocation5 + $0x7b0] sm:$0xf0] }
  0xbc   :  { %3441 = vmatpush.bf16.msrb.mxu2 %v12227_v16  ;;  %v17788_v16 = vld [vmem:[#allocation5 + $0xa2c] sm:$0xf0] }
  0xbd   :  { %3416 = vmatpush.bf16.msra.mxu3 %v13783_v23  ;;  %v13224_v23 = vld [vmem:[#allocation5 + $0x9e0] sm:$0xf0]  ;;  %v13263_v25 = vor.u32 %v17788_v16, %v13262_v15  ;;  %v17653_v16 = vld [vmem:[#allocation5 + $0x5fc] sm:$0xf] }
  0xbe   :  { %3454 = vmatpush.bf16.msra.mxu0 %v12547_v29  ;;  %v12907_v29 = vor.u32 %v17693_v19, %v12904_v20  ;;  %v13227_v33 = vor.u32 %v17773_v22, %v13224_v23  ;;  %v13064_v19 = vld [vmem:[#allocation5 + $0x8a0] sm:$0xf0]  ;;  %v17913_v20 = vld [vmem:[#allocation5 + $0xe1c] sm:$0xf]  ;;  %v13427_v22 = vor.u32 %v17823_v12, %v13424_v13  ;;  %v17539_v12 = vld [vmem:[#allocation5 + $0x264] sm:$0xf0] }
  0xbf   :  { %3404 = vmatpush.bf16.msra.mxu1 %v13423_v31  ;;  %v13544_v31 = vld [vmem:[#allocation5 + $0xc60] sm:$0xf0]  ;;  %v17943_v13 = vld [vmem:[#allocation5 + $0xf0c] sm:$0xf] }
  0xc0   :  { %3442 = vmatpush.bf16.msrb.mxu2 %v12187_v28  ;;  %v13583_v28 = vor.u32 %v17868_v18, %v13582_v17  ;;  %v12744_v17 = vld [vmem:[#allocation5 + $0x620] sm:$0xf0]  ;;  %v17733_v18 = vld [vmem:[#allocation5 + $0x87c] sm:$0xf] }
  0xc1   :  { %3417 = vmatpush.bf16.msra.mxu3 %v13743_v36  ;;  %v17553_v36 = vld [vmem:[#allocation5 + $0x2dc] sm:$0xf]  ;;  %v12747_v23 = vor.u32 %v17653_v16, %v12744_v17  ;;  %v13067_v26 = vor.u32 %v17733_v18, %v13064_v19  ;;  %v17783_v16 = vld [vmem:[#allocation5 + $0xa0c] sm:$0xf]  ;;  %v13264_v17 = vld [vmem:[#allocation5 + $0xa30] sm:$0xf0] }
  0xc2   :  { %3455 = vmatpush.bf16.msra.mxu0 %v12507_v43  ;;  %v17843_v43 = vld [vmem:[#allocation5 + $0xbec] sm:$0xf]  ;;  %v12590_v18 = vld [vmem:[#allocation5 + $0x4c0] sm:$0xf] }
  0xc3   :  { %3405 = vmatpush.bf16.msra.mxu1 %v13383_v45  ;;  %v12347_v45 = vor.u32 %v17553_v36, %v12344_v37  ;;  %v13507_v59 = vor.u32 %v17843_v43, %v13504_v46  ;;  %v17633_v46 = vld [vmem:[#allocation5 + $0x55c] sm:$0xf] }
  0xc4   :  { %3443 = vmatpush.bf16.msrb.mxu2 %v12147_v42  ;;  %v13547_v42 = vor.u32 %v17853_v30, %v13544_v31  ;;  %v17723_v30 = vld [vmem:[#allocation5 + $0x82c] sm:$0xf]  ;;  %v13024_v31 = vld [vmem:[#allocation5 + $0x850] sm:$0xf0] }
  0xc5   :  { %3418 = vmatpush.bf16.msra.mxu3 %v13703_v50  ;;  %13934 = vmatmul.msk.bf16.vlgmr.msrb.gmra.mxu0 %vm3163_vm0, %v19316_v48  ;;  %v13187_v50 = vor.u32 %v17763_v40, %v13184_v41  ;;  %v17803_v41 = vld [vmem:[#allocation5 + $0xaac] sm:$0xf] }
  0xc6   :  { %3456 = vmatpush.bf16.msra.mxu0 %v12467_v58  ;;  %v13864_v58 = vld [vmem:[#allocation5 + $0xee0] sm:$0xf0] }
  0xc7   :  { %3406 = vmatpush.bf16.msra.mxu1 %v13343_v60  ;;  %v12827_v60 = vor.u32 %v17673_v47, %v12824_v49  ;;  %v12664_v47 = vld [vmem:[#allocation5 + $0x580] sm:$0xf0]  ;;  %v17713_v49 = vld [vmem:[#allocation5 + $0x7dc] sm:$0xf] }
  0xc8   :  { %3444 = vmatpush.bf16.msrb.mxu2 %v12107_v57  ;;  %v17933_v57 = vld [vmem:[#allocation5 + $0xebc] sm:$0xf] }
  0xc9   :  { %3419 = vmatpush.bf16.msra.mxu3 %v13663_v0  ;;  %v13147_v0 = vor.u32 %v17753_v51, %v13144_v54  ;;  %v13867_v1 = vor.u32 %v17933_v57, %v13864_v58  ;;  %v12984_v51 = vld [vmem:[#allocation5 + $0x800] sm:$0xf0]  ;;  %v12667_v58 = vor.u32 %v17633_v46, %v12664_v47  ;;  %v17519_v46 = vld [vmem:[#allocation5 + $0x1c4] sm:$0xf0]  ;;  %v13230_v47 = vld [vmem:[#allocation5 + $0x9c0] sm:$0xf] }
  0xca   :  { %3457 = vmatpush.bf16.msra.mxu0 %v12427_v6  ;;  %v17923_v6 = vld [vmem:[#allocation5 + $0xe6c] sm:$0xf] }
  0xcb   :  { %3407 = vmatpush.bf16.msra.mxu1 %v13303_v10  ;;  %v13467_v10 = vor.u32 %v17833_v62, %v13464_v63  ;;  %v13827_v15 = vor.u32 %v17923_v6, %v13824_v7  ;;  %v17623_v62 = vld [vmem:[#allocation5 + $0x50c] sm:$0xf]  ;;  %v12987_v63 = vor.u32 %v17713_v49, %v12984_v51  ;;  %v13664_v6 = vld [vmem:[#allocation5 + $0xd50] sm:$0xf0]  ;;  %v17779_v49 = vld [vmem:[#allocation5 + $0x9e4] sm:$0xf0] }
  0xcc   :  { %3445 = vmatpush.bf16.msrb.mxu2 %v12067_v5  ;;  %v13104_v5 = vld [vmem:[#allocation5 + $0x8f0] sm:$0xf0] }
  0xcd   :  { %3420 = vmatpush.bf16.msra.mxu3 %v13623_v14  ;;  %v13107_v14 = vor.u32 %v17743_v4, %v13104_v5  ;;  %v12270_v4 = vld [vmem:[#allocation5 + $0x240] sm:$0xf]  ;;  %v17883_v5 = vld [vmem:[#allocation5 + $0xd2c] sm:$0xf] }
  0xce   :  { %3458 = vmatpush.bf16.msra.mxu0 %v12387_v24  ;;  %v17813_v24 = vld [vmem:[#allocation5 + $0xafc] sm:$0xf]  ;;  %v3176_v35 = vpop.f32.mrf.mxu0 }
  0xcf   :  { %3408 = vmatpush.bf16.msra.mxu1 %v13263_v25  ;;  %v13384_v25 = vld [vmem:[#allocation5 + $0xb20] sm:$0xf0]  ;;  %v3189_v36 = vpop.f32.mrf.mxu1 }
  0xd0   :  { %3446 = vmatpush.bf16.msrb.mxu2 %v12027_v21  ;;  %v13784_v21 = vld [vmem:[#allocation5 + $0xe40] sm:$0xf0]  ;;  %v13387_v37 = vor.u32 %v17813_v24, %v13384_v25  ;;  %v17699_v24 = vld [vmem:[#allocation5 + $0x764] sm:$0xf0] }
  0xd1   :  { %3421 = vmatpush.bf16.msra.mxu3 %v13583_v28  ;;  %v13787_v27 = vor.u32 %v17913_v20, %v13784_v21  ;;  %v17643_v28 = vld [vmem:[#allocation5 + $0x5ac] sm:$0xf]  ;;  %v12947_v20 = vor.u32 %v17703_v2, %v12944_v3  ;;  %v13667_v21 = vor.u32 %v17883_v5, %v13664_v6  ;;  %v17769_v2 = vld [vmem:[#allocation5 + $0x994] sm:$0xf0]  ;;  %v12470_v5 = vld [vmem:[#allocation5 + $0x3d0] sm:$0xf] }
  0xd2   :  { %3409 = vmatmul.bf16.vlgmr.msra.gmra.mxu1 %v19320_v34  ;;  %3459 = vmatpush.bf16.msra.mxu0 %v12347_v45  ;;  %v17589_v6 = vld [vmem:[#allocation5 + $0x3f4] sm:$0xf0] }
  0xd3   :  { %3466 = vmatpush.bf16.msrb.mxu1 %v12907_v29  ;;  %v12704_v29 = vld [vmem:[#allocation5 + $0x5d0] sm:$0xf0] }
  0xd4   :  { %3447 = vmatpush.bf16.msrb.mxu2 %v11987_v38  ;;  %3422 = vmatmul.bf16.vlgmr.msra.gmra.mxu3 %v19322_v39  ;;  %v3190_v38 = vadd.f32 %v3189_v36, %v3176_v35  ;;  %v12707_v40 = vor.u32 %v17643_v28, %v12704_v29  ;;  %v17873_v28 = vld [vmem:[#allocation5 + $0xcdc] sm:$0xf]  ;;  %v13624_v29 = vld [vmem:[#allocation5 + $0xd00] sm:$0xf0]  ;;  %v12550_v36 = vld [vmem:[#allocation5 + $0x470] sm:$0xf] }
  0xd5   :  { %3479 = vmatpush.bf16.msrb.mxu3 %v13227_v33  ;;  %v13744_v33 = vld [vmem:[#allocation5 + $0xdf0] sm:$0xf0] }
  0xd6   :  { %3460 = vmatpush.bf16.msra.mxu0 %v12307_v61  ;;  %v3202_v43 = vpop.f32.mrf.mxu2  ;;  %v13747_v45 = vor.u32 %v17903_v32, %v13744_v33  ;;  %v3178_v7 = vpop.f32.mrf.mxu0  ;;  %v17529_v32 = vld [vmem:[#allocation5 + $0x214] sm:$0xf0] }
  0xd7   :  { %3467 = vmatpush.bf16.msrb.mxu1 %v12867_v44  ;;  %3448 = vmatmul.bf16.vlgmr.msrb.gmra.mxu2 %v19308_v8  ;;  %v13027_v44 = vor.u32 %v17723_v30, %v13024_v31  ;;  %v3203_v54 = vadd.f32 %v3202_v43, %v3190_v38  ;;  %v13267_v30 = vor.u32 %v17783_v16, %v13264_v17  ;;  %v12230_v31 = vld [vmem:[#allocation5 + $0x1f0] sm:$0xf]  ;;  %v17609_v38 = vld [vmem:[#allocation5 + $0x494] sm:$0xf0]  ;;  %v12190_v43 = vld [vmem:[#allocation5 + $0x1a0] sm:$0xf] }
  0xd8   :  { %3492 = vmatpush.bf16.msra.mxu2 %v13547_v42  ;;  %v13344_v42 = vld [vmem:[#allocation5 + $0xad0] sm:$0xf0]  ;;  %v12790_v7 = vld [vmem:[#allocation5 + $0x650] sm:$0xf]  ;;  %v13150_v16 = vld [vmem:[#allocation5 + $0x920] sm:$0xf] }
  0xd9   :  { %3480 = vmatpush.bf16.msrb.mxu3 %v13187_v50  ;;  %3461 = vmatmul.bf16.vlgmr.msra.gmra.mxu0 %v19310_v9  ;;  %v3215_v50 = vpop.f32.mrf.mxu3  ;;  %v13347_v57 = vor.u32 %v17803_v41, %v13344_v42  ;;  %v17689_v41 = vld [vmem:[#allocation5 + $0x714] sm:$0xf0]  ;;  %v12231_v42 = vor.u32 %v17529_v32, %v12230_v31  ;;  %v17759_v17 = vld [vmem:[#allocation5 + $0x944] sm:$0xf0] }
  0xda   :  { %3505 = vmatpush.bf16.msrb.mxu0 %v13867_v1  ;;  %v19344_v61 = vadd.f32 %v3215_v50, %v3203_v54  ;;  %v12624_v1 = vld [vmem:[#allocation5 + $0x530] sm:$0xf0]  ;;  %v12551_v50 = vor.u32 %v17609_v38, %v12550_v36  ;;  %v17599_v54 = vld [vmem:[#allocation5 + $0x444] sm:$0xf0]  ;;  %v17489_v31 = vld [vmem:[#allocation5 + $0xd4] sm:$0xf0] }
  0xdb   :  { %3468 = vmatpush.bf16.msrb.mxu1 %v12827_v60  ;;  %v13304_v60 = vld [vmem:[#allocation5 + $0xa80] sm:$0xf0]  ;;  %v17749_v32 = vld [vmem:[#allocation5 + $0x8f4] sm:$0xf0] }
  0xdc   :  { %3493 = vmatpush.bf16.msra.mxu2 %v13507_v59  ;;  %v17793_v59 = vld [vmem:[#allocation5 + $0xa5c] sm:$0xf]  ;;  %v17569_v38 = vld [vmem:[#allocation5 + $0x354] sm:$0xf0] }
  0xdd   :  { %3481 = vmatpush.bf16.msrb.mxu3 %v13147_v0  ;;  %v13707_v0 = vor.u32 %v17893_v52, %v13704_v53  ;;  %v12510_v52 = vld [vmem:[#allocation5 + $0x420] sm:$0xf] }
  0xde   :  { %3506 = vmatpush.bf16.msrb.mxu0 %v13827_v15  ;;  %v12627_v15 = vor.u32 %v17623_v62, %v12624_v1  ;;  %v3204_v19 = vpop.f32.mrf.mxu2  ;;  %v13231_v62 = vor.u32 %v17779_v49, %v13230_v47  ;;  %v13190_v1 = vld [vmem:[#allocation5 + $0x970] sm:$0xf]  ;;  %v12511_v3 = vor.u32 %v17599_v54, %v12510_v52  ;;  %v17739_v47 = vld [vmem:[#allocation5 + $0x8a4] sm:$0xf0] }
  0xdf   :  { %3469 = vmatpush.bf16.msrb.mxu1 %v12787_v11  ;;  %v13307_v11 = vor.u32 %v17793_v59, %v13304_v60  ;;  %v12191_v60 = vor.u32 %v17519_v46, %v12190_v43  ;;  %v13070_v46 = vld [vmem:[#allocation5 + $0x880] sm:$0xf] }
  0xe0   :  { %3494 = vmatpush.bf16.msra.mxu2 %v13467_v10  ;;  %v3191_v10 = vpop.f32.mrf.mxu1 }
  0xe1   :  { %3482 = vmatpush.bf16.msrb.mxu3 %v13107_v14  ;;  %v13904_v14 = vld [vmem:[#allocation5 + $0xf30] sm:$0xf0]  ;;  %v3217_v25 = vpop.f32.mrf.mxu3  ;;  %v17669_v10 = vld [vmem:[#allocation5 + $0x674] sm:$0xf0] }
  0xe2   :  { %3507 = vmatpush.bf16.msrb.mxu0 %v13787_v27  ;;  %v13907_v27 = vor.u32 %v17943_v13, %v13904_v14  ;;  %v12110_v13 = vld [vmem:[#allocation5 + $0x100] sm:$0xf]  ;;  %v17659_v25 = vld [vmem:[#allocation5 + $0x624] sm:$0xf0] }
  0xe3   :  { %3470 = vmatpush.bf16.msrb.mxu1 %v12747_v23  ;;  %v12910_v23 = vld [vmem:[#allocation5 + $0x740] sm:$0xf] }
  0xe4   :  { %3495 = vmatpush.bf16.msra.mxu2 %v13427_v22  ;;  %v17619_v22 = vld [vmem:[#allocation5 + $0x4e4] sm:$0xf0]  ;;  %v12911_v35 = vor.u32 %v17699_v24, %v12910_v23  ;;  %v12750_v24 = vld [vmem:[#allocation5 + $0x600] sm:$0xf] }
  0xe5   :  { %3483 = vmatpush.bf16.msrb.mxu3 %v13067_v26  ;;  %v12271_v26 = vor.u32 %v17539_v12, %v12270_v4  ;;  %v12591_v33 = vor.u32 %v17619_v22, %v12590_v18  ;;  %v13191_v12 = vor.u32 %v17769_v2, %v13190_v1  ;;  %v12430_v22 = vld [vmem:[#allocation5 + $0x380] sm:$0xf]  ;;  %v17579_v23 = vld [vmem:[#allocation5 + $0x3a4] sm:$0xf0]  ;;  %v12751_v36 = vor.u32 %v17659_v25, %v12750_v24  ;;  %v11990_v1 = vld [vmem:[#allocation5 + $0x10] sm:$0xf] }
  0xe6   :  { %3508 = vmatpush.bf16.msrb.mxu0 %v13747_v45  ;;  %v13584_v45 = vld [vmem:[#allocation5 + $0xcb0] sm:$0xf0]  ;;  %v3254_v59 = vpop.f32.mrf.mxu2  ;;  %v17469_v2 = vld [vmem:[#allocation5 + $0x34] sm:$0xf0] }
  0xe7   :  { %3471 = vmatpush.bf16.msrb.mxu1 %v12707_v40  ;;  %v12870_v40 = vld [vmem:[#allocation5 + $0x6f0] sm:$0xf] }
  0xe8   :  { %3496 = vmatpush.bf16.msra.mxu2 %v13387_v37  ;;  %v13627_v37 = vor.u32 %v17873_v28, %v13624_v29  ;;  %v12871_v51 = vor.u32 %v17689_v41, %v12870_v40  ;;  %v13151_v29 = vor.u32 %v17759_v17, %v13150_v16  ;;  %v12710_v40 = vld [vmem:[#allocation5 + $0x5b0] sm:$0xf]  ;;  %v17649_v41 = vld [vmem:[#allocation5 + $0x5d4] sm:$0xf0] }
  0xe9   :  { %3484 = vmatpush.bf16.msrb.mxu3 %v13027_v44  ;;  %v17863_v44 = vld [vmem:[#allocation5 + $0xc8c] sm:$0xf]  ;;  %v12711_v52 = vor.u32 %v17649_v41, %v12710_v40  ;;  %v17629_v17 = vld [vmem:[#allocation5 + $0x534] sm:$0xf0] }
  0xea   :  { %3509 = vmatpush.bf16.msrb.mxu0 %v13707_v0  ;;  %v13587_v53 = vor.u32 %v17863_v44, %v13584_v45  ;;  %v17509_v0 = vld [vmem:[#allocation5 + $0x174] sm:$0xf0]  ;;  %v12030_v44 = vld [vmem:[#allocation5 + $0x60] sm:$0xf]  ;;  %v17479_v45 = vld [vmem:[#allocation5 + $0x84] sm:$0xf0] }
  0xeb   :  { %3472 = vmatpush.bf16.msrb.mxu1 %v12667_v58  ;;  %v17679_v58 = vld [vmem:[#allocation5 + $0x6c4] sm:$0xf0]  ;;  %v12592_v40 = vld [vmem:[#allocation5 + $0x4e8] sm:$0xf0] }
  0xec   :  { %3497 = vmatpush.bf16.msra.mxu2 %v13347_v57  ;;  %v12830_v57 = vld [vmem:[#allocation5 + $0x6a0] sm:$0xf] }
  0xed   :  { %3485 = vmatpush.bf16.msrb.mxu3 %v12987_v63  ;;  %v12150_v63 = vld [vmem:[#allocation5 + $0x150] sm:$0xf]  ;;  %v12831_v4 = vor.u32 %v17679_v58, %v12830_v57  ;;  %v19209_v57 = vmov 8.0   ;;  %v17559_v58 = vld [vmem:[#allocation5 + $0x304] sm:$0xf0] }
  0xee   :  { %3510 = vmatpush.bf16.msrb.mxu0 %v13667_v21  ;;  %v3228_v14 = vpop.f32.mrf.mxu0  ;;  %v12791_v21 = vor.u32 %v17669_v10, %v12790_v7  ;;  %18850 = vrcp.f32 %v19209_v57  ;;  %v17729_v7 = vld [vmem:[#allocation5 + $0x854] sm:$0xf0] }
  0xef   :  { %3473 = vmatpush.bf16.msrb.mxu1 %v12627_v15  ;;  %v17499_v15 = vld [vmem:[#allocation5 + $0x124] sm:$0xf0]  ;;  %v3229_v18 = vadd.f32 %v3228_v14, %v19344_v61  ;;  %v3241_v19 = vpop.f32.mrf.mxu1  ;;  %v13110_v61 = vld [vmem:[#allocation5 + $0x8d0] sm:$0xf] }
  0xf0   :  { %3498 = vmatpush.bf16.msra.mxu2 %v13307_v11  ;;  %v12151_v11 = vor.u32 %v17509_v0, %v12150_v63  ;;  %v12111_v28 = vor.u32 %v17499_v15, %v12110_v13  ;;  %v13111_v43 = vor.u32 %v17749_v32, %v13110_v61  ;;  %v12031_v63 = vor.u32 %v17479_v45, %v12030_v44  ;;  %v17549_v13 = vld [vmem:[#allocation5 + $0x2b4] sm:$0xf0]  ;;  %v12630_v14 = vld [vmem:[#allocation5 + $0x510] sm:$0xf] }
  0xf1   :  { %3486 = vmatpush.bf16.msrb.mxu3 %v12947_v20  ;;  %v12471_v20 = vor.u32 %v17589_v6, %v12470_v5  ;;  %v13071_v0 = vor.u32 %v17739_v47, %v13070_v46  ;;  %v17859_v5 = vld [vmem:[#allocation5 + $0xc64] sm:$0xf0]  ;;  %v13030_v6 = vld [vmem:[#allocation5 + $0x830] sm:$0xf]  ;;  %v17849_v61 = vld [vmem:[#allocation5 + $0xc14] sm:$0xf0] }
  0xf2   :  { %3474 = vmatmul.bf16.vlgmr.msrb.gmra.mxu1 %v19304_v55  ;;  %3511 = vmatpush.bf16.msrb.mxu0 %v13627_v37  ;;  %v12390_v37 = vld [vmem:[#allocation5 + $0x330] sm:$0xf]  ;;  %v17929_v45 = vld [vmem:[#allocation5 + $0xe94] sm:$0xf0]  ;;  %v13470_v47 = vld [vmem:[#allocation5 + $0xba0] sm:$0xf] }
  0xf3   :  { %3525 = vmatpush.bf16.msra.mxu1 %v13907_v27  ;;  %v3242_v27 = vadd.f32 %v3241_v19, %v3229_v18  ;;  %v13870_v18 = vld [vmem:[#allocation5 + $0xec0] sm:$0xf]  ;;  %v11991_v19 = vor.u32 %v17469_v2, %v11990_v1  ;;  %v13830_v44 = vld [vmem:[#allocation5 + $0xe70] sm:$0xf]  ;;  %v17919_v2 = vld [vmem:[#allocation5 + $0xe44] sm:$0xf0] }
  0xf4   :  { %3499 = vmatpush.bf16.msra.mxu2 %v13267_v30  ;;  %3487 = vmatmul.bf16.vlgmr.msrb.gmra.mxu3 %v19306_v56  ;;  %v12070_v30 = vld [vmem:[#allocation5 + $0xb0] sm:$0xf]  ;;  %v19360_v24 = vpop.eup %18850  ;;  %v13790_v1 = vld [vmem:[#allocation5 + $0xe20] sm:$0xf] }
  0xf5   :  { %3531 = vmatpush.bf16.msra.mxu3 %v12271_v26  ;;  %v3256_v26 = vpop.f32.mrf.mxu2  ;;  %vm4151_vm1 = vweird.f32 %v19360_v24 }
  0xf6   :  { %3512 = vmatpush.bf16.msrb.mxu0 %v13587_v53  ;;  %v3230_v49 = vpop.f32.mrf.mxu0  ;;  %v12350_v53 = vld [vmem:[#allocation5 + $0x2e0] sm:$0xf] }
  0xf7   :  { %3544 = vmatpush.bf16.msrb.mxu1 %v12591_v33  ;;  %3500 = vmatmul.bf16.vlgmr.msra.gmra.mxu2 %v19320_v34  ;;  %v19351_v33 = vadd.f32 %v3254_v59, %v3242_v27  ;;  %v3243_v54 = vpop.f32.mrf.mxu1  ;;  %v12670_v59 = vld [vmem:[#allocation5 + $0x560] sm:$0xf]  ;;  %v12351_v10 = vor.u32 %v17559_v58, %v12350_v53  ;;  %v17719_v27 = vld [vmem:[#allocation5 + $0x804] sm:$0xf0]  ;;  %v12950_v49 = vld [vmem:[#allocation5 + $0x790] sm:$0xf] }
  0xf8   :  { %3557 = vmatpush.bf16.msrb.mxu2 %v12911_v35  ;;  %v12431_v35 = vor.u32 %v17579_v23, %v12430_v22  ;;  %v13910_v22 = vld [vmem:[#allocation5 + $0xf10] sm:$0xf]  ;;  %v17949_v23 = vld [vmem:[#allocation5 + $0xf34] sm:$0xf0]  ;;  %v12990_v26 = vld [vmem:[#allocation5 + $0x7e0] sm:$0xf] }
  0xf9   :  { %3532 = vmatpush.bf16.msra.mxu3 %v12231_v42  ;;  %3513 = vmatmul.bf16.vlgmr.msrb.gmra.mxu0 %v19322_v39  ;;  %v12071_v42 = vor.u32 %v17489_v31, %v12070_v30  ;;  %v4086_v15 = vrot.slane %v19351_v33, 4  ;;  %v4163_v16 = vmul.f32 %v19351_v33, %v19351_v33  ;;  %v12631_v30 = vor.u32 %v17629_v17, %v12630_v14  ;;  %v13510_v31 = vld [vmem:[#allocation5 + $0xbf0] sm:$0xf]  ;;  %v17534_v53 = vld [vmem:[#allocation5 + $0x244] sm:$0xf] }
  0xfa   :  { %3570 = vmatpush.bf16.msra.mxu0 %v13231_v62  ;;  %v13511_v46 = vor.u32 %v17849_v61, %v13510_v31  ;;  %v12272_v54 = vld [vmem:[#allocation5 + $0x268] sm:$0xf0] }
  0xfb   :  { %3545 = vmatpush.bf16.msrb.mxu1 %v12551_v50  ;;  %v3267_v50 = vpop.f32.mrf.mxu3  ;;  %v4087_v32 = vadd.f32 %v4086_v15, %v19351_v33  ;;  %v13791_v15 = vor.u32 %v17919_v2, %v13790_v1  ;;  %v12512_v17 = vld [vmem:[#allocation5 + $0x448] sm:$0xf0]  ;;  %v17799_v2 = vld [vmem:[#allocation5 + $0xa84] sm:$0xf0] }
  0xfc   :  { %3558 = vmatpush.bf16.msrb.mxu2 %v12871_v51  ;;  %v12391_v51 = vor.u32 %v17569_v38, %v12390_v37  ;;  %v13911_v37 = vor.u32 %v17949_v23, %v13910_v22  ;;  %v17614_v38 = vld [vmem:[#allocation5 + $0x4c4] sm:$0xf]  ;;  %v13390_v23 = vld [vmem:[#allocation5 + $0xb00] sm:$0xf] }
  0xfd   :  { %3533 = vmatpush.bf16.msra.mxu3 %v12191_v60  ;;  %v17639_v60 = vld [vmem:[#allocation5 + $0x584] sm:$0xf0]  ;;  %v3280_v62 = vpop.f32.mrf.mxu2  ;;  %v4088_v57 = vrot.slane %v4087_v32, 2 }
  0xfe   :  { %3571 = vmatpush.bf16.msra.mxu0 %v13191_v12  ;;  %v12310_v12 = vld [vmem:[#allocation5 + $0x290] sm:$0xf] }
  0xff   :  { %3546 = vmatpush.bf16.msrb.mxu1 %v12511_v3  ;;  %v13550_v3 = vld [vmem:[#allocation5 + $0xc40] sm:$0xf] }
 0x100   :  { %3559 = vmatpush.bf16.msrb.mxu2 %v12831_v4  ;;  %v19355_v4 = vadd.f32 %v3280_v62, %v3267_v50  ;;  %v13551_v25 = vor.u32 %v17859_v5, %v13550_v3  ;;  %v17709_v50 = vld [vmem:[#allocation5 + $0x7b4] sm:$0xf0]  ;;  %v12552_v62 = vld [vmem:[#allocation5 + $0x498] sm:$0xf0]  ;;  %v12275_v5 = vor.u32 %v17534_v53, %v12272_v54  ;;  %v12432_v53 = vld [vmem:[#allocation5 + $0x3a8] sm:$0xf0] }
 0x101   :  { %3534 = vmatpush.bf16.msra.mxu3 %v12151_v11  ;;  %v12671_v11 = vor.u32 %v17639_v60, %v12670_v59  ;;  %v13831_v59 = vor.u32 %v17929_v45, %v13830_v44  ;;  %v17604_v60 = vld [vmem:[#allocation5 + $0x474] sm:$0xf]  ;;  %v17809_v45 = vld [vmem:[#allocation5 + $0xad4] sm:$0xf0] }
 0x102   :  { %3572 = vmatpush.bf16.msra.mxu0 %v13151_v29  ;;  %13935 = vmatmul.msk.bf16.vlgmr.msra.gmra.mxu1 %vm3163_vm0, %v19316_v48  ;;  %v12311_v29 = vor.u32 %v17549_v13, %v12310_v12  ;;  %v12232_v12 = vld [vmem:[#allocation5 + $0x218] sm:$0xf0]  ;;  %v4089_v13 = vadd.f32 %v4088_v57, %v4087_v32  ;;  %v17584_v32 = vld [vmem:[#allocation5 + $0x3d4] sm:$0xf] }
 0x103   :  { %3547 = vmatpush.bf16.msrb.mxu1 %v12471_v20  ;;  %v13031_v20 = vor.u32 %v17729_v7, %v13030_v6  ;;  %v13430_v6 = vld [vmem:[#allocation5 + $0xb50] sm:$0xf]  ;;  %v12555_v7 = vor.u32 %v17604_v60, %v12552_v62 }
 0x104   :  { %3560 = vmatpush.bf16.msrb.mxu2 %v12791_v21  ;;  %v17939_v21 = vld [vmem:[#allocation5 + $0xee4] sm:$0xf0] }
 0x105   :  { %3535 = vmatpush.bf16.msra.mxu3 %v12111_v28  ;;  %v3269_v28 = vpop.f32.mrf.mxu3  ;;  %v3282_v41 = vpop.f32.mrf.mxu2 }
 0x106   :  { %3573 = vmatpush.bf16.msra.mxu0 %v13111_v43  ;;  %v12991_v43 = vor.u32 %v17719_v27, %v12990_v26  ;;  %v17819_v26 = vld [vmem:[#allocation5 + $0xb24] sm:$0xf0]  ;;  %v17514_v27 = vld [vmem:[#allocation5 + $0x1a4] sm:$0xf]  ;;  %v12192_v28 = vld [vmem:[#allocation5 + $0x1c8] sm:$0xf0] }
 0x107   :  { %3548 = vmatpush.bf16.msrb.mxu1 %v12431_v35  ;;  %v4173_v35 = vrot.slane %v4163_v16, 4  ;;  %v13391_v41 = vor.u32 %v17819_v26, %v13390_v23  ;;  %v17694_v23 = vld [vmem:[#allocation5 + $0x744] sm:$0xf]  ;;  %v12072_v26 = vld [vmem:[#allocation5 + $0xd8] sm:$0xf0] }
 0x108   :  { %3561 = vmatpush.bf16.msrb.mxu2 %v12751_v36  ;;  %v13871_v36 = vor.u32 %v17939_v21, %v13870_v18 }
 0x109   :  { %3536 = vmatpush.bf16.msra.mxu3 %v12071_v42  ;;  %v4147_v42 = vmul.f32 8.0, %v19360_v24  ;;  %v4174_v58 = vadd.f32 %v4173_v35, %v4163_v16  ;;  %v17594_v16 = vld [vmem:[#allocation5 + $0x424] sm:$0xf]  ;;  %v12472_v35 = vld [vmem:[#allocation5 + $0x3f8] sm:$0xf0] }
 0x10a   :  { %3574 = vmatpush.bf16.msra.mxu0 %v13071_v0  ;;  %v12951_v0 = vor.u32 %v17709_v50, %v12950_v49  ;;  %v12475_v44 = vor.u32 %v17584_v32, %v12472_v35  ;;  %v13590_v35 = vld [vmem:[#allocation5 + $0xc90] sm:$0xf] }
 0x10b   :  { %3549 = vmatpush.bf16.msrb.mxu1 %v12391_v51  ;;  %v12595_v51 = vor.u32 %v17614_v38, %v12592_v40  ;;  %v4175_v14 = vrot.slane %v4174_v58, 2  ;;  %v13710_v38 = vld [vmem:[#allocation5 + $0xd80] sm:$0xf]  ;;  %v17899_v40 = vld [vmem:[#allocation5 + $0xda4] sm:$0xf0] }
 0x10c   :  { %3562 = vmatpush.bf16.msrb.mxu2 %v12711_v52  ;;  %v17839_v52 = vld [vmem:[#allocation5 + $0xbc4] sm:$0xf0] }
 0x10d   :  { %3537 = vmatpush.bf16.msra.mxu3 %v12031_v63  ;;  %v4148_v63 = vsub.f32 1.0, %v4147_v42  ;;  %v13471_v3 = vor.u32 %v17839_v52, %v13470_v47  ;;  %v12195_v42 = vor.u32 %v17514_v27, %v12192_v28  ;;  %v12152_v47 = vld [vmem:[#allocation5 + $0x178] sm:$0xf0]  ;;  %v13711_v52 = vor.u32 %v17899_v40, %v13710_v38  ;;  %v17774_v40 = vld [vmem:[#allocation5 + $0x9c4] sm:$0xf] }
 0x10e   :  { %3575 = vmatpush.bf16.msra.mxu0 %v13031_v20  ;;  %v17909_v20 = vld [vmem:[#allocation5 + $0xdf4] sm:$0xf0]  ;;  %v3293_v31 = vpop.f32.mrf.mxu0 }
 0x10f   :  { %3550 = vmatpush.bf16.msrb.mxu1 %v12351_v10  ;;  %v17829_v10 = vld [vmem:[#allocation5 + $0xb74] sm:$0xf0]  ;;  %v4149_v18 = vmul.f32 %v19360_v24, %v4148_v63  ;;  %v13310_v63 = vld [vmem:[#allocation5 + $0xa60] sm:$0xf] }
 0x110   :  { %3563 = vmatpush.bf16.msrb.mxu2 %v12671_v11  ;;  %v17524_v11 = vld [vmem:[#allocation5 + $0x1f4] sm:$0xf]  ;;  %v13431_v21 = vor.u32 %v17829_v10, %v13430_v6 }
 0x111   :  { %3538 = vmatpush.bf16.msra.mxu3 %v11991_v19  ;;  %v13750_v19 = vld [vmem:[#allocation5 + $0xdd0] sm:$0xf]  ;;  %v12235_v22 = vor.u32 %v17524_v11, %v12232_v12  ;;  %v17564_v12 = vld [vmem:[#allocation5 + $0x334] sm:$0xf] }
 0x112   :  { %3576 = vmatpush.bf16.msra.mxu0 %v12991_v43  ;;  %v13751_v61 = vor.u32 %v17909_v20, %v13750_v19  ;;  %v13350_v43 = vld [vmem:[#allocation5 + $0xab0] sm:$0xf] }
 0x113   :  { %3551 = vmatpush.bf16.msrb.mxu1 %v12311_v29  ;;  %v4090_v29 = vrot.slane %v4089_v13, 1  ;;  %v13351_v60 = vor.u32 %v17809_v45, %v13350_v43  ;;  %v13270_v20 = vld [vmem:[#allocation5 + $0xa10] sm:$0xf]  ;;  %v17474_v45 = vld [vmem:[#allocation5 + $0x64] sm:$0xf] }
 0x114   :  { %3564 = vmatpush.bf16.msrb.mxu2 %v12631_v30  ;;  %3539 = vmatmul.bf16.vlgmr.msra.gmra.mxu3 %v19308_v8  ;;  %v4176_v30 = vadd.f32 %v4175_v14, %v4174_v58  ;;  %v13670_v58 = vld [vmem:[#allocation5 + $0xd30] sm:$0xf] }
 0x115   :  { %3583 = vmatpush.bf16.msrb.mxu3 %v13551_v25  ;;  %v12515_v25 = vor.u32 %v17594_v16, %v12512_v17  ;;  %v4091_v49 = vadd.f32 %v4090_v29, %v4089_v13  ;;  %v12392_v13 = vld [vmem:[#allocation5 + $0x358] sm:$0xf0]  ;;  %v17879_v16 = vld [vmem:[#allocation5 + $0xd04] sm:$0xf0] }
 0x116   :  { %3552 = vmatmul.bf16.vlgmr.msrb.gmra.mxu1 %v19310_v9  ;;  %3577 = vmatpush.bf16.msra.mxu0 %v12951_v0  ;;  %v4177_v50 = vrot.slane %v4176_v30, 1 }
 0x117   :  { %3596 = vmatpush.bf16.msra.mxu1 %v13871_v36  ;;  %3565 = vmatmul.bf16.vlgmr.msrb.gmra.mxu2 %v19304_v55  ;;  %v4150_v36 = vadd.f32 %v19360_v24, %v4149_v18  ;;  %v3319_v0 = vpop.f32.mrf.mxu3  ;;  %v13311_v18 = vor.u32 %v17799_v2, %v13310_v63  ;;  %v17674_v2 = vld [vmem:[#allocation5 + $0x6a4] sm:$0xf] }
 0x118   :  { %3616 = vmatpush.bf16.msra.mxu2 %v13911_v37  ;;  %v3294_v37 = vadd.f32 %v3293_v31, %v19355_v4  ;;  %v17574_v4 = vld [vmem:[#allocation5 + $0x384] sm:$0xf] }
 0x119   :  { %3584 = vmatpush.bf16.msrb.mxu3 %v13511_v46  ;;  %3578 = vmatmul.bf16.vlgmr.msra.gmra.mxu0 %v19306_v56  ;;  %v17504_v46 = vld [vmem:[#allocation5 + $0x154] sm:$0xf]  ;;  %v19375_v54 = vsel %vm4151_vm1, %v19360_v24, %v4150_v36  ;;  %v12435_v1 = vor.u32 %v17574_v4, %v12432_v53  ;;  %v3295_v24 = vpop.f32.mrf.mxu0  ;;  %v17554_v31 = vld [vmem:[#allocation5 + $0x2e4] sm:$0xf]  ;;  %v17869_v36 = vld [vmem:[#allocation5 + $0xcb4] sm:$0xf0] }
 0x11a   :  { %3622 = vmatpush.bf16.msrb.mxu0 %v12275_v5  ;;  %v12155_v62 = vor.u32 %v17504_v46, %v12152_v47  ;;  %v12112_v5 = vld [vmem:[#allocation5 + $0x128] sm:$0xf0]  ;;  %v19378_v6 = vmul.f32 %v19375_v54, %v4091_v49  ;;  %v3332_v14 = vpop.f32.mrf.mxu2  ;;  %v17544_v4 = vld [vmem:[#allocation5 + $0x294] sm:$0xf]  ;;  %v12312_v53 = vld [vmem:[#allocation5 + $0x2b8] sm:$0xf0] }
 0x11b   :  { %3597 = vmatpush.bf16.msra.mxu1 %v13831_v59  ;;  %v17889_v59 = vld [vmem:[#allocation5 + $0xd54] sm:$0xf0]  ;;  %v12032_v46 = vld [vmem:[#allocation5 + $0x88] sm:$0xf0]  ;;  %vm4405_vm1 = vcmask 1041408  }
 0x11c   :  { %3635 = vmatpush.bf16.msrb.mxu2 %v12595_v51  ;;  %v3306_v51 = vpop.f32.mrf.mxu1  ;;  %v13671_v11 = vor.u32 %v17889_v59, %v13670_v58  ;;  %v4243_v28 = vmul.f32 %v19378_v6, %v19378_v6  ;;  %v17934_v59 = vld [vmem:[#allocation5 + $0xec4] sm:$0xf] }
 0x11d   :  { %3585 = vmatpush.bf16.msrb.mxu3 %v13471_v3  ;;  %v3307_v57 = vadd.f32 %v3306_v51, %v3294_v37  ;;  %v17494_v3 = vld [vmem:[#allocation5 + $0x104] sm:$0xf]  ;;  %v13591_v51 = vor.u32 %v17869_v36, %v13590_v35  ;;  %v17844_v36 = vld [vmem:[#allocation5 + $0xbf4] sm:$0xf] }
 0x11e   :  { %3623 = vmatpush.bf16.msrb.mxu0 %v12235_v22  ;;  %v12115_v19 = vor.u32 %v17494_v3, %v12112_v5  ;;  %v12395_v22 = vor.u32 %v17564_v12, %v12392_v13  ;;  %v12832_v3 = vld [vmem:[#allocation5 + $0x6c8] sm:$0xf0]  ;;  %v11992_v12 = vld [vmem:[#allocation5 + $0x38] sm:$0xf0] }
 0x11f   :  { %3598 = vmatpush.bf16.msra.mxu1 %v13791_v15  ;;  %v3320_v10 = vadd.f32 %v3319_v0, %v3307_v57  ;;  %v13630_v15 = vld [vmem:[#allocation5 + $0xce0] sm:$0xf]  ;;  %v3321_v47 = vpop.f32.mrf.mxu3  ;;  %v12035_v0 = vor.u32 %v17474_v45, %v12032_v46  ;;  %v13112_v45 = vld [vmem:[#allocation5 + $0x8f8] sm:$0xf0] }
 0x120   :  { %3636 = vmatpush.bf16.msrb.mxu2 %v12555_v7  ;;  %v4178_v7 = vadd.f32 %v4177_v50, %v4176_v30  ;;  %v13631_v29 = vor.u32 %v17879_v16, %v13630_v15  ;;  %v12912_v30 = vld [vmem:[#allocation5 + $0x768] sm:$0xf0]  ;;  %v17854_v15 = vld [vmem:[#allocation5 + $0xc44] sm:$0xf] }
 0x121   :  { %3586 = vmatpush.bf16.msrb.mxu3 %v13431_v21  ;;  %v3333_v17 = vadd.f32 %v3332_v14, %v3320_v10  ;;  %v17789_v21 = vld [vmem:[#allocation5 + $0xa34] sm:$0xf0]  ;;  %v3345_v50 = vpop.f32.mrf.mxu0  ;;  %v12315_v10 = vor.u32 %v17544_v4, %v12312_v53  ;;  %v13552_v16 = vld [vmem:[#allocation5 + $0xc68] sm:$0xf0]  ;;  %v17834_v53 = vld [vmem:[#allocation5 + $0xba4] sm:$0xf] }
 0x122   :  { %3624 = vmatpush.bf16.msrb.mxu0 %v12195_v42  ;;  %v4233_v27 = vmul.f32 %v4178_v7, %v19375_v54  ;;  %v13271_v37 = vor.u32 %v17789_v21, %v13270_v20  ;;  %v12915_v42 = vor.u32 %v17694_v23, %v12912_v30  ;;  %v3334_v63 = vpop.f32.mrf.mxu2  ;;  %v17924_v20 = vld [vmem:[#allocation5 + $0xe74] sm:$0xf]  ;;  %v13832_v21 = vld [vmem:[#allocation5 + $0xe98] sm:$0xf0]  ;;  %v17754_v23 = vld [vmem:[#allocation5 + $0x924] sm:$0xf] }
 0x123   :  { %3599 = vmatpush.bf16.msra.mxu1 %v13751_v61  ;;  %v12352_v61 = vld [vmem:[#allocation5 + $0x308] sm:$0xf0]  ;;  %v19385_v57 = vadd.f32 %v3345_v50, %v3333_v17  ;;  %v17664_v30 = vld [vmem:[#allocation5 + $0x654] sm:$0xf] }
 0x124   :  { %3637 = vmatpush.bf16.msrb.mxu2 %v12515_v25  ;;  %v17484_v25 = vld [vmem:[#allocation5 + $0xb4] sm:$0xf]  ;;  %v3308_v32 = vpop.f32.mrf.mxu1  ;;  %v12355_v43 = vor.u32 %v17554_v31, %v12352_v61  ;;  %v4253_v49 = vsub.f32 %v4233_v27, %v4243_v28  ;;  %v12835_v28 = vor.u32 %v17674_v2, %v12832_v3  ;;  %v12792_v31 = vld [vmem:[#allocation5 + $0x678] sm:$0xf0]  ;;  %v17734_v3 = vld [vmem:[#allocation5 + $0x884] sm:$0xf] }
 0x125   :  { %3587 = vmatpush.bf16.msrb.mxu3 %v13391_v41  ;;  %v12075_v38 = vor.u32 %v17484_v25, %v12072_v26  ;;  %v13232_v41 = vld [vmem:[#allocation5 + $0x9e8] sm:$0xf0]  ;;  %v4092_v5 = vrot.slane %v19385_v57, 4  ;;  %v4164_v7 = vmul.f32 %v19385_v57, %v19385_v57  ;;  %v13835_v32 = vor.u32 %v17924_v20, %v13832_v21  ;;  %v17904_v63 = vld [vmem:[#allocation5 + $0xdd4] sm:$0xf] }
 0x126   :  { %3625 = vmatpush.bf16.msrb.mxu0 %v12155_v62  ;;  %v13235_v58 = vor.u32 %v17774_v40, %v13232_v41  ;;  %v17764_v62 = vld [vmem:[#allocation5 + $0x974] sm:$0xf]  ;;  %v4263_v13 = vmax.f32 %v4253_v49, 0.0  ;;  %v13152_v25 = vld [vmem:[#allocation5 + $0x948] sm:$0xf0]  ;;  %v12795_v49 = vor.u32 %v17664_v30, %v12792_v31 }
 0x127   :  { %3600 = vmatpush.bf16.msra.mxu1 %v13711_v52  ;;  %13936 = vmatmul.msk.bf16.vlgmr.msra.gmra.mxu2 %vm3163_vm0, %v19316_v48  ;;  %v12872_v52 = vld [vmem:[#allocation5 + $0x718] sm:$0xf0]  ;;  %v4093_v17 = vadd.f32 %v4092_v5, %v19385_v57  ;;  %v13155_v41 = vor.u32 %v17754_v23, %v13152_v25  ;;  %v13072_v5 = vld [vmem:[#allocation5 + $0x8a8] sm:$0xf0]  ;;  %v17894_v20 = vld [vmem:[#allocation5 + $0xd84] sm:$0xf] }
 0x128   :  { %3638 = vmatpush.bf16.msrb.mxu2 %v12475_v44  ;;  %v17684_v44 = vld [vmem:[#allocation5 + $0x6f4] sm:$0xf]  ;;  %v19392_v61 = vadd.f32 1e-05, %v4263_v13  ;;  %v12712_v13 = vld [vmem:[#allocation5 + $0x5d8] sm:$0xf0] }
 0x129   :  { %3588 = vmatpush.bf16.msrb.mxu3 %v13351_v60  ;;  %v13872_v60 = vld [vmem:[#allocation5 + $0xee8] sm:$0xf0]  ;;  %v12875_v24 = vor.u32 %v17684_v44, %v12872_v52  ;;  %v4094_v26 = vrot.slane %v4093_v17, 2  ;;  %v3347_v35 = vpop.f32.mrf.mxu0  ;;  %v17744_v44 = vld [vmem:[#allocation5 + $0x8d4] sm:$0xf] }
 0x12a   :  { %3626 = vmatpush.bf16.msrb.mxu0 %v12115_v19  ;;  %v13875_v14 = vor.u32 %v17934_v59, %v13872_v60  ;;  %v12752_v52 = vld [vmem:[#allocation5 + $0x628] sm:$0xf0]  ;;  %18852 = vrsqrt.f32 %v19392_v61  ;;  %v13032_v23 = vld [vmem:[#allocation5 + $0x858] sm:$0xf0]  ;;  %vm4289_vm6 = vweird.f32 %v19392_v61 }
 0x12b   :  { %3601 = vmatpush.bf16.msra.mxu1 %v13671_v11  ;;  %v17464_v11 = vld [vmem:[#allocation5 + $0x14] sm:$0xf]  ;;  %v13712_v21 = vld [vmem:[#allocation5 + $0xda8] sm:$0xf0] }
 0x12c   :  { %3639 = vmatpush.bf16.msrb.mxu2 %v12435_v1  ;;  %v13192_v1 = vld [vmem:[#allocation5 + $0x998] sm:$0xf0]  ;;  %v13715_v30 = vor.u32 %v17894_v20, %v13712_v21  ;;  %v12672_v31 = vld [vmem:[#allocation5 + $0x588] sm:$0xf0]  ;;  %v17620_v20 = vld [vmem:[#allocation5 + $0x4ec] sm:$0xf0] }
 0x12d   :  { %3589 = vmatpush.bf16.msrb.mxu3 %v13311_v18  ;;  %v4179_v18 = vrot.slane %v4164_v7, 4  ;;  %v13195_v19 = vor.u32 %v17764_v62, %v13192_v1  ;;  %v13115_v62 = vor.u32 %v17744_v44, %v13112_v45  ;;  %v13392_v35 = vld [vmem:[#allocation5 + $0xb28] sm:$0xf0]  ;;  %v17794_v21 = vld [vmem:[#allocation5 + $0xa64] sm:$0xf] }
 0x12e   :  { %3627 = vmatpush.bf16.msrb.mxu0 %v12075_v38  ;;  %v4095_v38 = vadd.f32 %v4094_v26, %v4093_v17  ;;  %v12992_v44 = vld [vmem:[#allocation5 + $0x808] sm:$0xf0] }
 0x12f   :  { %3602 = vmatpush.bf16.msra.mxu1 %v13631_v29  ;;  %v4180_v27 = vadd.f32 %v4179_v18, %v4164_v7  ;;  %v13555_v29 = vor.u32 %v17854_v15, %v13552_v16  ;;  %v3358_v1 = vpop.f32.mrf.mxu1  ;;  %v13432_v15 = vld [vmem:[#allocation5 + $0xb78] sm:$0xf0] }
 0x130   :  { %3640 = vmatpush.bf16.msrb.mxu2 %v12395_v22  ;;  %v11995_v22 = vor.u32 %v17464_v11, %v11992_v12  ;;  %v4096_v46 = vrot.slane %v4095_v38, 1  ;;  %v17644_v11 = vld [vmem:[#allocation5 + $0x5b4] sm:$0xf]  ;;  %v19404_v25 = vpop.eup %18852 }
 0x131   :  { %3590 = vmatpush.bf16.msrb.mxu3 %v13271_v37  ;;  %v13512_v37 = vld [vmem:[#allocation5 + $0xc18] sm:$0xf0]  ;;  %v4181_v40 = vrot.slane %v4180_v27, 2  ;;  %vm4290_vm3 = vweird.f32 %v19404_v25 }
 0x132   :  { %3628 = vmatpush.bf16.msrb.mxu0 %v12035_v0  ;;  %v13515_v50 = vor.u32 %v17844_v36, %v13512_v37  ;;  %v4097_v59 = vadd.f32 %v4096_v46, %v4095_v38  ;;  %v13752_v0 = vld [vmem:[#allocation5 + $0xdf8] sm:$0xf0]  ;;  %v3384_v18 = vpop.f32.mrf.mxu0  ;;  %v17884_v38 = vld [vmem:[#allocation5 + $0xd34] sm:$0xf]  ;;  %vm4291_vm8 = vmor %vm4289_vm6, %vm4290_vm3 }
 0x133   :  { %3603 = vmatpush.bf16.msra.mxu1 %v13591_v51  ;;  %v4182_v47 = vadd.f32 %v4181_v40, %v4180_v27  ;;  %v17654_v51 = vld [vmem:[#allocation5 + $0x604] sm:$0xf]  ;;  %v13755_v12 = vor.u32 %v17904_v63, %v13752_v0  ;;  %v12715_v27 = vor.u32 %v17644_v11, %v12712_v13  ;;  %v13672_v40 = vld [vmem:[#allocation5 + $0xd58] sm:$0xf0]  ;;  %v13632_v0 = vld [vmem:[#allocation5 + $0xd08] sm:$0xf0] }
 0x134   :  { %3641 = vmatpush.bf16.msrb.mxu2 %v12355_v43  ;;  %3591 = vmatmul.bf16.vlgmr.msrb.gmra.mxu3 %v19320_v34  ;;  %v13792_v43 = vld [vmem:[#allocation5 + $0xe48] sm:$0xf0]  ;;  %v12755_v2 = vor.u32 %v17654_v51, %v12752_v52  ;;  %v19399_v7 = vmul.f32 %v19375_v54, %v4097_v59  ;;  %v17624_v51 = vld [vmem:[#allocation5 + $0x514] sm:$0xf]  ;;  %v12632_v52 = vld [vmem:[#allocation5 + $0x538] sm:$0xf0] }
 0x135   :  { %3648 = vmatpush.bf16.msra.mxu3 %v12915_v42  ;;  %v17914_v42 = vld [vmem:[#allocation5 + $0xe24] sm:$0xf]  ;;  %v4183_v60 = vrot.slane %v4182_v47, 1  ;;  %v13352_v59 = vld [vmem:[#allocation5 + $0xad8] sm:$0xf0] }
 0x136   :  { %3604 = vmatmul.bf16.vlgmr.msra.gmra.mxu1 %v19322_v39  ;;  %3629 = vmatpush.bf16.msrb.mxu0 %v11995_v22  ;;  %v13795_v4 = vor.u32 %v17914_v42, %v13792_v43  ;;  %v4244_v17 = vmul.f32 %v19399_v7, %v19399_v7  ;;  %v17724_v22 = vld [vmem:[#allocation5 + $0x834] sm:$0xf]  ;;  %v4284_v42 = vmul.f32 %v19404_v25, %v19392_v61  ;;  %v17714_v43 = vld [vmem:[#allocation5 + $0x7e4] sm:$0xf]  ;;  %v12952_v11 = vld [vmem:[#allocation5 + $0x7b8] sm:$0xf0] }
 0x137   :  { %3661 = vmatpush.bf16.msrb.mxu1 %v13235_v58  ;;  %v13472_v58 = vld [vmem:[#allocation5 + $0xbc8] sm:$0xf0]  ;;  %v13035_v37 = vor.u32 %v17724_v22, %v13032_v23  ;;  %v12995_v63 = vor.u32 %v17714_v43, %v12992_v44  ;;  %v12278_v13 = vld [vmem:[#allocation5 + $0x248] sm:$0xf]  ;;  %v17610_v44 = vld [vmem:[#allocation5 + $0x49c] sm:$0xf0] }
 0x138   :  { %3642 = vmatpush.bf16.msrb.mxu2 %v12315_v10  ;;  %v13475_v10 = vor.u32 %v17834_v53, %v13472_v58  ;;  %v13675_v53 = vor.u32 %v17884_v38, %v13672_v40  ;;  %v17804_v58 = vld [vmem:[#allocation5 + $0xab4] sm:$0xf]  ;;  %v13312_v22 = vld [vmem:[#allocation5 + $0xa88] sm:$0xf0]  ;;  %v17530_v38 = vld [vmem:[#allocation5 + $0x21c] sm:$0xf0] }
 0x139   :  { %3649 = vmatpush.bf16.msra.mxu3 %v12875_v24  ;;  %3630 = vmatmul.bf16.vlgmr.msrb.gmra.mxu0 %v19308_v8  ;;  %v4184_v24 = vadd.f32 %v4183_v60, %v4182_v47  ;;  %v17874_v60 = vld [vmem:[#allocation5 + $0xce4] sm:$0xf]  ;;  %v12558_v40 = vld [vmem:[#allocation5 + $0x478] sm:$0xf] }
 0x13a   :  { %3674 = vmatpush.bf16.msra.mxu0 %v13555_v29  ;;  %v17634_v29 = vld [vmem:[#allocation5 + $0x564] sm:$0xf]  ;;  %v3397_v45 = vpop.f32.mrf.mxu2 }
 0x13b   :  { %3662 = vmatpush.bf16.msrb.mxu1 %v13195_v19  ;;  %3643 = vmatmul.bf16.vlgmr.msrb.gmra.mxu2 %v19310_v9  ;;  %v4234_v16 = vmul.f32 %v4184_v24, %v19375_v54  ;;  %v13075_v19 = vor.u32 %v17734_v3, %v13072_v5  ;;  %v12675_v47 = vor.u32 %v17634_v29, %v12672_v31  ;;  %v13912_v3 = vld [vmem:[#allocation5 + $0xf38] sm:$0xf0]  ;;  %v13238_v29 = vld [vmem:[#allocation5 + $0x9c8] sm:$0xf] }
 0x13c   :  { %3687 = vmatpush.bf16.msra.mxu2 %v13875_v14  ;;  %v17824_v14 = vld [vmem:[#allocation5 + $0xb54] sm:$0xf]  ;;  %v4285_v5 = vmul.f32 %v19404_v25, %v4284_v42 }
 0x13d   :  { %3650 = vmatpush.bf16.msra.mxu3 %v12835_v28  ;;  %v4254_v26 = vsub.f32 %v4234_v16, %v4244_v17  ;;  %v13435_v28 = vor.u32 %v17824_v14, %v13432_v15  ;;  %v17540_v14 = vld [vmem:[#allocation5 + $0x26c] sm:$0xf0]  ;;  %v12598_v15 = vld [vmem:[#allocation5 + $0x4c8] sm:$0xf]  ;;  %v13635_v17 = vor.u32 %v17874_v60, %v13632_v0  ;;  %v12559_v60 = vor.u32 %v17610_v44, %v12558_v40  ;;  %v17750_v40 = vld [vmem:[#allocation5 + $0x8fc] sm:$0xf0] }
 0x13e   :  { %3675 = vmatpush.bf16.msra.mxu0 %v13515_v50  ;;  %v17520_v0 = vld [vmem:[#allocation5 + $0x1cc] sm:$0xf0] }
 0x13f   :  { %3663 = vmatpush.bf16.msrb.mxu1 %v13155_v41  ;;  %v4264_v36 = vmax.f32 %v4254_v26, 0.0  ;;  %v3360_v41 = vpop.f32.mrf.mxu1  ;;  %v13592_v26 = vld [vmem:[#allocation5 + $0xcb8] sm:$0xf0]  ;;  %v17500_v44 = vld [vmem:[#allocation5 + $0x12c] sm:$0xf0] }
 0x140   :  { %3688 = vmatpush.bf16.msra.mxu2 %v13835_v32  ;;  %v17814_v32 = vld [vmem:[#allocation5 + $0xb04] sm:$0xf] }
 0x141   :  { %3651 = vmatpush.bf16.msra.mxu3 %v12795_v49  ;;  %v19408_v46 = vadd.f32 1e-05, %v4264_v36  ;;  %v3371_v49 = vpop.f32.mrf.mxu3  ;;  %v13395_v50 = vor.u32 %v17814_v32, %v13392_v35  ;;  %v12599_v35 = vor.u32 %v17620_v20, %v12598_v15  ;;  %v13315_v36 = vor.u32 %v17794_v21, %v13312_v22  ;;  %v13158_v15 = vld [vmem:[#allocation5 + $0x928] sm:$0xf]  ;;  %v12158_v20 = vld [vmem:[#allocation5 + $0x158] sm:$0xf] }
 0x142   :  { %3676 = vmatpush.bf16.msra.mxu0 %v13475_v10  ;;  %v17704_v10 = vld [vmem:[#allocation5 + $0x794] sm:$0xf]  ;;  %v3399_v31 = vpop.f32.mrf.mxu2  ;;  %v17510_v21 = vld [vmem:[#allocation5 + $0x17c] sm:$0xf0] }
 0x143   :  { %3664 = vmatpush.bf16.msrb.mxu1 %v13115_v62  ;;  %18854 = vrsqrt.f32 %v19408_v46  ;;  %v3386_v62 = vpop.f32.mrf.mxu0  ;;  %v12955_v23 = vor.u32 %v17704_v10, %v12952_v11  ;;  %v17600_v10 = vld [vmem:[#allocation5 + $0x44c] sm:$0xf0]  ;;  %vm4299_vm4 = vweird.f32 %v19408_v46 }
 0x144   :  { %3689 = vmatpush.bf16.msra.mxu2 %v13795_v4  ;;  %v3372_v4 = vadd.f32 %v3371_v49, %v3358_v1  ;;  %v12635_v1 = vor.u32 %v17624_v51, %v12632_v52  ;;  %v17700_v51 = vld [vmem:[#allocation5 + $0x76c] sm:$0xf0] }
 0x145   :  { %3652 = vmatpush.bf16.msra.mxu3 %v12755_v2  ;;  %v17944_v2 = vld [vmem:[#allocation5 + $0xf14] sm:$0xf]  ;;  %v17680_v31 = vld [vmem:[#allocation5 + $0x6cc] sm:$0xf0] }
 0x146   :  { %3677 = vmatpush.bf16.msra.mxu0 %v13435_v28  ;;  %v3385_v24 = vadd.f32 %v3384_v18, %v3372_v4  ;;  %v17864_v18 = vld [vmem:[#allocation5 + $0xc94] sm:$0xf]  ;;  %v12279_v28 = vor.u32 %v17540_v14, %v12278_v13 }
 0x147   :  { %3665 = vmatpush.bf16.msrb.mxu1 %v13075_v19  ;;  %v13915_v19 = vor.u32 %v17944_v2, %v13912_v3  ;;  %v13595_v43 = vor.u32 %v17864_v18, %v13592_v26  ;;  %v12478_v26 = vld [vmem:[#allocation5 + $0x3d8] sm:$0xf] }
 0x148   :  { %3690 = vmatpush.bf16.msra.mxu2 %v13755_v12  ;;  %v13355_v12 = vor.u32 %v17804_v58, %v13352_v59  ;;  %v19412_v16 = vadd.f32 %v3397_v45, %v3385_v24  ;;  %v17784_v45 = vld [vmem:[#allocation5 + $0xa14] sm:$0xf]  ;;  %v13198_v58 = vld [vmem:[#allocation5 + $0x978] sm:$0xf]  ;;  %v17770_v59 = vld [vmem:[#allocation5 + $0x99c] sm:$0xf0] }
 0x149   :  { %3653 = vmatpush.bf16.msra.mxu3 %v12715_v27  ;;  %v4286_v27 = vmul.f32 0.5, %v4285_v5  ;;  %v19414_v32 = vpop.eup %18854  ;;  %v3373_v41 = vpop.f32.mrf.mxu3  ;;  %v12518_v24 = vld [vmem:[#allocation5 + $0x428] sm:$0xf]  ;;  %v13199_v11 = vor.u32 %v17770_v59, %v13198_v58  ;;  %v17740_v59 = vld [vmem:[#allocation5 + $0x8ac] sm:$0xf0] }
 0x14a   :  { %3678 = vmatpush.bf16.msra.mxu0 %v13395_v50  ;;  %v4294_v42 = vmul.f32 %v19414_v32, %v19408_v46  ;;  %v12918_v50 = vld [vmem:[#allocation5 + $0x748] sm:$0xf]  ;;  %vm4300_vm2 = vweird.f32 %v19414_v32 }
 0x14b   :  { %3666 = vmatpush.bf16.msrb.mxu1 %v13035_v37  ;;  %v12238_v37 = vld [vmem:[#allocation5 + $0x1f8] sm:$0xf]  ;;  %v19418_v52 = vpop.f32.mrf.mxu0  ;;  %v4287_v2 = vsub.f32 1.5, %v4286_v27  ;;  %v12919_v5 = vor.u32 %v17700_v51, %v12918_v50  ;;  %v17590_v27 = vld [vmem:[#allocation5 + $0x3fc] sm:$0xf0]  ;;  %vm19431_vm5 = vmor %vm4299_vm4, %vm4300_vm2 }
 0x14c   :  { %3691 = vmatpush.bf16.msra.mxu2 %v13715_v30  ;;  %v17780_v30 = vld [vmem:[#allocation5 + $0x9ec] sm:$0xf0]  ;;  %v4295_v4 = vmul.f32 %v19414_v32, %v4294_v42  ;;  %v12479_v61 = vor.u32 %v17590_v27, %v12478_v26  ;;  %v12718_v27 = vld [vmem:[#allocation5 + $0x5b8] sm:$0xf] }
 0x14d   :  { %3654 = vmatpush.bf16.msra.mxu3 %v12675_v47  ;;  %v13272_v47 = vld [vmem:[#allocation5 + $0xa38] sm:$0xf0]  ;;  %v13239_v49 = vor.u32 %v17780_v30, %v13238_v29  ;;  %v4288_v22 = vmul.f32 %v19404_v25, %v4287_v2  ;;  %v12838_v30 = vld [vmem:[#allocation5 + $0x6a8] sm:$0xf]  ;;  %v17570_v2 = vld [vmem:[#allocation5 + $0x35c] sm:$0xf0] }
 0x14e   :  { %3679 = vmatpush.bf16.msra.mxu0 %v13355_v12  ;;  %v13275_v62 = vor.u32 %v17784_v45, %v13272_v47  ;;  %v4296_v3 = vmul.f32 0.5, %v4295_v4  ;;  %v17690_v12 = vld [vmem:[#allocation5 + $0x71c] sm:$0xf0]  ;;  %v12839_v45 = vor.u32 %v17680_v31, %v12838_v30  ;;  %v12438_v47 = vld [vmem:[#allocation5 + $0x388] sm:$0xf] }
 0x14f   :  { %3667 = vmatpush.bf16.msrb.mxu1 %v12995_v63  ;;  %v12198_v63 = vld [vmem:[#allocation5 + $0x1a8] sm:$0xf]  ;;  %v12798_v4 = vld [vmem:[#allocation5 + $0x658] sm:$0xf]  ;;  %v17560_v26 = vld [vmem:[#allocation5 + $0x30c] sm:$0xf0] }
 0x150   :  { %3692 = vmatpush.bf16.msra.mxu2 %v13675_v53  ;;  %v12239_v53 = vor.u32 %v17530_v38, %v12238_v37  ;;  %v4297_v13 = vsub.f32 1.5, %v4296_v3  ;;  %v12199_v14 = vor.u32 %v17520_v0, %v12198_v63  ;;  %v12159_v37 = vor.u32 %v17510_v21, %v12158_v20  ;;  %v13118_v38 = vld [vmem:[#allocation5 + $0x8d8] sm:$0xf]  ;;  %v17490_v63 = vld [vmem:[#allocation5 + $0xdc] sm:$0xf0] }
 0x151   :  { %3655 = vmatpush.bf16.msra.mxu3 %v12635_v1  ;;  %v12878_v1 = vld [vmem:[#allocation5 + $0x6f8] sm:$0xf]  ;;  %v13119_v51 = vor.u32 %v17750_v40, %v13118_v38  ;;  %v17650_v30 = vld [vmem:[#allocation5 + $0x5dc] sm:$0xf0]  ;;  %v12998_v31 = vld [vmem:[#allocation5 + $0x7e8] sm:$0xf] }
 0x152   :  { %3680 = vmatpush.bf16.msra.mxu0 %v13315_v36  ;;  %v12879_v18 = vor.u32 %v17690_v12, %v12878_v1  ;;  %v3410_v36 = vpop.f32.mrf.mxu1  ;;  %v12398_v0 = vld [vmem:[#allocation5 + $0x338] sm:$0xf]  ;;  %v17470_v38 = vld [vmem:[#allocation5 + $0x3c] sm:$0xf0] }
 0x153   :  { %3668 = vmatpush.bf16.msrb.mxu1 %v12955_v23  ;;  %v4298_v23 = vmul.f32 %v19414_v32, %v4297_v13  ;;  %v3411_v42 = vadd.f32 %v3410_v36, %v19412_v16  ;;  %v13078_v16 = vld [vmem:[#allocation5 + $0x888] sm:$0xf]  ;;  %v13038_v12 = vld [vmem:[#allocation5 + $0x838] sm:$0xf]  ;;  %v17730_v13 = vld [vmem:[#allocation5 + $0x85c] sm:$0xf0] }
 0x154   :  { %3693 = vmatpush.bf16.msra.mxu2 %v13635_v17  ;;  %3656 = vmatmul.bf16.vlgmr.msra.gmra.mxu3 %v19304_v55  ;;  %v17760_v17 = vld [vmem:[#allocation5 + $0x94c] sm:$0xf0] }
 0x155   :  { %3707 = vmatpush.bf16.msrb.mxu3 %v13915_v19  ;;  %v12519_v19 = vor.u32 %v17600_v10, %v12518_v24  ;;  %v13159_v29 = vor.u32 %v17760_v17, %v13158_v15  ;;  %v4302_v46 = vsel %vm19431_vm5, %v19414_v32, %v4298_v23  ;;  %v4292_v32 = vsel %vm4291_vm8, %v19404_v25, %v4288_v22  ;;  %v12758_v24 = vld [vmem:[#allocation5 + $0x608] sm:$0xf]  ;;  %v17660_v10 = vld [vmem:[#allocation5 + $0x62c] sm:$0xf0] }
 0x156   :  { %3669 = vmatmul.bf16.vlgmr.msrb.gmra.mxu1 %v19306_v56  ;;  %3681 = vmatpush.bf16.msra.mxu0 %v13275_v62  ;;  %v4393_v41 = vrot.slane %v4302_v46, 7  ;;  %v12078_v62 = vld [vmem:[#allocation5 + $0xb8] sm:$0xf]  ;;  %v12399_v15 = vor.u32 %v17570_v2, %v12398_v0  ;;  %v12038_v17 = vld [vmem:[#allocation5 + $0x68] sm:$0xf]  ;;  %v12759_v23 = vor.u32 %v17660_v10, %v12758_v24 }
 0x157   :  { %3713 = vmatpush.bf16.msra.mxu1 %v12279_v28  ;;  %v3423_v3 = vpop.f32.mrf.mxu3  ;;  %v12079_v1 = vor.u32 %v17490_v63, %v12078_v62  ;;  %v12280_v0 = vld [vmem:[#allocation5 + $0x270] sm:$0xf0]  ;;  %v13518_v2 = vld [vmem:[#allocation5 + $0xbf8] sm:$0xf] }
 0x158   :  { %3694 = vmatpush.bf16.msra.mxu2 %v13595_v43  ;;  %v12118_v43 = vld [vmem:[#allocation5 + $0x108] sm:$0xf]  ;;  %v19445_v50 = vsel %vm4401_vm7, %v4292_v32, %v4393_v41  ;;  %v12318_v41 = vld [vmem:[#allocation5 + $0x298] sm:$0xf]  ;;  %v12719_v32 = vor.u32 %v17650_v30, %v12718_v27  ;;  %v12240_v27 = vld [vmem:[#allocation5 + $0x220] sm:$0xf0] }
 0x159   :  { %3726 = vmatpush.bf16.msra.mxu3 %v12599_v35  ;;  %v3438_v35 = vpop.f32.mrf.mxu0  ;;  %3682 = vmatmul.bf16.vlgmr.msra.gmra.mxu0 %v19320_v34  ;;  %v12119_v58 = vor.u32 %v17500_v44, %v12118_v43 }
 0x15a   :  { %3739 = vmatpush.bf16.msrb.mxu0 %v12919_v5  ;;  %v13079_v5 = vor.u32 %v17740_v59, %v13078_v16  ;;  %v3449_v20 = vpop.f32.mrf.mxu2  ;;  %v17720_v35 = vld [vmem:[#allocation5 + $0x80c] sm:$0xf0]  ;;  %v12958_v59 = vld [vmem:[#allocation5 + $0x798] sm:$0xf] }
 0x15b   :  { %3714 = vmatpush.bf16.msra.mxu1 %v12239_v53  ;;  %3695 = vmatmul.bf16.vlgmr.msra.gmra.mxu2 %v19322_v39  ;;  %v17670_v53 = vld [vmem:[#allocation5 + $0x67c] sm:$0xf0] }
 0x15c   :  { %3752 = vmatpush.bf16.msrb.mxu2 %v13239_v49  ;;  %v17580_v49 = vld [vmem:[#allocation5 + $0x3ac] sm:$0xf0]  ;;  %v12799_v25 = vor.u32 %v17670_v53, %v12798_v4  ;;  %v12678_v4 = vld [vmem:[#allocation5 + $0x568] sm:$0xf] }
 0x15d   :  { %3727 = vmatpush.bf16.msra.mxu3 %v12559_v60  ;;  %v12439_v60 = vor.u32 %v17580_v49, %v12438_v47  ;;  %v13878_v47 = vld [vmem:[#allocation5 + $0xec8] sm:$0xf]  ;;  %v12999_v49 = vor.u32 %v17720_v35, %v12998_v31  ;;  %v17640_v53 = vld [vmem:[#allocation5 + $0x58c] sm:$0xf0] }
 0x15e   :  { %3740 = vmatpush.bf16.msrb.mxu0 %v12879_v18  ;;  %v12358_v18 = vld [vmem:[#allocation5 + $0x2e8] sm:$0xf] }
 0x15f   :  { %3715 = vmatpush.bf16.msra.mxu1 %v12199_v14  ;;  %v3412_v14 = vpop.f32.mrf.mxu1  ;;  %v12359_v40 = vor.u32 %v17560_v26, %v12358_v18  ;;  %v17525_v26 = vld [vmem:[#allocation5 + $0x1fc] sm:$0xf] }
 0x160   :  { %3753 = vmatpush.bf16.msrb.mxu2 %v13199_v11  ;;  %v3424_v11 = vadd.f32 %v3423_v3, %v3411_v42  ;;  %v17550_v42 = vld [vmem:[#allocation5 + $0x2bc] sm:$0xf0] }
 0x161   :  { %3728 = vmatpush.bf16.msra.mxu3 %v12519_v19  ;;  %v17480_v19 = vld [vmem:[#allocation5 + $0x8c] sm:$0xf0]  ;;  %v3462_v21 = vpop.f32.mrf.mxu0  ;;  %v12319_v62 = vor.u32 %v17550_v42, %v12318_v41  ;;  %v12600_v41 = vld [vmem:[#allocation5 + $0x4f0] sm:$0xf0]  ;;  %v12243_v42 = vor.u32 %v17525_v26, %v12240_v27  ;;  %v17810_v26 = vld [vmem:[#allocation5 + $0xadc] sm:$0xf0] }
 0x162   :  { %3741 = vmatpush.bf16.msrb.mxu0 %v12839_v45  ;;  %v19450_v22 = vadd.f32 %v19418_v52, %v3424_v11  ;;  %v19452_v28 = vadd.f32 %v3462_v21, %v3449_v20  ;;  %v12039_v52 = vor.u32 %v17480_v19, %v12038_v17  ;;  %v17860_v45 = vld [vmem:[#allocation5 + $0xc6c] sm:$0xf0]  ;;  %v3451_v3 = vpop.f32.mrf.mxu2  ;;  %v12638_v17 = vld [vmem:[#allocation5 + $0x518] sm:$0xf]  ;;  %v17630_v19 = vld [vmem:[#allocation5 + $0x53c] sm:$0xf0] }
 0x163   :  { %3716 = vmatpush.bf16.msra.mxu1 %v12159_v37  ;;  %v11998_v37 = vld [vmem:[#allocation5 + $0x18] sm:$0xf]  ;;  %v13398_v3 = vld [vmem:[#allocation5 + $0xb08] sm:$0xf] }
 0x164   :  { %3754 = vmatpush.bf16.msrb.mxu2 %v13159_v29  ;;  %13937 = vmatmul.msk.bf16.vlgmr.msrb.gmra.mxu3 %vm3163_vm0, %v19316_v48  ;;  %v13039_v29 = vor.u32 %v17730_v13, %v13038_v12  ;;  %v4098_v46 = vrot.slane %v19450_v22, 4  ;;  %v4165_v36 = vmul.f32 %v19450_v22, %v19450_v22  ;;  %v11999_v16 = vor.u32 %v17470_v38, %v11998_v37  ;;  %v17850_v12 = vld [vmem:[#allocation5 + $0xc1c] sm:$0xf0]  ;;  %v13838_v13 = vld [vmem:[#allocation5 + $0xe78] sm:$0xf] }
 0x165   :  { %3729 = vmatpush.bf16.msra.mxu3 %v12479_v61  ;;  %v13558_v61 = vld [vmem:[#allocation5 + $0xc48] sm:$0xf]  ;;  %v13918_v21 = vld [vmem:[#allocation5 + $0xf18] sm:$0xf]  ;;  %v13519_v18 = vor.u32 %v17850_v12, %v13518_v2  ;;  %v17920_v37 = vld [vmem:[#allocation5 + $0xe4c] sm:$0xf0] }
 0x166   :  { %3742 = vmatpush.bf16.msrb.mxu0 %v12799_v25  ;;  %v4099_v43 = vadd.f32 %v4098_v46, %v19450_v22  ;;  %v4185_v44 = vrot.slane %v4165_v36, 4  ;;  %v13559_v63 = vor.u32 %v17860_v45, %v13558_v61  ;;  %v17535_v25 = vld [vmem:[#allocation5 + $0x24c] sm:$0xf]  ;;  %v12639_v46 = vor.u32 %v17630_v19, %v12638_v17  ;;  %v17830_v45 = vld [vmem:[#allocation5 + $0xb7c] sm:$0xf0] }
 0x167   :  { %3717 = vmatpush.bf16.msra.mxu1 %v12119_v58  ;;  %v3425_v58 = vpop.f32.mrf.mxu3  ;;  %v12283_v20 = vor.u32 %v17535_v25, %v12280_v0  ;;  %v17515_v61 = vld [vmem:[#allocation5 + $0x1ac] sm:$0xf]  ;;  %v12160_v2 = vld [vmem:[#allocation5 + $0x180] sm:$0xf0]  ;;  %v13718_v12 = vld [vmem:[#allocation5 + $0xd88] sm:$0xf] }
 0x168   :  { %3755 = vmatpush.bf16.msrb.mxu2 %v13119_v51  ;;  %v17940_v51 = vld [vmem:[#allocation5 + $0xeec] sm:$0xf0]  ;;  %v4100_v24 = vrot.slane %v4099_v43, 2  ;;  %v4186_v10 = vadd.f32 %v4185_v44, %v4165_v36  ;;  %v12200_v44 = vld [vmem:[#allocation5 + $0x1d0] sm:$0xf0] }
 0x169   :  { %3730 = vmatpush.bf16.msra.mxu3 %v12439_v60  ;;  %v17710_v60 = vld [vmem:[#allocation5 + $0x7bc] sm:$0xf0]  ;;  %v13879_v11 = vor.u32 %v17940_v51, %v13878_v47  ;;  %v17840_v36 = vld [vmem:[#allocation5 + $0xbcc] sm:$0xf0]  ;;  %v17495_v19 = vld [vmem:[#allocation5 + $0x10c] sm:$0xf] }
 0x16a   :  { %3743 = vmatpush.bf16.msrb.mxu0 %v12759_v23  ;;  %v12959_v14 = vor.u32 %v17710_v60, %v12958_v59  ;;  %v17950_v23 = vld [vmem:[#allocation5 + $0xf3c] sm:$0xf0]  ;;  %v4101_v30 = vadd.f32 %v4100_v24, %v4099_v43  ;;  %v4187_v31 = vrot.slane %v4186_v10, 2  ;;  %v12560_v59 = vld [vmem:[#allocation5 + $0x4a0] sm:$0xf0]  ;;  %v12203_v60 = vor.u32 %v17515_v61, %v12200_v44 }
 0x16b   :  { %3718 = vmatpush.bf16.msra.mxu1 %v12079_v1  ;;  %v12679_v1 = vor.u32 %v17640_v53, %v12678_v4  ;;  %v13919_v38 = vor.u32 %v17950_v23, %v13918_v21  ;;  %v13758_v53 = vld [vmem:[#allocation5 + $0xdd8] sm:$0xf]  ;;  %v17910_v58 = vld [vmem:[#allocation5 + $0xdfc] sm:$0xf0]  ;;  %v12080_v61 = vld [vmem:[#allocation5 + $0xe0] sm:$0xf0] }
 0x16c   :  { %3756 = vmatpush.bf16.msrb.mxu2 %v13079_v5  ;;  %v3464_v5 = vpop.f32.mrf.mxu0  ;;  %v4102_v47 = vrot.slane %v4101_v30, 1  ;;  %v13759_v0 = vor.u32 %v17910_v58, %v13758_v53  ;;  %v13678_v27 = vld [vmem:[#allocation5 + $0xd38] sm:$0xf]  ;;  %v17575_v58 = vld [vmem:[#allocation5 + $0x38c] sm:$0xf] }
 0x16d   :  { %3731 = vmatpush.bf16.msra.mxu3 %v12399_v15  ;;  %v17930_v15 = vld [vmem:[#allocation5 + $0xe9c] sm:$0xf0]  ;;  %v17820_v5 = vld [vmem:[#allocation5 + $0xb2c] sm:$0xf0] }
 0x16e   :  { %3744 = vmatpush.bf16.msrb.mxu0 %v12719_v32  ;;  %v13839_v35 = vor.u32 %v17930_v15, %v13838_v13  ;;  %v13438_v32 = vld [vmem:[#allocation5 + $0xb58] sm:$0xf]  ;;  %v4103_v24 = vadd.f32 %v4102_v47, %v4101_v30  ;;  %v17900_v13 = vld [vmem:[#allocation5 + $0xdac] sm:$0xf0]  ;;  %v12520_v15 = vld [vmem:[#allocation5 + $0x450] sm:$0xf0]  ;;  %v13399_v21 = vor.u32 %v17820_v5, %v13398_v3 }
 0x16f   :  { %3719 = vmatpush.bf16.msra.mxu1 %v12039_v52  ;;  %v13798_v52 = vld [vmem:[#allocation5 + $0xe28] sm:$0xf]  ;;  %v13439_v25 = vor.u32 %v17830_v45, %v13438_v32  ;;  %v13719_v23 = vor.u32 %v17900_v13, %v13718_v12  ;;  %v17695_v12 = vld [vmem:[#allocation5 + $0x74c] sm:$0xf]  ;;  %v12920_v13 = vld [vmem:[#allocation5 + $0x770] sm:$0xf0] }
 0x170   :  { %3757 = vmatpush.bf16.msrb.mxu2 %v13039_v29  ;;  %v13478_v29 = vld [vmem:[#allocation5 + $0xba8] sm:$0xf]  ;;  %v13799_v51 = vor.u32 %v17920_v37, %v13798_v52 }
 0x171   :  { %3732 = vmatpush.bf16.msra.mxu3 %v12359_v40  ;;  %v17615_v40 = vld [vmem:[#allocation5 + $0x4cc] sm:$0xf]  ;;  %v13479_v43 = vor.u32 %v17840_v36, %v13478_v29  ;;  %v19464_v29 = vmul.f32 %v19375_v54, %v4103_v24 }
 0x172   :  { %3745 = vmatpush.bf16.msrb.mxu0 %v12679_v1  ;;  %v12603_v4 = vor.u32 %v17615_v40, %v12600_v41 }
 0x173   :  { %3720 = vmatpush.bf16.msra.mxu1 %v11999_v16  ;;  %v17605_v16 = vld [vmem:[#allocation5 + $0x47c] sm:$0xf]  ;;  %v4245_v32 = vmul.f32 %v19464_v29, %v19464_v29 }
 0x174   :  { %3758 = vmatpush.bf16.msrb.mxu2 %v12999_v49  ;;  %v4188_v49 = vadd.f32 %v4187_v31, %v4186_v10  ;;  %v12563_v1 = vor.u32 %v17605_v16, %v12560_v59  ;;  %v17890_v31 = vld [vmem:[#allocation5 + $0xd5c] sm:$0xf0]  ;;  %v12440_v16 = vld [vmem:[#allocation5 + $0x3b0] sm:$0xf0] }
 0x175   :  { %3733 = vmatpush.bf16.msra.mxu3 %v12319_v62  ;;  %v17505_v62 = vld [vmem:[#allocation5 + $0x15c] sm:$0xf]  ;;  %v13679_v40 = vor.u32 %v17890_v31, %v13678_v27  ;;  %v12443_v24 = vor.u32 %v17575_v58, %v12440_v16  ;;  %v17855_v27 = vld [vmem:[#allocation5 + $0xc4c] sm:$0xf] }
 0x176   :  { %3721 = vmatmul.bf16.vlgmr.msra.gmra.mxu1 %v19308_v8  ;;  %3746 = vmatpush.bf16.msrb.mxu0 %v12639_v46  ;;  %v4189_v10 = vrot.slane %v4188_v49, 1  ;;  %v12163_v17 = vor.u32 %v17505_v62, %v12160_v2  ;;  %v12480_v46 = vld [vmem:[#allocation5 + $0x400] sm:$0xf0]  ;;  %v3514_v53 = vpop.f32.mrf.mxu0  ;;  %v13278_v2 = vld [vmem:[#allocation5 + $0xa18] sm:$0xf] }
 0x177   :  { %3765 = vmatpush.bf16.msrb.mxu1 %v13559_v63  ;;  %v3475_v63 = vpop.f32.mrf.mxu1  ;;  %v3488_v37 = vpop.f32.mrf.mxu3 }
 0x178   :  { %3759 = vmatpush.bf16.msrb.mxu2 %v12959_v14  ;;  %3734 = vmatmul.bf16.vlgmr.msra.gmra.mxu3 %v19310_v9  ;;  %v17595_v14 = vld [vmem:[#allocation5 + $0x42c] sm:$0xf] }
 0x179   :  { %3778 = vmatpush.bf16.msrb.mxu3 %v13879_v11  ;;  %3747 = vmatmul.bf16.vlgmr.msrb.gmra.mxu0 %v19304_v55  ;;  %v3476_v11 = vadd.f32 %v3475_v63, %v19452_v28  ;;  %v4190_v28 = vadd.f32 %v4189_v10, %v4188_v49  ;;  %v12523_v30 = vor.u32 %v17595_v14, %v12520_v15  ;;  %v17800_v49 = vld [vmem:[#allocation5 + $0xa8c] sm:$0xf0]  ;;  %v17790_v10 = vld [vmem:[#allocation5 + $0xa3c] sm:$0xf0]  ;;  %v17775_v14 = vld [vmem:[#allocation5 + $0x9cc] sm:$0xf] }
 0x17a   :  { %3798 = vmatpush.bf16.msra.mxu0 %v13919_v38  ;;  %v3501_v47 = vpop.f32.mrf.mxu2 }
 0x17b   :  { %3766 = vmatpush.bf16.msrb.mxu1 %v13519_v18  ;;  %3760 = vmatmul.bf16.vlgmr.msrb.gmra.mxu2 %v19306_v56  ;;  %v13358_v18 = vld [vmem:[#allocation5 + $0xab8] sm:$0xf]  ;;  %v4235_v44 = vmul.f32 %v4190_v28, %v19375_v54  ;;  %v3489_v45 = vadd.f32 %v3488_v37, %v3476_v11 }
 0x17c   :  { %3804 = vmatpush.bf16.msra.mxu2 %v12283_v20  ;;  %v12120_v20 = vld [vmem:[#allocation5 + $0x130] sm:$0xf0]  ;;  %v13359_v38 = vor.u32 %v17810_v26, %v13358_v18  ;;  %v13598_v11 = vld [vmem:[#allocation5 + $0xc98] sm:$0xf]  ;;  %v17465_v18 = vld [vmem:[#allocation5 + $0x1c] sm:$0xf] }
 0x17d   :  { %3779 = vmatpush.bf16.msrb.mxu3 %v13839_v35  ;;  %v17585_v35 = vld [vmem:[#allocation5 + $0x3dc] sm:$0xf]  ;;  %v12123_v36 = vor.u32 %v17495_v19, %v12120_v20  ;;  %v3502_v59 = vadd.f32 %v3501_v47, %v3489_v45  ;;  %v4255_v3 = vsub.f32 %v4235_v44, %v4245_v32  ;;  %v12400_v20 = vld [vmem:[#allocation5 + $0x360] sm:$0xf0]  ;;  %v17555_v47 = vld [vmem:[#allocation5 + $0x2ec] sm:$0xf] }
 0x17e   :  { %3817 = vmatpush.bf16.msrb.mxu0 %v12603_v4  ;;  %v12483_v41 = vor.u32 %v17585_v35, %v12480_v46  ;;  %v17880_v4 = vld [vmem:[#allocation5 + $0xd0c] sm:$0xf0]  ;;  %v17565_v19 = vld [vmem:[#allocation5 + $0x33c] sm:$0xf]  ;;  %v12000_v26 = vld [vmem:[#allocation5 + $0x40] sm:$0xf0]  ;;  %v12923_v46 = vor.u32 %v17695_v12, %v12920_v13 }
 0x17f   :  { %3767 = vmatpush.bf16.msrb.mxu1 %v13479_v43  ;;  %v3477_v52 = vpop.f32.mrf.mxu1  ;;  %v13318_v43 = vld [vmem:[#allocation5 + $0xa68] sm:$0xf]  ;;  %v3515_v5 = vadd.f32 %v3514_v53, %v3502_v59  ;;  %v3490_v28 = vpop.f32.mrf.mxu3  ;;  %v12003_v45 = vor.u32 %v17465_v18, %v12000_v26  ;;  %v13520_v53 = vld [vmem:[#allocation5 + $0xc20] sm:$0xf0]  ;;  %v17935_v12 = vld [vmem:[#allocation5 + $0xecc] sm:$0xf] }
 0x180   :  { %3805 = vmatpush.bf16.msra.mxu2 %v12243_v42  ;;  %v17485_v42 = vld [vmem:[#allocation5 + $0xbc] sm:$0xf]  ;;  %v13319_v62 = vor.u32 %v17800_v49, %v13318_v43  ;;  %v3516_v43 = vpop.f32.mrf.mxu0  ;;  %v12360_v49 = vld [vmem:[#allocation5 + $0x310] sm:$0xf0] }
 0x181   :  { %3780 = vmatpush.bf16.msrb.mxu3 %v13799_v51  ;;  %v13638_v51 = vld [vmem:[#allocation5 + $0xce8] sm:$0xf]  ;;  %v17685_v52 = vld [vmem:[#allocation5 + $0x6fc] sm:$0xf]  ;;  %v13880_v13 = vld [vmem:[#allocation5 + $0xef0] sm:$0xf0] }
 0x182   :  { %3818 = vmatpush.bf16.msrb.mxu0 %v12563_v1  ;;  %v13639_v63 = vor.u32 %v17880_v4, %v13638_v51  ;;  %v17870_v1 = vld [vmem:[#allocation5 + $0xcbc] sm:$0xf0]  ;;  %v3503_v37 = vpop.f32.mrf.mxu2  ;;  %v17845_v4 = vld [vmem:[#allocation5 + $0xbfc] sm:$0xf]  ;;  %v13440_v43 = vld [vmem:[#allocation5 + $0xb80] sm:$0xf0] }
 0x183   :  { %3768 = vmatpush.bf16.msrb.mxu1 %v13439_v25  ;;  %v17475_v25 = vld [vmem:[#allocation5 + $0x6c] sm:$0xf]  ;;  %v13599_v35 = vor.u32 %v17870_v1, %v13598_v11  ;;  %v12320_v11 = vld [vmem:[#allocation5 + $0x2c0] sm:$0xf0]  ;;  %v13523_v1 = vor.u32 %v17845_v4, %v13520_v53  ;;  %v17665_v26 = vld [vmem:[#allocation5 + $0x65c] sm:$0xf] }
 0x184   :  { %3806 = vmatpush.bf16.msra.mxu2 %v12203_v60  ;;  %v12083_v60 = vor.u32 %v17485_v42, %v12080_v61  ;;  %v17765_v42 = vld [vmem:[#allocation5 + $0x97c] sm:$0xf]  ;;  %v13200_v61 = vld [vmem:[#allocation5 + $0x9a0] sm:$0xf0]  ;;  %v17735_v53 = vld [vmem:[#allocation5 + $0x88c] sm:$0xf] }
 0x185   :  { %3781 = vmatpush.bf16.msrb.mxu3 %v13759_v0  ;;  %v12040_v0 = vld [vmem:[#allocation5 + $0x90] sm:$0xf0]  ;;  %v17925_v37 = vld [vmem:[#allocation5 + $0xe7c] sm:$0xf] }
 0x186   :  { %3819 = vmatpush.bf16.msrb.mxu0 %v12523_v30  ;;  %v12043_v15 = vor.u32 %v17475_v25, %v12040_v0  ;;  %v4265_v30 = vmax.f32 %v4255_v3, 0.0  ;;  %v12363_v25 = vor.u32 %v17555_v47, %v12360_v49  ;;  %v12840_v0 = vld [vmem:[#allocation5 + $0x6d0] sm:$0xf0] }
 0x187   :  { %3769 = vmatpush.bf16.msrb.mxu1 %v13399_v21  ;;  %v3527_v21 = vpop.f32.mrf.mxu1  ;;  %v13160_v3 = vld [vmem:[#allocation5 + $0x950] sm:$0xf0] }
 0x188   :  { %3807 = vmatpush.bf16.msra.mxu2 %v12163_v17  ;;  %v13240_v17 = vld [vmem:[#allocation5 + $0x9f0] sm:$0xf0]  ;;  %v19471_v31 = vadd.f32 %v3527_v21, %v3515_v5  ;;  %v19476_v58 = vadd.f32 1e-05, %v4265_v30 }
 0x189   :  { %3782 = vmatpush.bf16.msrb.mxu3 %v13719_v23  ;;  %v13279_v23 = vor.u32 %v17790_v10, %v13278_v2  ;;  %13938 = vmatmul.msk.bf16.vlgmr.msra.gmra.mxu0 %vm3163_vm0, %v19316_v48  ;;  %v17755_v2 = vld [vmem:[#allocation5 + $0x92c] sm:$0xf]  ;;  %v17545_v10 = vld [vmem:[#allocation5 + $0x29c] sm:$0xf]  ;;  %v13480_v21 = vld [vmem:[#allocation5 + $0xbd0] sm:$0xf0] }
 0x18a   :  { %3820 = vmatpush.bf16.msrb.mxu0 %v12483_v41  ;;  %v12880_v41 = vld [vmem:[#allocation5 + $0x720] sm:$0xf0]  ;;  %v4104_v44 = vrot.slane %v19471_v31, 4  ;;  %v4166_v32 = vmul.f32 %v19471_v31, %v19471_v31  ;;  %18856 = vrsqrt.f32 %v19476_v58  ;;  %v12323_v18 = vor.u32 %v17545_v10, %v12320_v11  ;;  %v17645_v11 = vld [vmem:[#allocation5 + $0x5bc] sm:$0xf] }
 0x18b   :  { %3770 = vmatpush.bf16.msrb.mxu1 %v13359_v38  ;;  %v13243_v38 = vor.u32 %v17775_v14, %v13240_v17  ;;  %vm4309_vm10 = vweird.f32 %v19476_v58 }
 0x18c   :  { %3808 = vmatpush.bf16.msra.mxu2 %v12123_v36  ;;  %v13560_v36 = vld [vmem:[#allocation5 + $0xc70] sm:$0xf0]  ;;  %v4105_v16 = vadd.f32 %v4104_v44, %v19471_v31  ;;  %v4191_v59 = vrot.slane %v4166_v32, 4 }
 0x18d   :  { %3783 = vmatpush.bf16.msrb.mxu3 %v13679_v40  ;;  %v12403_v40 = vor.u32 %v17565_v19, %v12400_v20  ;;  %v13563_v51 = vor.u32 %v17855_v27, %v13560_v36  ;;  %v17835_v20 = vld [vmem:[#allocation5 + $0xbac] sm:$0xf]  ;;  %v12800_v27 = vld [vmem:[#allocation5 + $0x680] sm:$0xf0] }
 0x18e   :  { %3821 = vmatpush.bf16.msrb.mxu0 %v12443_v24  ;;  %v4106_v5 = vrot.slane %v4105_v16, 2  ;;  %v4192_v24 = vadd.f32 %v4191_v59, %v4166_v32  ;;  %v13120_v36 = vld [vmem:[#allocation5 + $0x900] sm:$0xf0]  ;;  %v17655_v32 = vld [vmem:[#allocation5 + $0x60c] sm:$0xf] }
 0x18f   :  { %3771 = vmatpush.bf16.msrb.mxu1 %v13319_v62  ;;  %v17675_v62 = vld [vmem:[#allocation5 + $0x6ac] sm:$0xf]  ;;  %v3529_v14 = vpop.f32.mrf.mxu1 }
 0x190   :  { %3809 = vmatpush.bf16.msra.mxu2 %v12083_v60  ;;  %v12883_v60 = vor.u32 %v17685_v52, %v12880_v41  ;;  %v4193_v17 = vrot.slane %v4192_v24, 2  ;;  %v12843_v19 = vor.u32 %v17675_v62, %v12840_v0  ;;  %v13483_v52 = vor.u32 %v17835_v20, %v13480_v21  ;;  %v19483_v47 = vpop.eup %18856  ;;  %v13800_v62 = vld [vmem:[#allocation5 + $0xe50] sm:$0xf0]  ;;  %v17725_v14 = vld [vmem:[#allocation5 + $0x83c] sm:$0xf] }
 0x191   :  { %3784 = vmatpush.bf16.msrb.mxu3 %v13639_v63  ;;  %v13203_v63 = vor.u32 %v17765_v42, %v13200_v61  ;;  %v12803_v42 = vor.u32 %v17665_v26, %v12800_v27  ;;  %v17825_v61 = vld [vmem:[#allocation5 + $0xb5c] sm:$0xf]  ;;  %v13760_v20 = vld [vmem:[#allocation5 + $0xe00] sm:$0xf0]  ;;  %vm4310_vm9 = vweird.f32 %v19483_v47 }
 0x192   :  { %3822 = vmatpush.bf16.msrb.mxu0 %v12403_v40  ;;  %v4194_v30 = vadd.f32 %v4193_v17, %v4192_v24  ;;  %v13443_v59 = vor.u32 %v17825_v61, %v13440_v43  ;;  %v4304_v24 = vmul.f32 %v19483_v47, %v19476_v58  ;;  %v13360_v26 = vld [vmem:[#allocation5 + $0xae0] sm:$0xf0]  ;;  %v17895_v43 = vld [vmem:[#allocation5 + $0xd8c] sm:$0xf]  ;;  %vm19512_vm11 = vmor %vm4309_vm10, %vm4310_vm9 }
 0x193   :  { %3772 = vmatpush.bf16.msrb.mxu1 %v13279_v23  ;;  %v13163_v23 = vor.u32 %v17755_v2, %v13160_v3  ;;  %v17815_v2 = vld [vmem:[#allocation5 + $0xb0c] sm:$0xf]  ;;  %v13400_v3 = vld [vmem:[#allocation5 + $0xb30] sm:$0xf0] }
 0x194   :  { %3810 = vmatpush.bf16.msra.mxu2 %v12043_v15  ;;  %v4107_v15 = vadd.f32 %v4106_v5, %v4105_v16  ;;  %v4195_v41 = vrot.slane %v4194_v30, 1  ;;  %v13080_v16 = vld [vmem:[#allocation5 + $0x8b0] sm:$0xf0]  ;;  %v13403_v17 = vor.u32 %v17815_v2, %v13400_v3  ;;  %v12286_v3 = vld [vmem:[#allocation5 + $0x250] sm:$0xf] }
 0x195   :  { %3785 = vmatpush.bf16.msrb.mxu3 %v13599_v35  ;;  %v13883_v35 = vor.u32 %v17935_v12, %v13880_v13  ;;  %v13083_v10 = vor.u32 %v17735_v53, %v13080_v16  ;;  %v17625_v53 = vld [vmem:[#allocation5 + $0x51c] sm:$0xf]  ;;  %v12640_v16 = vld [vmem:[#allocation5 + $0x540] sm:$0xf0] }
 0x196   :  { %3773 = vmatmul.bf16.vlgmr.msrb.gmra.mxu1 %v19320_v34  ;;  %3823 = vmatpush.bf16.msrb.mxu0 %v12363_v25  ;;  %v4108_v28 = vrot.slane %v4107_v15, 1 }
 0x197   :  { %3830 = vmatpush.bf16.msra.mxu1 %v12923_v46  ;;  %v17745_v46 = vld [vmem:[#allocation5 + $0x8dc] sm:$0xf]  ;;  %v3553_v5 = vpop.f32.mrf.mxu1  ;;  %v3540_v27 = vpop.f32.mrf.mxu3 }
 0x198   :  { %3811 = vmatpush.bf16.msra.mxu2 %v12003_v45  ;;  %3786 = vmatmul.bf16.vlgmr.msrb.gmra.mxu3 %v19322_v39  ;;  %v4109_v40 = vadd.f32 %v4108_v28, %v4107_v15  ;;  %v13123_v44 = vor.u32 %v17745_v46, %v13120_v36  ;;  %v12760_v45 = vld [vmem:[#allocation5 + $0x630] sm:$0xf0]  ;;  %v13040_v15 = vld [vmem:[#allocation5 + $0x860] sm:$0xf0]  ;;  %v4305_v28 = vmul.f32 %v19483_v47, %v4304_v24  ;;  %v17635_v36 = vld [vmem:[#allocation5 + $0x56c] sm:$0xf] }
 0x199   :  { %3843 = vmatpush.bf16.msra.mxu3 %v13243_v38  ;;  %v13840_v38 = vld [vmem:[#allocation5 + $0xea0] sm:$0xf0]  ;;  %v12763_v0 = vor.u32 %v17655_v32, %v12760_v45  ;;  %v3554_v46 = vadd.f32 %v3553_v5, %v3540_v27  ;;  %v17795_v32 = vld [vmem:[#allocation5 + $0xa6c] sm:$0xf]  ;;  %v17945_v5 = vld [vmem:[#allocation5 + $0xf1c] sm:$0xf] }
 0x19a   :  { %3824 = vmatpush.bf16.msrb.mxu0 %v12323_v18  ;;  %v19486_v49 = vmul.f32 %v19375_v54, %v4109_v40  ;;  %v13843_v4 = vor.u32 %v17925_v37, %v13840_v38  ;;  %v17805_v18 = vld [vmem:[#allocation5 + $0xabc] sm:$0xf]  ;;  %v3579_v37 = vpop.f32.mrf.mxu0  ;;  %v13920_v24 = vld [vmem:[#allocation5 + $0xf40] sm:$0xf0] }
 0x19b   :  { %3831 = vmatpush.bf16.msra.mxu1 %v12883_v60  ;;  %3812 = vmatmul.bf16.vlgmr.msra.gmra.mxu2 %v19308_v8  ;;  %v17915_v60 = vld [vmem:[#allocation5 + $0xe2c] sm:$0xf]  ;;  %v13363_v61 = vor.u32 %v17805_v18, %v13360_v26  ;;  %v17701_v18 = vld [vmem:[#allocation5 + $0x774] sm:$0xf0]  ;;  %v13923_v26 = vor.u32 %v17945_v5, %v13920_v24  ;;  %v13246_v24 = vld [vmem:[#allocation5 + $0x9d0] sm:$0xf] }
 0x19c   :  { %3856 = vmatpush.bf16.msrb.mxu2 %v13563_v51  ;;  %v4196_v51 = vadd.f32 %v4195_v41, %v4194_v30  ;;  %v4246_v25 = vmul.f32 %v19486_v49, %v19486_v49  ;;  %v13803_v13 = vor.u32 %v17915_v60, %v13800_v62  ;;  %v3566_v30 = vpop.f32.mrf.mxu2  ;;  %v17715_v41 = vld [vmem:[#allocation5 + $0x7ec] sm:$0xf]  ;;  %v4306_v60 = vmul.f32 0.5, %v4305_v28 }
 0x19d   :  { %3844 = vmatpush.bf16.msra.mxu3 %v13203_v63  ;;  %3825 = vmatmul.bf16.vlgmr.msrb.gmra.mxu0 %v19310_v9  ;;  %v3567_v45 = vadd.f32 %v3566_v30, %v3554_v46  ;;  %v12246_v46 = vld [vmem:[#allocation5 + $0x200] sm:$0xf] }
 0x19e   :  { %3869 = vmatpush.bf16.msra.mxu0 %v13883_v35  ;;  %v4236_v63 = vmul.f32 %v4196_v51, %v19375_v54  ;;  %v13043_v35 = vor.u32 %v17725_v14, %v13040_v15  ;;  %v17785_v14 = vld [vmem:[#allocation5 + $0xa1c] sm:$0xf]  ;;  %v13280_v15 = vld [vmem:[#allocation5 + $0xa40] sm:$0xf0] }
 0x19f   :  { %3832 = vmatpush.bf16.msra.mxu1 %v12843_v19  ;;  %v17905_v19 = vld [vmem:[#allocation5 + $0xddc] sm:$0xf] }
 0x1a0   :  { %3857 = vmatpush.bf16.msrb.mxu2 %v13523_v1  ;;  %v12720_v1 = vld [vmem:[#allocation5 + $0x5e0] sm:$0xf0]  ;;  %v4256_v12 = vsub.f32 %v4236_v63, %v4246_v25  ;;  %v13763_v40 = vor.u32 %v17905_v19, %v13760_v20  ;;  %v19498_v63 = vadd.f32 %v3579_v37, %v3567_v45  ;;  %v17705_v25 = vld [vmem:[#allocation5 + $0x79c] sm:$0xf]  ;;  %v4307_v19 = vsub.f32 1.5, %v4306_v60 }
 0x1a1   :  { %3845 = vmatpush.bf16.msra.mxu3 %v13163_v23  ;;  %v12723_v23 = vor.u32 %v17645_v11, %v12720_v1  ;;  %v17541_v11 = vld [vmem:[#allocation5 + $0x274] sm:$0xf0]  ;;  %v17885_v1 = vld [vmem:[#allocation5 + $0xd3c] sm:$0xf]  ;;  %v17691_v45 = vld [vmem:[#allocation5 + $0x724] sm:$0xf0] }
 0x1a2   :  { %3870 = vmatpush.bf16.msra.mxu0 %v13843_v4  ;;  %v4266_v21 = vmax.f32 %v4256_v12, 0.0  ;;  %v13320_v4 = vld [vmem:[#allocation5 + $0xa90] sm:$0xf0]  ;;  %v13680_v12 = vld [vmem:[#allocation5 + $0xd60] sm:$0xf0]  ;;  %v3581_v27 = vpop.f32.mrf.mxu0  ;;  %v12287_v30 = vor.u32 %v17541_v11, %v12286_v3 }
 0x1a3   :  { %3833 = vmatpush.bf16.msra.mxu1 %v12803_v42  ;;  %v13000_v42 = vld [vmem:[#allocation5 + $0x810] sm:$0xf0]  ;;  %v17521_v60 = vld [vmem:[#allocation5 + $0x1d4] sm:$0xf0]  ;;  %v13600_v3 = vld [vmem:[#allocation5 + $0xcc0] sm:$0xf0] }
 0x1a4   :  { %3858 = vmatpush.bf16.msrb.mxu2 %v13483_v52  ;;  %v12680_v52 = vld [vmem:[#allocation5 + $0x590] sm:$0xf0]  ;;  %v19495_v38 = vadd.f32 1e-05, %v4266_v21  ;;  %v13003_v62 = vor.u32 %v17715_v41, %v13000_v42  ;;  %v3568_v20 = vpop.f32.mrf.mxu2  ;;  %v17531_v41 = vld [vmem:[#allocation5 + $0x224] sm:$0xf0] }
 0x1a5   :  { %3846 = vmatpush.bf16.msra.mxu3 %v13123_v44  ;;  %v13720_v44 = vld [vmem:[#allocation5 + $0xdb0] sm:$0xf0]  ;;  %v12683_v51 = vor.u32 %v17635_v36, %v12680_v52  ;;  %v12606_v36 = vld [vmem:[#allocation5 + $0x4d0] sm:$0xf]  ;;  %v17621_v52 = vld [vmem:[#allocation5 + $0x4f4] sm:$0xf0] }
 0x1a6   :  { %3871 = vmatpush.bf16.msra.mxu0 %v13803_v13  ;;  %18858 = vrsqrt.f32 %v19495_v38  ;;  %v13723_v2 = vor.u32 %v17895_v43, %v13720_v44  ;;  %v12643_v13 = vor.u32 %v17625_v53, %v12640_v16  ;;  %v17875_v42 = vld [vmem:[#allocation5 + $0xcec] sm:$0xf]  ;;  %v4308_v53 = vmul.f32 %v19483_v47, %v4307_v19  ;;  %v12526_v19 = vld [vmem:[#allocation5 + $0x430] sm:$0xf]  ;;  %v17601_v20 = vld [vmem:[#allocation5 + $0x454] sm:$0xf0] }
 0x1a7   :  { %3834 = vmatpush.bf16.msra.mxu1 %v12763_v0  ;;  %v12960_v0 = vld [vmem:[#allocation5 + $0x7c0] sm:$0xf0]  ;;  %v12247_v16 = vor.u32 %v17531_v41, %v12246_v46  ;;  %vm4319_vm13 = vweird.f32 %v19495_v38 }
 0x1a8   :  { %3859 = vmatpush.bf16.msrb.mxu2 %v13443_v59  ;;  %v3555_v59 = vpop.f32.mrf.mxu1  ;;  %v12963_v21 = vor.u32 %v17705_v25, %v12960_v0  ;;  %v17611_v25 = vld [vmem:[#allocation5 + $0x4a4] sm:$0xf0]  ;;  %v4312_v58 = vsel %vm19512_vm11, %v19483_v47, %v4308_v53 }
 0x1a9   :  { %3847 = vmatpush.bf16.msra.mxu3 %v13083_v10  ;;  %v13323_v10 = vor.u32 %v17795_v32, %v13320_v4  ;;  %v12886_v32 = vld [vmem:[#allocation5 + $0x700] sm:$0xf]  ;;  %v12607_v4 = vor.u32 %v17621_v52, %v12606_v36  ;;  %v4394_v46 = vrot.slane %v4312_v58, 6 }
 0x1aa   :  { %3872 = vmatpush.bf16.msra.mxu0 %v13763_v40  ;;  %v13283_v40 = vor.u32 %v17785_v14, %v13280_v15  ;;  %v12887_v5 = vor.u32 %v17691_v45, %v12886_v32  ;;  %v12806_v52 = vld [vmem:[#allocation5 + $0x660] sm:$0xf]  ;;  %v17501_v32 = vld [vmem:[#allocation5 + $0x134] sm:$0xf0] }
 0x1ab   :  { %3835 = vmatpush.bf16.msra.mxu1 %v12723_v23  ;;  %v12926_v23 = vld [vmem:[#allocation5 + $0x750] sm:$0xf]  ;;  %v12726_v58 = vld [vmem:[#allocation5 + $0x5c0] sm:$0xf] }
 0x1ac   :  { %3860 = vmatpush.bf16.msrb.mxu2 %v13403_v17  ;;  %v3542_v17 = vpop.f32.mrf.mxu3  ;;  %v19500_v28 = vpop.eup %18858  ;;  %v12927_v43 = vor.u32 %v17701_v18, %v12926_v23  ;;  %v12166_v18 = vld [vmem:[#allocation5 + $0x160] sm:$0xf] }
 0x1ad   :  { %3848 = vmatpush.bf16.msra.mxu3 %v13043_v35  ;;  %v13683_v35 = vor.u32 %v17885_v1, %v13680_v12  ;;  %v4314_v37 = vmul.f32 %v19500_v28, %v19495_v38  ;;  %vm4320_vm12 = vweird.f32 %v19500_v28  ;;  %v12846_v12 = vld [vmem:[#allocation5 + $0x6b0] sm:$0xf]  ;;  %v19523_v27 = vpop.f32.mrf.mxu2  ;;  %v17671_v38 = vld [vmem:[#allocation5 + $0x684] sm:$0xf0] }
 0x1ae   :  { %3873 = vmatpush.bf16.msra.mxu0 %v13723_v2  ;;  %v17865_v2 = vld [vmem:[#allocation5 + $0xc9c] sm:$0xf]  ;;  %vm4321_vm14 = vmor %vm4319_vm13, %vm4320_vm12  ;;  %v12807_v45 = vor.u32 %v17671_v38, %v12806_v52  ;;  %v17641_v52 = vld [vmem:[#allocation5 + $0x594] sm:$0xf0] }
 0x1af   :  { %3836 = vmatpush.bf16.msra.mxu1 %v12683_v51  ;;  %v4315_v44 = vmul.f32 %v19500_v28, %v4314_v37  ;;  %v12206_v51 = vld [vmem:[#allocation5 + $0x1b0] sm:$0xf]  ;;  %v13603_v17 = vor.u32 %v17865_v2, %v13600_v3  ;;  %v12527_v37 = vor.u32 %v17601_v20, %v12526_v19  ;;  %v17581_v2 = vld [vmem:[#allocation5 + $0x3b4] sm:$0xf0]  ;;  %v12406_v19 = vld [vmem:[#allocation5 + $0x340] sm:$0xf] }
 0x1b0   :  { %3861 = vmatpush.bf16.msrb.mxu2 %v13363_v61  ;;  %v13640_v61 = vld [vmem:[#allocation5 + $0xd10] sm:$0xf0]  ;;  %v12207_v15 = vor.u32 %v17521_v60, %v12206_v51  ;;  %v13166_v51 = vld [vmem:[#allocation5 + $0x930] sm:$0xf]  ;;  %v17571_v20 = vld [vmem:[#allocation5 + $0x364] sm:$0xf0] }
 0x1b1   :  { %3849 = vmatpush.bf16.msra.mxu3 %v13003_v62  ;;  %v13643_v59 = vor.u32 %v17875_v42, %v13640_v61  ;;  %v12566_v62 = vld [vmem:[#allocation5 + $0x480] sm:$0xf]  ;;  %v4316_v0 = vmul.f32 0.5, %v4315_v44  ;;  %v17591_v61 = vld [vmem:[#allocation5 + $0x404] sm:$0xf0]  ;;  %v12407_v38 = vor.u32 %v17571_v20, %v12406_v19 }
 0x1b2   :  { %3874 = vmatpush.bf16.msra.mxu0 %v13683_v35  ;;  %v12567_v14 = vor.u32 %v17611_v25, %v12566_v62  ;;  %v17771_v35 = vld [vmem:[#allocation5 + $0x9a4] sm:$0xf0]  ;;  %v12486_v42 = vld [vmem:[#allocation5 + $0x3e0] sm:$0xf]  ;;  %v12126_v44 = vld [vmem:[#allocation5 + $0x110] sm:$0xf] }
 0x1b3   :  { %3837 = vmatpush.bf16.msra.mxu1 %v12643_v13  ;;  %v4317_v1 = vsub.f32 1.5, %v4316_v0  ;;  %v17681_v13 = vld [vmem:[#allocation5 + $0x6d4] sm:$0xf0]  ;;  %v3605_v53 = vpop.f32.mrf.mxu1  ;;  %v12487_v60 = vor.u32 %v17591_v61, %v12486_v42  ;;  %v12127_v25 = vor.u32 %v17501_v32, %v12126_v44  ;;  %v12446_v0 = vld [vmem:[#allocation5 + $0x390] sm:$0xf] }
 0x1b4   :  { %3862 = vmatpush.bf16.msrb.mxu2 %v13323_v10  ;;  %v17781_v10 = vld [vmem:[#allocation5 + $0x9f4] sm:$0xf0]  ;;  %v12847_v47 = vor.u32 %v17681_v13, %v12846_v12  ;;  %v13126_v12 = vld [vmem:[#allocation5 + $0x8e0] sm:$0xf]  ;;  %v17751_v13 = vld [vmem:[#allocation5 + $0x904] sm:$0xf0] }
 0x1b5   :  { %3850 = vmatpush.bf16.msra.mxu3 %v12963_v21  ;;  %v4318_v21 = vmul.f32 %v19500_v28, %v4317_v1  ;;  %v13247_v23 = vor.u32 %v17781_v10, %v13246_v24  ;;  %v17491_v24 = vld [vmem:[#allocation5 + $0xe4] sm:$0xf0]  ;;  %v3620_v10 = vpop.f32.mrf.mxu2  ;;  %v17561_v42 = vld [vmem:[#allocation5 + $0x314] sm:$0xf0]  ;;  %v13566_v32 = vld [vmem:[#allocation5 + $0xc50] sm:$0xf] }
 0x1b6   :  { %3838 = vmatmul.bf16.vlgmr.msra.gmra.mxu1 %v19304_v55  ;;  %3875 = vmatpush.bf16.msra.mxu0 %v13643_v59  ;;  %v17661_v59 = vld [vmem:[#allocation5 + $0x634] sm:$0xf0]  ;;  %v17471_v44 = vld [vmem:[#allocation5 + $0x44] sm:$0xf0] }
 0x1b7   :  { %3889 = vmatpush.bf16.msrb.mxu1 %v13923_v26  ;;  %v17511_v26 = vld [vmem:[#allocation5 + $0x184] sm:$0xf0]  ;;  %v4322_v36 = vsel %vm4321_vm14, %v19500_v28, %v4318_v21  ;;  %v17761_v28 = vld [vmem:[#allocation5 + $0x954] sm:$0xf0]  ;;  %v3592_v11 = vpop.f32.mrf.mxu3  ;;  %vm4407_vm14 = vcmask 1044484  }
 0x1b8   :  { %3863 = vmatpush.bf16.msrb.mxu2 %v13283_v40  ;;  %3851 = vmatmul.bf16.vlgmr.msra.gmra.mxu3 %v19306_v56  ;;  %v4395_v40 = vrot.slane %v4322_v36, 5  ;;  %v12167_v41 = vor.u32 %v17511_v26, %v12166_v18  ;;  %v13167_v3 = vor.u32 %v17761_v28, %v13166_v51  ;;  %v12046_v18 = vld [vmem:[#allocation5 + $0x70] sm:$0xf]  ;;  %v17481_v26 = vld [vmem:[#allocation5 + $0x94] sm:$0xf0] }
 0x1b9   :  { %3895 = vmatpush.bf16.msrb.mxu3 %v12287_v30  ;;  %v13206_v30 = vld [vmem:[#allocation5 + $0x980] sm:$0xf]  ;;  %v12686_v36 = vld [vmem:[#allocation5 + $0x570] sm:$0xf]  ;;  %v17861_v28 = vld [vmem:[#allocation5 + $0xc74] sm:$0xf0] }
 0x1ba   :  { %3876 = vmatpush.bf16.msra.mxu0 %v13603_v17  ;;  %v13567_v10 = vor.u32 %v17861_v28, %v13566_v32  ;;  %v17921_v28 = vld [vmem:[#allocation5 + $0xe54] sm:$0xf0] }
 0x1bb   :  { %3908 = vmatpush.bf16.msra.mxu1 %v12607_v4  ;;  %3864 = vmatmul.bf16.vlgmr.msrb.gmra.mxu2 %v19320_v34  ;;  %v4404_v4 = vsel %vm4403_vm15, %v4394_v46, %v4395_v40  ;;  %v12047_v40 = vor.u32 %v17481_v26, %v12046_v18 }
 0x1bc   :  { %3921 = vmatpush.bf16.msra.mxu2 %v12927_v43  ;;  %v13207_v43 = vor.u32 %v17771_v35, %v13206_v30  ;;  %v19532_v62 = vsel %vm4405_vm1, %v19445_v50, %v4404_v4  ;;  %v17651_v50 = vld [vmem:[#allocation5 + $0x5e4] sm:$0xf0]  ;;  %v17741_v35 = vld [vmem:[#allocation5 + $0x8b4] sm:$0xf0] }
 0x1bd   :  { %3896 = vmatpush.bf16.msrb.mxu3 %v12247_v16  ;;  %3877 = vmatmul.bf16.vlgmr.msra.gmra.mxu0 %v19322_v39  ;;  %v12766_v16 = vld [vmem:[#allocation5 + $0x610] sm:$0xf]  ;;  %v12727_v30 = vor.u32 %v17651_v50, %v12726_v58  ;;  %v17731_v4 = vld [vmem:[#allocation5 + $0x864] sm:$0xf0] }
 0x1be   :  { %3934 = vmatpush.bf16.msrb.mxu0 %v13247_v23  ;;  %v12767_v1 = vor.u32 %v17661_v59, %v12766_v16  ;;  %v13127_v23 = vor.u32 %v17751_v13, %v13126_v12  ;;  %v12646_v16 = vld [vmem:[#allocation5 + $0x520] sm:$0xf]  ;;  %v17631_v59 = vld [vmem:[#allocation5 + $0x544] sm:$0xf0]  ;;  %v13886_v12 = vld [vmem:[#allocation5 + $0xed0] sm:$0xf] }
 0x1bf   :  { %3909 = vmatpush.bf16.msra.mxu1 %v12567_v14  ;;  %v3593_v14 = vadd.f32 %v3592_v11, %v19498_v63  ;;  %v13086_v63 = vld [vmem:[#allocation5 + $0x890] sm:$0xf]  ;;  %v3594_v51 = vpop.f32.mrf.mxu3  ;;  %v17941_v13 = vld [vmem:[#allocation5 + $0xef4] sm:$0xf0]  ;;  %v12647_v58 = vor.u32 %v17631_v59, %v12646_v16  ;;  %v17851_v50 = vld [vmem:[#allocation5 + $0xc24] sm:$0xf0] }
 0x1c0   :  { %3922 = vmatpush.bf16.msra.mxu2 %v12887_v5  ;;  %v12086_v5 = vld [vmem:[#allocation5 + $0xc0] sm:$0xf]  ;;  %v13087_v61 = vor.u32 %v17741_v35, %v13086_v63  ;;  %v13887_v18 = vor.u32 %v17941_v13, %v13886_v12  ;;  %v17931_v35 = vld [vmem:[#allocation5 + $0xea4] sm:$0xf0]  ;;  %v13806_v51 = vld [vmem:[#allocation5 + $0xe30] sm:$0xf] }
 0x1c1   :  { %3897 = vmatpush.bf16.msrb.mxu3 %v12207_v15  ;;  %v12447_v15 = vor.u32 %v17581_v2, %v12446_v0  ;;  %v12087_v17 = vor.u32 %v17491_v24, %v12086_v5  ;;  %v3606_v21 = vadd.f32 %v3605_v53, %v3593_v14  ;;  %v3644_v53 = vpop.f32.mrf.mxu2  ;;  %v13926_v0 = vld [vmem:[#allocation5 + $0xf20] sm:$0xf]  ;;  %v17551_v24 = vld [vmem:[#allocation5 + $0x2c4] sm:$0xf0]  ;;  %v17526_v59 = vld [vmem:[#allocation5 + $0x204] sm:$0xf] }
 0x1c2   :  { %3935 = vmatpush.bf16.msrb.mxu0 %v13207_v43  ;;  %v12006_v43 = vld [vmem:[#allocation5 + $0x20] sm:$0xf]  ;;  %v17821_v12 = vld [vmem:[#allocation5 + $0xb34] sm:$0xf0] }
 0x1c3   :  { %3910 = vmatpush.bf16.msra.mxu1 %v12527_v37  ;;  %v19538_v46 = vadd.f32 %v19523_v27, %v3606_v21  ;;  %v3607_v37 = vpop.f32.mrf.mxu1  ;;  %v13046_v27 = vld [vmem:[#allocation5 + $0x840] sm:$0xf]  ;;  %v12007_v2 = vor.u32 %v17471_v44, %v12006_v43  ;;  %v17616_v21 = vld [vmem:[#allocation5 + $0x4d4] sm:$0xf]  ;;  %v12568_v43 = vld [vmem:[#allocation5 + $0x4a8] sm:$0xf0] }
 0x1c4   :  { %3923 = vmatpush.bf16.msra.mxu2 %v12847_v47  ;;  %v3631_v47 = vpop.f32.mrf.mxu0  ;;  %v12326_v5 = vld [vmem:[#allocation5 + $0x2a0] sm:$0xf]  ;;  %v13047_v11 = vor.u32 %v17731_v4, %v13046_v27 }
 0x1c5   :  { %3898 = vmatpush.bf16.msrb.mxu3 %v12167_v41  ;;  %v12366_v41 = vld [vmem:[#allocation5 + $0x2f0] sm:$0xf]  ;;  %v12327_v20 = vor.u32 %v17551_v24, %v12326_v5  ;;  %v13846_v63 = vld [vmem:[#allocation5 + $0xe80] sm:$0xf] }
 0x1c6   :  { %13939 = vmatmul.msk.bf16.vlgmr.msrb.gmra.mxu1 %vm3163_vm0, %v19316_v48  ;;  %3936 = vmatpush.bf16.msrb.mxu0 %v13167_v3  ;;  %v17951_v3 = vld [vmem:[#allocation5 + $0xf44] sm:$0xf0]  ;;  %v13847_v44 = vor.u32 %v17931_v35, %v13846_v63  ;;  %v13446_v4 = vld [vmem:[#allocation5 + $0xb60] sm:$0xf]  ;;  %v17506_v35 = vld [vmem:[#allocation5 + $0x164] sm:$0xf] }
 0x1c7   :  { %3911 = vmatpush.bf16.msra.mxu1 %v12487_v60  ;;  %v12367_v60 = vor.u32 %v17561_v42, %v12366_v41  ;;  %v13927_v19 = vor.u32 %v17951_v3, %v13926_v0  ;;  %v17536_v41 = vld [vmem:[#allocation5 + $0x254] sm:$0xf]  ;;  %v12288_v42 = vld [vmem:[#allocation5 + $0x278] sm:$0xf0]  ;;  %v13807_v3 = vor.u32 %v17921_v28, %v13806_v51  ;;  %v13766_v24 = vld [vmem:[#allocation5 + $0xde0] sm:$0xf] }
 0x1c8   :  { %3924 = vmatpush.bf16.msra.mxu2 %v12807_v45  ;;  %v12687_v45 = vor.u32 %v17641_v52, %v12686_v36  ;;  %v17841_v36 = vld [vmem:[#allocation5 + $0xbd4] sm:$0xf0]  ;;  %v12966_v52 = vld [vmem:[#allocation5 + $0x7a0] sm:$0xf]  ;;  %v12291_v27 = vor.u32 %v17536_v41, %v12288_v42  ;;  %v17596_v0 = vld [vmem:[#allocation5 + $0x434] sm:$0xf] }
 0x1c9   :  { %3899 = vmatpush.bf16.msrb.mxu3 %v12127_v25  ;;  %v19540_v25 = vadd.f32 %v3644_v53, %v3631_v47  ;;  %v3646_v37 = vpop.f32.mrf.mxu2  ;;  %v17831_v53 = vld [vmem:[#allocation5 + $0xb84] sm:$0xf0]  ;;  %v17801_v51 = vld [vmem:[#allocation5 + $0xa94] sm:$0xf0] }
 0x1ca   :  { %3937 = vmatpush.bf16.msrb.mxu0 %v13127_v23  ;;  %v12608_v23 = vld [vmem:[#allocation5 + $0x4f8] sm:$0xf0]  ;;  %v13447_v5 = vor.u32 %v17831_v53, %v13446_v4 }
 0x1cb   :  { %3912 = vmatpush.bf16.msra.mxu1 %v12447_v15  ;;  %v13006_v15 = vld [vmem:[#allocation5 + $0x7f0] sm:$0xf]  ;;  %v12448_v37 = vld [vmem:[#allocation5 + $0x3b8] sm:$0xf0] }
 0x1cc   :  { %3925 = vmatpush.bf16.msra.mxu2 %v12767_v1  ;;  %v13526_v1 = vld [vmem:[#allocation5 + $0xc00] sm:$0xf]  ;;  %v3633_v14 = vpop.f32.mrf.mxu0  ;;  %v12128_v4 = vld [vmem:[#allocation5 + $0x138] sm:$0xf0] }
 0x1cd   :  { %3900 = vmatpush.bf16.msrb.mxu3 %v12087_v17  ;;  %v17721_v17 = vld [vmem:[#allocation5 + $0x814] sm:$0xf0]  ;;  %v13527_v26 = vor.u32 %v17851_v50, %v13526_v1  ;;  %v13406_v1 = vld [vmem:[#allocation5 + $0xb10] sm:$0xf]  ;;  %v12208_v50 = vld [vmem:[#allocation5 + $0x1d8] sm:$0xf0] }
 0x1ce   :  { %3938 = vmatpush.bf16.msrb.mxu0 %v13087_v61  ;;  %v13007_v47 = vor.u32 %v17721_v17, %v13006_v15  ;;  %v17606_v61 = vld [vmem:[#allocation5 + $0x484] sm:$0xf]  ;;  %v12488_v17 = vld [vmem:[#allocation5 + $0x408] sm:$0xf0] }
 0x1cf   :  { %3913 = vmatpush.bf16.msra.mxu1 %v12407_v38  ;;  %v17711_v38 = vld [vmem:[#allocation5 + $0x7c4] sm:$0xf0]  ;;  %v12571_v16 = vor.u32 %v17606_v61, %v12568_v43  ;;  %v17586_v15 = vld [vmem:[#allocation5 + $0x3e4] sm:$0xf]  ;;  %v13686_v61 = vld [vmem:[#allocation5 + $0xd40] sm:$0xf] }
 0x1d0   :  { %3926 = vmatpush.bf16.msra.mxu2 %v12727_v30  ;;  %v13486_v30 = vld [vmem:[#allocation5 + $0xbb0] sm:$0xf]  ;;  %v12491_v63 = vor.u32 %v17586_v15, %v12488_v17  ;;  %v17891_v43 = vld [vmem:[#allocation5 + $0xd64] sm:$0xf0]  ;;  %v12088_v15 = vld [vmem:[#allocation5 + $0xe8] sm:$0xf0] }
 0x1d1   :  { %3901 = vmatpush.bf16.msrb.mxu3 %v12047_v40  ;;  %v12611_v40 = vor.u32 %v17616_v21, %v12608_v23  ;;  %v13487_v32 = vor.u32 %v17841_v36, %v13486_v30  ;;  %v13726_v21 = vld [vmem:[#allocation5 + $0xd90] sm:$0xf]  ;;  %v17901_v23 = vld [vmem:[#allocation5 + $0xdb4] sm:$0xf0]  ;;  %v12168_v36 = vld [vmem:[#allocation5 + $0x188] sm:$0xf0] }
 0x1d2   :  { %3939 = vmatpush.bf16.msrb.mxu0 %v13047_v11  ;;  %v17556_v17 = vld [vmem:[#allocation5 + $0x2f4] sm:$0xf] }
 0x1d3   :  { %3914 = vmatpush.bf16.msra.mxu1 %v12367_v60  ;;  %v12248_v60 = vld [vmem:[#allocation5 + $0x228] sm:$0xf0]  ;;  %v3670_v14 = vpop.f32.mrf.mxu1 }
 0x1d4   :  { %3927 = vmatpush.bf16.msra.mxu2 %v12687_v45  ;;  %v12967_v45 = vor.u32 %v17711_v38, %v12966_v52  ;;  %v12251_v11 = vor.u32 %v17526_v59, %v12248_v60  ;;  %v17576_v38 = vld [vmem:[#allocation5 + $0x394] sm:$0xf]  ;;  %v12408_v59 = vld [vmem:[#allocation5 + $0x368] sm:$0xf0]  ;;  %v13687_v60 = vor.u32 %v17891_v43, %v13686_v61 }
 0x1d5   :  { %3902 = vmatpush.bf16.msrb.mxu3 %v12007_v2  ;;  %v12528_v2 = vld [vmem:[#allocation5 + $0x458] sm:$0xf0]  ;;  %v12451_v28 = vor.u32 %v17576_v38, %v12448_v37  ;;  %v12888_v38 = vld [vmem:[#allocation5 + $0x728] sm:$0xf0]  ;;  %v17476_v37 = vld [vmem:[#allocation5 + $0x74] sm:$0xf] }
 0x1d6   :  { %3940 = vmatpush.bf16.msrb.mxu0 %v13007_v47  ;;  %v12531_v13 = vor.u32 %v17596_v0, %v12528_v2  ;;  %v17811_v47 = vld [vmem:[#allocation5 + $0xae4] sm:$0xf0]  ;;  %v3683_v41 = vpop.f32.mrf.mxu0  ;;  %v17936_v43 = vld [vmem:[#allocation5 + $0xed4] sm:$0xf] }
 0x1d7   :  { %3915 = vmatpush.bf16.msra.mxu1 %v12327_v20  ;;  %v13407_v20 = vor.u32 %v17821_v12, %v13406_v1  ;;  %v3657_v30 = vpop.f32.mrf.mxu3  ;;  %v17791_v1 = vld [vmem:[#allocation5 + $0xa44] sm:$0xf0]  ;;  %v17696_v12 = vld [vmem:[#allocation5 + $0x754] sm:$0xf] }
 0x1d8   :  { %3928 = vmatpush.bf16.msra.mxu2 %v12647_v58  ;;  %3903 = vmatmul.bf16.vlgmr.msrb.gmra.mxu3 %v19308_v8  ;;  %v17516_v58 = vld [vmem:[#allocation5 + $0x1b4] sm:$0xf]  ;;  %v3658_v52 = vadd.f32 %v3657_v30, %v19540_v25 }
 0x1d9   :  { %3947 = vmatpush.bf16.msra.mxu3 %v13567_v10  ;;  %v17911_v10 = vld [vmem:[#allocation5 + $0xe04] sm:$0xf0] }
 0x1da   :  { %3916 = vmatmul.bf16.vlgmr.msra.gmra.mxu1 %v19310_v9  ;;  %3941 = vmatpush.bf16.msrb.mxu0 %v12967_v45  ;;  %v13326_v45 = vld [vmem:[#allocation5 + $0xa70] sm:$0xf] }
 0x1db   :  { %3960 = vmatpush.bf16.msrb.mxu1 %v13887_v18  ;;  %3929 = vmatmul.bf16.vlgmr.msra.gmra.mxu2 %v19304_v55  ;;  %v12211_v18 = vor.u32 %v17516_v58, %v12208_v50  ;;  %v3672_v53 = vpop.f32.mrf.mxu1  ;;  %v13327_v2 = vor.u32 %v17801_v51, %v13326_v45  ;;  %v12928_v58 = vld [vmem:[#allocation5 + $0x778] sm:$0xf0]  ;;  %v17486_v50 = vld [vmem:[#allocation5 + $0xc4] sm:$0xf] }
 0x1dc   :  { %3980 = vmatpush.bf16.msrb.mxu2 %v13927_v19  ;;  %v13767_v19 = vor.u32 %v17911_v10, %v13766_v24  ;;  %v12091_v30 = vor.u32 %v17486_v50, %v12088_v15  ;;  %v13208_v53 = vld [vmem:[#allocation5 + $0x9a8] sm:$0xf0]  ;;  %v13168_v50 = vld [vmem:[#allocation5 + $0x958] sm:$0xf0]  ;;  %v17666_v15 = vld [vmem:[#allocation5 + $0x664] sm:$0xf] }
 0x1dd   :  { %3948 = vmatpush.bf16.msra.mxu3 %v13527_v26  ;;  %3942 = vmatmul.bf16.vlgmr.msrb.gmra.mxu0 %v19306_v56  ;;  %v13366_v26 = vld [vmem:[#allocation5 + $0xac0] sm:$0xf] }
 0x1de   :  { %3986 = vmatpush.bf16.msra.mxu0 %v12291_v27  ;;  %v13367_v42 = vor.u32 %v17811_v47, %v13366_v26  ;;  %v17496_v27 = vld [vmem:[#allocation5 + $0x114] sm:$0xf]  ;;  %v3696_v0 = vpop.f32.mrf.mxu2  ;;  %v3685_v26 = vpop.f32.mrf.mxu0  ;;  %v12931_v47 = vor.u32 %v17696_v12, %v12928_v58 }
 0x1df   :  { %3961 = vmatpush.bf16.msrb.mxu1 %v13847_v44  ;;  %v3671_v44 = vadd.f32 %v3670_v14, %v3658_v52  ;;  %v12131_v10 = vor.u32 %v17496_v27, %v12128_v4  ;;  %v17676_v27 = vld [vmem:[#allocation5 + $0x6b4] sm:$0xf]  ;;  %v17766_v4 = vld [vmem:[#allocation5 + $0x984] sm:$0xf] }
 0x1e0   :  { %3999 = vmatpush.bf16.msra.mxu2 %v12611_v40  ;;  %v13727_v40 = vor.u32 %v17901_v23, %v13726_v21  ;;  %v13606_v23 = vld [vmem:[#allocation5 + $0xca0] sm:$0xf]  ;;  %v13211_v12 = vor.u32 %v17766_v4, %v13208_v53  ;;  %v17756_v58 = vld [vmem:[#allocation5 + $0x934] sm:$0xf]  ;;  %v17826_v53 = vld [vmem:[#allocation5 + $0xb64] sm:$0xf] }
 0x1e1   :  { %3949 = vmatpush.bf16.msra.mxu3 %v13487_v32  ;;  %v12171_v32 = vor.u32 %v17506_v35, %v12168_v36  ;;  %v3684_v25 = vadd.f32 %v3683_v41, %v3671_v44  ;;  %v17776_v35 = vld [vmem:[#allocation5 + $0x9d4] sm:$0xf]  ;;  %v13248_v36 = vld [vmem:[#allocation5 + $0x9f8] sm:$0xf0]  ;;  %v17546_v41 = vld [vmem:[#allocation5 + $0x2a4] sm:$0xf]  ;;  %v13171_v26 = vor.u32 %v17756_v58, %v13168_v50 }
 0x1e2   :  { %3987 = vmatpush.bf16.msra.mxu0 %v12251_v11  ;;  %v13286_v11 = vld [vmem:[#allocation5 + $0xa20] sm:$0xf]  ;;  %v13888_v44 = vld [vmem:[#allocation5 + $0xef8] sm:$0xf0] }
 0x1e3   :  { %3962 = vmatpush.bf16.msrb.mxu1 %v13807_v3  ;;  %v13646_v3 = vld [vmem:[#allocation5 + $0xcf0] sm:$0xf]  ;;  %v3697_v24 = vadd.f32 %v3696_v0, %v3684_v25  ;;  %v13287_v21 = vor.u32 %v17791_v1, %v13286_v11  ;;  %v12008_v0 = vld [vmem:[#allocation5 + $0x48] sm:$0xf0]  ;;  %v17926_v11 = vld [vmem:[#allocation5 + $0xe84] sm:$0xf] }
 0x1e4   :  { %4000 = vmatpush.bf16.msra.mxu2 %v12571_v16  ;;  %v17566_v16 = vld [vmem:[#allocation5 + $0x344] sm:$0xf]  ;;  %v13848_v1 = vld [vmem:[#allocation5 + $0xea8] sm:$0xf0]  ;;  %v13408_v58 = vld [vmem:[#allocation5 + $0xb38] sm:$0xf0] }
 0x1e5   :  { %3950 = vmatpush.bf16.msra.mxu3 %v13447_v5  ;;  %v17881_v5 = vld [vmem:[#allocation5 + $0xd14] sm:$0xf0]  ;;  %v12411_v14 = vor.u32 %v17566_v16, %v12408_v59  ;;  %v12848_v59 = vld [vmem:[#allocation5 + $0x6d8] sm:$0xf0] }
 0x1e6   :  { %3988 = vmatpush.bf16.msra.mxu0 %v12211_v18  ;;  %v17871_v18 = vld [vmem:[#allocation5 + $0xcc4] sm:$0xf0]  ;;  %v3698_v45 = vpop.f32.mrf.mxu2 }
 0x1e7   :  { %3963 = vmatpush.bf16.msrb.mxu1 %v13767_v19  ;;  %v12368_v19 = vld [vmem:[#allocation5 + $0x318] sm:$0xf0]  ;;  %v13607_v61 = vor.u32 %v17871_v18, %v13606_v23  ;;  %v17916_v23 = vld [vmem:[#allocation5 + $0xe34] sm:$0xf] }
 0x1e8   :  { %4001 = vmatpush.bf16.msra.mxu2 %v12531_v13  ;;  %v3659_v13 = vpop.f32.mrf.mxu3  ;;  %v12371_v52 = vor.u32 %v17556_v17, %v12368_v19  ;;  %v12808_v17 = vld [vmem:[#allocation5 + $0x688] sm:$0xf0]  ;;  %v13851_v19 = vor.u32 %v17926_v11, %v13848_v1  ;;  %v13808_v18 = vld [vmem:[#allocation5 + $0xe58] sm:$0xf0]  ;;  %v17736_v45 = vld [vmem:[#allocation5 + $0x894] sm:$0xf] }
 0x1e9   :  { %3951 = vmatpush.bf16.msra.mxu3 %v13407_v20  ;;  %v13647_v20 = vor.u32 %v17881_v5, %v13646_v3  ;;  %v13891_v3 = vor.u32 %v17936_v43, %v13888_v44  ;;  %v17856_v5 = vld [vmem:[#allocation5 + $0xc54] sm:$0xf]  ;;  %v12851_v13 = vor.u32 %v17676_v27, %v12848_v59  ;;  %v13768_v43 = vld [vmem:[#allocation5 + $0xe08] sm:$0xf0]  ;;  %v17646_v27 = vld [vmem:[#allocation5 + $0x5c4] sm:$0xf] }
 0x1ea   :  { %3989 = vmatpush.bf16.msra.mxu0 %v12171_v32  ;;  %v13251_v32 = vor.u32 %v17776_v35, %v13248_v36  ;;  %v13728_v59 = vld [vmem:[#allocation5 + $0xdb8] sm:$0xf0]  ;;  %v17636_v11 = vld [vmem:[#allocation5 + $0x574] sm:$0xf] }
 0x1eb   :  { %3964 = vmatpush.bf16.msrb.mxu1 %v13727_v40  ;;  %13940 = vmatmul.msk.bf16.vlgmr.msrb.gmra.mxu2 %vm3163_vm0, %v19316_v48  ;;  %v12048_v40 = vld [vmem:[#allocation5 + $0x98] sm:$0xf0] }
 0x1ec   :  { %4002 = vmatpush.bf16.msra.mxu2 %v12491_v63  ;;  %v17686_v63 = vld [vmem:[#allocation5 + $0x704] sm:$0xf]  ;;  %v12688_v1 = vld [vmem:[#allocation5 + $0x598] sm:$0xf0] }
 0x1ed   :  { %3952 = vmatpush.bf16.msra.mxu3 %v13367_v42  ;;  %v12328_v42 = vld [vmem:[#allocation5 + $0x2c8] sm:$0xf0]  ;;  %v12891_v51 = vor.u32 %v17686_v63, %v12888_v38  ;;  %v12768_v38 = vld [vmem:[#allocation5 + $0x638] sm:$0xf0] }
 0x1ee   :  { %3990 = vmatpush.bf16.msra.mxu0 %v12131_v10  ;;  %v12331_v16 = vor.u32 %v17546_v41, %v12328_v42  ;;  %v13568_v10 = vld [vmem:[#allocation5 + $0xc78] sm:$0xf0]  ;;  %v13128_v63 = vld [vmem:[#allocation5 + $0x908] sm:$0xf0] }
 0x1ef   :  { %3965 = vmatpush.bf16.msrb.mxu1 %v13687_v60  ;;  %v17466_v60 = vld [vmem:[#allocation5 + $0x24] sm:$0xf]  ;;  %v13488_v41 = vld [vmem:[#allocation5 + $0xbd8] sm:$0xf0] }
 0x1f0   :  { %4003 = vmatpush.bf16.msra.mxu2 %v12451_v28  ;;  %v12051_v28 = vor.u32 %v17476_v37, %v12048_v40  ;;  %v3709_v25 = vpop.f32.mrf.mxu3  ;;  %v13811_v37 = vor.u32 %v17916_v23, %v13808_v18  ;;  %v17836_v40 = vld [vmem:[#allocation5 + $0xbb4] sm:$0xf]  ;;  %v13008_v23 = vld [vmem:[#allocation5 + $0x818] sm:$0xf0] }
 0x1f1   :  { %3953 = vmatpush.bf16.msra.mxu3 %v13327_v2  ;;  %v19549_v2 = vadd.f32 %v3709_v25, %v3697_v24  ;;  %v13571_v24 = vor.u32 %v17856_v5, %v13568_v10  ;;  %v13448_v25 = vld [vmem:[#allocation5 + $0xb88] sm:$0xf0] }
 0x1f2   :  { %3991 = vmatpush.bf16.msra.mxu0 %v12091_v30  ;;  %v17746_v30 = vld [vmem:[#allocation5 + $0x8e4] sm:$0xf]  ;;  %v13048_v5 = vld [vmem:[#allocation5 + $0x868] sm:$0xf0]  ;;  %v13451_v10 = vor.u32 %v17826_v53, %v13448_v25 }
 0x1f3   :  { %3966 = vmatpush.bf16.msrb.mxu1 %v13647_v20  ;;  %v17846_v20 = vld [vmem:[#allocation5 + $0xc04] sm:$0xf]  ;;  %v19554_v42 = vpop.f32.mrf.mxu1  ;;  %v13131_v44 = vor.u32 %v17746_v30, %v13128_v63  ;;  %v13608_v53 = vld [vmem:[#allocation5 + $0xcc8] sm:$0xf0] }
 0x1f4   :  { %4004 = vmatpush.bf16.msra.mxu2 %v12411_v14  ;;  %v12011_v14 = vor.u32 %v17466_v60, %v12008_v0  ;;  %v17806_v30 = vld [vmem:[#allocation5 + $0xac4] sm:$0xf] }
 0x1f5   :  { %3954 = vmatpush.bf16.msra.mxu3 %v13287_v21  ;;  %v13528_v21 = vld [vmem:[#allocation5 + $0xc28] sm:$0xf0] }
 0x1f6   :  { %3992 = vmatpush.bf16.msra.mxu0 %v12051_v28  ;;  %v13531_v35 = vor.u32 %v17846_v20, %v13528_v21  ;;  %v13491_v28 = vor.u32 %v17836_v40, %v13488_v41  ;;  %v19557_v0 = vpop.f32.mrf.mxu0  ;;  %v17716_v21 = vld [vmem:[#allocation5 + $0x7f4] sm:$0xf] }
 0x1f7   :  { %3967 = vmatpush.bf16.msrb.mxu1 %v13607_v61  ;;  %v17906_v61 = vld [vmem:[#allocation5 + $0xde4] sm:$0xf]  ;;  %v13011_v40 = vor.u32 %v17716_v21, %v13008_v23 }
 0x1f8   :  { %4005 = vmatpush.bf16.msra.mxu2 %v12371_v52  ;;  %3955 = vmatmul.bf16.vlgmr.msra.gmra.mxu3 %v19320_v34  ;;  %v3711_v36 = vpop.f32.mrf.mxu3  ;;  %v17656_v52 = vld [vmem:[#allocation5 + $0x614] sm:$0xf]  ;;  %v13771_v4 = vor.u32 %v17906_v61, %v13768_v43  ;;  %v17706_v43 = vld [vmem:[#allocation5 + $0x7a4] sm:$0xf] }
 0x1f9   :  { %4012 = vmatpush.bf16.msrb.mxu3 %v12931_v47  ;;  %v12811_v47 = vor.u32 %v17666_v15, %v12808_v17  ;;  %v13688_v15 = vld [vmem:[#allocation5 + $0xd68] sm:$0xf0]  ;;  %v17946_v36 = vld [vmem:[#allocation5 + $0xf24] sm:$0xf] }
 0x1fa   :  { %3968 = vmatmul.bf16.vlgmr.msrb.gmra.mxu1 %v19322_v39  ;;  %3993 = vmatpush.bf16.msra.mxu0 %v12011_v14  ;;  %v17816_v14 = vld [vmem:[#allocation5 + $0xb14] sm:$0xf] }
 0x1fb   :  { %4025 = vmatpush.bf16.msra.mxu1 %v13251_v32  ;;  %v12771_v32 = vor.u32 %v17656_v52, %v12768_v38  ;;  %v3724_v50 = vpop.f32.mrf.mxu1  ;;  %v13411_v18 = vor.u32 %v17816_v14, %v13408_v58  ;;  %v13928_v52 = vld [vmem:[#allocation5 + $0xf48] sm:$0xf0]  ;;  %v17876_v38 = vld [vmem:[#allocation5 + $0xcf4] sm:$0xf]  ;;  %v4167_v58 = vmul.f32 %v19538_v46, %v19538_v46 }
 0x1fc   :  { %4006 = vmatpush.bf16.msra.mxu2 %v12331_v16  ;;  %v17896_v16 = vld [vmem:[#allocation5 + $0xd94] sm:$0xf] }
 0x1fd   :  { %4013 = vmatpush.bf16.msrb.mxu3 %v12891_v51  ;;  %3994 = vmatmul.bf16.vlgmr.msra.gmra.mxu0 %v19308_v8  ;;  %v13088_v51 = vld [vmem:[#allocation5 + $0x8b8] sm:$0xf0] }
 0x1fe   :  { %4038 = vmatpush.bf16.msrb.mxu0 %v13571_v24  ;;  %v13091_v60 = vor.u32 %v17736_v45, %v13088_v51  ;;  %v17886_v24 = vld [vmem:[#allocation5 + $0xd44] sm:$0xf]  ;;  %v3761_v20 = vpop.f32.mrf.mxu2  ;;  %v3750_v41 = vpop.f32.mrf.mxu0  ;;  %v13931_v51 = vor.u32 %v17946_v36, %v13928_v52 }
 0x1ff   :  { %4026 = vmatpush.bf16.msra.mxu1 %v13211_v12  ;;  %4007 = vmatmul.bf16.vlgmr.msra.gmra.mxu2 %v19310_v9  ;;  %v12728_v9 = vld [vmem:[#allocation5 + $0x5e8] sm:$0xf0]  ;;  %v13691_v63 = vor.u32 %v17886_v24, %v13688_v15 }
 0x200   :  { %4051 = vmatpush.bf16.msrb.mxu2 %v13891_v3  ;;  %v12731_v8 = vor.u32 %v17646_v27, %v12728_v9  ;;  %v17726_v3 = vld [vmem:[#allocation5 + $0x844] sm:$0xf]  ;;  %v3735_v12 = vpop.f32.mrf.mxu3  ;;  %v17796_v27 = vld [vmem:[#allocation5 + $0xa74] sm:$0xf]  ;;  %v13328_v9 = vld [vmem:[#allocation5 + $0xa98] sm:$0xf0] }
 0x201   :  { %4014 = vmatpush.bf16.msrb.mxu3 %v12851_v13  ;;  %v13731_v13 = vor.u32 %v17896_v16, %v13728_v59  ;;  %v13051_v17 = vor.u32 %v17726_v3, %v13048_v5  ;;  %v13331_v59 = vor.u32 %v17796_v27, %v13328_v9  ;;  %v13288_v3 = vld [vmem:[#allocation5 + $0xa48] sm:$0xf0] }
 0x202   :  { %4039 = vmatpush.bf16.msrb.mxu0 %v13531_v35  ;;  %v13368_v35 = vld [vmem:[#allocation5 + $0xae8] sm:$0xf0] }
 0x203   :  { %4027 = vmatpush.bf16.msra.mxu1 %v13171_v26  ;;  %v17626_v26 = vld [vmem:[#allocation5 + $0x524] sm:$0xf] }
 0x204   :  { %4052 = vmatpush.bf16.msrb.mxu2 %v13851_v19  ;;  %v12691_v19 = vor.u32 %v17636_v11, %v12688_v1  ;;  %v3736_v11 = vadd.f32 %v3735_v12, %v19554_v42  ;;  %v4168_v42 = vmul.f32 %v19549_v2, %v19549_v2 }
 0x205   :  { %4015 = vmatpush.bf16.msrb.mxu3 %v12811_v47  ;;  %v12648_v47 = vld [vmem:[#allocation5 + $0x548] sm:$0xf0] }
 0x206   :  { %4040 = vmatpush.bf16.msrb.mxu0 %v13491_v28  ;;  %v12651_v61 = vor.u32 %v17626_v26, %v12648_v47  ;;  %v3763_v16 = vpop.f32.mrf.mxu2  ;;  %v3800_v5 = vpop.f32.mrf.mxu0  ;;  %v3749_v1 = vadd.f32 %v19557_v0, %v3736_v11  ;;  %v4197_v0 = vrot.slane %v4167_v58, 4  ;;  %v4203_v23 = vrot.slane %v4168_v42, 4 }
 0x207   :  { %4028 = vmatpush.bf16.msra.mxu1 %v13131_v44  ;;  %v12968_v44 = vld [vmem:[#allocation5 + $0x7c8] sm:$0xf0] }
 0x208   :  { %4053 = vmatpush.bf16.msrb.mxu2 %v13811_v37  ;;  %v13648_v37 = vld [vmem:[#allocation5 + $0xd18] sm:$0xf0]  ;;  %v3737_v45 = vpop.f32.mrf.mxu3  ;;  %v12971_v25 = vor.u32 %v17706_v43, %v12968_v44  ;;  %v3762_v50 = vadd.f32 %v3761_v20, %v3749_v1  ;;  %v4198_v26 = vadd.f32 %v4197_v0, %v4167_v58 }
 0x209   :  { %4016 = vmatpush.bf16.msrb.mxu3 %v12771_v32  ;;  %v13371_v32 = vor.u32 %v17806_v30, %v13368_v35  ;;  %v13651_v28 = vor.u32 %v17876_v38, %v13648_v37 }
 0x20a   :  { %4041 = vmatpush.bf16.msrb.mxu0 %v13451_v10  ;;  %v4199_v37 = vrot.slane %v4198_v26, 2 }
 0x20b   :  { %4029 = vmatpush.bf16.msra.mxu1 %v13091_v60 }
 0x20c   :  { %4054 = vmatpush.bf16.msrb.mxu2 %v13771_v4  ;;  %v17866_v4 = vld [vmem:[#allocation5 + $0xca4] sm:$0xf] }
 0x20d   :  { %4017 = vmatpush.bf16.msrb.mxu3 %v12731_v8  ;;  %v13611_v60 = vor.u32 %v17866_v4, %v13608_v53  ;;  %v17786_v8 = vld [vmem:[#allocation5 + $0xa24] sm:$0xf] }
 0x20e   :  { %4042 = vmatpush.bf16.msrb.mxu0 %v13411_v18  ;;  %v13291_v10 = vor.u32 %v17786_v8, %v13288_v3  ;;  %v3802_v14 = vpop.f32.mrf.mxu0 }
 0x20f   :  { %4030 = vmatpush.bf16.msra.mxu1 %v13051_v17 }
 0x210   :  { %4055 = vmatpush.bf16.msrb.mxu2 %v13731_v13 }
 0x211   :  { %4018 = vmatpush.bf16.msrb.mxu3 %v12691_v19 }
 0x212   :  { %4043 = vmatpush.bf16.msrb.mxu0 %v13371_v32 }
 0x213   :  { %4031 = vmatpush.bf16.msra.mxu1 %v13011_v40  ;;  %v3774_v13 = vpop.f32.mrf.mxu1 }
 0x214   :  { %4056 = vmatpush.bf16.msrb.mxu2 %v13691_v63  ;;  %v3775_v24 = vadd.f32 %v3774_v13, %v3762_v50 }
 0x215   :  { %4019 = vmatpush.bf16.msrb.mxu3 %v12651_v61 }
 0x216   :  { %4044 = vmatpush.bf16.msrb.mxu0 %v13331_v59 }
 0x217   :  { %4032 = vmatpush.bf16.msra.mxu1 %v12971_v25 }
 0x218   :  { %4057 = vmatpush.bf16.msrb.mxu2 %v13651_v28  ;;  %4020 = vmatmul.bf16.vlgmr.msrb.gmra.mxu3 %v19304_v55  ;;  %v4110_v55 = vrot.slane %v19538_v46, 4 }
 0x219   :  { %4071 = vmatpush.bf16.msra.mxu3 %v13931_v51  ;;  %v4200_v51 = vadd.f32 %v4199_v37, %v4198_v26  ;;  %v18177_v37 = vld [vmem:[#allocation11 + $0x704] sm:$0xf0] }
 0x21a   :  { %4033 = vmatmul.bf16.vlgmr.msra.gmra.mxu1 %v19306_v56  ;;  %4045 = vmatpush.bf16.msrb.mxu0 %v13291_v10  ;;  %v4116_v56 = vrot.slane %v19549_v2, 4  ;;  %v4111_v12 = vadd.f32 %v4110_v55, %v19538_v46  ;;  %v3826_v21 = vpop.f32.mrf.mxu0 }
 0x21b   :  { %v4201_v25 = vrot.slane %v4200_v51, 1 }
 0x21c   :  { %4058 = vmatpush.bf16.msrb.mxu2 %v13611_v60  ;;  %v4117_v20 = vadd.f32 %v4116_v56, %v19549_v2  ;;  %v4112_v18 = vrot.slane %v4111_v12, 2 }
 0x21d   :  { %4046 = vmatmul.bf16.vlgmr.msrb.gmra.mxu0 %v19320_v34  ;;  %v3776_v34 = vpop.f32.mrf.mxu1 }
 0x21e   :  { %v3813_v19 = vpop.f32.mrf.mxu2  ;;  %v4118_v36 = vrot.slane %v4117_v20, 2  ;;  %v4113_v38 = vadd.f32 %v4112_v18, %v4111_v12  ;;  %v14864_v34 = vld [vmem:[#allocation11 + $0x730] sm:$0xf] }
 0x21f   :  { %4059 = vmatmul.bf16.vlgmr.msrb.gmra.mxu2 %v19322_v39  ;;  %v3787_v39 = vpop.f32.mrf.mxu3  ;;  %v3827_v1 = vadd.f32 %v3826_v21, %v3813_v19  ;;  %v18187_v19 = vld [vmem:[#allocation11 + $0x754] sm:$0xf0]  ;;  %v15184_v21 = vld [vmem:[#allocation11 + $0x9b0] sm:$0xf] }
 0x220   :  { %v3788_v15 = vadd.f32 %v3787_v39, %v3775_v24  ;;  %v4119_v44 = vadd.f32 %v4118_v36, %v4117_v20  ;;  %v4114_v45 = vrot.slane %v4113_v38, 1 }
 0x222   :  { %v19574_v17 = vadd.f32 %v3800_v5, %v3788_v15  ;;  %v3828_v43 = vpop.f32.mrf.mxu0  ;;  %v4120_v9 = vrot.slane %v4119_v44, 1  ;;  %v4115_v53 = vadd.f32 %v4114_v45, %v4113_v38  ;;  %v4202_v5 = vadd.f32 %v4201_v25, %v4200_v51  ;;  %v14824_v38 = vld [vmem:[#allocation11 + $0x6e0] sm:$0xf] }
 0x223   :  { %v14825_v43 = vor.u32 %v18177_v37, %v14824_v38  ;;  %v18227_v38 = vld [vmem:[#allocation11 + $0x894] sm:$0xf0] }
 0x224   :  { %v4122_v47 = vrot.slane %v19574_v17, 4  ;;  %v4169_v30 = vmul.f32 %v19574_v17, %v19574_v17  ;;  %v4121_v60 = vadd.f32 %v4120_v9, %v4119_v44  ;;  %v19582_v3 = vmul.f32 %v19375_v54, %v4115_v53  ;;  %v18257_v44 = vld [vmem:[#allocation11 + $0x984] sm:$0xf0]  ;;  %v18167_v9 = vld [vmem:[#allocation11 + $0x6b4] sm:$0xf0] }
 0x225   :  { %v4237_v58 = vmul.f32 %v4202_v5, %v19375_v54 }
 0x226   :  { %v4123_v63 = vadd.f32 %v4122_v47, %v19574_v17  ;;  %v4209_v35 = vrot.slane %v4169_v30, 4  ;;  %v3815_v61 = vpop.f32.mrf.mxu2  ;;  %v19585_v14 = vmul.f32 %v19375_v54, %v4121_v60  ;;  %v4247_v50 = vmul.f32 %v19582_v3, %v19582_v3  ;;  %v18247_v60 = vld [vmem:[#allocation11 + $0x934] sm:$0xf0] }
 0x227   :  { %v3789_v52 = vpop.f32.mrf.mxu3  ;;  %v14865_v47 = vor.u32 %v18187_v19, %v14864_v34  ;;  %v14224_v19 = vld [vmem:[#allocation11 + $0x230] sm:$0xf] }
 0x228   :  { %13941 = vmatmul.msk.bf16.vlgmr.msra.gmra.mxu3 %vm3163_vm0, %v19316_v48  ;;  %v4204_v48 = vadd.f32 %v4203_v23, %v4168_v42  ;;  %v4124_v40 = vrot.slane %v4123_v63, 2  ;;  %v4210_v41 = vadd.f32 %v4209_v35, %v4169_v30  ;;  %v4248_v12 = vmul.f32 %v19585_v14, %v19585_v14  ;;  %v18267_v30 = vld [vmem:[#allocation11 + $0x9d4] sm:$0xf0] }
 0x229   :  { %v4257_v0 = vsub.f32 %v4237_v58, %v4247_v50  ;;  %9409 = vmatpush.bf16.msra.mxu0 %v14865_v47  ;;  %v14744_v58 = vld [vmem:[#allocation11 + $0x640] sm:$0xf]  ;;  %v18157_v50 = vld [vmem:[#allocation11 + $0x664] sm:$0xf0] }
 0x22a   :  { %v4205_v32 = vrot.slane %v4204_v48, 2  ;;  %v4125_v28 = vadd.f32 %v4124_v40, %v4123_v63  ;;  %v4211_v27 = vrot.slane %v4210_v41, 2  ;;  %v15185_v63 = vor.u32 %v18267_v30, %v15184_v21  ;;  %v15144_v40 = vld [vmem:[#allocation11 + $0x960] sm:$0xf]  ;;  %v18027_v21 = vld [vmem:[#allocation11 + $0x254] sm:$0xf0] }
 0x22b   :  { %v15145_v45 = vor.u32 %v18257_v44, %v15144_v40 }
 0x22c   :  { %v4206_v4 = vadd.f32 %v4205_v32, %v4204_v48  ;;  %v4126_v16 = vrot.slane %v4125_v28, 1  ;;  %v4212_v59 = vadd.f32 %v4211_v27, %v4210_v41  ;;  %9422 = vmatpush.bf16.msra.mxu2 %v15185_v63  ;;  %v4267_v41 = vmax.f32 %v4257_v0, 0.0  ;;  %v14784_v27 = vld [vmem:[#allocation11 + $0x690] sm:$0xf] }
 0x22d   :  { %9410 = vmatpush.bf16.msra.mxu0 %v14825_v43  ;;  %v14704_v63 = vld [vmem:[#allocation11 + $0x5f0] sm:$0xf]  ;;  %v18017_v43 = vld [vmem:[#allocation11 + $0x204] sm:$0xf0] }
 0x22e   :  { %v4207_v8 = vrot.slane %v4206_v4, 1  ;;  %v4127_v10 = vadd.f32 %v4126_v16, %v4125_v28  ;;  %v4213_v11 = vrot.slane %v4212_v59, 1  ;;  %v19599_v53 = vadd.f32 1e-05, %v4267_v41 }
 0x230   :  { %v4208_v55 = vadd.f32 %v4207_v8, %v4206_v4  ;;  %v19591_v24 = vmul.f32 %v19375_v54, %v4127_v10  ;;  %v4214_v56 = vadd.f32 %v4213_v11, %v4212_v59  ;;  %9423 = vmatpush.bf16.msra.mxu2 %v15145_v45  ;;  %v15104_v4 = vld [vmem:[#allocation11 + $0x910] sm:$0xf]  ;;  %v14785_v59 = vor.u32 %v18167_v9, %v14784_v27  ;;  %v14504_v45 = vld [vmem:[#allocation11 + $0x460] sm:$0xf] }
 0x231   :  { %v15105_v5 = vor.u32 %v18247_v60, %v15104_v4  ;;  %18860 = vrsqrt.f32 %v19599_v53  ;;  %v14664_v4 = vld [vmem:[#allocation11 + $0x5a0] sm:$0xf]  ;;  %vm4329_vm3 = vweird.f32 %v19599_v53 }
 0x232   :  { %v4238_v39 = vmul.f32 %v4208_v55, %v19375_v54  ;;  %v4239_v20 = vmul.f32 %v4214_v56, %v19375_v54  ;;  %v4249_v23 = vmul.f32 %v19591_v24, %v19591_v24  ;;  %9411 = vmatpush.bf16.msra.mxu0 %v14785_v59  ;;  %v14984_v60 = vld [vmem:[#allocation11 + $0x820] sm:$0xf] }
 0x233   :  { %v3839_v13 = vpop.f32.mrf.mxu1 }
 0x234   :  { %v3840_v42 = vadd.f32 %v3839_v13, %v3827_v1  ;;  %v4258_v35 = vsub.f32 %v4238_v39, %v4248_v12  ;;  %v4259_v61 = vsub.f32 %v4239_v20, %v4249_v23  ;;  %9424 = vmatpush.bf16.msra.mxu2 %v15105_v5  ;;  %v15064_v39 = vld [vmem:[#allocation11 + $0x8c0] sm:$0xf]  ;;  %v18237_v12 = vld [vmem:[#allocation11 + $0x8e4] sm:$0xf0]  ;;  %v14225_v20 = vor.u32 %v18027_v21, %v14224_v19  ;;  %v14544_v23 = vld [vmem:[#allocation11 + $0x4b0] sm:$0xf] }
 0x235   :  { %v15065_v34 = vor.u32 %v18237_v12, %v15064_v39  ;;  %v18217_v5 = vld [vmem:[#allocation11 + $0x844] sm:$0xf0]  ;;  %v14464_v39 = vld [vmem:[#allocation11 + $0x410] sm:$0xf]  ;;  %v18087_v12 = vld [vmem:[#allocation11 + $0x434] sm:$0xf0] }
 0x236   :  { %v4268_v51 = vmax.f32 %v4258_v35, 0.0  ;;  %v4269_v25 = vmax.f32 %v4259_v61, 0.0  ;;  %v18147_v35 = vld [vmem:[#allocation11 + $0x614] sm:$0xf0]  ;;  %9383 = vmatpush.bf16.msrb.mxu1 %v14225_v20  ;;  %v14184_v61 = vld [vmem:[#allocation11 + $0x1e0] sm:$0xf]  ;;  %v14465_v21 = vor.u32 %v18087_v12, %v14464_v39 }
 0x237   :  { %v19614_v44 = vpop.eup %18860  ;;  %v14624_v20 = vld [vmem:[#allocation11 + $0x550] sm:$0xf] }
 0x238   :  { %v19603_v10 = vadd.f32 1e-05, %v4268_v51  ;;  %v19609_v56 = vadd.f32 1e-05, %v4269_v25  ;;  %9425 = vmatpush.bf16.msra.mxu2 %v15065_v34  ;;  %v18097_v51 = vld [vmem:[#allocation11 + $0x484] sm:$0xf0]  ;;  %vm4330_vm0 = vweird.f32 %v19614_v44 }
 0x239   :  { %v14505_v9 = vor.u32 %v18097_v51, %v14504_v45  ;;  %v18137_v25 = vld [vmem:[#allocation11 + $0x5c4] sm:$0xf0]  ;;  %v14584_v51 = vld [vmem:[#allocation11 + $0x500] sm:$0xf]  ;;  %v14064_v12 = vld [vmem:[#allocation11 + $0xf0] sm:$0xf] }
 0x23a   :  { %v3878_v48 = vpop.f32.mrf.mxu0  ;;  %18862 = vrsqrt.f32 %v19603_v10  ;;  %v14665_v59 = vor.u32 %v18137_v25, %v14664_v4  ;;  %v18197_v4 = vld [vmem:[#allocation11 + $0x7a4] sm:$0xf0]  ;;  %v16144_v25 = vld [vmem:[#allocation11 + $0x1130] sm:$0xf]  ;;  %vm4331_vm4 = vmor %vm4329_vm3, %vm4330_vm0  ;;  %vm4339_vm5 = vweird.f32 %v19603_v10  ;;  %vm4349_vm9 = vweird.f32 %v19609_v56 }
 0x23b   :  { %v3852_v15 = vpop.f32.mrf.mxu3  ;;  %v3841_v18 = vpop.f32.mrf.mxu1  ;;  %18864 = vrsqrt.f32 %v19609_v56  ;;  %vm4409_vm0 = vcmask 1046534   ;;  %vm4413_vm3 = vcmask 1043456  }
 0x23c   :  { %v3853_v26 = vadd.f32 %v3852_v15, %v3840_v42  ;;  %v14745_v42 = vor.u32 %v18157_v50, %v14744_v58  ;;  %v18107_v18 = vld [vmem:[#allocation11 + $0x4d4] sm:$0xf0]  ;;  %v14144_v58 = vld [vmem:[#allocation11 + $0x190] sm:$0xf] }
 0x23d   :  { %v14545_v30 = vor.u32 %v18107_v18, %v14544_v23  ;;  %v18007_v50 = vld [vmem:[#allocation11 + $0x1b4] sm:$0xf0]  ;;  %v14944_v18 = vld [vmem:[#allocation11 + $0x7d0] sm:$0xf] }
 0x23e   :  { %v3865_v36 = vpop.f32.mrf.mxu2  ;;  %9412 = vmatpush.bf16.msra.mxu0 %v14745_v42  ;;  %v14145_v42 = vor.u32 %v18007_v50, %v14144_v58  ;;  %v18127_v23 = vld [vmem:[#allocation11 + $0x574] sm:$0xf0] }
 0x23f   :  { %v3866_v52 = vadd.f32 %v3865_v36, %v3853_v26  ;;  %9396 = vmatpush.bf16.msrb.mxu3 %v14545_v30  ;;  %v18587_v58 = vld [vmem:[#allocation11 + $0x13d4] sm:$0xf0] }
 0x241   :  { %v3879_v32 = vadd.f32 %v3878_v48, %v3866_v52  ;;  %v14705_v48 = vor.u32 %v18147_v35, %v14704_v63  ;;  %v15024_v52 = vld [vmem:[#allocation11 + $0x870] sm:$0xf] }
 0x242   :  { %v3880_v1 = vpop.f32.mrf.mxu0  ;;  %v15025_v41 = vor.u32 %v18227_v38, %v15024_v52  ;;  %v14104_v52 = vld [vmem:[#allocation11 + $0x140] sm:$0xf]  ;;  %v17997_v38 = vld [vmem:[#allocation11 + $0x164] sm:$0xf0] }
 0x243   :  { %v3854_v28 = vpop.f32.mrf.mxu3  ;;  %v3891_v16 = vpop.f32.mrf.mxu1  ;;  %9413 = vmatpush.bf16.msra.mxu0 %v14705_v48  ;;  %9397 = vmatpush.bf16.msrb.mxu3 %v14505_v9 }
 0x244   :  { %v19601_v8 = vadd.f32 %v3891_v16, %v3879_v32  ;;  %v14185_v32 = vor.u32 %v18017_v43, %v14184_v61  ;;  %9426 = vmatpush.bf16.msra.mxu2 %v15025_v41  ;;  %v19616_v16 = vpop.eup %18862  ;;  %v14105_v41 = vor.u32 %v17997_v38, %v14104_v52  ;;  %v18077_v61 = vld [vmem:[#allocation11 + $0x3e4] sm:$0xf0] }
 0x245   :  { %vm4340_vm2 = vweird.f32 %v19616_v16 }
 0x246   :  { %v3867_v11 = vpop.f32.mrf.mxu2  ;;  %v4128_v13 = vrot.slane %v19601_v8, 4  ;;  %v4170_v55 = vmul.f32 %v19601_v8, %v19601_v8  ;;  %9384 = vmatpush.bf16.msrb.mxu1 %v14185_v32  ;;  %vm4341_vm6 = vmor %vm4339_vm5, %vm4340_vm2  ;;  %vm4411_vm2 = vcmask 1045508  }
 0x247   :  { %v4324_v11 = vmul.f32 %v19614_v44, %v19599_v53  ;;  %9414 = vmatpush.bf16.msra.mxu0 %v14665_v59  ;;  %9398 = vmatpush.bf16.msrb.mxu3 %v14465_v21  ;;  %v18507_v59 = vld [vmem:[#allocation11 + $0x1154] sm:$0xf0] }
 0x248   :  { %v4129_v0 = vadd.f32 %v4128_v13, %v19601_v8  ;;  %v4215_v15 = vrot.slane %v4170_v55, 4 }
 0x249   :  { %v4325_v30 = vmul.f32 %v19614_v44, %v4324_v11 }
 0x24a   :  { %v4130_v26 = vrot.slane %v4129_v0, 2  ;;  %v4216_v47 = vadd.f32 %v4215_v15, %v4170_v55  ;;  %v14985_v55 = vor.u32 %v18217_v5, %v14984_v60  ;;  %v4334_v15 = vmul.f32 %v19616_v16, %v19603_v10  ;;  %9385 = vmatpush.bf16.msrb.mxu1 %v14145_v42 }
 0x24b   :  { %v3893_v36 = vpop.f32.mrf.mxu1  ;;  %v4326_v60 = vmul.f32 0.5, %v4325_v30 }
 0x24c   :  { %v4131_v37 = vadd.f32 %v4130_v26, %v4129_v0  ;;  %v4217_v40 = vrot.slane %v4216_v47, 2  ;;  %v19620_v0 = vpop.eup %18864  ;;  %9427 = vmatpush.bf16.msra.mxu2 %v14985_v55  ;;  %v14625_v26 = vor.u32 %v18127_v23, %v14624_v20  ;;  %v4335_v43 = vmul.f32 %v19616_v16, %v4334_v15  ;;  %v16464_v55 = vld [vmem:[#allocation11 + $0x13b0] sm:$0xf]  ;;  %v17987_v15 = vld [vmem:[#allocation11 + $0x114] sm:$0xf0] }
 0x24d   :  { %v16465_v39 = vor.u32 %v18587_v58, %v16464_v55  ;;  %vm4350_vm8 = vweird.f32 %v19620_v0  ;;  %v14024_v55 = vld [vmem:[#allocation11 + $0xa0] sm:$0xf] }
 0x24e   :  { %v4132_v28 = vrot.slane %v4131_v37, 1  ;;  %v4218_v27 = vadd.f32 %v4217_v40, %v4216_v47  ;;  %v18207_v47 = vld [vmem:[#allocation11 + $0x7f4] sm:$0xf0]  ;;  %v4344_v40 = vmul.f32 %v19620_v0, %v19609_v56  ;;  %9415 = vmatpush.bf16.msra.mxu0 %v14625_v26  ;;  %9386 = vmatpush.bf16.msrb.mxu1 %v14105_v41  ;;  %v4336_v21 = vmul.f32 0.5, %v4335_v43  ;;  %vm19648_vm10 = vmor %vm4349_vm9, %vm4350_vm8  ;;  %v18577_v56 = vld [vmem:[#allocation11 + $0x1384] sm:$0xf0] }
 0x24f   :  { %v14945_v48 = vor.u32 %v18207_v47, %v14944_v18  ;;  %v14065_v26 = vor.u32 %v17987_v15, %v14064_v12  ;;  %v18067_v47 = vld [vmem:[#allocation11 + $0x394] sm:$0xf0]  ;;  %v18057_v12 = vld [vmem:[#allocation11 + $0x344] sm:$0xf0] }
 0x250   :  { %v4133_v1 = vadd.f32 %v4132_v28, %v4131_v37  ;;  %v4219_v13 = vrot.slane %v4218_v27, 1  ;;  %v14424_v37 = vld [vmem:[#allocation11 + $0x3c0] sm:$0xf]  ;;  %v18117_v28 = vld [vmem:[#allocation11 + $0x524] sm:$0xf0]  ;;  %v4345_v50 = vmul.f32 %v19620_v0, %v4344_v40  ;;  %v4337_v38 = vsub.f32 1.5, %v4336_v21 }
 0x251   :  { %9428 = vmatpush.bf16.msra.mxu2 %v14945_v48  ;;  %v14425_v45 = vor.u32 %v18077_v61, %v14424_v37  ;;  %v14585_v9 = vor.u32 %v18117_v28, %v14584_v51  ;;  %v18487_v21 = vld [vmem:[#allocation11 + $0x10b4] sm:$0xf0] }
 0x252   :  { %v19625_v34 = vmul.f32 %v19375_v54, %v4133_v1  ;;  %v4220_v19 = vadd.f32 %v4219_v13, %v4218_v27  ;;  %v14904_v27 = vld [vmem:[#allocation11 + $0x780] sm:$0xf]  ;;  %v16145_v13 = vor.u32 %v18507_v59, %v16144_v25  ;;  %9387 = vmatpush.bf16.msrb.mxu1 %v14065_v26  ;;  %v4346_v48 = vmul.f32 0.5, %v4345_v50 }
 0x253   :  { %9399 = vmatpush.bf16.msrb.mxu3 %v14425_v45  ;;  %v14905_v1 = vor.u32 %v18197_v4, %v14904_v27  ;;  %9416 = vmatpush.bf16.msra.mxu0 %v14585_v9  ;;  %v4338_v43 = vmul.f32 %v19616_v16, %v4337_v38  ;;  %v14304_v38 = vld [vmem:[#allocation11 + $0x2d0] sm:$0xf] }
 0x254   :  { %v4240_v63 = vmul.f32 %v4220_v19, %v19375_v54  ;;  %v4250_v35 = vmul.f32 %v19625_v34, %v19625_v34  ;;  %v14384_v19 = vld [vmem:[#allocation11 + $0x370] sm:$0xf]  ;;  %v4347_v41 = vsub.f32 1.5, %v4346_v48  ;;  %v17967_v48 = vld [vmem:[#allocation11 + $0x74] sm:$0xf0] }
 0x255   :  { %9429 = vmatpush.bf16.msra.mxu2 %v14905_v1  ;;  %v4342_v4 = vsel %vm4341_vm6, %v19616_v16, %v4338_v43 }
 0x256   :  { %v4260_v32 = vsub.f32 %v4240_v63, %v4250_v35  ;;  %v14385_v63 = vor.u32 %v18067_v47, %v14384_v19  ;;  %v4348_v27 = vmul.f32 %v19620_v0, %v4347_v41  ;;  %v16064_v19 = vld [vmem:[#allocation11 + $0x1090] sm:$0xf]  ;;  %v18567_v47 = vld [vmem:[#allocation11 + $0x1334] sm:$0xf0] }
 0x257   :  { %v3917_v36 = vpop.f32.mrf.mxu1  ;;  %9461 = vmatpush.bf16.msrb.mxu0 %v16145_v13  ;;  %v16424_v13 = vld [vmem:[#allocation11 + $0x1360] sm:$0xf]  ;;  %v4079_v41 = vld [vmem:[#allocation8] sm:$0xff] }
 0x258   :  { %v4270_v5 = vmax.f32 %v4260_v32, 0.0  ;;  %9400 = vmatpush.bf16.msrb.mxu3 %v14385_v63  ;;  %v4352_v10 = vsel %vm19648_vm10, %v19620_v0, %v4348_v27  ;;  %v16425_v50 = vor.u32 %v18577_v56, %v16424_v13  ;;  %v16024_v27 = vld [vmem:[#allocation11 + $0x1040] sm:$0xf]  ;;  %v18037_v13 = vld [vmem:[#allocation11 + $0x2a4] sm:$0xf0] }
 0x259   :  { %9474 = vmatpush.bf16.msrb.mxu2 %v16465_v39  ;;  %v14344_v39 = vld [vmem:[#allocation11 + $0x320] sm:$0xf]  ;;  %v4398_v15 = vrot.slane %v4352_v10, 2  ;;  %v15504_v56 = vld [vmem:[#allocation11 + $0xc30] sm:$0xf] }
 0x25a   :  { %v4280_v20 = vadd.f32 1e-05, %v4270_v5  ;;  %v3943_v18 = vpop.f32.mrf.mxu0  ;;  %v16104_v5 = vld [vmem:[#allocation11 + $0x10e0] sm:$0xf] }
 0x25b   :  { %v3904_v11 = vpop.f32.mrf.mxu3  ;;  %v13944_v10 = vld [vmem:[#allocation11] sm:$0xf] }
 0x25c   :  { %v3918_v42 = vadd.f32 %v3917_v36, %v3904_v11  ;;  %18866 = vrsqrt.f32 %v4280_v20  ;;  %v4327_v36 = vsub.f32 1.5, %v4326_v60  ;;  %v4397_v60 = vrot.slane %v4342_v4, 3  ;;  %v18497_v11 = vld [vmem:[#allocation11 + $0x1104] sm:$0xf0]  ;;  %v16344_v4 = vld [vmem:[#allocation11 + $0x12c0] sm:$0xf] }
 0x25d   :  { %v16105_v16 = vor.u32 %v18497_v11, %v16104_v5  ;;  %vm4359_vm12 = vweird.f32 %v4280_v20  ;;  %9475 = vmatpush.bf16.msrb.mxu2 %v16425_v50 }
 0x25e   :  { %v3930_v23 = vpop.f32.mrf.mxu2  ;;  %v4328_v40 = vmul.f32 %v19614_v44, %v4327_v36 }
 0x25f   :  { %v3931_v30 = vadd.f32 %v3930_v23, %v3918_v42  ;;  %v3919_v35 = vpop.f32.mrf.mxu1  ;;  %v17977_v42 = vld [vmem:[#allocation11 + $0xc4] sm:$0xf0]  ;;  %9462 = vmatpush.bf16.msrb.mxu0 %v16105_v16  ;;  %v16384_v23 = vld [vmem:[#allocation11 + $0x1310] sm:$0xf]  ;;  %v14264_v16 = vld [vmem:[#allocation11 + $0x280] sm:$0xf] }
 0x260   :  { %v4332_v28 = vsel %vm4331_vm4, %v19614_v44, %v4328_v40  ;;  %v14025_v26 = vor.u32 %v17977_v42, %v14024_v55  ;;  %v16065_v35 = vor.u32 %v18487_v21, %v16064_v19  ;;  %v16385_v36 = vor.u32 %v18567_v47, %v16384_v23  ;;  %v4077_v40 = vld [vmem:[#allocation7] sm:$0xff]  ;;  %v18347_v42 = vld [vmem:[#allocation11 + $0xc54] sm:$0xf0]  ;;  %v15984_v19 = vld [vmem:[#allocation11 + $0xff0] sm:$0xf] }
 0x261   :  { %v19635_v52 = vadd.f32 %v3943_v18, %v3931_v30  ;;  %v4396_v59 = vrot.slane %v4332_v28, 4  ;;  %v13984_v30 = vld [vmem:[#allocation11 + $0x50] sm:$0xf]  ;;  %v14265_v50 = vor.u32 %v18037_v13, %v14264_v16  ;;  %v18467_v21 = vld [vmem:[#allocation11 + $0x1014] sm:$0xf0] }
 0x262   :  { %v18867_v61 = vpop.eup %18866  ;;  %v3945_v45 = vpop.f32.mrf.mxu0  ;;  %9388 = vmatpush.bf16.msrb.mxu1 %v14025_v26  ;;  %v13985_v43 = vor.u32 %v17967_v48, %v13984_v30  ;;  %9476 = vmatpush.bf16.msrb.mxu2 %v16385_v36  ;;  %v15784_v13 = vld [vmem:[#allocation11 + $0xe60] sm:$0xf] }
 0x263   :  { %v3906_v37 = vpop.f32.mrf.mxu3  ;;  %v4354_v51 = vmul.f32 %v18867_v61, %v4280_v20  ;;  %vm4360_vm11 = vweird.f32 %v18867_v61  ;;  %v14345_v20 = vor.u32 %v18057_v12, %v14344_v39  ;;  %v4408_v63 = vsel %vm4407_vm14, %v4396_v59, %v4397_v60  ;;  %v19660_v45 = vld [vmem:[#allocation10] sm:$0xff]  ;;  %9463 = vmatpush.bf16.msrb.mxu0 %v16065_v35  ;;  %v18557_v60 = vld [vmem:[#allocation11 + $0x12e4] sm:$0xf0]  ;;  %v15824_v39 = vld [vmem:[#allocation11 + $0xeb0] sm:$0xf] }
 0x264   :  { %vm4361_vm13 = vmor %vm4359_vm12, %vm4360_vm11  ;;  %v18047_v37 = vld [vmem:[#allocation11 + $0x2f4] sm:$0xf0]  ;;  %v16345_v11 = vor.u32 %v18557_v60, %v16344_v4  ;;  %v4553_v23 = vunpack.c.l.bf16 %v19660_v45 }
 0x265   :  { %v4355_v9 = vmul.f32 %v18867_v61, %v4354_v51  ;;  %9401 = vmatpush.bf16.msrb.mxu3 %v14345_v20  ;;  %v18427_v12 = vld [vmem:[#allocation11 + $0xed4] sm:$0xf0]  ;;  %v15985_v20 = vor.u32 %v18467_v21, %v15984_v19  ;;  %v4554_v19 = vunpack.c.h.bf16 %v19660_v45  ;;  %v18537_v21 = vld [vmem:[#allocation11 + $0x1244] sm:$0xf0] }
 0x266   :  { %v3932_v32 = vpop.f32.mrf.mxu2  ;;  %9389 = vmatpush.bf16.msrb.mxu1 %v13985_v43  ;;  %9477 = vmatpush.bf16.msrb.mxu2 %v16345_v11  ;;  %v15825_v26 = vor.u32 %v18427_v12, %v15824_v39  ;;  %v15944_v39 = vld [vmem:[#allocation11 + $0xfa0] sm:$0xf]  ;;  %v18457_v12 = vld [vmem:[#allocation11 + $0xfc4] sm:$0xf0] }
 0x267   :  { %v4356_v25 = vmul.f32 0.5, %v4355_v9  ;;  %v14305_v32 = vor.u32 %v18047_v37, %v14304_v38  ;;  %v18477_v9 = vld [vmem:[#allocation11 + $0x1064] sm:$0xf0] }
 0x268   :  { %v16025_v53 = vor.u32 %v18477_v9, %v16024_v27 }
 0x269   :  { %v4357_v44 = vsub.f32 1.5, %v4356_v25  ;;  %9402 = vmatpush.bf16.msrb.mxu3 %v14305_v32 }
 0x26a   :  { %9464 = vmatpush.bf16.msrb.mxu0 %v16025_v53 }
 0x26b   :  { %v4358_v58 = vmul.f32 %v18867_v61, %v4357_v44  ;;  %v17957_v44 = vld [vmem:[#allocation11 + $0x24] sm:$0xf0] }
 0x26d   :  { %v4362_v0 = vsel %vm4361_vm13, %v18867_v61, %v4358_v58  ;;  %v13945_v58 = vor.u32 %v17957_v44, %v13944_v10  ;;  %9403 = vmatpush.bf16.msrb.mxu3 %v14265_v50 }
 0x26e   :  { %v19655_v1 = vpop.f32.mrf.mxu2  ;;  %v4399_v18 = vrot.slane %v4362_v0, 1  ;;  %v15505_v0 = vor.u32 %v18347_v42, %v15504_v56  ;;  %9465 = vmatpush.bf16.msrb.mxu0 %v15985_v20  ;;  %v18417_v56 = vld [vmem:[#allocation11 + $0xe84] sm:$0xf0]  ;;  %v18327_v20 = vld [vmem:[#allocation11 + $0xbb4] sm:$0xf0] }
 0x26f   :  { %9390 = vmatpush.bf16.msrb.mxu1 %v13945_v58 }
 0x270   :  { %v4410_v61 = vsel %vm4409_vm0, %v4398_v15, %v4399_v18 }
 0x271   :  { %v4412_v51 = vsel %vm4411_vm2, %v4408_v63, %v4410_v61  ;;  %9448 = vmatpush.bf16.msra.mxu3 %v15825_v26  ;;  %v15424_v26 = vld [vmem:[#allocation11 + $0xb90] sm:$0xf] }
 0x272   :  { %v4414_v25 = vsel %vm4413_vm3, %v19532_v62, %v4412_v51  ;;  %v19669_v62 = vmul.f32 5.0, %v4079_v41 }
 0x273   :  { %v4418_v5 = vmul.f32 %v4414_v25, %v4077_v40  ;;  %9435 = vmatpush.bf16.msra.mxu1 %v15505_v0 }
 0x275   :  { %v19667_v15 = vmul.f32 5.0, %v4418_v5  ;;  %v15464_v5 = vld [vmem:[#allocation11 + $0xbe0] sm:$0xf] }
 0x276   :  { %v3984_v59 = vpop.f32.mrf.mxu2 }
 0x277   :  { %v19663_v28 = vpop.f32.mrf.mxu1  ;;  %v4426_v47 = vperm.slane %v19667_v15, 0  ;;  %v4427_v30 = vperm.slane %v19667_v15, 1  ;;  %v4428_v63 = vperm.slane %v19667_v15, 2  ;;  %v4429_v35 = vperm.slane %v19667_v15, 3  ;;  %v18547_v59 = vld [vmem:[#allocation11 + $0x1294] sm:$0xf0] }
 0x278   :  { %v4430_v36 = vperm.slane %v19667_v15, 4  ;;  %v4431_v48 = vperm.slane %v19667_v15, 5  ;;  %v4432_v38 = vperm.slane %v19667_v15, 6  ;;  %v4433_v37 = vperm.slane %v19667_v15, 7  ;;  %v16264_v15 = vld [vmem:[#allocation11 + $0x1220] sm:$0xf] }
 0x279   :  { %v4447_v40 = vmul.f32 %v4427_v30, %v19399_v7  ;;  %v4448_v41 = vmul.f32 %v4428_v63, %v19464_v29  ;;  %v4449_v61 = vmul.f32 %v4429_v35, %v19486_v49  ;;  %v4486_v29 = vmul.f32 %v4426_v47, %v19351_v33  ;;  %v16304_v49 = vld [vmem:[#allocation11 + $0x1270] sm:$0xf]  ;;  %v18337_v33 = vld [vmem:[#allocation11 + $0xc04] sm:$0xf0] }
 0x27a   :  { %v19685_v43 = vpop.f32.mrf.mxu0  ;;  %v4450_v51 = vmul.f32 %v4430_v36, %v19582_v3  ;;  %v4451_v27 = vmul.f32 %v4431_v48, %v19585_v14  ;;  %v4452_v9 = vmul.f32 %v4432_v38, %v19591_v24  ;;  %v4453_v4 = vmul.f32 %v4433_v37, %v19625_v34 }
 0x27b   :  { %v3956_v55 = vpop.f32.mrf.mxu3  ;;  %v4467_v25 = vrot.slane %v4448_v41, 6  ;;  %v4468_v7 = vrot.slane %v4449_v61, 5  ;;  %v4487_v11 = vmul.f32 %v4427_v30, %v19385_v57  ;;  %v4488_v16 = vmul.f32 %v4428_v63, %v19450_v22 }
 0x27c   :  { %v3957_v18 = vadd.f32 %v3956_v55, %v19635_v52  ;;  %v4446_v52 = vmul.f32 %v4426_v47, %v19378_v6  ;;  %v4466_v6 = vrot.slane %v4447_v40, 7  ;;  %v4469_v60 = vrot.slane %v4450_v51, 4 }
 0x27d   :  { %v4470_v10 = vrot.slane %v4451_v27, 3  ;;  %v4471_v3 = vrot.slane %v4452_v9, 2  ;;  %v4472_v44 = vrot.slane %v4453_v4, 1  ;;  %v4475_v34 = vsel %vm4403_vm15, %v4467_v25, %v4468_v7  ;;  %v4082_v4 = vld [vmem:[#allocation10 + $0x8] sm:$0xff] }
 0x27e   :  { %v4474_v24 = vsel %vm4401_vm7, %v4446_v52, %v4466_v6  ;;  %v4489_v42 = vmul.f32 %v4429_v35, %v19471_v31  ;;  %v4490_v57 = vmul.f32 %v4430_v36, %v19538_v46  ;;  %v4491_v22 = vmul.f32 %v4431_v48, %v19549_v2 }
 0x27f   :  { %v3971_v32 = vpop.f32.mrf.mxu1  ;;  %v4476_v55 = vsel %vm4405_vm1, %v4474_v24, %v4475_v34  ;;  %v4477_v58 = vsel %vm4407_vm14, %v4469_v60, %v4470_v10  ;;  %v4478_v50 = vsel %vm4409_vm0, %v4471_v3, %v4472_v44  ;;  %v4493_v30 = vmul.f32 %v4433_v37, %v19601_v8  ;;  %v15744_v60 = vld [vmem:[#allocation11 + $0xe10] sm:$0xf]  ;;  %v18407_v10 = vld [vmem:[#allocation11 + $0xe34] sm:$0xf0] }
 0x280   :  { %v4479_v0 = vsel %vm4411_vm2, %v4477_v58, %v4478_v50  ;;  %v3970_v31 = vadd.f32 %v19663_v28, %v3957_v18  ;;  %v16305_v63 = vor.u32 %v18547_v59, %v16304_v49  ;;  %v15465_v52 = vor.u32 %v18337_v33, %v15464_v5  ;;  %v15904_v3 = vld [vmem:[#allocation11 + $0xf50] sm:$0xf]  ;;  %v18447_v34 = vld [vmem:[#allocation11 + $0xf74] sm:$0xf0] }
 0x281   :  { %v4480_v47 = vsel %vm4413_vm3, %v4476_v55, %v4479_v0  ;;  %v15785_v40 = vor.u32 %v18417_v56, %v15784_v13  ;;  %v15945_v41 = vor.u32 %v18457_v12, %v15944_v39  ;;  %v4492_v2 = vmul.f32 %v4432_v38, %v19574_v17 }
 0x282   :  { %v19692_v53 = vpop.f32.mrf.mxu2  ;;  %v4484_v35 = vsub.f32 %v19669_v62, %v4480_v47  ;;  %v3997_v46 = vpop.f32.mrf.mxu0  ;;  %v19712_v36 = vadd.f32 %v19655_v1, %v3970_v31  ;;  %9478 = vmatpush.bf16.msrb.mxu2 %v16305_v63  ;;  %v16265_v48 = vor.u32 %v18537_v21, %v16264_v15  ;;  %v15425_v61 = vor.u32 %v18327_v20, %v15424_v26  ;;  %v16224_v20 = vld [vmem:[#allocation11 + $0x11d0] sm:$0xf]  ;;  %v18527_v47 = vld [vmem:[#allocation11 + $0x11f4] sm:$0xf0]  ;;  %v18317_v31 = vld [vmem:[#allocation11 + $0xb64] sm:$0xf0] }
 0x283   :  { %v3958_v14 = vpop.f32.mrf.mxu3  ;;  %9436 = vmatpush.bf16.msra.mxu1 %v15465_v52  ;;  %9449 = vmatpush.bf16.msra.mxu3 %v15785_v40  ;;  %v4555_v55 = vunpack.c.l.bf16 %v4082_v4  ;;  %v4556_v58 = vunpack.c.h.bf16 %v4082_v4  ;;  %v15745_v39 = vor.u32 %v18407_v10, %v15744_v60  ;;  %v15905_v12 = vor.u32 %v18447_v34, %v15904_v3  ;;  %v18397_v46 = vld [vmem:[#allocation11 + $0xde4] sm:$0xf0]  ;;  %v18307_v4 = vld [vmem:[#allocation11 + $0xb14] sm:$0xf0]  ;;  %v19739_v3 = vld [vmem:[#allocation10 + $0x18] sm:$0xff] }
 0x284   :  { %v4498_v32 = vperm.slane %v4484_v35, 0  ;;  %v4499_v51 = vperm.slane %v4484_v35, 1  ;;  %v4500_v8 = vperm.slane %v4484_v35, 2  ;;  %v4501_v37 = vperm.slane %v4484_v35, 3  ;;  %9466 = vmatpush.bf16.msrb.mxu0 %v15945_v41  ;;  %v15704_v41 = vld [vmem:[#allocation11 + $0xdc0] sm:$0xf] }
 0x285   :  { %v4502_v62 = vperm.slane %v4484_v35, 4  ;;  %v4503_v18 = vperm.slane %v4484_v35, 5  ;;  %v4504_v27 = vperm.slane %v4484_v35, 6  ;;  %v4505_v9 = vperm.slane %v4484_v35, 7  ;;  %v18092_v34 = vld [vmem:[#allocation11 + $0x464] sm:$0xf] }
 0x286   :  { %v4518_v17 = vadd.f32 %v4498_v32, %v4486_v29  ;;  %v4519_v38 = vadd.f32 %v4499_v51, %v4487_v11  ;;  %v4520_v1 = vadd.f32 %v4500_v8, %v4488_v16  ;;  %v4521_v6 = vadd.f32 %v4501_v37, %v4489_v42  ;;  %9479 = vmatpush.bf16.msrb.mxu2 %v16265_v48  ;;  %v18437_v48 = vld [vmem:[#allocation11 + $0xf24] sm:$0xf0] }
 0x287   :  { %v4522_v25 = vadd.f32 %v4502_v62, %v4490_v57  ;;  %v4523_v7 = vadd.f32 %v4503_v18, %v4491_v22  ;;  %v4524_v49 = vadd.f32 %v4504_v27, %v4492_v2  ;;  %v4525_v59 = vadd.f32 %v4505_v9, %v4493_v30  ;;  %9437 = vmatpush.bf16.msra.mxu1 %v15425_v61  ;;  %v15384_v30 = vld [vmem:[#allocation11 + $0xb40] sm:$0xf]  ;;  %v18517_v32 = vld [vmem:[#allocation11 + $0x11a4] sm:$0xf0]  ;;  %v18022_v62 = vld [vmem:[#allocation11 + $0x234] sm:$0xf] }
 0x288   :  { %v4528_v44 = vmax.f32 %v4518_v17, 0.0  ;;  %v4529_v14 = vmax.f32 %v4519_v38, 0.0  ;;  %v4530_v5 = vmax.f32 %v4520_v1, 0.0  ;;  %v4531_v24 = vmax.f32 %v4521_v6, 0.0  ;;  %9450 = vmatpush.bf16.msra.mxu3 %v15745_v39  ;;  %9467 = vmatpush.bf16.msrb.mxu0 %v15905_v12  ;;  %v15864_v2 = vld [vmem:[#allocation11 + $0xf00] sm:$0xf] }
 0x289   :  { %v4532_v33 = vmax.f32 %v4522_v25, 0.0  ;;  %v4533_v13 = vmax.f32 %v4523_v7, 0.0  ;;  %v4534_v29 = vmax.f32 %v4524_v49, 0.0  ;;  %v4535_v11 = vmax.f32 %v4525_v59, 0.0  ;;  %v16184_v61 = vld [vmem:[#allocation11 + $0x1180] sm:$0xf] }
 0x28a   :  { %v4010_v28 = vpop.f32.mrf.mxu2  ;;  %v4538_v16 = vpack.c.bf16 %v4529_v14, %v4528_v44  ;;  %v4539_v56 = vpack.c.bf16 %v4531_v24, %v4530_v5  ;;  %v4134_v21 = vrot.slane %v19712_v36, 4  ;;  %v4171_v26 = vmul.f32 %v19712_v36, %v19712_v36  ;;  %v18102_v18 = vld [vmem:[#allocation11 + $0x4b4] sm:$0xf]  ;;  %v14546_v27 = vld [vmem:[#allocation11 + $0x4d8] sm:$0xf0] }
 0x28b   :  { %v19714_v50 = vpack.c.bf16 %v4533_v13, %v4532_v33  ;;  %v19716_v42 = vpack.c.bf16 %v4535_v11, %v4534_v29  ;;  %v15344_v9 = vld [vmem:[#allocation11 + $0xaf0] sm:$0xf]  ;;  %v16225_v1 = vor.u32 %v18527_v47, %v16224_v20  ;;  %v15385_v6 = vor.u32 %v18317_v31, %v15384_v30  ;;  %v18387_v49 = vld [vmem:[#allocation11 + $0xd94] sm:$0xf0]  ;;  %v19744_v47 = vld [vmem:[#allocation10 + $0x10] sm:$0xff] }
 0x28c   :  { %v4543_v15 = vunpack.c.l.bf16 %v4538_v16  ;;  %v4544_v0 = vunpack.c.h.bf16 %v4538_v16  ;;  %v4545_v57 = vunpack.c.l.bf16 %v4539_v56  ;;  %v4546_v22 = vunpack.c.h.bf16 %v4539_v56  ;;  %v15664_v7 = vld [vmem:[#allocation11 + $0xd70] sm:$0xf]  ;;  %v14506_v16 = vld [vmem:[#allocation11 + $0x488] sm:$0xf0]  ;;  %v15304_v56 = vld [vmem:[#allocation11 + $0xaa0] sm:$0xf] }
 0x28d   :  { %v4135_v17 = vadd.f32 %v4134_v21, %v19712_v36  ;;  %v4221_v38 = vrot.slane %v4171_v26, 4  ;;  %v15705_v59 = vor.u32 %v18397_v46, %v15704_v41  ;;  %v15865_v60 = vor.u32 %v18437_v48, %v15864_v2  ;;  %9480 = vmatpush.bf16.msrb.mxu2 %v16225_v1  ;;  %9438 = vmatpush.bf16.msra.mxu1 %v15385_v6  ;;  %v18002_v21 = vld [vmem:[#allocation11 + $0x194] sm:$0xf]  ;;  %v14466_v2 = vld [vmem:[#allocation11 + $0x438] sm:$0xf0] }
 0x28e   :  { %v4563_v63 = vmul.f32 %v4553_v23, %v4543_v15  ;;  %v4564_v35 = vmul.f32 %v4554_v19, %v4544_v0  ;;  %v4565_v52 = vmul.f32 %v4555_v55, %v4545_v57  ;;  %v4566_v40 = vmul.f32 %v4556_v58, %v4546_v22  ;;  %v14226_v23 = vld [vmem:[#allocation11 + $0x258] sm:$0xf0]  ;;  %v18297_v55 = vld [vmem:[#allocation11 + $0xac4] sm:$0xf0]  ;;  %v15624_v15 = vld [vmem:[#allocation11 + $0xd20] sm:$0xf] }
 0x28f   :  { %v4009_v19 = vadd.f32 %v19692_v53, %v19685_v43  ;;  %v16185_v10 = vor.u32 %v18517_v32, %v16184_v61  ;;  %v18012_v43 = vld [vmem:[#allocation11 + $0x1e4] sm:$0xf]  ;;  %v14186_v53 = vld [vmem:[#allocation11 + $0x208] sm:$0xf0]  ;;  %v4136_v44 = vrot.slane %v4135_v17, 2  ;;  %v4222_v14 = vadd.f32 %v4221_v38, %v4171_v26  ;;  %9451 = vmatpush.bf16.msra.mxu3 %v15705_v59  ;;  %9468 = vmatpush.bf16.msrb.mxu0 %v15865_v60 }
 0x290   :  { %v19725_v8 = vpack.c.bf16 %v4563_v63, %v4563_v63  ;;  %v19727_v37 = vpack.c.bf16 %v4564_v35, %v4564_v35  ;;  %v19729_v28 = vpack.c.bf16 %v4565_v52, %v4565_v52  ;;  %v19731_v45 = vpack.c.bf16 %v4566_v40, %v4566_v40  ;;  %v18377_v0 = vld [vmem:[#allocation11 + $0xd44] sm:$0xf0]  ;;  %v14146_v26 = vld [vmem:[#allocation11 + $0x1b8] sm:$0xf0]  ;;  %v18082_v40 = vld [vmem:[#allocation11 + $0x414] sm:$0xf] }
 0x291   :  { %v14229_v24 = vor.u32 %v18022_v62, %v14226_v23  ;;  %v14549_v33 = vor.u32 %v18102_v18, %v14546_v27  ;;  %v15345_v13 = vor.u32 %v18307_v4, %v15344_v9  ;;  %v15665_v29 = vor.u32 %v18387_v49, %v15664_v7  ;;  %9481 = vmatpush.bf16.msrb.mxu2 %v16185_v10  ;;  %v15264_v48 = vld [vmem:[#allocation11 + $0xa50] sm:$0xf]  ;;  %v18287_v61 = vld [vmem:[#allocation11 + $0xa74] sm:$0xf0]  ;;  %v17992_v38 = vld [vmem:[#allocation11 + $0x144] sm:$0xf] }
 0x292   :  { %9391 = vmatmul.bf16.vlgmr.msrb.gmra.mxu1 %v19725_v8  ;;  %9404 = vmatmul.bf16.vlgmr.msrb.gmra.mxu3 %v19727_v37  ;;  %v4137_v58 = vadd.f32 %v4136_v44, %v4135_v17  ;;  %v4223_v39 = vrot.slane %v4222_v14, 2  ;;  %v14189_v12 = vor.u32 %v18012_v43, %v14186_v53  ;;  %v4549_v57 = vunpack.c.l.bf16 %v19716_v42  ;;  %v18367_v27 = vld [vmem:[#allocation11 + $0xcf4] sm:$0xf0]  ;;  %v14106_v1 = vld [vmem:[#allocation11 + $0x168] sm:$0xf0] }
 0x293   :  { %9417 = vmatmul.bf16.vlgmr.msra.gmra.mxu0 %v19729_v28  ;;  %9430 = vmatmul.bf16.vlgmr.msra.gmra.mxu2 %v19731_v45  ;;  %v4559_v22 = vunpack.c.l.bf16 %v19739_v3  ;;  %v15305_v35 = vor.u32 %v18297_v55, %v15304_v56  ;;  %v14509_v41 = vor.u32 %v18092_v34, %v14506_v16  ;;  %v15625_v46 = vor.u32 %v18377_v0, %v15624_v15  ;;  %v18072_v59 = vld [vmem:[#allocation11 + $0x3c4] sm:$0xf]  ;;  %v14426_v53 = vld [vmem:[#allocation11 + $0x3e8] sm:$0xf0]  ;;  %v15224_v44 = vld [vmem:[#allocation11 + $0xa00] sm:$0xf] }
 0x294   :  { %9513 = vmatpush.bf16.msra.mxu0 %v14229_v24  ;;  %v4138_v30 = vrot.slane %v4137_v58, 1  ;;  %v4224_v31 = vadd.f32 %v4223_v39, %v4222_v14  ;;  %9439 = vmatpush.bf16.msra.mxu1 %v15345_v13  ;;  %v14149_v18 = vor.u32 %v18002_v21, %v14146_v26  ;;  %v4547_v9 = vunpack.c.l.bf16 %v19714_v50  ;;  %v18277_v14 = vld [vmem:[#allocation11 + $0xa24] sm:$0xf0]  ;;  %v15544_v34 = vld [vmem:[#allocation11 + $0xc80] sm:$0xf] }
 0x295   :  { %9526 = vmatpush.bf16.msra.mxu2 %v14549_v33  ;;  %9452 = vmatpush.bf16.msra.mxu3 %v15665_v29  ;;  %v4557_v4 = vunpack.c.l.bf16 %v19744_v47  ;;  %v4560_v17 = vunpack.c.h.bf16 %v19739_v3  ;;  %v4569_v6 = vmul.f32 %v4559_v22, %v4549_v57  ;;  %v14469_v7 = vor.u32 %v18082_v40, %v14466_v2  ;;  %v18357_v33 = vld [vmem:[#allocation11 + $0xca4] sm:$0xf0]  ;;  %v14066_v16 = vld [vmem:[#allocation11 + $0x118] sm:$0xf0]  ;;  %v18062_v57 = vld [vmem:[#allocation11 + $0x374] sm:$0xf] }
 0x296   :  { %v4139_v32 = vadd.f32 %v4138_v30, %v4137_v58  ;;  %v4225_v62 = vrot.slane %v4224_v31, 1  ;;  %v15265_v49 = vor.u32 %v18287_v61, %v15264_v48  ;;  %v4548_v3 = vunpack.c.h.bf16 %v19714_v50  ;;  %v14386_v22 = vld [vmem:[#allocation11 + $0x398] sm:$0xf0]  ;;  %v16784_v30 = vld [vmem:[#allocation11 + $0x1630] sm:$0xf] }
 0x297   :  { %v4034_v51 = vpop.f32.mrf.mxu1  ;;  %v14109_v24 = vor.u32 %v17992_v38, %v14106_v1  ;;  %v4567_v13 = vmul.f32 %v4557_v4, %v4547_v9  ;;  %v19755_v56 = vpack.c.bf16 %v4569_v6, %v4569_v6  ;;  %v14429_v58 = vor.u32 %v18072_v59, %v14426_v53  ;;  %v18747_v40 = vld [vmem:[#allocation11 + $0x18d4] sm:$0xf0]  ;;  %v18052_v2 = vld [vmem:[#allocation11 + $0x324] sm:$0xf]  ;;  %v16744_v4 = vld [vmem:[#allocation11 + $0x15e0] sm:$0xf] }
 0x298   :  { %9514 = vmatpush.bf16.msra.mxu0 %v14189_v12  ;;  %9440 = vmatpush.bf16.msra.mxu1 %v15305_v35  ;;  %v19751_v60 = vmul.f32 %v19375_v54, %v4139_v32  ;;  %v4226_v10 = vadd.f32 %v4225_v62, %v4224_v31  ;;  %v15225_v39 = vor.u32 %v18277_v14, %v15224_v44  ;;  %v18667_v31 = vld [vmem:[#allocation11 + $0x1654] sm:$0xf0]  ;;  %v14026_v35 = vld [vmem:[#allocation11 + $0xc8] sm:$0xf0]  ;;  %v17064_v38 = vld [vmem:[#allocation11 + $0x1860] sm:$0xf] }
 0x299   :  { %9527 = vmatpush.bf16.msra.mxu2 %v14509_v41  ;;  %9453 = vmatpush.bf16.msra.mxu3 %v15625_v46  ;;  %v15545_v0 = vor.u32 %v18357_v33, %v15544_v34  ;;  %v19763_v41 = vpack.c.bf16 %v4567_v13, %v4567_v13  ;;  %v16785_v48 = vor.u32 %v18667_v31, %v16784_v30  ;;  %v14306_v14 = vld [vmem:[#allocation11 + $0x2f8] sm:$0xf0]  ;;  %v16704_v34 = vld [vmem:[#allocation11 + $0x1590] sm:$0xf]  ;;  %v18647_v33 = vld [vmem:[#allocation11 + $0x15b4] sm:$0xf0] }
 0x29a   :  { %v4047_v11 = vpop.f32.mrf.mxu0  ;;  %v4241_v15 = vmul.f32 %v4226_v10, %v19375_v54  ;;  %v4251_v50 = vmul.f32 %v19751_v60, %v19751_v60  ;;  %v17024_v13 = vld [vmem:[#allocation11 + $0x1810] sm:$0xf]  ;;  %v15826_v30 = vld [vmem:[#allocation11 + $0xed8] sm:$0xf0]  ;;  %v16664_v31 = vld [vmem:[#allocation11 + $0x1540] sm:$0xf] }
 0x29b   :  { %v4021_v25 = vpop.f32.mrf.mxu3 }
 0x29c   :  { %v4022_v5 = vadd.f32 %v4021_v25, %v4009_v19  ;;  %v15584_v19 = vld [vmem:[#allocation11 + $0xcd0] sm:$0xf]  ;;  %9515 = vmatpush.bf16.msra.mxu0 %v14149_v18  ;;  %9441 = vmatpush.bf16.msra.mxu1 %v15265_v49  ;;  %v4261_v32 = vsub.f32 %v4241_v15, %v4251_v50  ;;  %v14389_v18 = vor.u32 %v18062_v57, %v14386_v22  ;;  %v18042_v49 = vld [vmem:[#allocation11 + $0x2d4] sm:$0xf]  ;;  %v15506_v15 = vld [vmem:[#allocation11 + $0xc58] sm:$0xf0] }
 0x29d   :  { %v15585_v43 = vor.u32 %v18367_v27, %v15584_v19  ;;  %9528 = vmatpush.bf16.msra.mxu2 %v14469_v7  ;;  %v14346_v19 = vld [vmem:[#allocation11 + $0x348] sm:$0xf0]  ;;  %v17962_v27 = vld [vmem:[#allocation11 + $0x54] sm:$0xf]  ;;  %v18737_v7 = vld [vmem:[#allocation11 + $0x1884] sm:$0xf0]  ;;  %v16705_v50 = vor.u32 %v18647_v33, %v16704_v34 }
 0x29e   :  { %v4035_v63 = vadd.f32 %v4034_v51, %v4022_v5  ;;  %v4550_v51 = vunpack.c.h.bf16 %v19716_v42  ;;  %v4558_v5 = vunpack.c.h.bf16 %v19744_v47  ;;  %v17972_v47 = vld [vmem:[#allocation11 + $0xa4] sm:$0xf]  ;;  %v17065_v10 = vor.u32 %v18737_v7, %v17064_v38  ;;  %v16624_v38 = vld [vmem:[#allocation11 + $0x14f0] sm:$0xf]  ;;  %v18617_v34 = vld [vmem:[#allocation11 + $0x14c4] sm:$0xf0] }
 0x29f   :  { %v4036_v20 = vpop.f32.mrf.mxu1  ;;  %9454 = vmatpush.bf16.msra.mxu3 %v15585_v43  ;;  %v4271_v43 = vmax.f32 %v4261_v32, 0.0  ;;  %v14349_v44 = vor.u32 %v18052_v2, %v14346_v19  ;;  %v18332_v32 = vld [vmem:[#allocation11 + $0xbe4] sm:$0xf]  ;;  %v16904_v33 = vld [vmem:[#allocation11 + $0x1720] sm:$0xf] }
 0x2a0   :  { %v4048_v25 = vadd.f32 %v4047_v11, %v4035_v63  ;;  %v4570_v29 = vmul.f32 %v4560_v17, %v4550_v51  ;;  %v17982_v11 = vld [vmem:[#allocation11 + $0xf4] sm:$0xf]  ;;  %v4568_v21 = vmul.f32 %v4558_v5, %v4548_v3  ;;  %9516 = vmatpush.bf16.msra.mxu0 %v14109_v24  ;;  %9442 = vmatpush.bf16.msra.mxu1 %v15225_v39  ;;  %v18657_v17 = vld [vmem:[#allocation11 + $0x1604] sm:$0xf0]  ;;  %v17952_v3 = vld [vmem:[#allocation11 + $0x4] sm:$0xf] }
 0x2a1   :  { %v14069_v20 = vor.u32 %v17982_v11, %v14066_v16  ;;  %9529 = vmatpush.bf16.msra.mxu2 %v14429_v58  ;;  %v14029_v51 = vor.u32 %v17972_v47, %v14026_v35  ;;  %v16745_v59 = vor.u32 %v18657_v17, %v16744_v4  ;;  %v13946_v16 = vld [vmem:[#allocation11 + $0x28] sm:$0xf0]  ;;  %v18032_v58 = vld [vmem:[#allocation11 + $0x284] sm:$0xf]  ;;  %v19776_v57 = vadd.f32 1e-05, %v4271_v43 }
 0x2a2   :  { %v4060_v52 = vpop.f32.mrf.mxu2  ;;  %v4049_v42 = vpop.f32.mrf.mxu0  ;;  %v19765_v46 = vpack.c.bf16 %v4570_v29, %v4570_v29  ;;  %v19770_v9 = vpack.c.bf16 %v4568_v21, %v4568_v21  ;;  %v14266_v39 = vld [vmem:[#allocation11 + $0x2a8] sm:$0xf0]  ;;  %v13949_v47 = vor.u32 %v17952_v3, %v13946_v16  ;;  %v18637_v35 = vld [vmem:[#allocation11 + $0x1564] sm:$0xf0]  ;;  %v18412_v17 = vld [vmem:[#allocation11 + $0xe64] sm:$0xf] }
 0x2a3   :  { %v4023_v23 = vpop.f32.mrf.mxu3  ;;  %v4061_v55 = vadd.f32 %v4060_v52, %v4048_v25  ;;  %9469 = vmatmul.bf16.vlgmr.msrb.gmra.mxu0 %v19755_v56  ;;  %v17104_v52 = vld [vmem:[#allocation11 + $0x18b0] sm:$0xf]  ;;  %9455 = vmatpush.bf16.msra.mxu3 %v15545_v0  ;;  %v13986_v25 = vld [vmem:[#allocation11 + $0x78] sm:$0xf0]  ;;  %18868 = vrsqrt.f32 %v19776_v57  ;;  %v18322_v43 = vld [vmem:[#allocation11 + $0xb94] sm:$0xf]  ;;  %vm4369_vm9 = vweird.f32 %v19776_v57 }
 0x2a4   :  { %v17105_v61 = vor.u32 %v18747_v40, %v17104_v52  ;;  %9482 = vmatmul.bf16.vlgmr.msrb.gmra.mxu2 %v19765_v46  ;;  %9517 = vmatpush.bf16.msra.mxu0 %v14069_v20  ;;  %v13989_v24 = vor.u32 %v17962_v27, %v13986_v25  ;;  %v18422_v20 = vld [vmem:[#allocation11 + $0xeb4] sm:$0xf]  ;;  %v15746_v16 = vld [vmem:[#allocation11 + $0xe38] sm:$0xf0] }
 0x2a5   :  { %9443 = vmatmul.bf16.vlgmr.msra.gmra.mxu1 %v19763_v41  ;;  %9530 = vmatpush.bf16.msra.mxu2 %v14389_v18  ;;  %v15829_v4 = vor.u32 %v18422_v20, %v15826_v30  ;;  %v18402_v3 = vld [vmem:[#allocation11 + $0xe14] sm:$0xf]  ;;  %v16864_v20 = vld [vmem:[#allocation11 + $0x16d0] sm:$0xf]  ;;  %v18392_v30 = vld [vmem:[#allocation11 + $0xdc4] sm:$0xf] }
 0x2a6   :  { %9456 = vmatmul.bf16.vlgmr.msra.gmra.mxu3 %v19770_v9  ;;  %9487 = vmatpush.bf16.msrb.mxu1 %v16785_v48  ;;  %v16984_v48 = vld [vmem:[#allocation11 + $0x17c0] sm:$0xf] }
 0x2a7   :  { %9500 = vmatpush.bf16.msrb.mxu3 %v17105_v61  ;;  %v18717_v61 = vld [vmem:[#allocation11 + $0x17e4] sm:$0xf0] }
 0x2a8   :  { %9518 = vmatpush.bf16.msra.mxu0 %v14029_v51  ;;  %v16985_v18 = vor.u32 %v18717_v61, %v16984_v48  ;;  %v14269_v51 = vor.u32 %v18032_v58, %v14266_v39  ;;  %v18312_v58 = vld [vmem:[#allocation11 + $0xb44] sm:$0xf]  ;;  %v15386_v39 = vld [vmem:[#allocation11 + $0xb68] sm:$0xf0]  ;;  %v18382_v61 = vld [vmem:[#allocation11 + $0xd74] sm:$0xf] }
 0x2a9   :  { %9531 = vmatpush.bf16.msra.mxu2 %v14349_v44 }
 0x2aa   :  { %v4062_v12 = vpop.f32.mrf.mxu2  ;;  %9488 = vmatpush.bf16.msrb.mxu1 %v16745_v59  ;;  %v16944_v59 = vld [vmem:[#allocation11 + $0x1770] sm:$0xf] }
 0x2ab   :  { %v4073_v26 = vpop.f32.mrf.mxu3  ;;  %9501 = vmatpush.bf16.msrb.mxu3 %v17065_v10  ;;  %v18342_v12 = vld [vmem:[#allocation11 + $0xc34] sm:$0xf]  ;;  %v18707_v10 = vld [vmem:[#allocation11 + $0x1794] sm:$0xf0] }
 0x2ac   :  { %v19760_v63 = vadd.f32 %v4073_v26, %v4061_v55  ;;  %v18727_v55 = vld [vmem:[#allocation11 + $0x1834] sm:$0xf0]  ;;  %v14309_v26 = vor.u32 %v18042_v49, %v14306_v14  ;;  %9519 = vmatpush.bf16.msra.mxu0 %v13989_v24  ;;  %v15509_v2 = vor.u32 %v18342_v12, %v15506_v15  ;;  %v15786_v49 = vld [vmem:[#allocation11 + $0xe88] sm:$0xf0]  ;;  %v16945_v44 = vor.u32 %v18707_v10, %v16944_v59  ;;  %v16584_v24 = vld [vmem:[#allocation11 + $0x14a0] sm:$0xf] }
 0x2ad   :  { %v17025_v0 = vor.u32 %v18727_v55, %v17024_v13  ;;  %v19786_v13 = vpop.eup %18868  ;;  %v18697_v55 = vld [vmem:[#allocation11 + $0x1744] sm:$0xf0]  ;;  %v16585_v12 = vor.u32 %v18617_v34, %v16584_v24  ;;  %v18262_v59 = vld [vmem:[#allocation11 + $0x9b4] sm:$0xf] }
 0x2ae   :  { %v4140_v62 = vrot.slane %v19760_v63, 4  ;;  %v4172_v23 = vmul.f32 %v19760_v63, %v19760_v63  ;;  %9489 = vmatpush.bf16.msrb.mxu1 %v16705_v50  ;;  %9532 = vmatpush.bf16.msra.mxu2 %v14309_v26  ;;  %v16905_v15 = vor.u32 %v18697_v55, %v16904_v33  ;;  %v18607_v26 = vld [vmem:[#allocation11 + $0x1474] sm:$0xf0]  ;;  %v18282_v33 = vld [vmem:[#allocation11 + $0xa54] sm:$0xf]  ;;  %vm4370_vm5 = vweird.f32 %v19786_v13 }
 0x2af   :  { %9502 = vmatpush.bf16.msrb.mxu3 %v17025_v0  ;;  %v4364_v0 = vmul.f32 %v19786_v13, %v19776_v57  ;;  %v15266_v55 = vld [vmem:[#allocation11 + $0xa78] sm:$0xf0]  ;;  %vm4371_vm10 = vmor %vm4369_vm9, %vm4370_vm5 }
 0x2b0   :  { %v4141_v1 = vadd.f32 %v4140_v62, %v19760_v63  ;;  %v4227_v6 = vrot.slane %v4172_v23, 4  ;;  %v15466_v62 = vld [vmem:[#allocation11 + $0xc08] sm:$0xf0]  ;;  %9520 = vmatpush.bf16.msra.mxu0 %v13949_v47  ;;  %v15389_v47 = vor.u32 %v18312_v58, %v15386_v39  ;;  %v18252_v58 = vld [vmem:[#allocation11 + $0x964] sm:$0xf] }
 0x2b1   :  { %v15469_v7 = vor.u32 %v18332_v32, %v15466_v62  ;;  %v15666_v32 = vld [vmem:[#allocation11 + $0xd98] sm:$0xf0]  ;;  %v4365_v62 = vmul.f32 %v19786_v13, %v4364_v0  ;;  %v15146_v39 = vld [vmem:[#allocation11 + $0x988] sm:$0xf0] }
 0x2b2   :  { %v4142_v42 = vrot.slane %v4141_v1, 2  ;;  %v4228_v53 = vadd.f32 %v4227_v6, %v4172_v23  ;;  %v16665_v23 = vor.u32 %v18637_v35, %v16664_v31  ;;  %9533 = vmatpush.bf16.msra.mxu2 %v14269_v51  ;;  %v15706_v31 = vld [vmem:[#allocation11 + $0xde8] sm:$0xf0]  ;;  %v18687_v35 = vld [vmem:[#allocation11 + $0x16f4] sm:$0xf0]  ;;  %v15149_v0 = vor.u32 %v18252_v58, %v15146_v39 }
 0x2b3   :  { %v4075_v5 = vpop.f32.mrf.mxu3  ;;  %9503 = vmatpush.bf16.msrb.mxu3 %v16985_v18  ;;  %9521 = vmatmul.bf16.vlgmr.msra.gmra.mxu0 %v19725_v8  ;;  %v16865_v48 = vor.u32 %v18687_v35, %v16864_v20  ;;  %v18292_v18 = vld [vmem:[#allocation11 + $0xaa4] sm:$0xf]  ;;  %v16504_v51 = vld [vmem:[#allocation11 + $0x1400] sm:$0xf]  ;;  %v15586_v20 = vld [vmem:[#allocation11 + $0xcf8] sm:$0xf0] }
 0x2b4   :  { %v4143_v29 = vadd.f32 %v4142_v42, %v4141_v1  ;;  %v4229_v11 = vrot.slane %v4228_v53, 2  ;;  %v18627_v1 = vld [vmem:[#allocation11 + $0x1514] sm:$0xf0]  ;;  %9565 = vmatpush.bf16.msrb.mxu0 %v15509_v2  ;;  %v15426_v42 = vld [vmem:[#allocation11 + $0xbb8] sm:$0xf0]  ;;  %9490 = vmatpush.bf16.msrb.mxu1 %v16665_v23  ;;  %v15789_v5 = vor.u32 %v18412_v17, %v15786_v49  ;;  %v15709_v23 = vor.u32 %v18392_v30, %v15706_v31 }
 0x2b5   :  { %9534 = vmatmul.bf16.vlgmr.msra.gmra.mxu2 %v19727_v37  ;;  %v18597_v17 = vld [vmem:[#allocation11 + $0x1424] sm:$0xf0]  ;;  %v14866_v49 = vld [vmem:[#allocation11 + $0x758] sm:$0xf0]  ;;  %v15269_v30 = vor.u32 %v18282_v33, %v15266_v55  ;;  %v18162_v31 = vld [vmem:[#allocation11 + $0x694] sm:$0xf] }
 0x2b6   :  { %v4144_v22 = vrot.slane %v4143_v29, 1  ;;  %v4230_v21 = vadd.f32 %v4229_v11, %v4228_v53  ;;  %v16625_v53 = vor.u32 %v18627_v1, %v16624_v38  ;;  %9578 = vmatpush.bf16.msrb.mxu2 %v15829_v4  ;;  %v15429_v11 = vor.u32 %v18322_v43, %v15426_v42  ;;  %v16824_v38 = vld [vmem:[#allocation11 + $0x1680] sm:$0xf]  ;;  %v18677_v1 = vld [vmem:[#allocation11 + $0x16a4] sm:$0xf0] }
 0x2b7   :  { %9504 = vmatpush.bf16.msrb.mxu3 %v16945_v44  ;;  %v15186_v42 = vld [vmem:[#allocation11 + $0x9d8] sm:$0xf0]  ;;  %v18732_v39 = vld [vmem:[#allocation11 + $0x1864] sm:$0xf] }
 0x2b8   :  { %v4145_v52 = vadd.f32 %v4144_v22, %v4143_v29  ;;  %v4231_v40 = vrot.slane %v4230_v21, 1  ;;  %9566 = vmatpush.bf16.msrb.mxu0 %v15469_v7  ;;  %9491 = vmatpush.bf16.msrb.mxu1 %v16625_v53  ;;  %v15749_v22 = vor.u32 %v18402_v3, %v15746_v16  ;;  %v18182_v7 = vld [vmem:[#allocation11 + $0x734] sm:$0xf]  ;;  %v4366_v53 = vmul.f32 0.5, %v4365_v62  ;;  %v18372_v3 = vld [vmem:[#allocation11 + $0xd24] sm:$0xf] }
 0x2b9   :  { %v14869_v43 = vor.u32 %v18182_v7, %v14866_v49  ;;  %v15189_v24 = vor.u32 %v18262_v59, %v15186_v42  ;;  %v14786_v35 = vld [vmem:[#allocation11 + $0x6b8] sm:$0xf0]  ;;  %v18232_v7 = vld [vmem:[#allocation11 + $0x8c4] sm:$0xf]  ;;  %v15066_v49 = vld [vmem:[#allocation11 + $0x8e8] sm:$0xf0] }
 0x2ba   :  { %v19780_v19 = vmul.f32 %v19375_v54, %v4145_v52  ;;  %v4232_v27 = vadd.f32 %v4231_v40, %v4230_v21  ;;  %9579 = vmatpush.bf16.msrb.mxu2 %v15789_v5  ;;  %v16544_v21 = vld [vmem:[#allocation11 + $0x1450] sm:$0xf]  ;;  %v18302_v52 = vld [vmem:[#allocation11 + $0xaf4] sm:$0xf]  ;;  %v15346_v40 = vld [vmem:[#allocation11 + $0xb18] sm:$0xf0] }
 0x2bb   :  { %9505 = vmatpush.bf16.msrb.mxu3 %v16905_v15  ;;  %v16545_v2 = vor.u32 %v18607_v26, %v16544_v21  ;;  %v15349_v4 = vor.u32 %v18302_v52, %v15346_v40  ;;  %v15626_v5 = vld [vmem:[#allocation11 + $0xd48] sm:$0xf0]  ;;  %v18242_v52 = vld [vmem:[#allocation11 + $0x914] sm:$0xf]  ;;  %v16786_v62 = vld [vmem:[#allocation11 + $0x1658] sm:$0xf0] }
 0x2bc   :  { %v4242_v6 = vmul.f32 %v4232_v27, %v19375_v54  ;;  %v4252_v25 = vmul.f32 %v19780_v19, %v19780_v19  ;;  %9567 = vmatpush.bf16.msrb.mxu0 %v15429_v11  ;;  %9492 = vmatpush.bf16.msrb.mxu1 %v16585_v12  ;;  %v15306_v27 = vld [vmem:[#allocation11 + $0xac8] sm:$0xf0]  ;;  %v18362_v12 = vld [vmem:[#allocation11 + $0xcd4] sm:$0xf]  ;;  %v15629_v26 = vor.u32 %v18372_v3, %v15626_v5  ;;  %v14706_v33 = vld [vmem:[#allocation11 + $0x618] sm:$0xf0] }
 0x2bd   :  { %v15309_v34 = vor.u32 %v18292_v18, %v15306_v27  ;;  %v14826_v11 = vld [vmem:[#allocation11 + $0x708] sm:$0xf0]  ;;  %v18742_v42 = vld [vmem:[#allocation11 + $0x18b4] sm:$0xf] }
 0x2be   :  { %v4262_v14 = vsub.f32 %v4242_v6, %v4252_v25  ;;  %9580 = vmatpush.bf16.msrb.mxu2 %v15749_v22  ;;  %v16505_v6 = vor.u32 %v18597_v17, %v16504_v51  ;;  %v16825_v25 = vor.u32 %v18677_v1, %v16824_v38  ;;  %v4367_v22 = vsub.f32 1.5, %v4366_v53  ;;  %v15546_v17 = vld [vmem:[#allocation11 + $0xca8] sm:$0xf0]  ;;  %v18152_v38 = vld [vmem:[#allocation11 + $0x644] sm:$0xf] }
 0x2bf   :  { %9506 = vmatpush.bf16.msrb.mxu3 %v16865_v48  ;;  %v15106_v48 = vld [vmem:[#allocation11 + $0x938] sm:$0xf0]  ;;  %v14746_v1 = vld [vmem:[#allocation11 + $0x668] sm:$0xf0]  ;;  %v18652_v53 = vld [vmem:[#allocation11 + $0x15e4] sm:$0xf] }
 0x2c0   :  { %v4272_v29 = vmax.f32 %v4262_v14, 0.0  ;;  %9568 = vmatpush.bf16.msrb.mxu0 %v15389_v47  ;;  %9493 = vmatpush.bf16.msrb.mxu1 %v16545_v2  ;;  %v15669_v14 = vor.u32 %v18382_v61, %v15666_v32  ;;  %v18272_v47 = vld [vmem:[#allocation11 + $0xa04] sm:$0xf]  ;;  %v15226_v2 = vld [vmem:[#allocation11 + $0xa28] sm:$0xf0]  ;;  %v15109_v18 = vor.u32 %v18242_v52, %v15106_v48  ;;  %v4368_v27 = vmul.f32 %v19786_v13, %v4367_v22 }
 0x2c1   :  { %v18352_v61 = vld [vmem:[#allocation11 + $0xc84] sm:$0xf]  ;;  %v18662_v32 = vld [vmem:[#allocation11 + $0x1634] sm:$0xf]  ;;  %v16746_v3 = vld [vmem:[#allocation11 + $0x1608] sm:$0xf0]  ;;  %v14749_v5 = vor.u32 %v18152_v38, %v14746_v1 }
 0x2c2   :  { %v19789_v50 = vadd.f32 1e-05, %v4272_v29  ;;  %9581 = vmatpush.bf16.msrb.mxu2 %v15709_v23  ;;  %v18172_v29 = vld [vmem:[#allocation11 + $0x6e4] sm:$0xf]  ;;  %v14789_v23 = vor.u32 %v18162_v31, %v14786_v35  ;;  %v15549_v57 = vor.u32 %v18352_v61, %v15546_v17  ;;  %v16749_v58 = vor.u32 %v18652_v53, %v16746_v3  ;;  %v16706_v22 = vld [vmem:[#allocation11 + $0x15b8] sm:$0xf0] }
 0x2c3   :  { %9507 = vmatpush.bf16.msrb.mxu3 %v16825_v25  ;;  %v14829_v15 = vor.u32 %v18172_v29, %v14826_v11  ;;  %v15229_v25 = vor.u32 %v18272_v47, %v15226_v2  ;;  %v15026_v29 = vld [vmem:[#allocation11 + $0x898] sm:$0xf0]  ;;  %v18132_v47 = vld [vmem:[#allocation11 + $0x5a4] sm:$0xf]  ;;  %v4080_v31 = vld [vmem:[#allocation8 + $0x8] sm:$0x3] }
 0x2c4   :  { %18870 = vrsqrt.f32 %v19789_v50  ;;  %9569 = vmatpush.bf16.msrb.mxu0 %v15349_v4  ;;  %9494 = vmatpush.bf16.msrb.mxu1 %v16505_v6  ;;  %vm4379_vm6 = vweird.f32 %v19789_v50  ;;  %v15589_v4 = vor.u32 %v18362_v12, %v15586_v20  ;;  %v4078_v6 = vld [vmem:[#allocation7 + $0x8] sm:$0x3]  ;;  %v18722_v52 = vld [vmem:[#allocation11 + $0x1814] sm:$0xf]  ;;  %v17026_v61 = vld [vmem:[#allocation11 + $0x1838] sm:$0xf0] }
 0x2c5   :  { %v17066_v12 = vld [vmem:[#allocation11 + $0x1888] sm:$0xf0]  ;;  %v18122_v17 = vld [vmem:[#allocation11 + $0x554] sm:$0xf]  ;;  %v14626_v38 = vld [vmem:[#allocation11 + $0x578] sm:$0xf0] }
 0x2c6   :  { %9582 = vmatpush.bf16.msrb.mxu2 %v15669_v14  ;;  %v17069_v35 = vor.u32 %v18732_v39, %v17066_v12  ;;  %v4423_v1 = vmul.f32 5.0, %v4080_v31  ;;  %v16626_v53 = vld [vmem:[#allocation11 + $0x1518] sm:$0xf0]  ;;  %v18612_v39 = vld [vmem:[#allocation11 + $0x14a4] sm:$0xf] }
 0x2c7   :  { %9552 = vmatpush.bf16.msra.mxu3 %v15189_v24  ;;  %v18142_v24 = vld [vmem:[#allocation11 + $0x5f4] sm:$0xf]  ;;  %v16586_v12 = vld [vmem:[#allocation11 + $0x14c8] sm:$0xf0] }
 0x2c8   :  { %9539 = vmatpush.bf16.msra.mxu1 %v14869_v43  ;;  %9570 = vmatpush.bf16.msrb.mxu0 %v15309_v34  ;;  %v16789_v43 = vor.u32 %v18662_v32, %v16786_v62  ;;  %v4372_v34 = vsel %vm4371_vm10, %v19786_v13, %v4368_v27  ;;  %v14709_v13 = vor.u32 %v18142_v24, %v14706_v33  ;;  %v18632_v32 = vld [vmem:[#allocation11 + $0x1544] sm:$0xf]  ;;  %v18202_v27 = vld [vmem:[#allocation11 + $0x7d4] sm:$0xf]  ;;  %v14586_v24 = vld [vmem:[#allocation11 + $0x528] sm:$0xf0] }
 0x2c9   :  { %v18602_v31 = vld [vmem:[#allocation11 + $0x1454] sm:$0xf] }
 0x2ca   :  { %v19795_v10 = vpop.eup %18870  ;;  %9583 = vmatpush.bf16.msrb.mxu2 %v15629_v26  ;;  %v14986_v26 = vld [vmem:[#allocation11 + $0x848] sm:$0xf0] }
 0x2cb   :  { %v4374_v44 = vmul.f32 %v19795_v10, %v19789_v50  ;;  %vm4380_vm4 = vweird.f32 %v19795_v10  ;;  %9553 = vmatpush.bf16.msra.mxu3 %v15149_v0  ;;  %v17106_v50 = vld [vmem:[#allocation11 + $0x18d8] sm:$0xf0] }
 0x2cc   :  { %9540 = vmatpush.bf16.msra.mxu1 %v14829_v15  ;;  %vm4381_vm8 = vmor %vm4379_vm6, %vm4380_vm4  ;;  %9571 = vmatpush.bf16.msrb.mxu0 %v15269_v30  ;;  %v18642_v15 = vld [vmem:[#allocation11 + $0x1594] sm:$0xf]  ;;  %v14666_v30 = vld [vmem:[#allocation11 + $0x5c8] sm:$0xf0] }
 0x2cd   :  { %v4375_v16 = vmul.f32 %v19795_v10, %v4374_v44  ;;  %v15069_v44 = vor.u32 %v18232_v7, %v15066_v49  ;;  %v16709_v48 = vor.u32 %v18642_v15, %v16706_v22 }
 0x2ce   :  { %9584 = vmatpush.bf16.msrb.mxu2 %v15589_v4 }
 0x2cf   :  { %v4376_v21 = vmul.f32 0.5, %v4375_v16  ;;  %9554 = vmatpush.bf16.msra.mxu3 %v15109_v18  ;;  %v17109_v16 = vor.u32 %v18742_v42, %v17106_v50  ;;  %v14669_v18 = vor.u32 %v18132_v47, %v14666_v30  ;;  %v18622_v42 = vld [vmem:[#allocation11 + $0x14f4] sm:$0xf] }
 0x2d0   :  { %9541 = vmatpush.bf16.msra.mxu1 %v14789_v23  ;;  %9572 = vmatpush.bf16.msrb.mxu0 %v15229_v25  ;;  %v16666_v23 = vld [vmem:[#allocation11 + $0x1568] sm:$0xf0]  ;;  %v18712_v25 = vld [vmem:[#allocation11 + $0x17c4] sm:$0xf]  ;;  %v16629_v33 = vor.u32 %v18622_v42, %v16626_v53 }
 0x2d1   :  { %v4377_v40 = vsub.f32 1.5, %v4376_v21  ;;  %v18212_v21 = vld [vmem:[#allocation11 + $0x824] sm:$0xf]  ;;  %v16826_v42 = vld [vmem:[#allocation11 + $0x16a8] sm:$0xf0] }
 0x2d2   :  { %9585 = vmatpush.bf16.msrb.mxu2 %v15549_v57  ;;  %v14989_v62 = vor.u32 %v18212_v21, %v14986_v26  ;;  %v4085_v21 = vld [vmem:[#allocation10 + $0x20] sm:$0xff]  ;;  %v18692_v26 = vld [vmem:[#allocation11 + $0x1724] sm:$0xf] }
 0x2d3   :  { %v4378_v51 = vmul.f32 %v19795_v10, %v4377_v40  ;;  %9555 = vmatpush.bf16.msra.mxu3 %v15069_v44  ;;  %9573 = vmatmul.bf16.vlgmr.msrb.gmra.mxu0 %v19763_v41  ;;  %v14629_v44 = vor.u32 %v18122_v17, %v14626_v38  ;;  %v18502_v17 = vld [vmem:[#allocation11 + $0x1134] sm:$0xf]  ;;  %v16146_v38 = vld [vmem:[#allocation11 + $0x1158] sm:$0xf0] }
 0x2d4   :  { %9617 = vmatpush.bf16.msra.mxu0 %v16789_v43  ;;  %9542 = vmatpush.bf16.msra.mxu1 %v14749_v5  ;;  %v16986_v43 = vld [vmem:[#allocation11 + $0x17e8] sm:$0xf0]  ;;  %v18112_v5 = vld [vmem:[#allocation11 + $0x504] sm:$0xf] }
 0x2d5   :  { %v4382_v59 = vsel %vm4381_vm8, %v19795_v10, %v4378_v51  ;;  %v18222_v10 = vld [vmem:[#allocation11 + $0x874] sm:$0xf]  ;;  %9586 = vmatmul.bf16.vlgmr.msrb.gmra.mxu2 %v19770_v9  ;;  %v14946_v51 = vld [vmem:[#allocation11 + $0x7f8] sm:$0xf0]  ;;  %v16989_v57 = vor.u32 %v18712_v25, %v16986_v43  ;;  %v14589_v15 = vor.u32 %v18112_v5, %v14586_v24  ;;  %v18672_v43 = vld [vmem:[#allocation11 + $0x1684] sm:$0xf] }
 0x2d6   :  { %v4400_v14 = vrot.slane %v4382_v59, 7  ;;  %v15029_v0 = vor.u32 %v18222_v10, %v15026_v29  ;;  %9630 = vmatpush.bf16.msra.mxu2 %v17109_v16  ;;  %v16669_v59 = vor.u32 %v18632_v32, %v16666_v23  ;;  %v14949_v50 = vor.u32 %v18202_v27, %v14946_v51  ;;  %v18702_v10 = vld [vmem:[#allocation11 + $0x1774] sm:$0xf]  ;;  %v16946_v29 = vld [vmem:[#allocation11 + $0x1798] sm:$0xf0] }
 0x2d7   :  { %v16866_v32 = vld [vmem:[#allocation11 + $0x16f8] sm:$0xf0]  ;;  %v16506_v27 = vld [vmem:[#allocation11 + $0x1428] sm:$0xf0]  ;;  %v14872_v51 = vld [vmem:[#allocation11 + $0x738] sm:$0xf] }
 0x2d8   :  { %v4415_v11 = vsel %vm4401_vm7, %v4372_v34, %v4400_v14  ;;  %9618 = vmatpush.bf16.msra.mxu0 %v16749_v58  ;;  %9556 = vmatpush.bf16.msra.mxu3 %v15029_v0  ;;  %v18192_v14 = vld [vmem:[#allocation11 + $0x784] sm:$0xf]  ;;  %v14832_v5 = vld [vmem:[#allocation11 + $0x6e8] sm:$0xf] }
 0x2d9   :  { %v4419_v55 = vmul.f32 %v4415_v11, %v4078_v6  ;;  %9543 = vmatpush.bf16.msra.mxu1 %v14709_v13  ;;  %v17029_v6 = vor.u32 %v18722_v52, %v17026_v61  ;;  %v16949_v13 = vor.u32 %v18702_v10, %v16946_v29  ;;  %v4561_v52 = vunpack.c.l.bf16 %v4085_v21  ;;  %v18682_v61 = vld [vmem:[#allocation11 + $0x16d4] sm:$0xf]  ;;  %v18572_v10 = vld [vmem:[#allocation11 + $0x1364] sm:$0xf]  ;;  %v16426_v29 = vld [vmem:[#allocation11 + $0x1388] sm:$0xf0] }
 0x2da   :  { %9631 = vmatpush.bf16.msra.mxu2 %v17069_v35  ;;  %v16869_v25 = vor.u32 %v18682_v61, %v16866_v32  ;;  %v16346_v61 = vld [vmem:[#allocation11 + $0x12e8] sm:$0xf0] }
 0x2db   :  { %v4421_v20 = vmul.f32 5.0, %v4419_v55 }
 0x2dc   :  { %9619 = vmatpush.bf16.msra.mxu0 %v16709_v48  ;;  %9557 = vmatpush.bf16.msra.mxu3 %v14989_v62 }
 0x2dd   :  { %v4434_v40 = vperm.slane %v4421_v20, 0  ;;  %v4435_v2 = vperm.slane %v4421_v20, 1  ;;  %9544 = vmatpush.bf16.msra.mxu1 %v14669_v18  ;;  %v16906_v20 = vld [vmem:[#allocation11 + $0x1748] sm:$0xf0]  ;;  %v18592_v18 = vld [vmem:[#allocation11 + $0x1404] sm:$0xf] }
 0x2de   :  { %9632 = vmatpush.bf16.msra.mxu2 %v17029_v6 }
 0x2df   :  { %v4455_v4 = vmul.f32 %v4435_v2, %v19780_v19  ;;  %v4454_v7 = vmul.f32 %v4434_v40, %v19751_v60  ;;  %v14906_v19 = vld [vmem:[#allocation11 + $0x7a8] sm:$0xf0]  ;;  %v4494_v60 = vmul.f32 %v4434_v40, %v19712_v36  ;;  %v4495_v16 = vmul.f32 %v4435_v2, %v19760_v63  ;;  %v16546_v63 = vld [vmem:[#allocation11 + $0x1478] sm:$0xf0] }
 0x2e0   :  { %9620 = vmatpush.bf16.msra.mxu0 %v16669_v59  ;;  %9558 = vmatpush.bf16.msra.mxu3 %v14949_v50  ;;  %v14909_v11 = vor.u32 %v18192_v14, %v14906_v19  ;;  %v16589_v36 = vor.u32 %v18612_v39, %v16586_v12  ;;  %v4562_v40 = vunpack.c.h.bf16 %v4085_v21  ;;  %v16909_v2 = vor.u32 %v18692_v26, %v16906_v20  ;;  %v15192_v14 = vld [vmem:[#allocation11 + $0x9b8] sm:$0xf]  ;;  %v18268_v19 = vld [vmem:[#allocation11 + $0x9dc] sm:$0xf0]  ;;  %v18562_v21 = vld [vmem:[#allocation11 + $0x1314] sm:$0xf] }
 0x2e1   :  { %v4473_v49 = vrot.slane %v4455_v4, 7  ;;  %9545 = vmatpush.bf16.msra.mxu1 %v14629_v44  ;;  %v16549_v48 = vor.u32 %v18602_v31, %v16546_v63  ;;  %v18188_v4 = vld [vmem:[#allocation11 + $0x75c] sm:$0xf0]  ;;  %v16509_v59 = vor.u32 %v18592_v18, %v16506_v27  ;;  %v14792_v12 = vld [vmem:[#allocation11 + $0x698] sm:$0xf] }
 0x2e2   :  { %9633 = vmatpush.bf16.msra.mxu2 %v16989_v57  ;;  %v14873_v44 = vor.u32 %v18188_v4, %v14872_v51  ;;  %v18492_v57 = vld [vmem:[#allocation11 + $0x10e4] sm:$0xf]  ;;  %v14752_v63 = vld [vmem:[#allocation11 + $0x648] sm:$0xf]  ;;  %v18238_v18 = vld [vmem:[#allocation11 + $0x8ec] sm:$0xf0] }
 0x2e3   :  { %v4481_v3 = vsel %vm4401_vm7, %v4454_v7, %v4473_v49  ;;  %v18582_v7 = vld [vmem:[#allocation11 + $0x13b4] sm:$0xf]  ;;  %v16466_v49 = vld [vmem:[#allocation11 + $0x13d8] sm:$0xf0]  ;;  %v14712_v51 = vld [vmem:[#allocation11 + $0x5f8] sm:$0xf] }
 0x2e4   :  { %v4485_v34 = vsub.f32 %v4423_v1, %v4481_v3  ;;  %9621 = vmatpush.bf16.msra.mxu0 %v16629_v33  ;;  %9559 = vmatpush.bf16.msra.mxu3 %v14909_v11  ;;  %v16149_v3 = vor.u32 %v18502_v17, %v16146_v38  ;;  %v16469_v24 = vor.u32 %v18582_v7, %v16466_v49  ;;  %v18148_v17 = vld [vmem:[#allocation11 + $0x61c] sm:$0xf0]  ;;  %v18462_v38 = vld [vmem:[#allocation11 + $0xff4] sm:$0xf] }
 0x2e5   :  { %9546 = vmatpush.bf16.msra.mxu1 %v14589_v15  ;;  %v16829_v33 = vor.u32 %v18672_v43, %v16826_v42  ;;  %v15193_v11 = vor.u32 %v18268_v19, %v15192_v14  ;;  %v16429_v15 = vor.u32 %v18572_v10, %v16426_v29  ;;  %v14713_v49 = vor.u32 %v18148_v17, %v14712_v51  ;;  %v18228_v43 = vld [vmem:[#allocation11 + $0x89c] sm:$0xf0]  ;;  %v18138_v19 = vld [vmem:[#allocation11 + $0x5cc] sm:$0xf0]  ;;  %v16472_v17 = vld [vmem:[#allocation11 + $0x13b8] sm:$0xf] }
 0x2e6   :  { %v4506_v55 = vperm.slane %v4485_v34, 0  ;;  %v4507_v58 = vperm.slane %v4485_v34, 1  ;;  %9634 = vmatpush.bf16.msra.mxu2 %v16949_v13  ;;  %v18178_v34 = vld [vmem:[#allocation11 + $0x70c] sm:$0xf0]  ;;  %v16066_v13 = vld [vmem:[#allocation11 + $0x10b8] sm:$0xf0] }
 0x2e7   :  { %v18218_v10 = vld [vmem:[#allocation11 + $0x84c] sm:$0xf0] }
 0x2e8   :  { %v4526_v0 = vadd.f32 %v4506_v55, %v4494_v60  ;;  %v4527_v22 = vadd.f32 %v4507_v58, %v4495_v16  ;;  %9622 = vmatpush.bf16.msra.mxu0 %v16589_v36  ;;  %v16106_v60 = vld [vmem:[#allocation11 + $0x1108] sm:$0xf0]  ;;  %v14833_v16 = vor.u32 %v18178_v34, %v14832_v5  ;;  %v15152_v55 = vld [vmem:[#allocation11 + $0x968] sm:$0xf]  ;;  %v18258_v58 = vld [vmem:[#allocation11 + $0x98c] sm:$0xf0] }
 0x2e9   :  { %v16109_v39 = vor.u32 %v18492_v57, %v16106_v60  ;;  %v16386_v36 = vld [vmem:[#allocation11 + $0x1338] sm:$0xf0]  ;;  %v15153_v26 = vor.u32 %v18258_v58, %v15152_v55  ;;  %v15946_v5 = vld [vmem:[#allocation11 + $0xfc8] sm:$0xf0]  ;;  %v18128_v55 = vld [vmem:[#allocation11 + $0x57c] sm:$0xf0] }
 0x2ea   :  { %v4536_v47 = vmax.f32 %v4526_v0, 0.0  ;;  %v4537_v30 = vmax.f32 %v4527_v22, 0.0  ;;  %9635 = vmatpush.bf16.msra.mxu2 %v16909_v2  ;;  %v18168_v0 = vld [vmem:[#allocation11 + $0x6bc] sm:$0xf0]  ;;  %v18482_v22 = vld [vmem:[#allocation11 + $0x1094] sm:$0xf] }
 0x2eb   :  { %v14793_v20 = vor.u32 %v18168_v0, %v14792_v12  ;;  %v16069_v31 = vor.u32 %v18482_v22, %v16066_v13  ;;  %v16026_v2 = vld [vmem:[#allocation11 + $0x1068] sm:$0xf0]  ;;  %v18442_v58 = vld [vmem:[#allocation11 + $0xf54] sm:$0xf]  ;;  %v14952_v22 = vld [vmem:[#allocation11 + $0x7d8] sm:$0xf] }
 0x2ec   :  { %v4542_v35 = vpack.c.bf16 %v4537_v30, %v4536_v47  ;;  %9623 = vmatpush.bf16.msra.mxu0 %v16549_v48  ;;  %v15112_v47 = vld [vmem:[#allocation11 + $0x918] sm:$0xf]  ;;  %v18248_v30 = vld [vmem:[#allocation11 + $0x93c] sm:$0xf0]  ;;  %v18552_v48 = vld [vmem:[#allocation11 + $0x12c4] sm:$0xf] }
 0x2ed   :  { %v15113_v32 = vor.u32 %v18248_v30, %v15112_v47  ;;  %v16349_v4 = vor.u32 %v18552_v48, %v16346_v61  ;;  %v16266_v34 = vld [vmem:[#allocation11 + $0x1248] sm:$0xf0]  ;;  %v18522_v12 = vld [vmem:[#allocation11 + $0x11d4] sm:$0xf]  ;;  %v18208_v13 = vld [vmem:[#allocation11 + $0x7fc] sm:$0xf0] }
 0x2ee   :  { %v4551_v62 = vunpack.c.l.bf16 %v4542_v35  ;;  %v4552_v23 = vunpack.c.h.bf16 %v4542_v35  ;;  %9636 = vmatpush.bf16.msra.mxu2 %v16869_v25  ;;  %v16389_v35 = vor.u32 %v18562_v21, %v16386_v36  ;;  %v16306_v25 = vld [vmem:[#allocation11 + $0x1298] sm:$0xf0]  ;;  %v16152_v47 = vld [vmem:[#allocation11 + $0x1138] sm:$0xf]  ;;  %v14953_v48 = vor.u32 %v18208_v13, %v14952_v22  ;;  %v18028_v61 = vld [vmem:[#allocation11 + $0x25c] sm:$0xf0] }
 0x2ef   :  { %v16032_v22 = vld [vmem:[#allocation11 + $0x1048] sm:$0xf]  ;;  %v18478_v13 = vld [vmem:[#allocation11 + $0x106c] sm:$0xf0] }
 0x2f0   :  { %v4571_v1 = vmul.f32 %v4561_v52, %v4551_v62  ;;  %v4572_v6 = vmul.f32 %v4562_v40, %v4552_v23  ;;  %9624 = vmatpush.bf16.msra.mxu0 %v16509_v59  ;;  %v18158_v52 = vld [vmem:[#allocation11 + $0x66c] sm:$0xf0]  ;;  %v18472_v40 = vld [vmem:[#allocation11 + $0x1044] sm:$0xf]  ;;  %v15072_v23 = vld [vmem:[#allocation11 + $0x8c8] sm:$0xf] }
 0x2f1   :  { %v14753_v62 = vor.u32 %v18158_v52, %v14752_v63  ;;  %v16029_v27 = vor.u32 %v18472_v40, %v16026_v2  ;;  %v15073_v7 = vor.u32 %v18238_v18, %v15072_v23  ;;  %v15032_v59 = vld [vmem:[#allocation11 + $0x878] sm:$0xf]  ;;  %v18432_v63 = vld [vmem:[#allocation11 + $0xf04] sm:$0xf]  ;;  %v16186_v40 = vld [vmem:[#allocation11 + $0x11a8] sm:$0xf0] }
 0x2f2   :  { %v19820_v50 = vpack.c.bf16 %v4571_v1, %v4571_v1  ;;  %v19822_v53 = vpack.c.bf16 %v4572_v6, %v4572_v6  ;;  %9637 = vmatpush.bf16.msra.mxu2 %v16829_v33  ;;  %v15986_v1 = vld [vmem:[#allocation11 + $0x1018] sm:$0xf0]  ;;  %v18542_v6 = vld [vmem:[#allocation11 + $0x1274] sm:$0xf]  ;;  %v15033_v57 = vor.u32 %v18228_v43, %v15032_v59  ;;  %v14992_v33 = vld [vmem:[#allocation11 + $0x828] sm:$0xf] }
 0x2f3   :  { %v15989_v42 = vor.u32 %v18462_v38, %v15986_v1  ;;  %v16309_v14 = vor.u32 %v18542_v6, %v16306_v25  ;;  %v14993_v0 = vor.u32 %v18218_v10, %v14992_v33  ;;  %v18512_v52 = vld [vmem:[#allocation11 + $0x1184] sm:$0xf]  ;;  %v14232_v2 = vld [vmem:[#allocation11 + $0x238] sm:$0xf]  ;;  %v14912_v18 = vld [vmem:[#allocation11 + $0x788] sm:$0xf] }
 0x2f4   :  { %9495 = vmatmul.bf16.vlgmr.msrb.gmra.mxu1 %v19820_v50  ;;  %9508 = vmatmul.bf16.vlgmr.msrb.gmra.mxu3 %v19822_v53  ;;  %v18588_v38 = vld [vmem:[#allocation11 + $0x13dc] sm:$0xf0]  ;;  %v16189_v1 = vor.u32 %v18512_v52, %v16186_v40  ;;  %v14233_v6 = vor.u32 %v18028_v61, %v14232_v2  ;;  %v14192_v43 = vld [vmem:[#allocation11 + $0x1e8] sm:$0xf]  ;;  %v14152_v10 = vld [vmem:[#allocation11 + $0x198] sm:$0xf] }
 0x2f5   :  { %9669 = vmatpush.bf16.msrb.mxu0 %v14873_v44  ;;  %9591 = vmatpush.bf16.msrb.mxu1 %v16149_v3  ;;  %v14672_v44 = vld [vmem:[#allocation11 + $0x5a8] sm:$0xf]  ;;  %v18452_v3 = vld [vmem:[#allocation11 + $0xfa4] sm:$0xf]  ;;  %v18558_v52 = vld [vmem:[#allocation11 + $0x12ec] sm:$0xf0] }
 0x2f6   :  { %9604 = vmatpush.bf16.msrb.mxu3 %v16469_v24  ;;  %9625 = vmatmul.bf16.vlgmr.msra.gmra.mxu0 %v19820_v50  ;;  %v18532_v24 = vld [vmem:[#allocation11 + $0x1224] sm:$0xf]  ;;  %v14673_v60 = vor.u32 %v18138_v19, %v14672_v44  ;;  %v15949_v29 = vor.u32 %v18452_v3, %v15946_v5  ;;  %v16473_v44 = vor.u32 %v18588_v38, %v16472_v17  ;;  %v18098_v19 = vld [vmem:[#allocation11 + $0x48c] sm:$0xf0]  ;;  %v16432_v5 = vld [vmem:[#allocation11 + $0x1368] sm:$0xf] }
 0x2f7   :  { %9682 = vmatpush.bf16.msrb.mxu2 %v15193_v11  ;;  %v14632_v11 = vld [vmem:[#allocation11 + $0x558] sm:$0xf] }
 0x2f8   :  { %9638 = vmatmul.bf16.vlgmr.msra.gmra.mxu2 %v19822_v53  ;;  %v14633_v21 = vor.u32 %v18128_v55, %v14632_v11  ;;  %v18088_v55 = vld [vmem:[#allocation11 + $0x43c] sm:$0xf0]  ;;  %v15992_v2 = vld [vmem:[#allocation11 + $0xff8] sm:$0xf] }
 0x2f9   :  { %9670 = vmatpush.bf16.msrb.mxu0 %v14833_v16  ;;  %9592 = vmatpush.bf16.msrb.mxu1 %v16109_v39  ;;  %v16269_v16 = vor.u32 %v18532_v24, %v16266_v34  ;;  %v15906_v39 = vld [vmem:[#allocation11 + $0xf78] sm:$0xf0]  ;;  %v18578_v24 = vld [vmem:[#allocation11 + $0x138c] sm:$0xf0]  ;;  %v16312_v38 = vld [vmem:[#allocation11 + $0x1278] sm:$0xf] }
 0x2fa   :  { %9605 = vmatpush.bf16.msrb.mxu3 %v16429_v15  ;;  %v16226_v15 = vld [vmem:[#allocation11 + $0x11f8] sm:$0xf0]  ;;  %v15909_v36 = vor.u32 %v18442_v58, %v15906_v39  ;;  %v16433_v11 = vor.u32 %v18578_v24, %v16432_v5  ;;  %v16392_v39 = vld [vmem:[#allocation11 + $0x1318] sm:$0xf]  ;;  %v14352_v5 = vld [vmem:[#allocation11 + $0x328] sm:$0xf] }
 0x2fb   :  { %9683 = vmatpush.bf16.msrb.mxu2 %v15153_v26  ;;  %v14592_v26 = vld [vmem:[#allocation11 + $0x508] sm:$0xf]  ;;  %v16229_v30 = vor.u32 %v18522_v12, %v16226_v15  ;;  %v18568_v12 = vld [vmem:[#allocation11 + $0x133c] sm:$0xf0]  ;;  %v18058_v24 = vld [vmem:[#allocation11 + $0x34c] sm:$0xf0] }
 0x2fd   :  { %9671 = vmatpush.bf16.msrb.mxu0 %v14793_v20  ;;  %9593 = vmatpush.bf16.msrb.mxu1 %v16069_v31  ;;  %v18118_v20 = vld [vmem:[#allocation11 + $0x52c] sm:$0xf0]  ;;  %v18508_v31 = vld [vmem:[#allocation11 + $0x115c] sm:$0xf0] }
 0x2fe   :  { %9606 = vmatpush.bf16.msrb.mxu3 %v16389_v35  ;;  %v15866_v35 = vld [vmem:[#allocation11 + $0xf28] sm:$0xf0]  ;;  %v14593_v23 = vor.u32 %v18118_v20, %v14592_v26  ;;  %v14112_v26 = vld [vmem:[#allocation11 + $0x148] sm:$0xf]  ;;  %v17998_v20 = vld [vmem:[#allocation11 + $0x16c] sm:$0xf0] }
 0x2ff   :  { %9684 = vmatpush.bf16.msrb.mxu2 %v15113_v32  ;;  %v14552_v32 = vld [vmem:[#allocation11 + $0x4b8] sm:$0xf]  ;;  %v15869_v51 = vor.u32 %v18432_v63, %v15866_v35  ;;  %v16033_v63 = vor.u32 %v18478_v13, %v16032_v22  ;;  %v16352_v35 = vld [vmem:[#allocation11 + $0x12c8] sm:$0xf]  ;;  %v14113_v40 = vor.u32 %v17998_v20, %v14112_v26  ;;  %v18438_v20 = vld [vmem:[#allocation11 + $0xf2c] sm:$0xf0] }
 0x300   :  { %v16232_v13 = vld [vmem:[#allocation11 + $0x11d8] sm:$0xf] }
 0x301   :  { %9672 = vmatpush.bf16.msrb.mxu0 %v14753_v62  ;;  %9594 = vmatpush.bf16.msrb.mxu1 %v16029_v27  ;;  %v18108_v62 = vld [vmem:[#allocation11 + $0x4dc] sm:$0xf0]  ;;  %v18198_v27 = vld [vmem:[#allocation11 + $0x7ac] sm:$0xf0] }
 0x302   :  { %9607 = vmatpush.bf16.msrb.mxu3 %v16349_v4  ;;  %v16153_v4 = vor.u32 %v18508_v31, %v16152_v47  ;;  %v14553_v25 = vor.u32 %v18108_v62, %v14552_v32  ;;  %v14913_v59 = vor.u32 %v18198_v27, %v14912_v18  ;;  %v16393_v47 = vor.u32 %v18568_v12, %v16392_v39  ;;  %v18078_v31 = vld [vmem:[#allocation11 + $0x3ec] sm:$0xf0]  ;;  %v14072_v32 = vld [vmem:[#allocation11 + $0xf8] sm:$0xf]  ;;  %v17988_v62 = vld [vmem:[#allocation11 + $0x11c] sm:$0xf0] }
 0x303   :  { %9685 = vmatpush.bf16.msrb.mxu2 %v15073_v7  ;;  %v16112_v7 = vld [vmem:[#allocation11 + $0x10e8] sm:$0xf]  ;;  %v14392_v27 = vld [vmem:[#allocation11 + $0x378] sm:$0xf] }
 0x304   :  { %9547 = vmatmul.bf16.vlgmr.msra.gmra.mxu1 %v19729_v28  ;;  %9560 = vmatmul.bf16.vlgmr.msra.gmra.mxu3 %v19731_v45 }
 0x305   :  { %9673 = vmatpush.bf16.msrb.mxu0 %v14713_v49  ;;  %9595 = vmatpush.bf16.msrb.mxu1 %v15989_v42  ;;  %v18498_v49 = vld [vmem:[#allocation11 + $0x110c] sm:$0xf0] }
 0x306   :  { %9608 = vmatpush.bf16.msrb.mxu3 %v16309_v14  ;;  %v18018_v42 = vld [vmem:[#allocation11 + $0x20c] sm:$0xf0]  ;;  %v14512_v14 = vld [vmem:[#allocation11 + $0x468] sm:$0xf]  ;;  %v16113_v3 = vor.u32 %v18498_v49, %v16112_v7 }
 0x307   :  { %9686 = vmatpush.bf16.msrb.mxu2 %v15033_v57  ;;  %v14193_v34 = vor.u32 %v18018_v42, %v14192_v43  ;;  %v16072_v57 = vld [vmem:[#allocation11 + $0x1098] sm:$0xf]  ;;  %v14513_v33 = vor.u32 %v18098_v19, %v14512_v14  ;;  %v15952_v7 = vld [vmem:[#allocation11 + $0xfa8] sm:$0xf]  ;;  %v18458_v49 = vld [vmem:[#allocation11 + $0xfcc] sm:$0xf0] }
 0x308   :  { %v17978_v14 = vld [vmem:[#allocation11 + $0xcc] sm:$0xf0] }
 0x309   :  { %9674 = vmatpush.bf16.msrb.mxu0 %v14673_v60  ;;  %9596 = vmatpush.bf16.msrb.mxu1 %v15949_v29  ;;  %v18488_v60 = vld [vmem:[#allocation11 + $0x10bc] sm:$0xf0] }
 0x30a   :  { %9609 = vmatpush.bf16.msrb.mxu3 %v16269_v16  ;;  %v18008_v29 = vld [vmem:[#allocation11 + $0x1bc] sm:$0xf0]  ;;  %v14472_v16 = vld [vmem:[#allocation11 + $0x418] sm:$0xf]  ;;  %v16073_v58 = vor.u32 %v18488_v60, %v16072_v57  ;;  %v15953_v57 = vor.u32 %v18458_v49, %v15952_v7  ;;  %v16272_v60 = vld [vmem:[#allocation11 + $0x1228] sm:$0xf] }
 0x30b   :  { %9687 = vmatpush.bf16.msrb.mxu2 %v14993_v0  ;;  %v14153_v0 = vor.u32 %v18008_v29, %v14152_v10  ;;  %v15912_v29 = vld [vmem:[#allocation11 + $0xf58] sm:$0xf] }
 0x30d   :  { %9675 = vmatpush.bf16.msrb.mxu0 %v14633_v21  ;;  %9597 = vmatpush.bf16.msrb.mxu1 %v15909_v36  ;;  %v14473_v36 = vor.u32 %v18088_v55, %v14472_v16  ;;  %v14353_v16 = vor.u32 %v18058_v24, %v14352_v5  ;;  %v13992_v55 = vld [vmem:[#allocation11 + $0x58] sm:$0xf]  ;;  %v18338_v5 = vld [vmem:[#allocation11 + $0xc0c] sm:$0xf0]  ;;  %v15792_v24 = vld [vmem:[#allocation11 + $0xe68] sm:$0xf] }
 0x30e   :  { %9610 = vmatpush.bf16.msrb.mxu3 %v16229_v30  ;;  %v14432_v30 = vld [vmem:[#allocation11 + $0x3c8] sm:$0xf] }
 0x30f   :  { %9688 = vmatpush.bf16.msrb.mxu2 %v14953_v48  ;;  %v9392_v15 = vpop.f32.mrf.mxu1  ;;  %v18468_v48 = vld [vmem:[#allocation11 + $0x101c] sm:$0xf0]  ;;  %v14433_v61 = vor.u32 %v18078_v31, %v14432_v30  ;;  %v14234_v30 = vld [vmem:[#allocation11 + $0x260] sm:$0xf0] }
 0x310   :  { %v9418_v21 = vpop.f32.mrf.mxu0  ;;  %v15993_v17 = vor.u32 %v18468_v48, %v15992_v2  ;;  %v14272_v2 = vld [vmem:[#allocation11 + $0x288] sm:$0xf] }
 0x311   :  { %9676 = vmatpush.bf16.msrb.mxu0 %v14593_v23  ;;  %9598 = vmatpush.bf16.msrb.mxu1 %v15869_v51  ;;  %v16353_v23 = vor.u32 %v18558_v52, %v16352_v35  ;;  %v18068_v51 = vld [vmem:[#allocation11 + $0x39c] sm:$0xf0]  ;;  %v16192_v35 = vld [vmem:[#allocation11 + $0x1188] sm:$0xf] }
 0x312   :  { %9611 = vmatpush.bf16.msrb.mxu3 %v16189_v1  ;;  %v18548_v1 = vld [vmem:[#allocation11 + $0x129c] sm:$0xf0]  ;;  %v14393_v42 = vor.u32 %v18068_v51, %v14392_v27  ;;  %v13952_v52 = vld [vmem:[#allocation11 + $0x8] sm:$0xf]  ;;  %v18518_v27 = vld [vmem:[#allocation11 + $0x11ac] sm:$0xf0] }
 0x313   :  { %9689 = vmatpush.bf16.msrb.mxu2 %v14913_v59  ;;  %v15832_v51 = vld [vmem:[#allocation11 + $0xeb8] sm:$0xf] }
 0x314   :  { %9677 = vmatmul.bf16.vlgmr.msrb.gmra.mxu0 %v19729_v28  ;;  %9599 = vmatmul.bf16.vlgmr.msrb.gmra.mxu1 %v19755_v56 }
 0x315   :  { %9721 = vmatpush.bf16.msra.mxu0 %v16153_v4  ;;  %9643 = vmatpush.bf16.msra.mxu1 %v14233_v6  ;;  %v9405_v18 = vpop.f32.mrf.mxu3 }
 0x316   :  { %9656 = vmatpush.bf16.msra.mxu3 %v14553_v25  ;;  %9690 = vmatmul.bf16.vlgmr.msrb.gmra.mxu2 %v19731_v45  ;;  %v9406_v4 = vadd.f32 %v9405_v18, %v9392_v15  ;;  %v14073_v25 = vor.u32 %v17988_v62, %v14072_v32  ;;  %v9431_v19 = vpop.f32.mrf.mxu2  ;;  %v14312_v15 = vld [vmem:[#allocation11 + $0x2d8] sm:$0xf]  ;;  %v18038_v32 = vld [vmem:[#allocation11 + $0x2ac] sm:$0xf0] }
 0x317   :  { %9734 = vmatpush.bf16.msra.mxu2 %v16473_v44  ;;  %9612 = vmatmul.bf16.vlgmr.msrb.gmra.mxu3 %v19765_v46  ;;  %v9394_v6 = vpop.f32.mrf.mxu1  ;;  %v14032_v44 = vld [vmem:[#allocation11 + $0xa8] sm:$0xf]  ;;  %v15512_v62 = vld [vmem:[#allocation11 + $0xc38] sm:$0xf]  ;;  %v14273_v7 = vor.u32 %v18038_v32, %v14272_v2 }
 0x318   :  { %v9419_v59 = vadd.f32 %v9418_v21, %v9406_v4  ;;  %v9420_v43 = vpop.f32.mrf.mxu0  ;;  %v14033_v10 = vor.u32 %v17978_v14, %v14032_v44  ;;  %v18528_v21 = vld [vmem:[#allocation11 + $0x11fc] sm:$0xf0]  ;;  %v18013_v44 = vld [vmem:[#allocation11 + $0x1ec] sm:$0xf]  ;;  %v14194_v14 = vld [vmem:[#allocation11 + $0x210] sm:$0xf0] }
 0x319   :  { %9722 = vmatpush.bf16.msra.mxu0 %v16113_v3  ;;  %9644 = vmatpush.bf16.msra.mxu1 %v14193_v34  ;;  %v16313_v3 = vor.u32 %v18548_v1, %v16312_v38  ;;  %v18428_v4 = vld [vmem:[#allocation11 + $0xedc] sm:$0xf0]  ;;  %v18103_v38 = vld [vmem:[#allocation11 + $0x4bc] sm:$0xf]  ;;  %v14554_v1 = vld [vmem:[#allocation11 + $0x4e0] sm:$0xf0]  ;;  %v16193_v43 = vor.u32 %v18518_v27, %v16192_v35 }
 0x31a   :  { %9657 = vmatpush.bf16.msra.mxu3 %v14513_v33  ;;  %v9432_v34 = vadd.f32 %v9431_v19, %v9419_v59  ;;  %v18538_v33 = vld [vmem:[#allocation11 + $0x124c] sm:$0xf0]  ;;  %v15472_v19 = vld [vmem:[#allocation11 + $0xbe8] sm:$0xf]  ;;  %v17993_v35 = vld [vmem:[#allocation11 + $0x14c] sm:$0xf] }
 0x31b   :  { %9735 = vmatpush.bf16.msra.mxu2 %v16433_v11  ;;  %v18448_v11 = vld [vmem:[#allocation11 + $0xf7c] sm:$0xf0]  ;;  %v16273_v39 = vor.u32 %v18538_v33, %v16272_v60  ;;  %v18093_v60 = vld [vmem:[#allocation11 + $0x46c] sm:$0xf]  ;;  %v14514_v33 = vld [vmem:[#allocation11 + $0x490] sm:$0xf0] }
 0x31c   :  { %v15913_v22 = vor.u32 %v18448_v11, %v15912_v29  ;;  %v14197_v29 = vor.u32 %v18013_v44, %v14194_v14  ;;  %v15473_v11 = vor.u32 %v18338_v5, %v15472_v19  ;;  %v15712_v32 = vld [vmem:[#allocation11 + $0xdc8] sm:$0xf]  ;;  %v18063_v44 = vld [vmem:[#allocation11 + $0x37c] sm:$0xf]  ;;  %v14394_v14 = vld [vmem:[#allocation11 + $0x3a0] sm:$0xf0] }
 0x31d   :  { %9723 = vmatpush.bf16.msra.mxu0 %v16073_v58  ;;  %9645 = vmatpush.bf16.msra.mxu1 %v14153_v0  ;;  %v17968_v58 = vld [vmem:[#allocation11 + $0x7c] sm:$0xf0]  ;;  %v9407_v12 = vpop.f32.mrf.mxu3 }
 0x31e   :  { %9658 = vmatpush.bf16.msra.mxu3 %v14473_v36  ;;  %v18048_v0 = vld [vmem:[#allocation11 + $0x2fc] sm:$0xf0]  ;;  %v15872_v36 = vld [vmem:[#allocation11 + $0xf08] sm:$0xf]  ;;  %v13993_v26 = vor.u32 %v17968_v58, %v13992_v55  ;;  %v9433_v48 = vpop.f32.mrf.mxu2  ;;  %v18003_v55 = vld [vmem:[#allocation11 + $0x19c] sm:$0xf]  ;;  %v14517_v12 = vor.u32 %v18093_v60, %v14514_v33  ;;  %v14397_v33 = vor.u32 %v18063_v44, %v14394_v14 }
 0x31f   :  { %9736 = vmatpush.bf16.msra.mxu2 %v16393_v47  ;;  %v18023_v47 = vld [vmem:[#allocation11 + $0x23c] sm:$0xf]  ;;  %v15873_v18 = vor.u32 %v18438_v20, %v15872_v36  ;;  %v14154_v58 = vld [vmem:[#allocation11 + $0x1c0] sm:$0xf0]  ;;  %v15312_v60 = vld [vmem:[#allocation11 + $0xaa8] sm:$0xf] }
 0x320   :  { %v19834_v31 = vpop.f32.mrf.mxu0  ;;  %v14474_v36 = vld [vmem:[#allocation11 + $0x440] sm:$0xf0] }
 0x321   :  { %9724 = vmatpush.bf16.msra.mxu0 %v16033_v63  ;;  %9646 = vmatpush.bf16.msra.mxu1 %v14113_v40  ;;  %v14313_v63 = vor.u32 %v18048_v0, %v14312_v15  ;;  %v17958_v40 = vld [vmem:[#allocation11 + $0x2c] sm:$0xf0]  ;;  %v18328_v15 = vld [vmem:[#allocation11 + $0xbbc] sm:$0xf0]  ;;  %v15752_v0 = vld [vmem:[#allocation11 + $0xe18] sm:$0xf] }
 0x322   :  { %9659 = vmatpush.bf16.msra.mxu3 %v14433_v61  ;;  %v16233_v61 = vor.u32 %v18528_v21, %v16232_v13  ;;  %v13953_v6 = vor.u32 %v17958_v40, %v13952_v52  ;;  %v18083_v21 = vld [vmem:[#allocation11 + $0x41c] sm:$0xf]  ;;  %v14114_v52 = vld [vmem:[#allocation11 + $0x170] sm:$0xf0]  ;;  %v15392_v40 = vld [vmem:[#allocation11 + $0xb48] sm:$0xf] }
 0x323   :  { %9737 = vmatpush.bf16.msra.mxu2 %v16353_v23  ;;  %v18348_v23 = vld [vmem:[#allocation11 + $0xc5c] sm:$0xf0]  ;;  %v14477_v48 = vor.u32 %v18083_v21, %v14474_v36  ;;  %v15592_v36 = vld [vmem:[#allocation11 + $0xcd8] sm:$0xf] }
 0x324   :  { %v15513_v49 = vor.u32 %v18348_v23, %v15512_v62  ;;  %v18398_v62 = vld [vmem:[#allocation11 + $0xdec] sm:$0xf0]  ;;  %v18073_v23 = vld [vmem:[#allocation11 + $0x3cc] sm:$0xf]  ;;  %v18288_v21 = vld [vmem:[#allocation11 + $0xa7c] sm:$0xf0] }
 0x325   :  { %9725 = vmatpush.bf16.msra.mxu0 %v15993_v17  ;;  %9647 = vmatpush.bf16.msra.mxu1 %v14073_v25  ;;  %v14237_v17 = vor.u32 %v18023_v47, %v14234_v30  ;;  %v9444_v25 = vpop.f32.mrf.mxu1  ;;  %v14157_v47 = vor.u32 %v18003_v55, %v14154_v58 }
 0x326   :  { %9660 = vmatpush.bf16.msra.mxu3 %v14393_v42  ;;  %v9445_v59 = vadd.f32 %v9444_v25, %v9432_v34  ;;  %v15833_v42 = vor.u32 %v18428_v4, %v15832_v51  ;;  %v14117_v51 = vor.u32 %v17993_v35, %v14114_v52  ;;  %v15352_v25 = vld [vmem:[#allocation11 + $0xaf8] sm:$0xf]  ;;  %v17953_v52 = vld [vmem:[#allocation11 + $0xc] sm:$0xf] }
 0x327   :  { %9738 = vmatpush.bf16.msra.mxu2 %v16313_v3  ;;  %v14557_v3 = vor.u32 %v18103_v38, %v14554_v1  ;;  %v9483_v34 = vpop.f32.mrf.mxu2  ;;  %v15713_v38 = vor.u32 %v18398_v62, %v15712_v32  ;;  %v17983_v1 = vld [vmem:[#allocation11 + $0xfc] sm:$0xf]  ;;  %v14274_v32 = vld [vmem:[#allocation11 + $0x2b0] sm:$0xf0] }
 0x328   :  { %v18343_v62 = vld [vmem:[#allocation11 + $0xc3c] sm:$0xf] }
 0x329   :  { %9726 = vmatpush.bf16.msra.mxu0 %v15953_v57  ;;  %9648 = vmatpush.bf16.msra.mxu1 %v14033_v10  ;;  %v18418_v57 = vld [vmem:[#allocation11 + $0xe8c] sm:$0xf0]  ;;  %v9472_v10 = vpop.f32.mrf.mxu0  ;;  %v9457_v13 = vpop.f32.mrf.mxu3 }
 0x32a   :  { %9661 = vmatpush.bf16.msra.mxu3 %v14353_v16  ;;  %v15793_v16 = vor.u32 %v18418_v57, %v15792_v24  ;;  %v17973_v24 = vld [vmem:[#allocation11 + $0xac] sm:$0xf]  ;;  %v14034_v57 = vld [vmem:[#allocation11 + $0xd0] sm:$0xf0]  ;;  %v18298_v10 = vld [vmem:[#allocation11 + $0xacc] sm:$0xf0] }
 0x32b   :  { %9739 = vmatpush.bf16.msra.mxu2 %v16273_v39  ;;  %v15432_v39 = vld [vmem:[#allocation11 + $0xb98] sm:$0xf]  ;;  %v14037_v55 = vor.u32 %v17973_v24, %v14034_v57  ;;  %v15313_v58 = vor.u32 %v18298_v10, %v15312_v60  ;;  %v18333_v24 = vld [vmem:[#allocation11 + $0xbec] sm:$0xf]  ;;  %v15474_v57 = vld [vmem:[#allocation11 + $0xc10] sm:$0xf0] }
 0x32c   :  { %v15433_v30 = vor.u32 %v18328_v15, %v15432_v39  ;;  %v13994_v15 = vld [vmem:[#allocation11 + $0x80] sm:$0xf0]  ;;  %v18413_v60 = vld [vmem:[#allocation11 + $0xe6c] sm:$0xf]  ;;  %v15794_v10 = vld [vmem:[#allocation11 + $0xe90] sm:$0xf0] }
 0x32d   :  { %9727 = vmatpush.bf16.msra.mxu0 %v15913_v22  ;;  %9649 = vmatpush.bf16.msra.mxu1 %v13993_v26  ;;  %v18408_v22 = vld [vmem:[#allocation11 + $0xe3c] sm:$0xf0]  ;;  %v9458_v26 = vadd.f32 %v9457_v13, %v9445_v59  ;;  %v9446_v20 = vpop.f32.mrf.mxu1  ;;  %v15672_v59 = vld [vmem:[#allocation11 + $0xd78] sm:$0xf] }
 0x32e   :  { %9662 = vmatpush.bf16.msra.mxu3 %v14313_v63  ;;  %v15753_v63 = vor.u32 %v18408_v22, %v15752_v0  ;;  %v15272_v0 = vld [vmem:[#allocation11 + $0xa58] sm:$0xf] }
 0x32f   :  { %9740 = vmatpush.bf16.msra.mxu2 %v16233_v61  ;;  %v9471_v2 = vadd.f32 %v19834_v31, %v9458_v26  ;;  %v18318_v61 = vld [vmem:[#allocation11 + $0xb6c] sm:$0xf0]  ;;  %v9485_v4 = vpop.f32.mrf.mxu2  ;;  %v18368_v26 = vld [vmem:[#allocation11 + $0xcfc] sm:$0xf0] }
 0x330   :  { %v18278_v4 = vld [vmem:[#allocation11 + $0xa2c] sm:$0xf0] }
 0x331   :  { %9728 = vmatpush.bf16.msra.mxu0 %v15873_v18  ;;  %9650 = vmatpush.bf16.msra.mxu1 %v13953_v6  ;;  %v14434_v18 = vld [vmem:[#allocation11 + $0x3f0] sm:$0xf0]  ;;  %v19841_v27 = vadd.f32 %v9483_v34, %v9471_v2  ;;  %v14074_v6 = vld [vmem:[#allocation11 + $0x120] sm:$0xf0]  ;;  %v9522_v31 = vpop.f32.mrf.mxu0  ;;  %v18378_v34 = vld [vmem:[#allocation11 + $0xd4c] sm:$0xf0]  ;;  %v15273_v2 = vor.u32 %v18288_v21, %v15272_v0 }
 0x332   :  { %9663 = vmatpush.bf16.msra.mxu3 %v14273_v7  ;;  %v14437_v7 = vor.u32 %v18073_v23, %v14434_v18  ;;  %v14077_v19 = vor.u32 %v17983_v1, %v14074_v6  ;;  %v15514_v18 = vld [vmem:[#allocation11 + $0xc60] sm:$0xf0]  ;;  %v18358_v1 = vld [vmem:[#allocation11 + $0xcac] sm:$0xf0]  ;;  %v18403_v0 = vld [vmem:[#allocation11 + $0xe1c] sm:$0xf] }
 0x333   :  { %9741 = vmatpush.bf16.msra.mxu2 %v16193_v43  ;;  %v18388_v43 = vld [vmem:[#allocation11 + $0xd9c] sm:$0xf0]  ;;  %v16712_v21 = vld [vmem:[#allocation11 + $0x1598] sm:$0xf] }
 0x334   :  { %9729 = vmatmul.bf16.vlgmr.msra.gmra.mxu0 %v19755_v56  ;;  %9651 = vmatmul.bf16.vlgmr.msra.gmra.mxu1 %v19725_v8  ;;  %v15673_v5 = vor.u32 %v18388_v43, %v15672_v59  ;;  %v17112_v43 = vld [vmem:[#allocation11 + $0x18b8] sm:$0xf] }
 0x335   :  { %9773 = vmatpush.bf16.msrb.mxu0 %v14237_v17  ;;  %9695 = vmatpush.bf16.msrb.mxu1 %v15513_v49  ;;  %v15393_v17 = vor.u32 %v18318_v61, %v15392_v40  ;;  %v18308_v49 = vld [vmem:[#allocation11 + $0xb1c] sm:$0xf0]  ;;  %v13954_v40 = vld [vmem:[#allocation11 + $0x30] sm:$0xf0]  ;;  %v18033_v61 = vld [vmem:[#allocation11 + $0x28c] sm:$0xf] }
 0x336   :  { %9708 = vmatpush.bf16.msrb.mxu3 %v15833_v42  ;;  %9742 = vmatmul.bf16.vlgmr.msra.gmra.mxu2 %v19765_v46  ;;  %v9459_v42 = vpop.f32.mrf.mxu3  ;;  %v13957_v6 = vor.u32 %v17953_v52, %v13954_v40  ;;  %v14277_v44 = vor.u32 %v18033_v61, %v14274_v32  ;;  %v18313_v52 = vld [vmem:[#allocation11 + $0xb4c] sm:$0xf]  ;;  %v15394_v40 = vld [vmem:[#allocation11 + $0xb70] sm:$0xf0]  ;;  %v16672_v32 = vld [vmem:[#allocation11 + $0x1548] sm:$0xf] }
 0x337   :  { %9786 = vmatpush.bf16.msrb.mxu2 %v14557_v3  ;;  %9664 = vmatmul.bf16.vlgmr.msra.gmra.mxu3 %v19727_v37  ;;  %v15353_v3 = vor.u32 %v18308_v49, %v15352_v25  ;;  %v15834_v25 = vld [vmem:[#allocation11 + $0xee0] sm:$0xf0]  ;;  %v15517_v49 = vor.u32 %v18343_v62, %v15514_v18  ;;  %v18748_v42 = vld [vmem:[#allocation11 + $0x18dc] sm:$0xf0]  ;;  %v15714_v61 = vld [vmem:[#allocation11 + $0xdf0] sm:$0xf0] }
 0x338   :  { %v9535_v20 = vpop.f32.mrf.mxu2  ;;  %v18638_v62 = vld [vmem:[#allocation11 + $0x156c] sm:$0xf0] }
 0x339   :  { %9774 = vmatpush.bf16.msrb.mxu0 %v14197_v29  ;;  %9696 = vmatpush.bf16.msrb.mxu1 %v15473_v11  ;;  %v15632_v29 = vld [vmem:[#allocation11 + $0xd28] sm:$0xf]  ;;  %v18053_v11 = vld [vmem:[#allocation11 + $0x32c] sm:$0xf]  ;;  %v9524_v22 = vpop.f32.mrf.mxu0  ;;  %v18718_v18 = vld [vmem:[#allocation11 + $0x17ec] sm:$0xf0] }
 0x33a   :  { %9709 = vmatpush.bf16.msrb.mxu3 %v15793_v16  ;;  %v14354_v16 = vld [vmem:[#allocation11 + $0x350] sm:$0xf0]  ;;  %v15633_v39 = vor.u32 %v18378_v34, %v15632_v29  ;;  %v16752_v29 = vld [vmem:[#allocation11 + $0x15e8] sm:$0xf]  ;;  %v18658_v34 = vld [vmem:[#allocation11 + $0x160c] sm:$0xf0] }
 0x33b   :  { %9787 = vmatpush.bf16.msrb.mxu2 %v14517_v12  ;;  %v17963_v12 = vld [vmem:[#allocation11 + $0x5c] sm:$0xf]  ;;  %v14357_v13 = vor.u32 %v18053_v11, %v14354_v16  ;;  %v17072_v11 = vld [vmem:[#allocation11 + $0x1868] sm:$0xf]  ;;  %v18738_v16 = vld [vmem:[#allocation11 + $0x188c] sm:$0xf0] }
 0x33c   :  { %v13997_v35 = vor.u32 %v17963_v12, %v13994_v15  ;;  %v18323_v12 = vld [vmem:[#allocation11 + $0xb9c] sm:$0xf]  ;;  %v15434_v15 = vld [vmem:[#allocation11 + $0xbc0] sm:$0xf0]  ;;  %v17073_v22 = vor.u32 %v18738_v16, %v17072_v11 }
 0x33d   :  { %9775 = vmatpush.bf16.msrb.mxu0 %v14157_v47  ;;  %9697 = vmatpush.bf16.msrb.mxu1 %v15433_v30  ;;  %v18043_v47 = vld [vmem:[#allocation11 + $0x2dc] sm:$0xf]  ;;  %v14314_v30 = vld [vmem:[#allocation11 + $0x300] sm:$0xf0] }
 0x33e   :  { %9710 = vmatpush.bf16.msrb.mxu3 %v15753_v63  ;;  %v19843_v63 = vadd.f32 %v9535_v20, %v9522_v31  ;;  %v14317_v23 = vor.u32 %v18043_v47, %v14314_v30  ;;  %v16792_v31 = vld [vmem:[#allocation11 + $0x1638] sm:$0xf]  ;;  %v18728_v20 = vld [vmem:[#allocation11 + $0x183c] sm:$0xf0]  ;;  %v15437_v47 = vor.u32 %v18323_v12, %v15434_v15  ;;  %v15274_v12 = vld [vmem:[#allocation11 + $0xa80] sm:$0xf0] }
 0x33f   :  { %9788 = vmatpush.bf16.msrb.mxu2 %v14477_v48  ;;  %v15593_v48 = vor.u32 %v18368_v26, %v15592_v36  ;;  %v18648_v36 = vld [vmem:[#allocation11 + $0x15bc] sm:$0xf0]  ;;  %v17032_v26 = vld [vmem:[#allocation11 + $0x1818] sm:$0xf]  ;;  %v18363_v15 = vld [vmem:[#allocation11 + $0xcdc] sm:$0xf] }
 0x341   :  { %9776 = vmatpush.bf16.msrb.mxu0 %v14117_v51  ;;  %9698 = vmatpush.bf16.msrb.mxu1 %v15393_v17  ;;  %v15232_v51 = vld [vmem:[#allocation11 + $0xa08] sm:$0xf]  ;;  %v18423_v17 = vld [vmem:[#allocation11 + $0xebc] sm:$0xf] }
 0x342   :  { %9711 = vmatpush.bf16.msrb.mxu3 %v15713_v38  ;;  %v15552_v38 = vld [vmem:[#allocation11 + $0xc88] sm:$0xf]  ;;  %v15233_v59 = vor.u32 %v18278_v4, %v15232_v51  ;;  %v15397_v51 = vor.u32 %v18313_v52, %v15394_v40 }
 0x343   :  { %9789 = vmatpush.bf16.msrb.mxu2 %v14437_v7  ;;  %v18668_v7 = vld [vmem:[#allocation11 + $0x165c] sm:$0xf0]  ;;  %v15553_v14 = vor.u32 %v18358_v1, %v15552_v38  ;;  %v16673_v38 = vor.u32 %v18638_v62, %v16672_v32  ;;  %v18303_v1 = vld [vmem:[#allocation11 + $0xafc] sm:$0xf]  ;;  %v16794_v62 = vld [vmem:[#allocation11 + $0x1660] sm:$0xf0] }
 0x345   :  { %9777 = vmatpush.bf16.msrb.mxu0 %v14077_v19  ;;  %9699 = vmatpush.bf16.msrb.mxu1 %v15353_v3  ;;  %v9537_v19 = vpop.f32.mrf.mxu2  ;;  %v15837_v3 = vor.u32 %v18423_v17, %v15834_v25  ;;  %v18383_v25 = vld [vmem:[#allocation11 + $0xd7c] sm:$0xf] }
 0x346   :  { %9712 = vmatpush.bf16.msrb.mxu3 %v15673_v5  ;;  %v16793_v5 = vor.u32 %v18668_v7, %v16792_v31  ;;  %v15674_v7 = vld [vmem:[#allocation11 + $0xda0] sm:$0xf0] }
 0x347   :  { %9790 = vmatpush.bf16.msrb.mxu2 %v14397_v33  ;;  %v17113_v33 = vor.u32 %v18748_v42, %v17112_v43  ;;  %v16952_v43 = vld [vmem:[#allocation11 + $0x1778] sm:$0xf]  ;;  %v18708_v42 = vld [vmem:[#allocation11 + $0x179c] sm:$0xf0] }
 0x349   :  { %9778 = vmatpush.bf16.msrb.mxu0 %v14037_v55  ;;  %9700 = vmatpush.bf16.msrb.mxu1 %v15313_v58  ;;  %v15477_v55 = vor.u32 %v18333_v24, %v15474_v57  ;;  %v15797_v58 = vor.u32 %v18413_v60, %v15794_v10  ;;  %v18373_v24 = vld [vmem:[#allocation11 + $0xd2c] sm:$0xf]  ;;  %v16953_v57 = vor.u32 %v18708_v42, %v16952_v43  ;;  %v15634_v60 = vld [vmem:[#allocation11 + $0xd50] sm:$0xf0]  ;;  %v18618_v10 = vld [vmem:[#allocation11 + $0x14cc] sm:$0xf0] }
 0x34a   :  { %9713 = vmatpush.bf16.msrb.mxu3 %v15633_v39  ;;  %v16753_v39 = vor.u32 %v18658_v34, %v16752_v29  ;;  %v16912_v29 = vld [vmem:[#allocation11 + $0x1728] sm:$0xf]  ;;  %v18698_v34 = vld [vmem:[#allocation11 + $0x174c] sm:$0xf0]  ;;  %v15194_v43 = vld [vmem:[#allocation11 + $0x9e0] sm:$0xf0] }
 0x34b   :  { %9791 = vmatpush.bf16.msrb.mxu2 %v14357_v13  ;;  %v15754_v13 = vld [vmem:[#allocation11 + $0xe40] sm:$0xf0] }
 0x34c   :  { %v15757_v30 = vor.u32 %v18403_v0, %v15754_v13  ;;  %v15594_v13 = vld [vmem:[#allocation11 + $0xd00] sm:$0xf0] }
 0x34d   :  { %9779 = vmatpush.bf16.msrb.mxu0 %v13997_v35  ;;  %9701 = vmatpush.bf16.msrb.mxu1 %v15273_v2  ;;  %v16713_v35 = vor.u32 %v18648_v36, %v16712_v21  ;;  %v18393_v2 = vld [vmem:[#allocation11 + $0xdcc] sm:$0xf]  ;;  %v16552_v21 = vld [vmem:[#allocation11 + $0x1458] sm:$0xf]  ;;  %v18608_v36 = vld [vmem:[#allocation11 + $0x147c] sm:$0xf0]  ;;  %v15597_v52 = vor.u32 %v18363_v15, %v15594_v13 }
 0x34e   :  { %9714 = vmatpush.bf16.msrb.mxu3 %v15593_v48  ;;  %v17033_v48 = vor.u32 %v18728_v20, %v17032_v26  ;;  %v15717_v17 = vor.u32 %v18393_v2, %v15714_v61  ;;  %v16872_v26 = vld [vmem:[#allocation11 + $0x16d8] sm:$0xf]  ;;  %v18688_v20 = vld [vmem:[#allocation11 + $0x16fc] sm:$0xf0]  ;;  %v16553_v40 = vor.u32 %v18608_v36, %v16552_v21  ;;  %v18353_v2 = vld [vmem:[#allocation11 + $0xc8c] sm:$0xf] }
 0x34f   :  { %9792 = vmatpush.bf16.msrb.mxu2 %v14317_v23  ;;  %v16992_v23 = vld [vmem:[#allocation11 + $0x17c8] sm:$0xf]  ;;  %v18663_v61 = vld [vmem:[#allocation11 + $0x163c] sm:$0xf]  ;;  %v16873_v32 = vor.u32 %v18688_v20, %v16872_v26  ;;  %v17034_v13 = vld [vmem:[#allocation11 + $0x1840] sm:$0xf0] }
 0x350   :  { %v19849_v4 = vpop.f32.mrf.mxu0  ;;  %v16993_v31 = vor.u32 %v18718_v18, %v16992_v23  ;;  %v18743_v23 = vld [vmem:[#allocation11 + $0x18bc] sm:$0xf]  ;;  %v17114_v18 = vld [vmem:[#allocation11 + $0x18e0] sm:$0xf0] }
 0x351   :  { %9780 = vmatpush.bf16.msrb.mxu0 %v13957_v6  ;;  %9702 = vmatpush.bf16.msrb.mxu1 %v15233_v59  ;;  %v15354_v6 = vld [vmem:[#allocation11 + $0xb20] sm:$0xf0]  ;;  %v18628_v59 = vld [vmem:[#allocation11 + $0x151c] sm:$0xf0]  ;;  %v18723_v15 = vld [vmem:[#allocation11 + $0x181c] sm:$0xf] }
 0x352   :  { %9715 = vmatpush.bf16.msrb.mxu3 %v15553_v14  ;;  %v15677_v14 = vor.u32 %v18383_v25, %v15674_v7  ;;  %v18183_v25 = vld [vmem:[#allocation11 + $0x73c] sm:$0xf]  ;;  %v14794_v36 = vld [vmem:[#allocation11 + $0x6c0] sm:$0xf0] }
 0x353   :  { %9793 = vmatpush.bf16.msrb.mxu2 %v14277_v44  ;;  %v15357_v44 = vor.u32 %v18303_v1, %v15354_v6  ;;  %v18678_v6 = vld [vmem:[#allocation11 + $0x16ac] sm:$0xf0]  ;;  %v18163_v21 = vld [vmem:[#allocation11 + $0x69c] sm:$0xf]  ;;  %v15114_v20 = vld [vmem:[#allocation11 + $0x940] sm:$0xf0] }
 0x354   :  { %9781 = vmatmul.bf16.vlgmr.msrb.gmra.mxu0 %v19725_v8  ;;  %9703 = vmatmul.bf16.vlgmr.msrb.gmra.mxu1 %v19763_v41  ;;  %v18243_v26 = vld [vmem:[#allocation11 + $0x91c] sm:$0xf] }
 0x355   :  { %9825 = vmatpush.bf16.msra.mxu0 %v15517_v49  ;;  %9747 = vmatpush.bf16.msra.mxu1 %v16793_v5  ;;  %v16632_v49 = vld [vmem:[#allocation11 + $0x14f8] sm:$0xf]  ;;  %v15314_v5 = vld [vmem:[#allocation11 + $0xad0] sm:$0xf0] }
 0x356   :  { %9760 = vmatpush.bf16.msra.mxu3 %v17113_v33  ;;  %9794 = vmatmul.bf16.vlgmr.msrb.gmra.mxu2 %v19727_v37  ;;  %v16633_v19 = vor.u32 %v18628_v59, %v16632_v49  ;;  %v16592_v33 = vld [vmem:[#allocation11 + $0x14a8] sm:$0xf]  ;;  %v16797_v49 = vor.u32 %v18663_v61, %v16794_v62  ;;  %v18263_v59 = vld [vmem:[#allocation11 + $0x9bc] sm:$0xf]  ;;  %v18713_v61 = vld [vmem:[#allocation11 + $0x17cc] sm:$0xf] }
 0x357   :  { %9838 = vmatpush.bf16.msra.mxu2 %v15837_v3  ;;  %9716 = vmatmul.bf16.vlgmr.msrb.gmra.mxu3 %v19770_v9  ;;  %v18293_v3 = vld [vmem:[#allocation11 + $0xaac] sm:$0xf]  ;;  %v16994_v62 = vld [vmem:[#allocation11 + $0x17f0] sm:$0xf0] }
 0x358   :  { %v15317_v11 = vor.u32 %v18293_v3, %v15314_v5  ;;  %v9576_v16 = vpop.f32.mrf.mxu0  ;;  %v19851_v0 = vpop.f32.mrf.mxu2  ;;  %v18653_v5 = vld [vmem:[#allocation11 + $0x15ec] sm:$0xf] }
 0x359   :  { %9826 = vmatpush.bf16.msra.mxu0 %v15477_v55  ;;  %9748 = vmatpush.bf16.msra.mxu1 %v16753_v39  ;;  %v15637_v55 = vor.u32 %v18373_v24, %v15634_v60  ;;  %v18283_v39 = vld [vmem:[#allocation11 + $0xa5c] sm:$0xf]  ;;  %v16754_v24 = vld [vmem:[#allocation11 + $0x1610] sm:$0xf0]  ;;  %v15197_v60 = vor.u32 %v18263_v59, %v15194_v43  ;;  %v16954_v59 = vld [vmem:[#allocation11 + $0x17a0] sm:$0xf0] }
 0x35a   :  { %9761 = vmatpush.bf16.msra.mxu3 %v17073_v22  ;;  %v16913_v22 = vor.u32 %v18698_v34, %v16912_v29  ;;  %v14834_v29 = vld [vmem:[#allocation11 + $0x710] sm:$0xf0]  ;;  %v18253_v34 = vld [vmem:[#allocation11 + $0x96c] sm:$0xf]  ;;  %v16757_v16 = vor.u32 %v18653_v5, %v16754_v24  ;;  %v18143_v43 = vld [vmem:[#allocation11 + $0x5fc] sm:$0xf] }
 0x35b   :  { %9839 = vmatpush.bf16.msra.mxu2 %v15797_v58  ;;  %v16593_v58 = vor.u32 %v18618_v10, %v16592_v33  ;;  %v17074_v33 = vld [vmem:[#allocation11 + $0x1890] sm:$0xf0]  ;;  %v18173_v10 = vld [vmem:[#allocation11 + $0x6ec] sm:$0xf] }
 0x35d   :  { %9827 = vmatpush.bf16.msra.mxu0 %v15437_v47  ;;  %9749 = vmatpush.bf16.msra.mxu1 %v16713_v35  ;;  %v15277_v47 = vor.u32 %v18283_v39, %v15274_v12  ;;  %v15234_v35 = vld [vmem:[#allocation11 + $0xa30] sm:$0xf0]  ;;  %v18643_v39 = vld [vmem:[#allocation11 + $0x159c] sm:$0xf]  ;;  %v16714_v12 = vld [vmem:[#allocation11 + $0x15c0] sm:$0xf0] }
 0x35e   :  { %9762 = vmatpush.bf16.msra.mxu3 %v17033_v48  ;;  %v15554_v48 = vld [vmem:[#allocation11 + $0xcb0] sm:$0xf0] }
 0x35f   :  { %9840 = vmatpush.bf16.msra.mxu2 %v15757_v30  ;;  %v18273_v30 = vld [vmem:[#allocation11 + $0xa0c] sm:$0xf]  ;;  %v15557_v7 = vor.u32 %v18353_v2, %v15554_v48  ;;  %v16674_v48 = vld [vmem:[#allocation11 + $0x1570] sm:$0xf0] }
 0x360   :  { %v15237_v1 = vor.u32 %v18273_v30, %v15234_v35  ;;  %v9589_v42 = vpop.f32.mrf.mxu2  ;;  %v17037_v35 = vor.u32 %v18723_v15, %v17034_v13  ;;  %v18633_v2 = vld [vmem:[#allocation11 + $0x154c] sm:$0xf] }
 0x361   :  { %9828 = vmatpush.bf16.msra.mxu0 %v15397_v51  ;;  %9750 = vmatpush.bf16.msra.mxu1 %v16673_v38  ;;  %v16512_v51 = vld [vmem:[#allocation11 + $0x1408] sm:$0xf]  ;;  %v14714_v42 = vld [vmem:[#allocation11 + $0x620] sm:$0xf0] }
 0x362   :  { %9763 = vmatpush.bf16.msra.mxu3 %v16993_v31  ;;  %v16832_v38 = vld [vmem:[#allocation11 + $0x1688] sm:$0xf]  ;;  %v14874_v31 = vld [vmem:[#allocation11 + $0x760] sm:$0xf0] }
 0x363   :  { %9841 = vmatpush.bf16.msra.mxu2 %v15717_v17  ;;  %v18598_v17 = vld [vmem:[#allocation11 + $0x142c] sm:$0xf0]  ;;  %v14877_v3 = vor.u32 %v18183_v25, %v14874_v31  ;;  %v18623_v31 = vld [vmem:[#allocation11 + $0x14fc] sm:$0xf] }
 0x365   :  { %9829 = vmatpush.bf16.msra.mxu0 %v15357_v44  ;;  %9751 = vmatpush.bf16.msra.mxu1 %v16633_v19  ;;  %v17117_v44 = vor.u32 %v18743_v23, %v17114_v18  ;;  %v16833_v19 = vor.u32 %v18678_v6, %v16832_v38  ;;  %v18153_v23 = vld [vmem:[#allocation11 + $0x64c] sm:$0xf]  ;;  %v14754_v18 = vld [vmem:[#allocation11 + $0x670] sm:$0xf0]  ;;  %v16997_v6 = vor.u32 %v18713_v61, %v16994_v62  ;;  %v18203_v61 = vld [vmem:[#allocation11 + $0x7dc] sm:$0xf] }
 0x366   :  { %9764 = vmatpush.bf16.msra.mxu3 %v16953_v57  ;;  %v18733_v57 = vld [vmem:[#allocation11 + $0x186c] sm:$0xf]  ;;  %v14757_v25 = vor.u32 %v18153_v23, %v14754_v18 }
 0x367   :  { %9842 = vmatpush.bf16.msra.mxu2 %v15677_v14  ;;  %v16513_v14 = vor.u32 %v18598_v17, %v16512_v51  ;;  %v18233_v51 = vld [vmem:[#allocation11 + $0x8cc] sm:$0xf]  ;;  %v15074_v17 = vld [vmem:[#allocation11 + $0x8f0] sm:$0xf0] }
 0x368   :  { %v18593_v18 = vld [vmem:[#allocation11 + $0x140c] sm:$0xf] }
 0x369   :  { %9830 = vmatpush.bf16.msra.mxu0 %v15317_v11  ;;  %9752 = vmatpush.bf16.msra.mxu1 %v16593_v58  ;;  %v15154_v11 = vld [vmem:[#allocation11 + $0x990] sm:$0xf0]  ;;  %v14837_v58 = vor.u32 %v18173_v10, %v14834_v29  ;;  %v18693_v29 = vld [vmem:[#allocation11 + $0x172c] sm:$0xf] }
 0x36a   :  { %9765 = vmatpush.bf16.msra.mxu3 %v16913_v22  ;;  %v15157_v22 = vor.u32 %v18253_v34, %v15154_v11  ;;  %v16594_v10 = vld [vmem:[#allocation11 + $0x14d0] sm:$0xf0] }
 0x36b   :  { %9843 = vmatpush.bf16.msra.mxu2 %v15637_v55  ;;  %v17077_v55 = vor.u32 %v18733_v57, %v17074_v33  ;;  %v18613_v33 = vld [vmem:[#allocation11 + $0x14ac] sm:$0xf]  ;;  %v16914_v11 = vld [vmem:[#allocation11 + $0x1750] sm:$0xf0] }
 0x36c   :  { %v16597_v15 = vor.u32 %v18613_v33, %v16594_v10  ;;  %v16917_v13 = vor.u32 %v18693_v29, %v16914_v11  ;;  %v16154_v33 = vld [vmem:[#allocation11 + $0x1160] sm:$0xf0] }
 0x36d   :  { %9831 = vmatpush.bf16.msra.mxu0 %v15277_v47  ;;  %9753 = vmatpush.bf16.msra.mxu1 %v16553_v40  ;;  %v16717_v47 = vor.u32 %v18643_v39, %v16714_v12  ;;  %v14994_v39 = vld [vmem:[#allocation11 + $0x850] sm:$0xf0]  ;;  %v16474_v11 = vld [vmem:[#allocation11 + $0x13e0] sm:$0xf0] }
 0x36e   :  { %9766 = vmatpush.bf16.msra.mxu3 %v16873_v32  ;;  %v15117_v32 = vor.u32 %v18243_v26, %v15114_v20  ;;  %v16554_v26 = vld [vmem:[#allocation11 + $0x1480] sm:$0xf0]  ;;  %v18683_v20 = vld [vmem:[#allocation11 + $0x16dc] sm:$0xf] }
 0x36f   :  { %9844 = vmatpush.bf16.msra.mxu2 %v15597_v52  ;;  %v14797_v52 = vor.u32 %v18163_v21, %v14794_v36  ;;  %v18603_v36 = vld [vmem:[#allocation11 + $0x145c] sm:$0xf] }
 0x370   :  { %v16557_v62 = vor.u32 %v18603_v36, %v16554_v26  ;;  %v18179_v36 = vld [vmem:[#allocation11 + $0x714] sm:$0xf0]  ;;  %v15160_v26 = vld [vmem:[#allocation11 + $0x970] sm:$0xf] }
 0x371   :  { %9832 = vmatpush.bf16.msra.mxu0 %v15237_v1  ;;  %9754 = vmatpush.bf16.msra.mxu1 %v16513_v14  ;;  %v9496_v30 = vpop.f32.mrf.mxu1  ;;  %v16677_v1 = vor.u32 %v18633_v2, %v16674_v48  ;;  %v18223_v14 = vld [vmem:[#allocation11 + $0x87c] sm:$0xf] }
 0x372   :  { %9767 = vmatpush.bf16.msra.mxu3 %v16833_v19  ;;  %v9497_v40 = vadd.f32 %v9496_v30, %v19841_v27  ;;  %v16634_v27 = vld [vmem:[#allocation11 + $0x1520] sm:$0xf0] }
 0x373   :  { %9845 = vmatpush.bf16.msra.mxu2 %v15557_v7  ;;  %v19858_v38 = vpop.f32.mrf.mxu0  ;;  %v18703_v7 = vld [vmem:[#allocation11 + $0x177c] sm:$0xf]  ;;  %v15034_v19 = vld [vmem:[#allocation11 + $0x8a0] sm:$0xf0] }
 0x374   :  { %9833 = vmatmul.bf16.vlgmr.msra.gmra.mxu0 %v19763_v41  ;;  %9755 = vmatmul.bf16.vlgmr.msra.gmra.mxu1 %v19820_v50  ;;  %v16957_v57 = vor.u32 %v18703_v7, %v16954_v59  ;;  %v15037_v34 = vor.u32 %v18223_v14, %v15034_v19  ;;  %v18189_v7 = vld [vmem:[#allocation11 + $0x764] sm:$0xf0]  ;;  %v18113_v14 = vld [vmem:[#allocation11 + $0x50c] sm:$0xf]  ;;  %v14594_v19 = vld [vmem:[#allocation11 + $0x530] sm:$0xf0] }
 0x375   :  { %9877 = vmatpush.bf16.msrb.mxu0 %v16797_v49  ;;  %9799 = vmatpush.bf16.msrb.mxu1 %v14877_v3  ;;  %v15077_v49 = vor.u32 %v18233_v51, %v15074_v17  ;;  %v16637_v3 = vor.u32 %v18623_v31, %v16634_v27  ;;  %v16514_v51 = vld [vmem:[#allocation11 + $0x1430] sm:$0xf0]  ;;  %v18673_v17 = vld [vmem:[#allocation11 + $0x168c] sm:$0xf]  ;;  %v14880_v27 = vld [vmem:[#allocation11 + $0x740] sm:$0xf] }
 0x376   :  { %9812 = vmatpush.bf16.msrb.mxu3 %v15197_v60  ;;  %9846 = vmatmul.bf16.vlgmr.msra.gmra.mxu2 %v19770_v9  ;;  %v14717_v60 = vor.u32 %v18143_v43, %v14714_v42  ;;  %v16834_v31 = vld [vmem:[#allocation11 + $0x16b0] sm:$0xf0]  ;;  %v15200_v43 = vld [vmem:[#allocation11 + $0x9c0] sm:$0xf]  ;;  %v18269_v42 = vld [vmem:[#allocation11 + $0x9e4] sm:$0xf0]  ;;  %v14881_v29 = vor.u32 %v18189_v7, %v14880_v27 }
 0x377   :  { %9890 = vmatpush.bf16.msrb.mxu2 %v17117_v44  ;;  %9768 = vmatmul.bf16.vlgmr.msra.gmra.mxu3 %v19822_v53  ;;  %v9509_v44 = vpop.f32.mrf.mxu3  ;;  %v16837_v10 = vor.u32 %v18673_v17, %v16834_v31  ;;  %v14800_v17 = vld [vmem:[#allocation11 + $0x6a0] sm:$0xf]  ;;  %v18249_v31 = vld [vmem:[#allocation11 + $0x944] sm:$0xf0]  ;;  %v18483_v27 = vld [vmem:[#allocation11 + $0x109c] sm:$0xf] }
 0x378   :  { %v19860_v5 = vadd.f32 %v9509_v44, %v9497_v40  ;;  %v14634_v40 = vld [vmem:[#allocation11 + $0x580] sm:$0xf0] }
 0x379   :  { %9878 = vmatpush.bf16.msrb.mxu0 %v16757_v16  ;;  %9800 = vmatpush.bf16.msrb.mxu1 %v14837_v58  ;;  %v9498_v24 = vpop.f32.mrf.mxu1  ;;  %v18133_v16 = vld [vmem:[#allocation11 + $0x5ac] sm:$0xf]  ;;  %v16074_v7 = vld [vmem:[#allocation11 + $0x10c0] sm:$0xf0] }
 0x37a   :  { %9813 = vmatpush.bf16.msrb.mxu3 %v15157_v22  ;;  %v18213_v58 = vld [vmem:[#allocation11 + $0x82c] sm:$0xf]  ;;  %v10692_v2 = vrot.slane %v19860_v5, 4  ;;  %v16517_v24 = vor.u32 %v18593_v18, %v16514_v51 }
 0x37b   :  { %9891 = vmatpush.bf16.msrb.mxu2 %v17077_v55  ;;  %v14674_v55 = vld [vmem:[#allocation11 + $0x5d0] sm:$0xf0]  ;;  %v9628_v12 = vpop.f32.mrf.mxu0  ;;  %v19862_v22 = vpop.f32.mrf.mxu2  ;;  %v14997_v30 = vor.u32 %v18213_v58, %v14994_v39  ;;  %v14597_v58 = vor.u32 %v18113_v14, %v14594_v19  ;;  %v14840_v39 = vld [vmem:[#allocation11 + $0x6f0] sm:$0xf]  ;;  %v18159_v14 = vld [vmem:[#allocation11 + $0x674] sm:$0xf0] }
 0x37c   :  { %v14677_v21 = vor.u32 %v18133_v16, %v14674_v55  ;;  %v10693_v44 = vadd.f32 %v10692_v2, %v19860_v5  ;;  %v15201_v55 = vor.u32 %v18269_v42, %v15200_v43  ;;  %v16114_v2 = vld [vmem:[#allocation11 + $0x1110] sm:$0xf0] }
 0x37d   :  { %9879 = vmatpush.bf16.msrb.mxu0 %v16717_v47  ;;  %9801 = vmatpush.bf16.msrb.mxu1 %v14797_v52  ;;  %v10762_v47 = vmul.f32 %v19860_v5, %v19860_v5  ;;  %v18123_v52 = vld [vmem:[#allocation11 + $0x55c] sm:$0xf] }
 0x37e   :  { %9814 = vmatpush.bf16.msrb.mxu3 %v15117_v32  ;;  %v14954_v32 = vld [vmem:[#allocation11 + $0x800] sm:$0xf0]  ;;  %v10694_v12 = vrot.slane %v10693_v44, 2 }
 0x37f   :  { %9892 = vmatpush.bf16.msrb.mxu2 %v17037_v35  ;;  %v16874_v35 = vld [vmem:[#allocation11 + $0x1700] sm:$0xf0]  ;;  %v9511_v48 = vpop.f32.mrf.mxu3  ;;  %v14957_v59 = vor.u32 %v18203_v61, %v14954_v32 }
 0x380   :  { %v16434_v48 = vld [vmem:[#allocation11 + $0x1390] sm:$0xf0] }
 0x381   :  { %9880 = vmatpush.bf16.msrb.mxu0 %v16677_v1  ;;  %9802 = vmatpush.bf16.msrb.mxu1 %v14757_v25  ;;  %v9548_v23 = vpop.f32.mrf.mxu1  ;;  %v16877_v1 = vor.u32 %v18683_v20, %v16874_v35  ;;  %v18259_v35 = vld [vmem:[#allocation11 + $0x994] sm:$0xf0] }
 0x382   :  { %9815 = vmatpush.bf16.msrb.mxu3 %v15077_v49  ;;  %v9549_v25 = vadd.f32 %v9548_v23, %v19843_v63  ;;  %v10772_v49 = vrot.slane %v10762_v47, 4  ;;  %v10695_v23 = vadd.f32 %v10694_v12, %v10693_v44  ;;  %v15161_v18 = vor.u32 %v18259_v35, %v15160_v26  ;;  %v14760_v44 = vld [vmem:[#allocation11 + $0x650] sm:$0xf]  ;;  %v15040_v26 = vld [vmem:[#allocation11 + $0x880] sm:$0xf] }
 0x383   :  { %9893 = vmatpush.bf16.msrb.mxu2 %v16997_v6  ;;  %v14637_v6 = vor.u32 %v18123_v52, %v14634_v40  ;;  %v9641_v63 = vpop.f32.mrf.mxu2  ;;  %v18493_v40 = vld [vmem:[#allocation11 + $0x10ec] sm:$0xf]  ;;  %v18463_v35 = vld [vmem:[#allocation11 + $0xffc] sm:$0xf] }
 0x384   :  { %v10773_v16 = vadd.f32 %v10772_v49, %v10762_v47  ;;  %v18573_v47 = vld [vmem:[#allocation11 + $0x136c] sm:$0xf]  ;;  %v16117_v51 = vor.u32 %v18493_v40, %v16114_v2  ;;  %v10696_v19 = vrot.slane %v10695_v23, 1  ;;  %v18543_v40 = vld [vmem:[#allocation11 + $0x127c] sm:$0xf] }
 0x385   :  { %9881 = vmatpush.bf16.msrb.mxu0 %v16637_v3  ;;  %9803 = vmatpush.bf16.msrb.mxu1 %v14717_v60  ;;  %v18193_v3 = vld [vmem:[#allocation11 + $0x78c] sm:$0xf]  ;;  %v18503_v60 = vld [vmem:[#allocation11 + $0x113c] sm:$0xf]  ;;  %v16314_v2 = vld [vmem:[#allocation11 + $0x12a0] sm:$0xf0] }
 0x386   :  { %9816 = vmatpush.bf16.msrb.mxu3 %v15037_v34  ;;  %v18583_v34 = vld [vmem:[#allocation11 + $0x13bc] sm:$0xf]  ;;  %v10774_v61 = vrot.slane %v10773_v16, 2  ;;  %v18473_v63 = vld [vmem:[#allocation11 + $0x104c] sm:$0xf]  ;;  %v10697_v12 = vadd.f32 %v10696_v19, %v10695_v23 }
 0x387   :  { %9894 = vmatpush.bf16.msrb.mxu2 %v16957_v57  ;;  %v14914_v57 = vld [vmem:[#allocation11 + $0x7b0] sm:$0xf0]  ;;  %v16477_v20 = vor.u32 %v18583_v34, %v16474_v11  ;;  %v18553_v34 = vld [vmem:[#allocation11 + $0x12cc] sm:$0xf]  ;;  %v14680_v23 = vld [vmem:[#allocation11 + $0x5b0] sm:$0xf] }
 0x388   :  { %v10775_v43 = vadd.f32 %v10774_v61, %v10773_v16  ;;  %v16354_v11 = vld [vmem:[#allocation11 + $0x12f0] sm:$0xf0]  ;;  %v19878_v61 = vmul.f32 %v10697_v12, %v19375_v54  ;;  %v18119_v12 = vld [vmem:[#allocation11 + $0x534] sm:$0xf0] }
 0x389   :  { %9882 = vmatpush.bf16.msrb.mxu0 %v16597_v15  ;;  %9804 = vmatpush.bf16.msrb.mxu1 %v14677_v21  ;;  %v14917_v15 = vor.u32 %v18193_v3, %v14914_v57  ;;  %v9561_v21 = vpop.f32.mrf.mxu3  ;;  %v9550_v52 = vpop.f32.mrf.mxu1 }
 0x38a   :  { %9817 = vmatpush.bf16.msrb.mxu3 %v14997_v30  ;;  %v9562_v30 = vadd.f32 %v9561_v21, %v9549_v25  ;;  %v16437_v25 = vor.u32 %v18573_v47, %v16434_v48  ;;  %v10776_v16 = vrot.slane %v10775_v43, 1  ;;  %v14720_v21 = vld [vmem:[#allocation11 + $0x600] sm:$0xf]  ;;  %v15994_v52 = vld [vmem:[#allocation11 + $0x1020] sm:$0xf0] }
 0x38b   :  { %9895 = vmatpush.bf16.msrb.mxu2 %v16917_v13  ;;  %v16157_v13 = vor.u32 %v18503_v60, %v16154_v33  ;;  %v18239_v60 = vld [vmem:[#allocation11 + $0x8f4] sm:$0xf0] }
 0x38c   :  { %v9575_v32 = vadd.f32 %v19849_v4, %v9562_v30  ;;  %v18563_v4 = vld [vmem:[#allocation11 + $0x131c] sm:$0xf]  ;;  %v18229_v30 = vld [vmem:[#allocation11 + $0x8a4] sm:$0xf0]  ;;  %v10777_v47 = vadd.f32 %v10776_v16, %v10775_v43  ;;  %v16234_v16 = vld [vmem:[#allocation11 + $0x1200] sm:$0xf0] }
 0x38d   :  { %9883 = vmatpush.bf16.msrb.mxu0 %v16557_v62  ;;  %9805 = vmatpush.bf16.msrb.mxu1 %v14637_v6  ;;  %v14841_v62 = vor.u32 %v18179_v36, %v14840_v39  ;;  %v15120_v6 = vld [vmem:[#allocation11 + $0x920] sm:$0xf]  ;;  %v18149_v36 = vld [vmem:[#allocation11 + $0x624] sm:$0xf0] }
 0x38e   :  { %9818 = vmatpush.bf16.msrb.mxu3 %v14957_v59  ;;  %v9588_v49 = vadd.f32 %v19851_v0, %v9575_v32  ;;  %v16394_v59 = vld [vmem:[#allocation11 + $0x1340] sm:$0xf0]  ;;  %v15121_v3 = vor.u32 %v18249_v31, %v15120_v6  ;;  %v15080_v0 = vld [vmem:[#allocation11 + $0x8d0] sm:$0xf]  ;;  %v14721_v48 = vor.u32 %v18149_v36, %v14720_v21  ;;  %v15041_v32 = vor.u32 %v18229_v30, %v15040_v26  ;;  %v18453_v6 = vld [vmem:[#allocation11 + $0xfac] sm:$0xf] }
 0x38f   :  { %9896 = vmatpush.bf16.msrb.mxu2 %v16877_v1  ;;  %v18169_v1 = vld [vmem:[#allocation11 + $0x6c4] sm:$0xf0]  ;;  %v16397_v33 = vor.u32 %v18563_v4, %v16394_v59  ;;  %v10832_v4 = vmul.f32 %v10777_v47, %v19375_v54  ;;  %v16160_v26 = vld [vmem:[#allocation11 + $0x1140] sm:$0xf] }
 0x390   :  { %v14801_v42 = vor.u32 %v18169_v1, %v14800_v17  ;;  %v16317_v17 = vor.u32 %v18543_v40, %v16314_v2  ;;  %v18219_v1 = vld [vmem:[#allocation11 + $0x854] sm:$0xf0]  ;;  %v16480_v30 = vld [vmem:[#allocation11 + $0x13c0] sm:$0xf]  ;;  %v18589_v40 = vld [vmem:[#allocation11 + $0x13e4] sm:$0xf0] }
 0x391   :  { %9884 = vmatpush.bf16.msrb.mxu0 %v16517_v24  ;;  %9806 = vmatpush.bf16.msrb.mxu1 %v14597_v58  ;;  %v16077_v24 = vor.u32 %v18483_v27, %v16074_v7  ;;  %v9563_v57 = vpop.f32.mrf.mxu3  ;;  %v15081_v58 = vor.u32 %v18239_v60, %v15080_v0  ;;  %v9600_v39 = vpop.f32.mrf.mxu1  ;;  %v18533_v7 = vld [vmem:[#allocation11 + $0x122c] sm:$0xf]  ;;  %v14960_v0 = vld [vmem:[#allocation11 + $0x7e0] sm:$0xf] }
 0x392   :  { %9819 = vmatpush.bf16.msrb.mxu3 %v14917_v15  ;;  %v9601_v15 = vadd.f32 %v9600_v39, %v9588_v49  ;;  %v16274_v49 = vld [vmem:[#allocation11 + $0x1250] sm:$0xf0]  ;;  %v18129_v57 = vld [vmem:[#allocation11 + $0x584] sm:$0xf0]  ;;  %v18433_v2 = vld [vmem:[#allocation11 + $0xf0c] sm:$0xf] }
 0x393   :  { %9897 = vmatpush.bf16.msrb.mxu2 %v16837_v10  ;;  %v16034_v10 = vld [vmem:[#allocation11 + $0x1070] sm:$0xf0] }
 0x394   :  { %9885 = vmatmul.bf16.vlgmr.msrb.gmra.mxu0 %v19820_v50  ;;  %9807 = vmatmul.bf16.vlgmr.msrb.gmra.mxu1 %v19729_v28 }
 0x395   :  { %9929 = vmatpush.bf16.msra.mxu0 %v14881_v29  ;;  %9851 = vmatpush.bf16.msra.mxu1 %v16157_v13  ;;  %v19875_v29 = vpop.f32.mrf.mxu0  ;;  %v16037_v13 = vor.u32 %v18473_v63, %v16034_v10  ;;  %v18209_v63 = vld [vmem:[#allocation11 + $0x804] sm:$0xf0]  ;;  %v18443_v10 = vld [vmem:[#allocation11 + $0xf5c] sm:$0xf] }
 0x396   :  { %9864 = vmatpush.bf16.msra.mxu3 %v16477_v20  ;;  %9898 = vmatmul.bf16.vlgmr.msrb.gmra.mxu2 %v19822_v53  ;;  %v16357_v20 = vor.u32 %v18553_v34, %v16354_v11  ;;  %v15914_v34 = vld [vmem:[#allocation11 + $0xf80] sm:$0xf0]  ;;  %v18523_v11 = vld [vmem:[#allocation11 + $0x11dc] sm:$0xf]  ;;  %v14961_v36 = vor.u32 %v18209_v63, %v14960_v0  ;;  %v18579_v0 = vld [vmem:[#allocation11 + $0x1394] sm:$0xf0] }
 0x397   :  { %9942 = vmatpush.bf16.msra.mxu2 %v15201_v55  ;;  %9820 = vmatmul.bf16.vlgmr.msrb.gmra.mxu3 %v19731_v45  ;;  %v14761_v55 = vor.u32 %v18159_v14, %v14760_v44  ;;  %v10842_v14 = vmul.f32 %v19878_v61, %v19878_v61 }
 0x399   :  { %9930 = vmatpush.bf16.msra.mxu0 %v14841_v62  ;;  %9852 = vmatpush.bf16.msra.mxu1 %v16117_v51  ;;  %v15997_v62 = vor.u32 %v18463_v35, %v15994_v52  ;;  %v15000_v51 = vld [vmem:[#allocation11 + $0x830] sm:$0xf]  ;;  %v19881_v59 = vpop.f32.mrf.mxu2  ;;  %v9602_v44 = vpop.f32.mrf.mxu1  ;;  %v10852_v21 = vsub.f32 %v10832_v4, %v10842_v14 }
 0x39a   :  { %9865 = vmatpush.bf16.msra.mxu3 %v16437_v25  ;;  %v15954_v25 = vld [vmem:[#allocation11 + $0xfd0] sm:$0xf0]  ;;  %v9613_v27 = vpop.f32.mrf.mxu3  ;;  %v15001_v19 = vor.u32 %v18219_v1, %v15000_v51  ;;  %v14240_v1 = vld [vmem:[#allocation11 + $0x240] sm:$0xf]  ;;  %v16120_v14 = vld [vmem:[#allocation11 + $0x10f0] sm:$0xf] }
 0x39b   :  { %9943 = vmatpush.bf16.msra.mxu2 %v15161_v18  ;;  %v18139_v18 = vld [vmem:[#allocation11 + $0x5d4] sm:$0xf0]  ;;  %v9614_v43 = vadd.f32 %v9613_v27, %v9601_v15  ;;  %v14920_v15 = vld [vmem:[#allocation11 + $0x790] sm:$0xf] }
 0x39d   :  { %9931 = vmatpush.bf16.msra.mxu0 %v14801_v42  ;;  %9853 = vmatpush.bf16.msra.mxu1 %v16077_v24  ;;  %v9680_v31 = vpop.f32.mrf.mxu0  ;;  %v14681_v42 = vor.u32 %v18139_v18, %v14680_v23  ;;  %v14640_v24 = vld [vmem:[#allocation11 + $0x560] sm:$0xf]  ;;  %v9627_v60 = vadd.f32 %v19858_v38, %v9614_v43  ;;  %v15917_v38 = vor.u32 %v18443_v10, %v15914_v34  ;;  %v14200_v10 = vld [vmem:[#allocation11 + $0x1f0] sm:$0xf]  ;;  %v18019_v34 = vld [vmem:[#allocation11 + $0x214] sm:$0xf0] }
 0x39e   :  { %9866 = vmatpush.bf16.msra.mxu3 %v16397_v33  ;;  %v16277_v33 = vor.u32 %v18533_v7, %v16274_v49  ;;  %v14641_v39 = vor.u32 %v18129_v57, %v14640_v24  ;;  %v14560_v7 = vld [vmem:[#allocation11 + $0x4c0] sm:$0xf]  ;;  %v18109_v49 = vld [vmem:[#allocation11 + $0x4e4] sm:$0xf0]  ;;  %v18499_v24 = vld [vmem:[#allocation11 + $0x1114] sm:$0xf0] }
 0x39f   :  { %9944 = vmatpush.bf16.msra.mxu2 %v15121_v3  ;;  %v15957_v3 = vor.u32 %v18453_v6, %v15954_v25  ;;  %v18029_v6 = vld [vmem:[#allocation11 + $0x264] sm:$0xf0]  ;;  %v10862_v25 = vmax.f32 %v10852_v21, 0.0  ;;  %v16440_v57 = vld [vmem:[#allocation11 + $0x1370] sm:$0xf]  ;;  %v14561_v63 = vor.u32 %v18109_v49, %v14560_v7 }
 0x3a0   :  { %v16441_v21 = vor.u32 %v18579_v0, %v16440_v57  ;;  %v14120_v7 = vld [vmem:[#allocation11 + $0x150] sm:$0xf]  ;;  %v17999_v49 = vld [vmem:[#allocation11 + $0x174] sm:$0xf0] }
 0x3a1   :  { %9932 = vmatpush.bf16.msra.mxu0 %v14761_v55  ;;  %9854 = vmatpush.bf16.msra.mxu1 %v16037_v13  ;;  %v14600_v55 = vld [vmem:[#allocation11 + $0x510] sm:$0xf]  ;;  %v18199_v13 = vld [vmem:[#allocation11 + $0x7b4] sm:$0xf0]  ;;  %v9693_v51 = vpop.f32.mrf.mxu2  ;;  %v14121_v0 = vor.u32 %v17999_v49, %v14120_v7  ;;  %v18449_v7 = vld [vmem:[#allocation11 + $0xf84] sm:$0xf0] }
 0x3a2   :  { %9867 = vmatpush.bf16.msra.mxu3 %v16357_v20  ;;  %v18509_v20 = vld [vmem:[#allocation11 + $0x1164] sm:$0xf0]  ;;  %v9615_v47 = vpop.f32.mrf.mxu3  ;;  %v14921_v31 = vor.u32 %v18199_v13, %v14920_v15  ;;  %v16121_v15 = vor.u32 %v18499_v24, %v16120_v14  ;;  %v16080_v13 = vld [vmem:[#allocation11 + $0x10a0] sm:$0xf]  ;;  %v16040_v51 = vld [vmem:[#allocation11 + $0x1050] sm:$0xf] }
 0x3a3   :  { %9945 = vmatpush.bf16.msra.mxu2 %v15081_v58  ;;  %v19887_v58 = vadd.f32 %v19862_v22, %v9627_v60  ;;  %v16237_v22 = vor.u32 %v18523_v11, %v16234_v16  ;;  %v16161_v27 = vor.u32 %v18509_v20, %v16160_v26  ;;  %v19893_v11 = vadd.f32 1e-05, %v10862_v25  ;;  %v14520_v16 = vld [vmem:[#allocation11 + $0x470] sm:$0xf]  ;;  %v16400_v26 = vld [vmem:[#allocation11 + $0x1320] sm:$0xf] }
 0x3a4   :  { %v18569_v20 = vld [vmem:[#allocation11 + $0x1344] sm:$0xf0]  ;;  %v16240_v49 = vld [vmem:[#allocation11 + $0x11e0] sm:$0xf] }
 0x3a5   :  { %9933 = vmatpush.bf16.msra.mxu0 %v14721_v48  ;;  %9855 = vmatpush.bf16.msra.mxu1 %v15997_v62  ;;  %v10698_v35 = vrot.slane %v19887_v58, 4  ;;  %v10763_v52 = vmul.f32 %v19887_v58, %v19887_v58  ;;  %v15874_v48 = vld [vmem:[#allocation11 + $0xf30] sm:$0xf0]  ;;  %18872 = vrsqrt.f32 %v19893_v11  ;;  %v18089_v47 = vld [vmem:[#allocation11 + $0x444] sm:$0xf0]  ;;  %vm10888_vm5 = vweird.f32 %v19893_v11 }
 0x3a6   :  { %9868 = vmatpush.bf16.msra.mxu3 %v16317_v17  ;;  %v16194_v62 = vld [vmem:[#allocation11 + $0x11b0] sm:$0xf0]  ;;  %v14601_v17 = vor.u32 %v18119_v12, %v14600_v55  ;;  %v15877_v44 = vor.u32 %v18433_v2, %v15874_v48  ;;  %v18099_v55 = vld [vmem:[#allocation11 + $0x494] sm:$0xf0]  ;;  %v14480_v2 = vld [vmem:[#allocation11 + $0x420] sm:$0xf] }
 0x3a7   :  { %9946 = vmatpush.bf16.msra.mxu2 %v15041_v32  ;;  %v18513_v32 = vld [vmem:[#allocation11 + $0x118c] sm:$0xf]  ;;  %v10699_v23 = vadd.f32 %v10698_v35, %v19887_v58  ;;  %v10778_v18 = vrot.slane %v10763_v52, 4 }
 0x3a9   :  { %9934 = vmatpush.bf16.msra.mxu0 %v14681_v42  ;;  %9856 = vmatpush.bf16.msra.mxu1 %v15957_v3  ;;  %v10700_v4 = vrot.slane %v10699_v23, 2  ;;  %v10779_v43 = vadd.f32 %v10778_v18, %v10763_v52  ;;  %v16481_v42 = vor.u32 %v18589_v40, %v16480_v30  ;;  %v14241_v3 = vor.u32 %v18029_v6, %v14240_v1  ;;  %v18009_v40 = vld [vmem:[#allocation11 + $0x1c4] sm:$0xf0]  ;;  %v16360_v1 = vld [vmem:[#allocation11 + $0x12d0] sm:$0xf] }
 0x3aa   :  { %9869 = vmatpush.bf16.msra.mxu3 %v16277_v33  ;;  %v14521_v52 = vor.u32 %v18099_v55, %v14520_v16  ;;  %v14080_v16 = vld [vmem:[#allocation11 + $0x100] sm:$0xf]  ;;  %v17989_v55 = vld [vmem:[#allocation11 + $0x124] sm:$0xf0] }
 0x3ab   :  { %9947 = vmatpush.bf16.msra.mxu2 %v15001_v19  ;;  %v16197_v19 = vor.u32 %v18513_v32, %v16194_v62  ;;  %v10701_v60 = vadd.f32 %v10700_v4, %v10699_v23  ;;  %v10780_v33 = vrot.slane %v10779_v43, 2  ;;  %v16401_v23 = vor.u32 %v18569_v20, %v16400_v26  ;;  %v19908_v24 = vpop.eup %18872  ;;  %v15960_v26 = vld [vmem:[#allocation11 + $0xfb0] sm:$0xf]  ;;  %v18459_v20 = vld [vmem:[#allocation11 + $0xfd4] sm:$0xf0] }
 0x3ac   :  { %vm10889_vm12 = vweird.f32 %v19908_v24 }
 0x3ad   :  { %9935 = vmatpush.bf16.msra.mxu0 %v14641_v39  ;;  %9857 = vmatpush.bf16.msra.mxu1 %v15917_v38  ;;  %v10702_v39 = vrot.slane %v10701_v60, 1  ;;  %v10781_v12 = vadd.f32 %v10780_v33, %v10779_v43  ;;  %v18489_v38 = vld [vmem:[#allocation11 + $0x10c4] sm:$0xf0]  ;;  %v14440_v43 = vld [vmem:[#allocation11 + $0x3d0] sm:$0xf]  ;;  %vm10890_vm6 = vmor %vm10888_vm5, %vm10889_vm12 }
 0x3ae   :  { %9870 = vmatpush.bf16.msra.mxu3 %v16237_v22  ;;  %v14160_v22 = vld [vmem:[#allocation11 + $0x1a0] sm:$0xf]  ;;  %v16081_v62 = vor.u32 %v18489_v38, %v16080_v13  ;;  %v14081_v38 = vor.u32 %v17989_v55, %v14080_v16  ;;  %v16200_v55 = vld [vmem:[#allocation11 + $0x1190] sm:$0xf] }
 0x3af   :  { %9948 = vmatpush.bf16.msra.mxu2 %v14961_v36  ;;  %v14201_v36 = vor.u32 %v18019_v34, %v14200_v10  ;;  %v10703_v30 = vadd.f32 %v10702_v39, %v10701_v60  ;;  %v10782_v35 = vrot.slane %v10781_v12, 1  ;;  %v14161_v18 = vor.u32 %v18009_v40, %v14160_v22  ;;  %v18469_v60 = vld [vmem:[#allocation11 + $0x1024] sm:$0xf0]  ;;  %v16320_v33 = vld [vmem:[#allocation11 + $0x1280] sm:$0xf] }
 0x3b0   :  { %v14400_v39 = vld [vmem:[#allocation11 + $0x380] sm:$0xf]  ;;  %v18539_v22 = vld [vmem:[#allocation11 + $0x1254] sm:$0xf0]  ;;  %v14040_v40 = vld [vmem:[#allocation11 + $0xb0] sm:$0xf] }
 0x3b1   :  { %9936 = vmatpush.bf16.msra.mxu0 %v14601_v17  ;;  %9858 = vmatpush.bf16.msra.mxu1 %v15877_v44  ;;  %v19900_v48 = vmul.f32 %v10703_v30, %v19375_v54  ;;  %v10783_v32 = vadd.f32 %v10782_v35, %v10781_v12  ;;  %v18479_v17 = vld [vmem:[#allocation11 + $0x1074] sm:$0xf0]  ;;  %v19906_v4 = vpop.f32.mrf.mxu0  ;;  %v18069_v12 = vld [vmem:[#allocation11 + $0x3a4] sm:$0xf0]  ;;  %v16280_v30 = vld [vmem:[#allocation11 + $0x1230] sm:$0xf] }
 0x3b2   :  { %9871 = vmatpush.bf16.msra.mxu3 %v16197_v19  ;;  %v16041_v14 = vor.u32 %v18479_v17, %v16040_v51  ;;  %v9652_v19 = vpop.f32.mrf.mxu1  ;;  %v14401_v35 = vor.u32 %v18069_v12, %v14400_v39  ;;  %v15961_v17 = vor.u32 %v18459_v20, %v15960_v26  ;;  %v18519_v39 = vld [vmem:[#allocation11 + $0x11b4] sm:$0xf0]  ;;  %v18024_v12 = vld [vmem:[#allocation11 + $0x244] sm:$0xf] }
 0x3b3   :  { %9949 = vmatpush.bf16.msra.mxu2 %v14921_v31  ;;  %v10833_v6 = vmul.f32 %v10783_v32, %v19375_v54  ;;  %v10843_v25 = vmul.f32 %v19900_v48, %v19900_v48  ;;  %v14481_v31 = vor.u32 %v18089_v47, %v14480_v2  ;;  %v17979_v2 = vld [vmem:[#allocation11 + $0xd4] sm:$0xf0] }
 0x3b4   :  { %9937 = vmatmul.bf16.vlgmr.msra.gmra.mxu0 %v19729_v28  ;;  %9859 = vmatmul.bf16.vlgmr.msra.gmra.mxu1 %v19755_v56 }
 0x3b5   :  { %9981 = vmatpush.bf16.msrb.mxu0 %v16161_v27  ;;  %9903 = vmatpush.bf16.msrb.mxu1 %v14241_v3  ;;  %v18559_v27 = vld [vmem:[#allocation11 + $0x12f4] sm:$0xf0]  ;;  %v10853_v44 = vsub.f32 %v10833_v6, %v10843_v25  ;;  %v16000_v3 = vld [vmem:[#allocation11 + $0x1000] sm:$0xf]  ;;  %v16281_v25 = vor.u32 %v18539_v22, %v16280_v30  ;;  %v13960_v30 = vld [vmem:[#allocation11 + $0x10] sm:$0xf] }
 0x3b6   :  { %9916 = vmatpush.bf16.msrb.mxu3 %v14561_v63  ;;  %9950 = vmatmul.bf16.vlgmr.msra.gmra.mxu2 %v19731_v45  ;;  %v16361_v57 = vor.u32 %v18559_v27, %v16360_v1  ;;  %v18549_v63 = vld [vmem:[#allocation11 + $0x12a4] sm:$0xf0]  ;;  %v15920_v27 = vld [vmem:[#allocation11 + $0xf60] sm:$0xf] }
 0x3b7   :  { %9994 = vmatpush.bf16.msrb.mxu2 %v16481_v42  ;;  %9872 = vmatmul.bf16.vlgmr.msra.gmra.mxu3 %v19765_v46  ;;  %v18079_v42 = vld [vmem:[#allocation11 + $0x3f4] sm:$0xf0]  ;;  %v10863_v10 = vmax.f32 %v10853_v44, 0.0  ;;  %v14000_v44 = vld [vmem:[#allocation11 + $0x60] sm:$0xf] }
 0x3b8   :  { %v14441_v34 = vor.u32 %v18079_v42, %v14440_v43  ;;  %v18529_v42 = vld [vmem:[#allocation11 + $0x1204] sm:$0xf0] }
 0x3b9   :  { %9982 = vmatpush.bf16.msrb.mxu0 %v16121_v15  ;;  %9904 = vmatpush.bf16.msrb.mxu1 %v14201_v36  ;;  %v10883_v15 = vmul.f32 %v19908_v24, %v19893_v11  ;;  %v19912_v13 = vadd.f32 1e-05, %v10863_v10  ;;  %v16321_v36 = vor.u32 %v18549_v63, %v16320_v33  ;;  %v19915_v47 = vpop.f32.mrf.mxu2  ;;  %v15880_v33 = vld [vmem:[#allocation11 + $0xf10] sm:$0xf]  ;;  %v18439_v63 = vld [vmem:[#allocation11 + $0xf34] sm:$0xf0] }
 0x3ba   :  { %9917 = vmatpush.bf16.msrb.mxu3 %v14521_v52  ;;  %v9665_v52 = vpop.f32.mrf.mxu3  ;;  %v9654_v1 = vpop.f32.mrf.mxu1  ;;  %v15881_v22 = vor.u32 %v18439_v63, %v15880_v33  ;;  %v15800_v33 = vld [vmem:[#allocation11 + $0xe70] sm:$0xf]  ;;  %v18419_v63 = vld [vmem:[#allocation11 + $0xe94] sm:$0xf0]  ;;  %v15440_v11 = vld [vmem:[#allocation11 + $0xba0] sm:$0xf] }
 0x3bb   :  { %9995 = vmatpush.bf16.msrb.mxu2 %v16441_v21  ;;  %v16001_v21 = vor.u32 %v18469_v60, %v16000_v3  ;;  %18874 = vrsqrt.f32 %v19912_v13  ;;  %v9666_v32 = vadd.f32 %v9665_v52, %v9652_v19  ;;  %v10884_v51 = vmul.f32 %v19908_v24, %v10883_v15  ;;  %v14320_v19 = vld [vmem:[#allocation11 + $0x2e0] sm:$0xf]  ;;  %v18049_v3 = vld [vmem:[#allocation11 + $0x304] sm:$0xf0]  ;;  %v14280_v52 = vld [vmem:[#allocation11 + $0x290] sm:$0xf] }
 0x3bc   :  { %v18429_v1 = vld [vmem:[#allocation11 + $0xee4] sm:$0xf0]  ;;  %vm10898_vm13 = vweird.f32 %v19912_v13 }
 0x3bd   :  { %9983 = vmatpush.bf16.msrb.mxu0 %v16081_v62  ;;  %9905 = vmatpush.bf16.msrb.mxu1 %v14161_v18  ;;  %v9732_v62 = vpop.f32.mrf.mxu0  ;;  %v18059_v18 = vld [vmem:[#allocation11 + $0x354] sm:$0xf0]  ;;  %v9679_v6 = vadd.f32 %v19875_v29, %v9666_v32  ;;  %v10885_v60 = vmul.f32 0.5, %v10884_v51  ;;  %v15921_v29 = vor.u32 %v18449_v7, %v15920_v27  ;;  %v18349_v32 = vld [vmem:[#allocation11 + $0xc64] sm:$0xf0] }
 0x3be   :  { %9918 = vmatpush.bf16.msrb.mxu3 %v14481_v31  ;;  %v14041_v31 = vor.u32 %v17979_v2, %v14040_v40  ;;  %v18039_v40 = vld [vmem:[#allocation11 + $0x2b4] sm:$0xf0]  ;;  %v15520_v2 = vld [vmem:[#allocation11 + $0xc40] sm:$0xf] }
 0x3bf   :  { %9996 = vmatpush.bf16.msrb.mxu2 %v16401_v23  ;;  %v14360_v23 = vld [vmem:[#allocation11 + $0x330] sm:$0xf]  ;;  %v10886_v62 = vsub.f32 1.5, %v10885_v60  ;;  %v14281_v7 = vor.u32 %v18039_v40, %v14280_v52  ;;  %v17994_v40 = vld [vmem:[#allocation11 + $0x154] sm:$0xf] }
 0x3c0   :  { %v14361_v43 = vor.u32 %v18059_v18, %v14360_v23  ;;  %v16201_v18 = vor.u32 %v18519_v39, %v16200_v55 }
 0x3c1   :  { %9984 = vmatpush.bf16.msrb.mxu0 %v16041_v14  ;;  %9906 = vmatpush.bf16.msrb.mxu1 %v14121_v0  ;;  %v17969_v14 = vld [vmem:[#allocation11 + $0x84] sm:$0xf0]  ;;  %v19922_v0 = vpop.eup %18874  ;;  %v9745_v20 = vpop.f32.mrf.mxu2  ;;  %v10887_v60 = vmul.f32 %v19908_v24, %v10886_v62  ;;  %v14442_v62 = vld [vmem:[#allocation11 + $0x3f8] sm:$0xf0] }
 0x3c2   :  { %9919 = vmatpush.bf16.msrb.mxu3 %v14441_v34  ;;  %v10893_v10 = vmul.f32 %v19922_v0, %v19912_v13  ;;  %v16241_v34 = vor.u32 %v18529_v42, %v16240_v49  ;;  %v14001_v16 = vor.u32 %v17969_v14, %v14000_v44  ;;  %v9667_v15 = vpop.f32.mrf.mxu3  ;;  %vm10899_vm11 = vweird.f32 %v19922_v0  ;;  %v18094_v42 = vld [vmem:[#allocation11 + $0x474] sm:$0xf]  ;;  %v14522_v14 = vld [vmem:[#allocation11 + $0x498] sm:$0xf0]  ;;  %v18409_v20 = vld [vmem:[#allocation11 + $0xe44] sm:$0xf0] }
 0x3c3   :  { %9997 = vmatpush.bf16.msrb.mxu2 %v16361_v57  ;;  %v19920_v57 = vadd.f32 %v19881_v59, %v9679_v6  ;;  %v14321_v59 = vor.u32 %v18049_v3, %v14320_v19  ;;  %v15521_v49 = vor.u32 %v18349_v32, %v15520_v2  ;;  %v15480_v19 = vld [vmem:[#allocation11 + $0xbf0] sm:$0xf]  ;;  %v18339_v3 = vld [vmem:[#allocation11 + $0xc14] sm:$0xf0]  ;;  %vm19934_vm4 = vmor %vm10898_vm13, %vm10899_vm11  ;;  %v14525_v55 = vor.u32 %v18094_v42, %v14522_v14 }
 0x3c4   :  { %v10894_v26 = vmul.f32 %v19922_v0, %v10893_v10  ;;  %v15481_v39 = vor.u32 %v18339_v3, %v15480_v19  ;;  %v14482_v15 = vld [vmem:[#allocation11 + $0x448] sm:$0xf0]  ;;  %v14122_v2 = vld [vmem:[#allocation11 + $0x178] sm:$0xf0]  ;;  %v18064_v42 = vld [vmem:[#allocation11 + $0x384] sm:$0xf] }
 0x3c5   :  { %9985 = vmatpush.bf16.msrb.mxu0 %v16001_v21  ;;  %9907 = vmatpush.bf16.msrb.mxu1 %v14081_v38  ;;  %v14242_v21 = vld [vmem:[#allocation11 + $0x268] sm:$0xf0]  ;;  %v15360_v19 = vld [vmem:[#allocation11 + $0xb00] sm:$0xf]  ;;  %v18309_v3 = vld [vmem:[#allocation11 + $0xb24] sm:$0xf0] }
 0x3c6   :  { %9920 = vmatpush.bf16.msrb.mxu3 %v14401_v35  ;;  %v14562_v38 = vld [vmem:[#allocation11 + $0x4e8] sm:$0xf0]  ;;  %v17959_v35 = vld [vmem:[#allocation11 + $0x34] sm:$0xf0]  ;;  %v10895_v23 = vmul.f32 0.5, %v10894_v26  ;;  %v14245_v51 = vor.u32 %v18024_v12, %v14242_v21  ;;  %v10891_v26 = vsel %vm10890_vm6, %v19908_v24, %v10887_v60  ;;  %v15361_v10 = vor.u32 %v18309_v3, %v15360_v19 }
 0x3c7   :  { %9998 = vmatpush.bf16.msrb.mxu2 %v16321_v36  ;;  %v18104_v36 = vld [vmem:[#allocation11 + $0x4c4] sm:$0xf]  ;;  %v14162_v12 = vld [vmem:[#allocation11 + $0x1c8] sm:$0xf0]  ;;  %v18074_v24 = vld [vmem:[#allocation11 + $0x3d4] sm:$0xf] }
 0x3c8   :  { %v14565_v6 = vor.u32 %v18104_v36, %v14562_v38  ;;  %v10896_v27 = vsub.f32 1.5, %v10895_v23  ;;  %v15801_v36 = vor.u32 %v18419_v63, %v15800_v33  ;;  %v18329_v38 = vld [vmem:[#allocation11 + $0xbc4] sm:$0xf0]  ;;  %v15400_v23 = vld [vmem:[#allocation11 + $0xb50] sm:$0xf] }
 0x3c9   :  { %9986 = vmatpush.bf16.msrb.mxu0 %v15961_v17  ;;  %9908 = vmatpush.bf16.msrb.mxu1 %v14041_v31  ;;  %v15840_v17 = vld [vmem:[#allocation11 + $0xec0] sm:$0xf]  ;;  %v18014_v31 = vld [vmem:[#allocation11 + $0x1f4] sm:$0xf]  ;;  %v14402_v14 = vld [vmem:[#allocation11 + $0x3a8] sm:$0xf0] }
 0x3ca   :  { %9921 = vmatpush.bf16.msrb.mxu3 %v14361_v43  ;;  %v14202_v43 = vld [vmem:[#allocation11 + $0x218] sm:$0xf0]  ;;  %v15841_v44 = vor.u32 %v18429_v1, %v15840_v17  ;;  %v15720_v17 = vld [vmem:[#allocation11 + $0xdd0] sm:$0xf]  ;;  %v18399_v1 = vld [vmem:[#allocation11 + $0xdf4] sm:$0xf0]  ;;  %v14405_v63 = vor.u32 %v18064_v42, %v14402_v14 }
 0x3cb   :  { %9999 = vmatpush.bf16.msrb.mxu2 %v16281_v25  ;;  %v13961_v25 = vor.u32 %v17959_v35, %v13960_v30  ;;  %v15680_v60 = vld [vmem:[#allocation11 + $0xd80] sm:$0xf]  ;;  %v15522_v14 = vld [vmem:[#allocation11 + $0xc68] sm:$0xf0]  ;;  %v18424_v19 = vld [vmem:[#allocation11 + $0xec4] sm:$0xf] }
 0x3cc   :  { %v15842_v3 = vld [vmem:[#allocation11 + $0xee8] sm:$0xf0] }
 0x3cd   :  { %9987 = vmatpush.bf16.msrb.mxu0 %v15921_v29  ;;  %9909 = vmatpush.bf16.msrb.mxu1 %v14001_v16  ;;  %v10897_v29 = vmul.f32 %v19922_v0, %v10896_v27  ;;  %v18004_v16 = vld [vmem:[#allocation11 + $0x1a4] sm:$0xf] }
 0x3ce   :  { %9922 = vmatpush.bf16.msrb.mxu3 %v14321_v59  ;;  %v18084_v59 = vld [vmem:[#allocation11 + $0x424] sm:$0xf]  ;;  %v14165_v35 = vor.u32 %v18004_v16, %v14162_v12  ;;  %v14042_v16 = vld [vmem:[#allocation11 + $0xd8] sm:$0xf0]  ;;  %v15320_v12 = vld [vmem:[#allocation11 + $0xab0] sm:$0xf] }
 0x3cf   :  { %10000 = vmatpush.bf16.msrb.mxu2 %v16241_v34  ;;  %v14205_v34 = vor.u32 %v18014_v31, %v14202_v43  ;;  %v10901_v13 = vsel %vm19934_vm4, %v19922_v0, %v10897_v29  ;;  %v15760_v0 = vld [vmem:[#allocation11 + $0xe20] sm:$0xf]  ;;  %v14485_v52 = vor.u32 %v18084_v59, %v14482_v15  ;;  %v14445_v31 = vor.u32 %v18074_v24, %v14442_v62  ;;  %v14082_v43 = vld [vmem:[#allocation11 + $0x128] sm:$0xf0]  ;;  %v18389_v29 = vld [vmem:[#allocation11 + $0xda4] sm:$0xf0] }
 0x3d0   :  { %v10992_v21 = vrot.slane %v10901_v13, 7  ;;  %v15761_v32 = vor.u32 %v18409_v20, %v15760_v0  ;;  %v18299_v59 = vld [vmem:[#allocation11 + $0xad4] sm:$0xf0]  ;;  %v14322_v62 = vld [vmem:[#allocation11 + $0x308] sm:$0xf0] }
 0x3d1   :  { %9988 = vmatpush.bf16.msrb.mxu0 %v15881_v22  ;;  %9910 = vmatpush.bf16.msrb.mxu1 %v13961_v25  ;;  %v15441_v22 = vor.u32 %v18329_v38, %v15440_v11  ;;  %v9704_v25 = vpop.f32.mrf.mxu1  ;;  %v15640_v11 = vld [vmem:[#allocation11 + $0xd30] sm:$0xf]  ;;  %v18379_v38 = vld [vmem:[#allocation11 + $0xd54] sm:$0xf0] }
 0x3d2   :  { %9923 = vmatpush.bf16.msrb.mxu3 %v14281_v7  ;;  %v19949_v30 = vsel %vm4401_vm7, %v10891_v26, %v10992_v21  ;;  %v9705_v27 = vadd.f32 %v9704_v25, %v19920_v57  ;;  %v18054_v57 = vld [vmem:[#allocation11 + $0x334] sm:$0xf]  ;;  %v13962_v25 = vld [vmem:[#allocation11 + $0x38] sm:$0xf0] }
 0x3d3   :  { %10001 = vmatpush.bf16.msrb.mxu2 %v16201_v18  ;;  %v18319_v18 = vld [vmem:[#allocation11 + $0xb74] sm:$0xf0] }
 0x3d4   :  { %9989 = vmatmul.bf16.vlgmr.msrb.gmra.mxu0 %v19755_v56  ;;  %9911 = vmatmul.bf16.vlgmr.msrb.gmra.mxu1 %v19725_v8  ;;  %v15401_v7 = vor.u32 %v18319_v18, %v15400_v23  ;;  %v15280_v23 = vld [vmem:[#allocation11 + $0xa60] sm:$0xf]  ;;  %v18289_v18 = vld [vmem:[#allocation11 + $0xa84] sm:$0xf0] }
 0x3d5   :  { %10033 = vmatpush.bf16.msra.mxu0 %v14245_v51  ;;  %9955 = vmatpush.bf16.msra.mxu1 %v15521_v49  ;;  %v9782_v51 = vpop.f32.mrf.mxu0  ;;  %v17984_v49 = vld [vmem:[#allocation11 + $0x104] sm:$0xf] }
 0x3d6   :  { %9968 = vmatpush.bf16.msra.mxu3 %v15841_v44  ;;  %10002 = vmatmul.bf16.vlgmr.msrb.gmra.mxu2 %v19765_v46  ;;  %v15721_v44 = vor.u32 %v18399_v1, %v15720_v17  ;;  %v14085_v33 = vor.u32 %v17984_v49, %v14082_v43  ;;  %v18369_v17 = vld [vmem:[#allocation11 + $0xd04] sm:$0xf0]  ;;  %v18034_v49 = vld [vmem:[#allocation11 + $0x294] sm:$0xf]  ;;  %v14282_v43 = vld [vmem:[#allocation11 + $0x2b8] sm:$0xf0] }
 0x3d7   :  { %10046 = vmatpush.bf16.msra.mxu2 %v14565_v6  ;;  %9924 = vmatmul.bf16.vlgmr.msrb.gmra.mxu3 %v19727_v37  ;;  %v14125_v6 = vor.u32 %v17994_v40, %v14122_v2  ;;  %v14002_v40 = vld [vmem:[#allocation11 + $0x88] sm:$0xf0]  ;;  %v18044_v2 = vld [vmem:[#allocation11 + $0x2e4] sm:$0xf] }
 0x3d9   :  { %10034 = vmatpush.bf16.msra.mxu0 %v14205_v34  ;;  %9956 = vmatpush.bf16.msra.mxu1 %v15481_v39  ;;  %v17974_v34 = vld [vmem:[#allocation11 + $0xb4] sm:$0xf]  ;;  %v9795_v13 = vpop.f32.mrf.mxu2  ;;  %v14362_v39 = vld [vmem:[#allocation11 + $0x358] sm:$0xf0]  ;;  %v9706_v20 = vpop.f32.mrf.mxu1 }
 0x3da   :  { %9969 = vmatpush.bf16.msra.mxu3 %v15801_v36  ;;  %v19953_v15 = vadd.f32 %v9795_v13, %v9782_v51  ;;  %v9717_v21 = vpop.f32.mrf.mxu3  ;;  %v14045_v0 = vor.u32 %v17974_v34, %v14042_v16  ;;  %v15600_v51 = vld [vmem:[#allocation11 + $0xce0] sm:$0xf]  ;;  %v18669_v16 = vld [vmem:[#allocation11 + $0x1664] sm:$0xf0]  ;;  %v15802_v20 = vld [vmem:[#allocation11 + $0xe98] sm:$0xf0] }
 0x3db   :  { %10047 = vmatpush.bf16.msra.mxu2 %v14525_v55  ;;  %v15681_v55 = vor.u32 %v18389_v29, %v15680_v60  ;;  %v9718_v26 = vadd.f32 %v9717_v21, %v9705_v27  ;;  %v14325_v27 = vor.u32 %v18044_v2, %v14322_v62  ;;  %v15240_v29 = vld [vmem:[#allocation11 + $0xa10] sm:$0xf]  ;;  %v16800_v34 = vld [vmem:[#allocation11 + $0x1640] sm:$0xf]  ;;  %v18324_v62 = vld [vmem:[#allocation11 + $0xba4] sm:$0xf] }
 0x3dd   :  { %10035 = vmatpush.bf16.msra.mxu0 %v14165_v35  ;;  %9957 = vmatpush.bf16.msra.mxu1 %v15441_v22  ;;  %v9784_v36 = vpop.f32.mrf.mxu0  ;;  %v14365_v35 = vor.u32 %v18054_v57, %v14362_v39  ;;  %v17964_v22 = vld [vmem:[#allocation11 + $0x64] sm:$0xf]  ;;  %v9731_v24 = vadd.f32 %v19906_v4, %v9718_v26  ;;  %v14285_v57 = vor.u32 %v18034_v49, %v14282_v43  ;;  %v18749_v39 = vld [vmem:[#allocation11 + $0x18e4] sm:$0xf0]  ;;  %v18414_v26 = vld [vmem:[#allocation11 + $0xe74] sm:$0xf] }
 0x3de   :  { %9970 = vmatpush.bf16.msra.mxu3 %v15761_v32  ;;  %v15641_v32 = vor.u32 %v18379_v38, %v15640_v11  ;;  %v14005_v1 = vor.u32 %v17964_v22, %v14002_v40  ;;  %v18344_v4 = vld [vmem:[#allocation11 + $0xc44] sm:$0xf]  ;;  %v16801_v36 = vor.u32 %v18669_v16, %v16800_v34  ;;  %v18334_v11 = vld [vmem:[#allocation11 + $0xbf4] sm:$0xf]  ;;  %v15482_v38 = vld [vmem:[#allocation11 + $0xc18] sm:$0xf0] }
 0x3df   :  { %10048 = vmatpush.bf16.msra.mxu2 %v14485_v52  ;;  %v15321_v52 = vor.u32 %v18299_v59, %v15320_v12  ;;  %v15525_v13 = vor.u32 %v18344_v4, %v15522_v14  ;;  %v15845_v12 = vor.u32 %v18424_v19, %v15842_v3  ;;  %v17080_v22 = vld [vmem:[#allocation11 + $0x1870] sm:$0xf]  ;;  %v18739_v40 = vld [vmem:[#allocation11 + $0x1894] sm:$0xf0]  ;;  %v15485_v2 = vor.u32 %v18334_v11, %v15482_v38  ;;  %v18314_v4 = vld [vmem:[#allocation11 + $0xb54] sm:$0xf] }
 0x3e0   :  { %v15722_v19 = vld [vmem:[#allocation11 + $0xdf8] sm:$0xf0]  ;;  %v16680_v3 = vld [vmem:[#allocation11 + $0x1550] sm:$0xf]  ;;  %v16960_v11 = vld [vmem:[#allocation11 + $0x1780] sm:$0xf] }
 0x3e1   :  { %10036 = vmatpush.bf16.msra.mxu0 %v14125_v6  ;;  %9958 = vmatpush.bf16.msra.mxu1 %v15401_v7  ;;  %v17954_v6 = vld [vmem:[#allocation11 + $0x14] sm:$0xf]  ;;  %v15281_v7 = vor.u32 %v18289_v18, %v15280_v23  ;;  %v9797_v42 = vpop.f32.mrf.mxu2  ;;  %v15442_v23 = vld [vmem:[#allocation11 + $0xbc8] sm:$0xf0]  ;;  %v18404_v18 = vld [vmem:[#allocation11 + $0xe24] sm:$0xf] }
 0x3e2   :  { %9971 = vmatpush.bf16.msra.mxu3 %v15721_v44  ;;  %v15601_v44 = vor.u32 %v18369_v17, %v15600_v51  ;;  %v9719_v60 = vpop.f32.mrf.mxu3  ;;  %v17081_v51 = vor.u32 %v18739_v40, %v17080_v22  ;;  %v15762_v17 = vld [vmem:[#allocation11 + $0xe48] sm:$0xf0]  ;;  %v15402_v42 = vld [vmem:[#allocation11 + $0xb78] sm:$0xf0]  ;;  %v18709_v38 = vld [vmem:[#allocation11 + $0x17a4] sm:$0xf0] }
 0x3e3   :  { %10049 = vmatpush.bf16.msra.mxu2 %v14445_v31  ;;  %v19957_v31 = vadd.f32 %v19915_v47, %v9731_v24  ;;  %v13965_v47 = vor.u32 %v17954_v6, %v13962_v25  ;;  %v15805_v24 = vor.u32 %v18414_v26, %v15802_v20  ;;  %v18649_v6 = vld [vmem:[#allocation11 + $0x15c4] sm:$0xf0]  ;;  %v17040_v25 = vld [vmem:[#allocation11 + $0x1820] sm:$0xf]  ;;  %v15765_v49 = vor.u32 %v18404_v18, %v15762_v17  ;;  %v18639_v60 = vld [vmem:[#allocation11 + $0x1574] sm:$0xf0] }
 0x3e4   :  { %v16961_v40 = vor.u32 %v18709_v38, %v16960_v11  ;;  %v16920_v18 = vld [vmem:[#allocation11 + $0x1730] sm:$0xf]  ;;  %v18599_v11 = vld [vmem:[#allocation11 + $0x1434] sm:$0xf0] }
 0x3e5   :  { %10037 = vmatpush.bf16.msra.mxu0 %v14085_v33  ;;  %9959 = vmatpush.bf16.msra.mxu1 %v15361_v10  ;;  %v18279_v33 = vld [vmem:[#allocation11 + $0xa34] sm:$0xf0]  ;;  %v16840_v38 = vld [vmem:[#allocation11 + $0x1690] sm:$0xf] }
 0x3e6   :  { %9972 = vmatpush.bf16.msra.mxu3 %v15681_v55  ;;  %v18359_v10 = vld [vmem:[#allocation11 + $0xcb4] sm:$0xf0]  ;;  %v17120_v55 = vld [vmem:[#allocation11 + $0x18c0] sm:$0xf]  ;;  %v15241_v59 = vor.u32 %v18279_v33, %v15240_v29  ;;  %v17000_v33 = vld [vmem:[#allocation11 + $0x17d0] sm:$0xf] }
 0x3e7   :  { %10050 = vmatpush.bf16.msra.mxu2 %v14405_v63  ;;  %v15560_v63 = vld [vmem:[#allocation11 + $0xc90] sm:$0xf] }
 0x3e8   :  { %v15561_v21 = vor.u32 %v18359_v10, %v15560_v63  ;;  %v18719_v63 = vld [vmem:[#allocation11 + $0x17f4] sm:$0xf0] }
 0x3e9   :  { %10038 = vmatpush.bf16.msra.mxu0 %v14045_v0  ;;  %9960 = vmatpush.bf16.msra.mxu1 %v15321_v52  ;;  %v17121_v0 = vor.u32 %v18749_v39, %v17120_v55  ;;  %v18659_v52 = vld [vmem:[#allocation11 + $0x1614] sm:$0xf0]  ;;  %v15362_v55 = vld [vmem:[#allocation11 + $0xb28] sm:$0xf0]  ;;  %v18384_v39 = vld [vmem:[#allocation11 + $0xd84] sm:$0xf] }
 0x3ea   :  { %9973 = vmatpush.bf16.msra.mxu3 %v15641_v32 }
 0x3eb   :  { %10051 = vmatpush.bf16.msra.mxu2 %v14365_v35  ;;  %v16760_v35 = vld [vmem:[#allocation11 + $0x15f0] sm:$0xf] }
 0x3ec   :  { %v16761_v32 = vor.u32 %v18659_v52, %v16760_v35  ;;  %v18294_v35 = vld [vmem:[#allocation11 + $0xab4] sm:$0xf]  ;;  %v15322_v52 = vld [vmem:[#allocation11 + $0xad8] sm:$0xf0] }
 0x3ed   :  { %10039 = vmatpush.bf16.msra.mxu0 %v14005_v1  ;;  %9961 = vmatpush.bf16.msra.mxu1 %v15281_v7  ;;  %v16720_v1 = vld [vmem:[#allocation11 + $0x15a0] sm:$0xf]  ;;  %v15445_v7 = vor.u32 %v18324_v62, %v15442_v23 }
 0x3ee   :  { %9974 = vmatpush.bf16.msra.mxu3 %v15601_v44  ;;  %v16721_v43 = vor.u32 %v18649_v6, %v16720_v1  ;;  %v18394_v44 = vld [vmem:[#allocation11 + $0xdd4] sm:$0xf]  ;;  %v15325_v1 = vor.u32 %v18294_v35, %v15322_v52  ;;  %v14882_v35 = vld [vmem:[#allocation11 + $0x768] sm:$0xf0] }
 0x3ef   :  { %10052 = vmatpush.bf16.msra.mxu2 %v14325_v27  ;;  %v18729_v27 = vld [vmem:[#allocation11 + $0x1844] sm:$0xf0]  ;;  %v15725_v34 = vor.u32 %v18394_v44, %v15722_v19  ;;  %v16560_v44 = vld [vmem:[#allocation11 + $0x1460] sm:$0xf] }
 0x3f0   :  { %v17041_v14 = vor.u32 %v18729_v27, %v17040_v25  ;;  %v16880_v19 = vld [vmem:[#allocation11 + $0x16e0] sm:$0xf] }
 0x3f1   :  { %10040 = vmatpush.bf16.msra.mxu0 %v13965_v47  ;;  %9962 = vmatpush.bf16.msra.mxu1 %v15241_v59  ;;  %v19963_v29 = vpop.f32.mrf.mxu0  ;;  %v15405_v47 = vor.u32 %v18314_v4, %v15402_v42  ;;  %v9756_v10 = vpop.f32.mrf.mxu1  ;;  %v15682_v59 = vld [vmem:[#allocation11 + $0xda8] sm:$0xf0] }
 0x3f2   :  { %9975 = vmatpush.bf16.msra.mxu3 %v15561_v21  ;;  %v9757_v16 = vadd.f32 %v9756_v10, %v19957_v31  ;;  %v16640_v21 = vld [vmem:[#allocation11 + $0x1500] sm:$0xf]  ;;  %v18374_v31 = vld [vmem:[#allocation11 + $0xd34] sm:$0xf]  ;;  %v15602_v42 = vld [vmem:[#allocation11 + $0xd08] sm:$0xf0] }
 0x3f3   :  { %10053 = vmatpush.bf16.msra.mxu2 %v14285_v57  ;;  %v16681_v57 = vor.u32 %v18639_v60, %v16680_v3  ;;  %v18689_v3 = vld [vmem:[#allocation11 + $0x1704] sm:$0xf0] }
 0x3f4   :  { %10041 = vmatmul.bf16.vlgmr.msra.gmra.mxu0 %v19725_v8  ;;  %9963 = vmatmul.bf16.vlgmr.msra.gmra.mxu1 %v19763_v41 }
 0x3f5   :  { %10085 = vmatpush.bf16.msrb.mxu0 %v15525_v13  ;;  %10007 = vmatpush.bf16.msrb.mxu1 %v16801_v36  ;;  %v18304_v13 = vld [vmem:[#allocation11 + $0xb04] sm:$0xf]  ;;  %v18629_v36 = vld [vmem:[#allocation11 + $0x1524] sm:$0xf0] }
 0x3f6   :  { %10020 = vmatpush.bf16.msrb.mxu3 %v17121_v0  ;;  %10054 = vmatmul.bf16.vlgmr.msra.gmra.mxu2 %v19727_v37  ;;  %v15365_v26 = vor.u32 %v18304_v13, %v15362_v55  ;;  %v15685_v0 = vor.u32 %v18384_v39, %v15682_v59  ;;  %v16641_v20 = vor.u32 %v18629_v36, %v16640_v21  ;;  %v16802_v39 = vld [vmem:[#allocation11 + $0x1668] sm:$0xf0]  ;;  %v16520_v36 = vld [vmem:[#allocation11 + $0x1410] sm:$0xf] }
 0x3f7   :  { %10098 = vmatpush.bf16.msrb.mxu2 %v15845_v12  ;;  %9976 = vmatmul.bf16.vlgmr.msra.gmra.mxu3 %v19770_v9  ;;  %v17001_v12 = vor.u32 %v18719_v63, %v17000_v33  ;;  %v18274_v33 = vld [vmem:[#allocation11 + $0xa14] sm:$0xf]  ;;  %v15242_v63 = vld [vmem:[#allocation11 + $0xa38] sm:$0xf0]  ;;  %v16881_v55 = vor.u32 %v18689_v3, %v16880_v19  ;;  %v17122_v59 = vld [vmem:[#allocation11 + $0x18e8] sm:$0xf0] }
 0x3f8   :  { %v16722_v19 = vld [vmem:[#allocation11 + $0x15c8] sm:$0xf0]  ;;  %v18724_v3 = vld [vmem:[#allocation11 + $0x1824] sm:$0xf] }
 0x3f9   :  { %10086 = vmatpush.bf16.msrb.mxu0 %v15485_v2  ;;  %10008 = vmatpush.bf16.msrb.mxu1 %v16761_v32  ;;  %v19966_v22 = vpop.f32.mrf.mxu2  ;;  %v15642_v2 = vld [vmem:[#allocation11 + $0xd58] sm:$0xf0]  ;;  %v18619_v32 = vld [vmem:[#allocation11 + $0x14d4] sm:$0xf0]  ;;  %v9836_v23 = vpop.f32.mrf.mxu0 }
 0x3fa   :  { %10021 = vmatpush.bf16.msrb.mxu3 %v17081_v51  ;;  %v9769_v62 = vpop.f32.mrf.mxu3  ;;  %v18699_v51 = vld [vmem:[#allocation11 + $0x1754] sm:$0xf0]  ;;  %v9758_v6 = vpop.f32.mrf.mxu1  ;;  %v15645_v25 = vor.u32 %v18374_v31, %v15642_v2  ;;  %v15202_v2 = vld [vmem:[#allocation11 + $0x9e8] sm:$0xf0] }
 0x3fb   :  { %10099 = vmatpush.bf16.msrb.mxu2 %v15805_v24  ;;  %v16600_v24 = vld [vmem:[#allocation11 + $0x14b0] sm:$0xf]  ;;  %v19968_v17 = vadd.f32 %v9769_v62, %v9757_v16  ;;  %v16921_v4 = vor.u32 %v18699_v51, %v16920_v18  ;;  %v15562_v16 = vld [vmem:[#allocation11 + $0xcb8] sm:$0xf0]  ;;  %v18654_v18 = vld [vmem:[#allocation11 + $0x15f4] sm:$0xf] }
 0x3fc   :  { %v16601_v27 = vor.u32 %v18619_v32, %v16600_v24  ;;  %v16521_v32 = vor.u32 %v18599_v11, %v16520_v36  ;;  %v16762_v51 = vld [vmem:[#allocation11 + $0x1618] sm:$0xf0]  ;;  %v18154_v36 = vld [vmem:[#allocation11 + $0x654] sm:$0xf] }
 0x3fd   :  { %10087 = vmatpush.bf16.msrb.mxu0 %v15445_v7  ;;  %10009 = vmatpush.bf16.msrb.mxu1 %v16721_v43  ;;  %v18284_v7 = vld [vmem:[#allocation11 + $0xa64] sm:$0xf]  ;;  %v14762_v11 = vld [vmem:[#allocation11 + $0x678] sm:$0xf0] }
 0x3fe   :  { %10022 = vmatpush.bf16.msrb.mxu3 %v17041_v14  ;;  %v18364_v43 = vld [vmem:[#allocation11 + $0xce4] sm:$0xf]  ;;  %v18609_v14 = vld [vmem:[#allocation11 + $0x1484] sm:$0xf0] }
 0x3ff   :  { %10100 = vmatpush.bf16.msrb.mxu2 %v15765_v49  ;;  %v15282_v49 = vld [vmem:[#allocation11 + $0xa88] sm:$0xf0]  ;;  %v16561_v10 = vor.u32 %v18609_v14, %v16560_v44  ;;  %v18644_v14 = vld [vmem:[#allocation11 + $0x15a4] sm:$0xf] }
 0x400   :  { %v15285_v60 = vor.u32 %v18284_v7, %v15282_v49  ;;  %v14842_v7 = vld [vmem:[#allocation11 + $0x718] sm:$0xf0]  ;;  %v18254_v49 = vld [vmem:[#allocation11 + $0x974] sm:$0xf] }
 0x401   :  { %10088 = vmatpush.bf16.msrb.mxu0 %v15405_v47  ;;  %10010 = vmatpush.bf16.msrb.mxu1 %v16681_v57  ;;  %v15605_v47 = vor.u32 %v18364_v43, %v15602_v42  ;;  %v18664_v57 = vld [vmem:[#allocation11 + $0x1644] sm:$0xf]  ;;  %v9849_v13 = vpop.f32.mrf.mxu2  ;;  %v15162_v43 = vld [vmem:[#allocation11 + $0x998] sm:$0xf0] }
 0x402   :  { %10023 = vmatpush.bf16.msrb.mxu3 %v17001_v12  ;;  %v18744_v12 = vld [vmem:[#allocation11 + $0x18c4] sm:$0xf]  ;;  %v9771_v21 = vpop.f32.mrf.mxu3  ;;  %v16805_v31 = vor.u32 %v18664_v57, %v16802_v39  ;;  %v16682_v39 = vld [vmem:[#allocation11 + $0x1578] sm:$0xf0] }
 0x403   :  { %10101 = vmatpush.bf16.msrb.mxu2 %v15725_v34  ;;  %v18354_v34 = vld [vmem:[#allocation11 + $0xc94] sm:$0xf]  ;;  %v17125_v24 = vor.u32 %v18744_v12, %v17122_v59  ;;  %v17002_v21 = vld [vmem:[#allocation11 + $0x17f8] sm:$0xf0] }
 0x404   :  { %v15565_v52 = vor.u32 %v18354_v34, %v15562_v16  ;;  %v15122_v34 = vld [vmem:[#allocation11 + $0x948] sm:$0xf0]  ;;  %v16725_v16 = vor.u32 %v18644_v14, %v16722_v19  ;;  %v18714_v12 = vld [vmem:[#allocation11 + $0x17d4] sm:$0xf] }
 0x405   :  { %10089 = vmatpush.bf16.msrb.mxu0 %v15365_v26  ;;  %10011 = vmatpush.bf16.msrb.mxu1 %v16641_v20  ;;  %v15245_v26 = vor.u32 %v18274_v33, %v15242_v63  ;;  %v18184_v20 = vld [vmem:[#allocation11 + $0x744] sm:$0xf]  ;;  %v17042_v33 = vld [vmem:[#allocation11 + $0x1848] sm:$0xf0]  ;;  %v18694_v14 = vld [vmem:[#allocation11 + $0x1734] sm:$0xf] }
 0x406   :  { %10024 = vmatpush.bf16.msrb.mxu3 %v16961_v40  ;;  %v18264_v40 = vld [vmem:[#allocation11 + $0x9c4] sm:$0xf]  ;;  %v14885_v23 = vor.u32 %v18184_v20, %v14882_v35  ;;  %v17045_v57 = vor.u32 %v18724_v3, %v17042_v33  ;;  %v10704_v20 = vrot.slane %v19968_v17, 4  ;;  %v10764_v35 = vmul.f32 %v19968_v17, %v19968_v17  ;;  %v18134_v33 = vld [vmem:[#allocation11 + $0x5b4] sm:$0xf] }
 0x407   :  { %10102 = vmatpush.bf16.msrb.mxu2 %v15685_v0  ;;  %v18679_v0 = vld [vmem:[#allocation11 + $0x16b4] sm:$0xf0]  ;;  %v15205_v6 = vor.u32 %v18264_v40, %v15202_v2  ;;  %v18164_v63 = vld [vmem:[#allocation11 + $0x6a4] sm:$0xf]  ;;  %v17005_v40 = vor.u32 %v18714_v12, %v17002_v21 }
 0x408   :  { %v16841_v62 = vor.u32 %v18679_v0, %v16840_v38  ;;  %v15082_v0 = vld [vmem:[#allocation11 + $0x8f8] sm:$0xf0] }
 0x409   :  { %10090 = vmatpush.bf16.msrb.mxu0 %v15325_v1  ;;  %10012 = vmatpush.bf16.msrb.mxu1 %v16601_v27  ;;  %v18734_v1 = vld [vmem:[#allocation11 + $0x1874] sm:$0xf] }
 0x40a   :  { %10025 = vmatpush.bf16.msrb.mxu3 %v16921_v4  ;;  %v18174_v27 = vld [vmem:[#allocation11 + $0x6f4] sm:$0xf]  ;;  %v16765_v4 = vor.u32 %v18654_v18, %v16762_v51  ;;  %v16962_v51 = vld [vmem:[#allocation11 + $0x17a8] sm:$0xf0] }
 0x40b   :  { %10103 = vmatpush.bf16.msrb.mxu2 %v15645_v25  ;;  %v17082_v25 = vld [vmem:[#allocation11 + $0x1898] sm:$0xf0]  ;;  %v14845_v44 = vor.u32 %v18174_v27, %v14842_v7  ;;  %v15042_v27 = vld [vmem:[#allocation11 + $0x8a8] sm:$0xf0]  ;;  %v10705_v7 = vadd.f32 %v10704_v20, %v19968_v17 }
 0x40c   :  { %v17085_v42 = vor.u32 %v18734_v1, %v17082_v25  ;;  %v18144_v1 = vld [vmem:[#allocation11 + $0x604] sm:$0xf] }
 0x40d   :  { %10091 = vmatpush.bf16.msrb.mxu0 %v15285_v60  ;;  %10013 = vmatpush.bf16.msrb.mxu1 %v16561_v10  ;;  %v15165_v60 = vor.u32 %v18254_v49, %v15162_v43  ;;  %v18244_v10 = vld [vmem:[#allocation11 + $0x924] sm:$0xf]  ;;  %v10784_v49 = vrot.slane %v10764_v35, 4 }
 0x40e   :  { %10026 = vmatpush.bf16.msrb.mxu3 %v16881_v55  ;;  %v18634_v55 = vld [vmem:[#allocation11 + $0x1554] sm:$0xf]  ;;  %v15125_v59 = vor.u32 %v18244_v10, %v15122_v34  ;;  %v18224_v25 = vld [vmem:[#allocation11 + $0x884] sm:$0xf] }
 0x40f   :  { %10104 = vmatpush.bf16.msrb.mxu2 %v15605_v47  ;;  %v14802_v47 = vld [vmem:[#allocation11 + $0x6c8] sm:$0xf0]  ;;  %v15045_v3 = vor.u32 %v18224_v25, %v15042_v27  ;;  %v18214_v34 = vld [vmem:[#allocation11 + $0x834] sm:$0xf]  ;;  %v14888_v25 = vld [vmem:[#allocation11 + $0x748] sm:$0xf] }
 0x410   :  { %v14805_v13 = vor.u32 %v18164_v63, %v14802_v47  ;;  %v14682_v63 = vld [vmem:[#allocation11 + $0x5d8] sm:$0xf0] }
 0x411   :  { %10092 = vmatpush.bf16.msrb.mxu0 %v15245_v26  ;;  %10014 = vmatpush.bf16.msrb.mxu1 %v16521_v32  ;;  %v19974_v38 = vpop.f32.mrf.mxu0  ;;  %v18234_v26 = vld [vmem:[#allocation11 + $0x8d4] sm:$0xf]  ;;  %v18624_v32 = vld [vmem:[#allocation11 + $0x1504] sm:$0xf]  ;;  %v14685_v21 = vor.u32 %v18134_v33, %v14682_v63  ;;  %v14922_v33 = vld [vmem:[#allocation11 + $0x7b8] sm:$0xf0] }
 0x412   :  { %10027 = vmatpush.bf16.msrb.mxu3 %v16841_v62  ;;  %v16642_v62 = vld [vmem:[#allocation11 + $0x1528] sm:$0xf0]  ;;  %v15085_v18 = vor.u32 %v18234_v26, %v15082_v0  ;;  %v18684_v26 = vld [vmem:[#allocation11 + $0x16e4] sm:$0xf] }
 0x413   :  { %10105 = vmatpush.bf16.msrb.mxu2 %v15565_v52  ;;  %v16685_v52 = vor.u32 %v18634_v55, %v16682_v39  ;;  %v16645_v43 = vor.u32 %v18624_v32, %v16642_v62  ;;  %v18594_v62 = vld [vmem:[#allocation11 + $0x1414] sm:$0xf]  ;;  %v18504_v63 = vld [vmem:[#allocation11 + $0x1144] sm:$0xf] }
 0x414   :  { %10093 = vmatmul.bf16.vlgmr.msrb.gmra.mxu0 %v19763_v41  ;;  %10015 = vmatmul.bf16.vlgmr.msrb.gmra.mxu1 %v19820_v50 }
 0x415   :  { %10137 = vmatpush.bf16.msra.mxu0 %v16805_v31  ;;  %10059 = vmatpush.bf16.msra.mxu1 %v14885_v23  ;;  %v9808_v31 = vpop.f32.mrf.mxu1  ;;  %v18704_v23 = vld [vmem:[#allocation11 + $0x1784] sm:$0xf] }
 0x416   :  { %10072 = vmatpush.bf16.msra.mxu3 %v15205_v6  ;;  %10106 = vmatmul.bf16.vlgmr.msrb.gmra.mxu2 %v19770_v9  ;;  %v9809_v2 = vadd.f32 %v9808_v31, %v19953_v15  ;;  %v14722_v6 = vld [vmem:[#allocation11 + $0x628] sm:$0xf0]  ;;  %v18124_v31 = vld [vmem:[#allocation11 + $0x564] sm:$0xf] }
 0x417   :  { %10150 = vmatpush.bf16.msra.mxu2 %v17125_v24  ;;  %10028 = vmatmul.bf16.vlgmr.msrb.gmra.mxu3 %v19822_v53  ;;  %v14765_v24 = vor.u32 %v18154_v36, %v14762_v11  ;;  %v14725_v15 = vor.u32 %v18144_v1, %v14722_v6  ;;  %v18604_v36 = vld [vmem:[#allocation11 + $0x1464] sm:$0xf]  ;;  %v16562_v11 = vld [vmem:[#allocation11 + $0x1488] sm:$0xf0]  ;;  %v18674_v6 = vld [vmem:[#allocation11 + $0x1694] sm:$0xf] }
 0x419   :  { %10138 = vmatpush.bf16.msra.mxu0 %v16765_v4  ;;  %10060 = vmatpush.bf16.msra.mxu1 %v14845_v44  ;;  %v16965_v4 = vor.u32 %v18704_v23, %v16962_v51  ;;  %v16602_v44 = vld [vmem:[#allocation11 + $0x14d8] sm:$0xf0]  ;;  %v19981_v19 = vpop.f32.mrf.mxu2  ;;  %v9888_v10 = vpop.f32.mrf.mxu0 }
 0x41a   :  { %10073 = vmatpush.bf16.msra.mxu3 %v15165_v60  ;;  %v16922_v60 = vld [vmem:[#allocation11 + $0x1758] sm:$0xf0]  ;;  %v9821_v47 = vpop.f32.mrf.mxu3 }
 0x41b   :  { %10151 = vmatpush.bf16.msra.mxu2 %v17085_v42  ;;  %v18614_v42 = vld [vmem:[#allocation11 + $0x14b4] sm:$0xf]  ;;  %v9822_v55 = vadd.f32 %v9821_v47, %v9809_v2  ;;  %v16565_v2 = vor.u32 %v18604_v36, %v16562_v11  ;;  %v16522_v23 = vld [vmem:[#allocation11 + $0x1438] sm:$0xf0]  ;;  %v16162_v47 = vld [vmem:[#allocation11 + $0x1168] sm:$0xf0] }
 0x41c   :  { %v16605_v39 = vor.u32 %v18614_v42, %v16602_v44  ;;  %v18270_v42 = vld [vmem:[#allocation11 + $0x9ec] sm:$0xf0]  ;;  %v14848_v36 = vld [vmem:[#allocation11 + $0x6f8] sm:$0xf]  ;;  %v18180_v11 = vld [vmem:[#allocation11 + $0x71c] sm:$0xf0] }
 0x41d   :  { %10139 = vmatpush.bf16.msra.mxu0 %v16725_v16  ;;  %10061 = vmatpush.bf16.msra.mxu1 %v14805_v13  ;;  %v15002_v16 = vld [vmem:[#allocation11 + $0x858] sm:$0xf0]  ;;  %v10785_v13 = vadd.f32 %v10784_v49, %v10764_v35  ;;  %v9810_v12 = vpop.f32.mrf.mxu1  ;;  %v9835_v0 = vadd.f32 %v19963_v29, %v9822_v55  ;;  %v14962_v35 = vld [vmem:[#allocation11 + $0x808] sm:$0xf0] }
 0x41e   :  { %10074 = vmatpush.bf16.msra.mxu3 %v15125_v59  ;;  %v16925_v59 = vor.u32 %v18694_v14, %v16922_v60  ;;  %v15005_v20 = vor.u32 %v18214_v34, %v15002_v16  ;;  %v16842_v29 = vld [vmem:[#allocation11 + $0x16b8] sm:$0xf0]  ;;  %v18114_v14 = vld [vmem:[#allocation11 + $0x514] sm:$0xf]  ;;  %v16482_v16 = vld [vmem:[#allocation11 + $0x13e8] sm:$0xf0] }
 0x41f   :  { %10152 = vmatpush.bf16.msra.mxu2 %v17045_v57  ;;  %v10706_v57 = vrot.slane %v10705_v7, 2  ;;  %v10786_v32 = vrot.slane %v10785_v13, 2  ;;  %v18194_v60 = vld [vmem:[#allocation11 + $0x794] sm:$0xf]  ;;  %v16845_v10 = vor.u32 %v18674_v6, %v16842_v29  ;;  %v18250_v29 = vld [vmem:[#allocation11 + $0x94c] sm:$0xf0] }
 0x421   :  { %10140 = vmatpush.bf16.msra.mxu0 %v16685_v52  ;;  %10062 = vmatpush.bf16.msra.mxu1 %v14765_v24  ;;  %v16882_v52 = vld [vmem:[#allocation11 + $0x1708] sm:$0xf0]  ;;  %v18204_v24 = vld [vmem:[#allocation11 + $0x7e4] sm:$0xf]  ;;  %v10707_v27 = vadd.f32 %v10706_v57, %v10705_v7  ;;  %v9901_v49 = vpop.f32.mrf.mxu2  ;;  %v10787_v55 = vadd.f32 %v10786_v32, %v10785_v13  ;;  %v14849_v13 = vor.u32 %v18180_v11, %v14848_v36  ;;  %v14728_v11 = vld [vmem:[#allocation11 + $0x608] sm:$0xf] }
 0x422   :  { %10075 = vmatpush.bf16.msra.mxu3 %v15085_v18  ;;  %v19985_v18 = vadd.f32 %v19966_v22, %v9835_v0  ;;  %v16885_v51 = vor.u32 %v18684_v26, %v16882_v52  ;;  %v9823_v44 = vpop.f32.mrf.mxu3  ;;  %v16525_v22 = vor.u32 %v18594_v62, %v16522_v23  ;;  %v18584_v7 = vld [vmem:[#allocation11 + $0x13c4] sm:$0xf]  ;;  %v15168_v26 = vld [vmem:[#allocation11 + $0x978] sm:$0xf]  ;;  %v18494_v52 = vld [vmem:[#allocation11 + $0x10f4] sm:$0xf] }
 0x423   :  { %10153 = vmatpush.bf16.msra.mxu2 %v17005_v40  ;;  %v14642_v40 = vld [vmem:[#allocation11 + $0x588] sm:$0xf0]  ;;  %v10708_v57 = vrot.slane %v10707_v27, 1  ;;  %v16485_v0 = vor.u32 %v18584_v7, %v16482_v16  ;;  %v14808_v23 = vld [vmem:[#allocation11 + $0x6a8] sm:$0xf] }
 0x424   :  { %v14645_v1 = vor.u32 %v18124_v31, %v14642_v40  ;;  %v16122_v31 = vld [vmem:[#allocation11 + $0x1118] sm:$0xf0]  ;;  %v18574_v40 = vld [vmem:[#allocation11 + $0x1374] sm:$0xf]  ;;  %v16082_v49 = vld [vmem:[#allocation11 + $0x10c8] sm:$0xf0] }
 0x425   :  { %10141 = vmatpush.bf16.msra.mxu0 %v16645_v43  ;;  %10063 = vmatpush.bf16.msra.mxu1 %v14725_v15  ;;  %v14965_v43 = vor.u32 %v18204_v24, %v14962_v35  ;;  %v15208_v15 = vld [vmem:[#allocation11 + $0x9c8] sm:$0xf]  ;;  %v16442_v24 = vld [vmem:[#allocation11 + $0x1398] sm:$0xf0]  ;;  %v10709_v35 = vadd.f32 %v10708_v57, %v10707_v27  ;;  %v16125_v62 = vor.u32 %v18494_v52, %v16122_v31  ;;  %v18564_v27 = vld [vmem:[#allocation11 + $0x1324] sm:$0xf] }
 0x426   :  { %10076 = vmatpush.bf16.msra.mxu3 %v15045_v3  ;;  %v14602_v3 = vld [vmem:[#allocation11 + $0x538] sm:$0xf0]  ;;  %v16445_v6 = vor.u32 %v18574_v40, %v16442_v24  ;;  %v18554_v7 = vld [vmem:[#allocation11 + $0x12d4] sm:$0xf]  ;;  %v18230_v52 = vld [vmem:[#allocation11 + $0x8ac] sm:$0xf0] }
 0x427   :  { %10154 = vmatpush.bf16.msra.mxu2 %v16965_v4  ;;  %v18190_v4 = vld [vmem:[#allocation11 + $0x76c] sm:$0xf0]  ;;  %v14605_v12 = vor.u32 %v18114_v14, %v14602_v3  ;;  %v14768_v3 = vld [vmem:[#allocation11 + $0x658] sm:$0xf]  ;;  %v16362_v16 = vld [vmem:[#allocation11 + $0x12f8] sm:$0xf0] }
 0x428   :  { %v14889_v34 = vor.u32 %v18190_v4, %v14888_v25  ;;  %v18484_v25 = vld [vmem:[#allocation11 + $0x10a4] sm:$0xf]  ;;  %v19991_v4 = vmul.f32 %v10709_v35, %v19375_v54  ;;  %v16002_v40 = vld [vmem:[#allocation11 + $0x1028] sm:$0xf0] }
 0x429   :  { %10142 = vmatpush.bf16.msra.mxu0 %v16605_v39  ;;  %10064 = vmatpush.bf16.msra.mxu1 %v14685_v21  ;;  %v15209_v39 = vor.u32 %v18270_v42, %v15208_v15  ;;  %v16165_v21 = vor.u32 %v18504_v63, %v16162_v47  ;;  %v16085_v14 = vor.u32 %v18484_v25, %v16082_v49  ;;  %v18240_v63 = vld [vmem:[#allocation11 + $0x8fc] sm:$0xf0]  ;;  %v18474_v47 = vld [vmem:[#allocation11 + $0x1054] sm:$0xf]  ;;  %v18464_v31 = vld [vmem:[#allocation11 + $0x1004] sm:$0xf] }
 0x42a   :  { %10077 = vmatpush.bf16.msra.mxu3 %v15005_v20  ;;  %v18260_v20 = vld [vmem:[#allocation11 + $0x99c] sm:$0xf0]  ;;  %v18544_v24 = vld [vmem:[#allocation11 + $0x1284] sm:$0xf]  ;;  %v16322_v35 = vld [vmem:[#allocation11 + $0x12a8] sm:$0xf0] }
 0x42b   :  { %10155 = vmatpush.bf16.msra.mxu2 %v16925_v59  ;;  %v14925_v59 = vor.u32 %v18194_v60, %v14922_v33  ;;  %v15169_v32 = vor.u32 %v18260_v20, %v15168_v26  ;;  %v18160_v60 = vld [vmem:[#allocation11 + $0x67c] sm:$0xf0]  ;;  %v18150_v26 = vld [vmem:[#allocation11 + $0x62c] sm:$0xf0]  ;;  %v16365_v20 = vor.u32 %v18554_v7, %v16362_v16  ;;  %v18454_v25 = vld [vmem:[#allocation11 + $0xfb4] sm:$0xf] }
 0x42c   :  { %v15962_v49 = vld [vmem:[#allocation11 + $0xfd8] sm:$0xf0] }
 0x42d   :  { %10143 = vmatpush.bf16.msra.mxu0 %v16565_v2  ;;  %10065 = vmatpush.bf16.msra.mxu1 %v14645_v1  ;;  %v10788_v2 = vrot.slane %v10787_v55, 1  ;;  %v15128_v1 = vld [vmem:[#allocation11 + $0x928] sm:$0xf] }
 0x42e   :  { %10078 = vmatpush.bf16.msra.mxu3 %v14965_v43  ;;  %v16402_v43 = vld [vmem:[#allocation11 + $0x1348] sm:$0xf0]  ;;  %v15129_v44 = vor.u32 %v18250_v29, %v15128_v1  ;;  %v18220_v29 = vld [vmem:[#allocation11 + $0x85c] sm:$0xf0] }
 0x42f   :  { %10156 = vmatpush.bf16.msra.mxu2 %v16885_v51  ;;  %v18170_v51 = vld [vmem:[#allocation11 + $0x6cc] sm:$0xf0]  ;;  %v10789_v15 = vadd.f32 %v10788_v2, %v10787_v55  ;;  %v16405_v33 = vor.u32 %v18564_v27, %v16402_v43  ;;  %v10844_v55 = vmul.f32 %v19991_v4, %v19991_v4 }
 0x430   :  { %v14809_v42 = vor.u32 %v18170_v51, %v14808_v23  ;;  %v14688_v23 = vld [vmem:[#allocation11 + $0x5b8] sm:$0xf] }
 0x431   :  { %10144 = vmatpush.bf16.msra.mxu0 %v16525_v22  ;;  %10066 = vmatpush.bf16.msra.mxu1 %v14605_v12  ;;  %v15088_v22 = vld [vmem:[#allocation11 + $0x8d8] sm:$0xf]  ;;  %v10834_v57 = vmul.f32 %v10789_v15, %v19375_v54  ;;  %v9860_v12 = vpop.f32.mrf.mxu1  ;;  %v18534_v15 = vld [vmem:[#allocation11 + $0x1234] sm:$0xf] }
 0x432   :  { %10079 = vmatpush.bf16.msra.mxu3 %v14925_v59  ;;  %v15089_v59 = vor.u32 %v18240_v63, %v15088_v22  ;;  %v15008_v51 = vld [vmem:[#allocation11 + $0x838] sm:$0xf]  ;;  %v14648_v63 = vld [vmem:[#allocation11 + $0x568] sm:$0xf] }
 0x433   :  { %10157 = vmatpush.bf16.msra.mxu2 %v16845_v10  ;;  %v16042_v10 = vld [vmem:[#allocation11 + $0x1078] sm:$0xf0]  ;;  %v10854_v2 = vsub.f32 %v10834_v57, %v10844_v55  ;;  %v15009_v22 = vor.u32 %v18220_v29, %v15008_v51  ;;  %v18210_v57 = vld [vmem:[#allocation11 + $0x80c] sm:$0xf0]  ;;  %v18444_v55 = vld [vmem:[#allocation11 + $0xf64] sm:$0xf] }
 0x434   :  { %10145 = vmatmul.bf16.vlgmr.msra.gmra.mxu0 %v19820_v50  ;;  %10067 = vmatmul.bf16.vlgmr.msra.gmra.mxu1 %v19729_v28  ;;  %v16045_v36 = vor.u32 %v18474_v47, %v16042_v10  ;;  %v18130_v47 = vld [vmem:[#allocation11 + $0x58c] sm:$0xf0]  ;;  %v14968_v10 = vld [vmem:[#allocation11 + $0x7e8] sm:$0xf]  ;;  %v18514_v51 = vld [vmem:[#allocation11 + $0x1194] sm:$0xf] }
 0x435   :  { %10189 = vmatpush.bf16.msrb.mxu0 %v14889_v34  ;;  %10111 = vmatpush.bf16.msrb.mxu1 %v16165_v21  ;;  %v19994_v34 = vpop.f32.mrf.mxu0  ;;  %v9861_v21 = vadd.f32 %v9860_v12, %v19985_v18  ;;  %v18140_v18 = vld [vmem:[#allocation11 + $0x5dc] sm:$0xf0]  ;;  %v18524_v12 = vld [vmem:[#allocation11 + $0x11e4] sm:$0xf] }
 0x436   :  { %10124 = vmatpush.bf16.msrb.mxu3 %v16485_v0  ;;  %10158 = vmatmul.bf16.vlgmr.msra.gmra.mxu2 %v19822_v53  ;;  %v15048_v0 = vld [vmem:[#allocation11 + $0x888] sm:$0xf] }
 0x437   :  { %10202 = vmatpush.bf16.msrb.mxu2 %v15209_v39  ;;  %10080 = vmatmul.bf16.vlgmr.msra.gmra.mxu3 %v19731_v45  ;;  %v14769_v39 = vor.u32 %v18160_v60, %v14768_v3  ;;  %v14689_v3 = vor.u32 %v18140_v18, %v14688_v23  ;;  %v15882_v18 = vld [vmem:[#allocation11 + $0xf38] sm:$0xf0] }
 0x439   :  { %10190 = vmatpush.bf16.msrb.mxu0 %v14849_v13  ;;  %10112 = vmatpush.bf16.msrb.mxu1 %v16125_v62  ;;  %v14729_v13 = vor.u32 %v18150_v26, %v14728_v11  ;;  %v16005_v62 = vor.u32 %v18464_v31, %v16002_v40  ;;  %v20000_v1 = vpop.f32.mrf.mxu2  ;;  %v9862_v60 = vpop.f32.mrf.mxu1  ;;  %v14649_v11 = vor.u32 %v18130_v47, %v14648_v63  ;;  %v18120_v26 = vld [vmem:[#allocation11 + $0x53c] sm:$0xf0]  ;;  %v18510_v40 = vld [vmem:[#allocation11 + $0x116c] sm:$0xf0] }
 0x43a   :  { %10125 = vmatpush.bf16.msrb.mxu3 %v16445_v6  ;;  %v16325_v6 = vor.u32 %v18544_v24, %v16322_v35  ;;  %v9873_v27 = vpop.f32.mrf.mxu3  ;;  %v16488_v24 = vld [vmem:[#allocation11 + $0x13c8] sm:$0xf]  ;;  %v18110_v60 = vld [vmem:[#allocation11 + $0x4ec] sm:$0xf0] }
 0x43b   :  { %10203 = vmatpush.bf16.msrb.mxu2 %v15169_v32  ;;  %v15049_v32 = vor.u32 %v18230_v52, %v15048_v0  ;;  %v14928_v0 = vld [vmem:[#allocation11 + $0x798] sm:$0xf]  ;;  %v14969_v52 = vor.u32 %v18210_v57, %v14968_v10  ;;  %v18500_v57 = vld [vmem:[#allocation11 + $0x111c] sm:$0xf0] }
 0x43c   :  { %v16128_v10 = vld [vmem:[#allocation11 + $0x10f8] sm:$0xf] }
 0x43d   :  { %10191 = vmatpush.bf16.msrb.mxu0 %v14809_v42  ;;  %10113 = vmatpush.bf16.msrb.mxu1 %v16085_v14  ;;  %v9940_v43 = vpop.f32.mrf.mxu0  ;;  %v16282_v42 = vld [vmem:[#allocation11 + $0x1258] sm:$0xf0]  ;;  %v9874_v14 = vadd.f32 %v9873_v27, %v9861_v21  ;;  %v14248_v27 = vld [vmem:[#allocation11 + $0x248] sm:$0xf] }
 0x43e   :  { %10126 = vmatpush.bf16.msrb.mxu3 %v16405_v33  ;;  %v15965_v33 = vor.u32 %v18454_v25, %v15962_v49  ;;  %v16285_v16 = vor.u32 %v18534_v15, %v16282_v42  ;;  %v18030_v43 = vld [vmem:[#allocation11 + $0x26c] sm:$0xf0] }
 0x43f   :  { %10204 = vmatpush.bf16.msrb.mxu2 %v15129_v44  ;;  %v10864_v44 = vmax.f32 %v10854_v2, 0.0  ;;  %v9887_v7 = vadd.f32 %v19974_v38, %v9874_v14  ;;  %v16168_v38 = vld [vmem:[#allocation11 + $0x1148] sm:$0xf] }
 0x440   :  { %v16169_v14 = vor.u32 %v18510_v40, %v16168_v38  ;;  %v16088_v38 = vld [vmem:[#allocation11 + $0x10a8] sm:$0xf] }
 0x441   :  { %10192 = vmatpush.bf16.msrb.mxu0 %v14769_v39  ;;  %10114 = vmatpush.bf16.msrb.mxu1 %v16045_v36  ;;  %v15922_v39 = vld [vmem:[#allocation11 + $0xf88] sm:$0xf0]  ;;  %v14608_v36 = vld [vmem:[#allocation11 + $0x518] sm:$0xf]  ;;  %v20004_v21 = vadd.f32 %v19981_v19, %v9887_v7  ;;  %v9953_v19 = vpop.f32.mrf.mxu2  ;;  %v20010_v15 = vadd.f32 1e-05, %v10864_v44 }
 0x442   :  { %10127 = vmatpush.bf16.msrb.mxu3 %v16365_v20  ;;  %v18200_v20 = vld [vmem:[#allocation11 + $0x7bc] sm:$0xf0]  ;;  %v15925_v31 = vor.u32 %v18444_v55, %v15922_v39  ;;  %v9875_v23 = vpop.f32.mrf.mxu3  ;;  %v14609_v49 = vor.u32 %v18120_v26, %v14608_v36  ;;  %v16448_v55 = vld [vmem:[#allocation11 + $0x1378] sm:$0xf]  ;;  %v18570_v19 = vld [vmem:[#allocation11 + $0x134c] sm:$0xf0] }
 0x443   :  { %10205 = vmatpush.bf16.msrb.mxu2 %v15089_v59  ;;  %v16242_v59 = vld [vmem:[#allocation11 + $0x1208] sm:$0xf0]  ;;  %v10710_v35 = vrot.slane %v20004_v21, 4  ;;  %v10765_v2 = vmul.f32 %v20004_v21, %v20004_v21  ;;  %v14929_v42 = vor.u32 %v18200_v20, %v14928_v0  ;;  %v18580_v39 = vld [vmem:[#allocation11 + $0x139c] sm:$0xf0]  ;;  %18876 = vrsqrt.f32 %v20010_v15 }
 0x444   :  { %v14208_v36 = vld [vmem:[#allocation11 + $0x1f8] sm:$0xf]  ;;  %v18100_v0 = vld [vmem:[#allocation11 + $0x49c] sm:$0xf0]  ;;  %v16449_v40 = vor.u32 %v18580_v39, %v16448_v55  ;;  %v14168_v23 = vld [vmem:[#allocation11 + $0x1a8] sm:$0xf]  ;;  %vm10908_vm9 = vweird.f32 %v20010_v15 }
 0x445   :  { %10193 = vmatpush.bf16.msrb.mxu0 %v14729_v13  ;;  %10115 = vmatpush.bf16.msrb.mxu1 %v16005_v62  ;;  %v16245_v13 = vor.u32 %v18524_v12, %v16242_v59  ;;  %v18434_v62 = vld [vmem:[#allocation11 + $0xf14] sm:$0xf]  ;;  %v10711_v29 = vadd.f32 %v10710_v35, %v20004_v21  ;;  %v10790_v25 = vrot.slane %v10765_v2, 4  ;;  %v14528_v26 = vld [vmem:[#allocation11 + $0x478] sm:$0xf] }
 0x446   :  { %10128 = vmatpush.bf16.msrb.mxu3 %v16325_v6  ;;  %v16202_v6 = vld [vmem:[#allocation11 + $0x11b8] sm:$0xf0]  ;;  %v15885_v47 = vor.u32 %v18434_v62, %v15882_v18  ;;  %v18490_v35 = vld [vmem:[#allocation11 + $0x10cc] sm:$0xf0]  ;;  %v14529_v62 = vor.u32 %v18100_v0, %v14528_v26  ;;  %v18080_v55 = vld [vmem:[#allocation11 + $0x3fc] sm:$0xf0] }
 0x447   :  { %10206 = vmatpush.bf16.msrb.mxu2 %v15049_v32  ;;  %v18590_v32 = vld [vmem:[#allocation11 + $0x13ec] sm:$0xf0]  ;;  %v16205_v7 = vor.u32 %v18514_v51, %v16202_v6  ;;  %v14488_v51 = vld [vmem:[#allocation11 + $0x428] sm:$0xf] }
 0x448   :  { %v16489_v63 = vor.u32 %v18590_v32, %v16488_v24  ;;  %v18010_v18 = vld [vmem:[#allocation11 + $0x1cc] sm:$0xf0] }
 0x449   :  { %10194 = vmatpush.bf16.msrb.mxu0 %v14689_v3  ;;  %10116 = vmatpush.bf16.msrb.mxu1 %v15965_v33  ;;  %v14568_v3 = vld [vmem:[#allocation11 + $0x4c8] sm:$0xf]  ;;  %v10791_v33 = vadd.f32 %v10790_v25, %v10765_v2  ;;  %v18090_v6 = vld [vmem:[#allocation11 + $0x44c] sm:$0xf0] }
 0x44a   :  { %10129 = vmatpush.bf16.msrb.mxu3 %v16285_v16  ;;  %v14249_v16 = vor.u32 %v18030_v43, %v14248_v27  ;;  %v14569_v59 = vor.u32 %v18110_v60, %v14568_v3  ;;  %v16408_v2 = vld [vmem:[#allocation11 + $0x1328] sm:$0xf]  ;;  %v20020_v27 = vpop.eup %18876  ;;  %v18480_v3 = vld [vmem:[#allocation11 + $0x107c] sm:$0xf0]  ;;  %v16368_v60 = vld [vmem:[#allocation11 + $0x12d8] sm:$0xf] }
 0x44b   :  { %10207 = vmatpush.bf16.msrb.mxu2 %v15009_v22  ;;  %v10712_v22 = vrot.slane %v10711_v29, 2  ;;  %v10792_v44 = vrot.slane %v10791_v33, 2  ;;  %v16409_v43 = vor.u32 %v18570_v19, %v16408_v2  ;;  %v10903_v39 = vmul.f32 %v20020_v27, %v20010_v15  ;;  %v18470_v0 = vld [vmem:[#allocation11 + $0x102c] sm:$0xf0]  ;;  %v14530_v15 = vld [vmem:[#allocation11 + $0x4a0] sm:$0xf0] }
 0x44c   :  { %v18070_v2 = vld [vmem:[#allocation11 + $0x3ac] sm:$0xf0]  ;;  %vm10909_vm8 = vweird.f32 %v20020_v27 }
 0x44d   :  { %10195 = vmatpush.bf16.msrb.mxu0 %v14649_v11  ;;  %10117 = vmatpush.bf16.msrb.mxu1 %v15925_v31  ;;  %v10713_v12 = vadd.f32 %v10712_v22, %v10711_v29  ;;  %v18020_v11 = vld [vmem:[#allocation11 + $0x21c] sm:$0xf0]  ;;  %v16129_v31 = vor.u32 %v18500_v57, %v16128_v10  ;;  %v14128_v10 = vld [vmem:[#allocation11 + $0x158] sm:$0xf]  ;;  %v10904_v19 = vmul.f32 %v20020_v27, %v10903_v39  ;;  %v15928_v39 = vld [vmem:[#allocation11 + $0xf68] sm:$0xf] }
 0x44e   :  { %10130 = vmatpush.bf16.msrb.mxu3 %v16245_v13  ;;  %v14209_v24 = vor.u32 %v18020_v11, %v14208_v36  ;;  %v14448_v57 = vld [vmem:[#allocation11 + $0x3d8] sm:$0xf]  ;;  %v16008_v36 = vld [vmem:[#allocation11 + $0x1008] sm:$0xf]  ;;  %vm20049_vm10 = vmor %vm10908_vm9, %vm10909_vm8 }
 0x44f   :  { %10208 = vmatpush.bf16.msrb.mxu2 %v14969_v52  ;;  %v10714_v20 = vrot.slane %v10713_v12, 1  ;;  %v10793_v52 = vadd.f32 %v10792_v44, %v10791_v33 }
 0x451   :  { %10196 = vmatpush.bf16.msrb.mxu0 %v14609_v49  ;;  %10118 = vmatpush.bf16.msrb.mxu1 %v15885_v47  ;;  %v10715_v13 = vadd.f32 %v10714_v20, %v10713_v12  ;;  %v10794_v32 = vrot.slane %v10793_v52, 1  ;;  %v16089_v49 = vor.u32 %v18490_v35, %v16088_v38  ;;  %v18560_v47 = vld [vmem:[#allocation11 + $0x12fc] sm:$0xf0]  ;;  %v16328_v20 = vld [vmem:[#allocation11 + $0x1288] sm:$0xf]  ;;  %v14449_v38 = vor.u32 %v18080_v55, %v14448_v57 }
 0x452   :  { %10131 = vmatpush.bf16.msrb.mxu3 %v16205_v7  ;;  %v18000_v7 = vld [vmem:[#allocation11 + $0x17c] sm:$0xf0]  ;;  %v16369_v11 = vor.u32 %v18560_v47, %v16368_v60  ;;  %v14408_v35 = vld [vmem:[#allocation11 + $0x388] sm:$0xf] }
 0x453   :  { %10209 = vmatpush.bf16.msrb.mxu2 %v14929_v42  ;;  %v20017_v29 = vmul.f32 %v10715_v13, %v19375_v54  ;;  %v10795_v25 = vadd.f32 %v10794_v32, %v10793_v52  ;;  %v14169_v42 = vor.u32 %v18010_v18, %v14168_v23  ;;  %v14129_v26 = vor.u32 %v18000_v7, %v14128_v10  ;;  %v18550_v52 = vld [vmem:[#allocation11 + $0x12ac] sm:$0xf0]  ;;  %v15968_v18 = vld [vmem:[#allocation11 + $0xfb8] sm:$0xf] }
 0x454   :  { %10197 = vmatmul.bf16.vlgmr.msrb.gmra.mxu0 %v19729_v28  ;;  %10119 = vmatmul.bf16.vlgmr.msrb.gmra.mxu1 %v19755_v56  ;;  %v16009_v32 = vor.u32 %v18470_v0, %v16008_v36  ;;  %v14008_v0 = vld [vmem:[#allocation11 + $0x68] sm:$0xf] }
 0x455   :  { %10241 = vmatpush.bf16.msra.mxu0 %v16169_v14  ;;  %10163 = vmatpush.bf16.msra.mxu1 %v14249_v16  ;;  %v16048_v14 = vld [vmem:[#allocation11 + $0x1058] sm:$0xf]  ;;  %v10835_v22 = vmul.f32 %v10795_v25, %v19375_v54  ;;  %v10845_v33 = vmul.f32 %v20017_v29, %v20017_v29  ;;  %v20025_v16 = vpop.f32.mrf.mxu0 }
 0x456   :  { %10176 = vmatpush.bf16.msra.mxu3 %v14569_v59  ;;  %10210 = vmatmul.bf16.vlgmr.msrb.gmra.mxu2 %v19731_v45  ;;  %v16049_v44 = vor.u32 %v18480_v3, %v16048_v14  ;;  %v9912_v59 = vpop.f32.mrf.mxu1  ;;  %v17980_v14 = vld [vmem:[#allocation11 + $0xdc] sm:$0xf0] }
 0x457   :  { %10254 = vmatpush.bf16.msra.mxu2 %v16489_v63  ;;  %10132 = vmatmul.bf16.vlgmr.msrb.gmra.mxu3 %v19765_v46  ;;  %v14489_v63 = vor.u32 %v18090_v6, %v14488_v51  ;;  %v10855_v12 = vsub.f32 %v10835_v22, %v10845_v33  ;;  %v18460_v51 = vld [vmem:[#allocation11 + $0xfdc] sm:$0xf0]  ;;  %v16288_v6 = vld [vmem:[#allocation11 + $0x1238] sm:$0xf] }
 0x458   :  { %v14368_v22 = vld [vmem:[#allocation11 + $0x338] sm:$0xf]  ;;  %v18060_v33 = vld [vmem:[#allocation11 + $0x35c] sm:$0xf0]  ;;  %v15969_v10 = vor.u32 %v18460_v51, %v15968_v18  ;;  %v18025_v18 = vld [vmem:[#allocation11 + $0x24c] sm:$0xf] }
 0x459   :  { %10242 = vmatpush.bf16.msra.mxu0 %v16129_v31  ;;  %10164 = vmatpush.bf16.msra.mxu1 %v14209_v24  ;;  %v10865_v31 = vmax.f32 %v10855_v12, 0.0  ;;  %v17990_v24 = vld [vmem:[#allocation11 + $0x12c] sm:$0xf0]  ;;  %v20033_v25 = vpop.f32.mrf.mxu2 }
 0x45a   :  { %10177 = vmatpush.bf16.msra.mxu3 %v14529_v62  ;;  %v16329_v62 = vor.u32 %v18550_v52, %v16328_v20  ;;  %v9925_v3 = vpop.f32.mrf.mxu3  ;;  %v18450_v12 = vld [vmem:[#allocation11 + $0xf8c] sm:$0xf0]  ;;  %v14328_v52 = vld [vmem:[#allocation11 + $0x2e8] sm:$0xf] }
 0x45b   :  { %10255 = vmatpush.bf16.msra.mxu2 %v16449_v40  ;;  %v14088_v40 = vld [vmem:[#allocation11 + $0x108] sm:$0xf]  ;;  %v20030_v13 = vadd.f32 1e-05, %v10865_v31  ;;  %v9926_v47 = vadd.f32 %v9925_v3, %v9912_v59  ;;  %v17970_v20 = vld [vmem:[#allocation11 + $0x8c] sm:$0xf0] }
 0x45c   :  { %v14089_v23 = vor.u32 %v17990_v24, %v14088_v40  ;;  %v18050_v31 = vld [vmem:[#allocation11 + $0x30c] sm:$0xf0]  ;;  %v15929_v40 = vor.u32 %v18450_v12, %v15928_v39  ;;  %v15888_v24 = vld [vmem:[#allocation11 + $0xf18] sm:$0xf]  ;;  %v15848_v12 = vld [vmem:[#allocation11 + $0xec8] sm:$0xf] }
 0x45d   :  { %10243 = vmatpush.bf16.msra.mxu0 %v16089_v49  ;;  %10165 = vmatpush.bf16.msra.mxu1 %v14169_v42  ;;  %18878 = vrsqrt.f32 %v20030_v13  ;;  %v14409_v49 = vor.u32 %v18070_v2, %v14408_v35  ;;  %v14048_v42 = vld [vmem:[#allocation11 + $0xb8] sm:$0xf]  ;;  %v9992_v60 = vpop.f32.mrf.mxu0  ;;  %v9939_v36 = vadd.f32 %v19994_v34, %v9926_v47  ;;  %v18440_v35 = vld [vmem:[#allocation11 + $0xf3c] sm:$0xf0]  ;;  %v15528_v47 = vld [vmem:[#allocation11 + $0xc48] sm:$0xf]  ;;  %vm10918_vm12 = vweird.f32 %v20030_v13 }
 0x45e   :  { %10178 = vmatpush.bf16.msra.mxu3 %v14489_v63  ;;  %v10905_v63 = vmul.f32 0.5, %v10904_v19  ;;  %v9914_v7 = vpop.f32.mrf.mxu1  ;;  %v14049_v55 = vor.u32 %v17980_v14, %v14048_v42  ;;  %v14570_v42 = vld [vmem:[#allocation11 + $0x4f0] sm:$0xf0]  ;;  %v13968_v3 = vld [vmem:[#allocation11 + $0x18] sm:$0xf] }
 0x45f   :  { %10256 = vmatpush.bf16.msra.mxu2 %v16409_v43  ;;  %v18540_v43 = vld [vmem:[#allocation11 + $0x125c] sm:$0xf0]  ;;  %v20039_v2 = vadd.f32 %v20000_v1, %v9939_v36 }
 0x460   :  { %v16289_v57 = vor.u32 %v18540_v43, %v16288_v6  ;;  %v10906_v59 = vsub.f32 1.5, %v10905_v63  ;;  %v14329_v6 = vor.u32 %v18050_v31, %v14328_v52  ;;  %v18105_v43 = vld [vmem:[#allocation11 + $0x4cc] sm:$0xf]  ;;  %v17960_v60 = vld [vmem:[#allocation11 + $0x3c] sm:$0xf0] }
 0x461   :  { %10244 = vmatpush.bf16.msra.mxu0 %v16049_v44  ;;  %10166 = vmatpush.bf16.msra.mxu1 %v14129_v26  ;;  %v16248_v44 = vld [vmem:[#allocation11 + $0x11e8] sm:$0xf]  ;;  %v18530_v26 = vld [vmem:[#allocation11 + $0x120c] sm:$0xf0]  ;;  %v10005_v51 = vpop.f32.mrf.mxu2  ;;  %v18040_v63 = vld [vmem:[#allocation11 + $0x2bc] sm:$0xf0]  ;;  %v14573_v36 = vor.u32 %v18105_v43, %v14570_v42 }
 0x462   :  { %10179 = vmatpush.bf16.msra.mxu3 %v14449_v38  ;;  %v16249_v34 = vor.u32 %v18530_v26, %v16248_v44  ;;  %v9927_v1 = vpop.f32.mrf.mxu3  ;;  %v10907_v7 = vmul.f32 %v20020_v27, %v10906_v59  ;;  %v18430_v44 = vld [vmem:[#allocation11 + $0xeec] sm:$0xf0]  ;;  %v18015_v26 = vld [vmem:[#allocation11 + $0x1fc] sm:$0xf]  ;;  %v14210_v59 = vld [vmem:[#allocation11 + $0x220] sm:$0xf0] }
 0x463   :  { %10257 = vmatpush.bf16.msra.mxu2 %v16369_v11  ;;  %v14369_v11 = vor.u32 %v18060_v33, %v14368_v22  ;;  %v20036_v38 = vpop.eup %18878  ;;  %v14288_v22 = vld [vmem:[#allocation11 + $0x298] sm:$0xf]  ;;  %v15889_v33 = vor.u32 %v18440_v35, %v15888_v24  ;;  %v15849_v24 = vor.u32 %v18430_v44, %v15848_v12  ;;  %v18005_v51 = vld [vmem:[#allocation11 + $0x1ac] sm:$0xf]  ;;  %v14170_v43 = vld [vmem:[#allocation11 + $0x1d0] sm:$0xf0] }
 0x464   :  { %v10913_v19 = vmul.f32 %v20036_v38, %v20030_v13  ;;  %vm10919_vm11 = vweird.f32 %v20036_v38  ;;  %v14289_v52 = vor.u32 %v18040_v63, %v14288_v22  ;;  %v15488_v35 = vld [vmem:[#allocation11 + $0xbf8] sm:$0xf]  ;;  %v18085_v42 = vld [vmem:[#allocation11 + $0x42c] sm:$0xf]  ;;  %v14490_v13 = vld [vmem:[#allocation11 + $0x450] sm:$0xf0] }
 0x465   :  { %10245 = vmatpush.bf16.msra.mxu0 %v16009_v32  ;;  %10167 = vmatpush.bf16.msra.mxu1 %v14089_v23  ;;  %v14009_v32 = vor.u32 %v17970_v20, %v14008_v0  ;;  %v18520_v23 = vld [vmem:[#allocation11 + $0x11bc] sm:$0xf0]  ;;  %vm10920_vm13 = vmor %vm10918_vm12, %vm10919_vm11  ;;  %v18330_v22 = vld [vmem:[#allocation11 + $0xbcc] sm:$0xf0] }
 0x466   :  { %10180 = vmatpush.bf16.msra.mxu3 %v14409_v49  ;;  %v14250_v49 = vld [vmem:[#allocation11 + $0x270] sm:$0xf0]  ;;  %v10914_v14 = vmul.f32 %v20036_v38, %v10913_v19  ;;  %v18340_v19 = vld [vmem:[#allocation11 + $0xc1c] sm:$0xf0]  ;;  %v18075_v12 = vld [vmem:[#allocation11 + $0x3dc] sm:$0xf] }
 0x467   :  { %10258 = vmatpush.bf16.msra.mxu2 %v16329_v62  ;;  %v16208_v62 = vld [vmem:[#allocation11 + $0x1198] sm:$0xf]  ;;  %v14253_v39 = vor.u32 %v18025_v18, %v14250_v49  ;;  %v14213_v18 = vor.u32 %v18015_v26, %v14210_v59  ;;  %v15489_v49 = vor.u32 %v18340_v19, %v15488_v35  ;;  %v18320_v26 = vld [vmem:[#allocation11 + $0xb7c] sm:$0xf0]  ;;  %v14090_v35 = vld [vmem:[#allocation11 + $0x130] sm:$0xf0] }
 0x468   :  { %v18065_v19 = vld [vmem:[#allocation11 + $0x38c] sm:$0xf] }
 0x469   :  { %10246 = vmatpush.bf16.msra.mxu0 %v15969_v10  ;;  %10168 = vmatpush.bf16.msra.mxu1 %v14049_v55  ;;  %v18350_v10 = vld [vmem:[#allocation11 + $0xc6c] sm:$0xf0]  ;;  %v16209_v55 = vor.u32 %v18520_v23, %v16208_v62  ;;  %v15808_v62 = vld [vmem:[#allocation11 + $0xe78] sm:$0xf]  ;;  %v18420_v23 = vld [vmem:[#allocation11 + $0xe9c] sm:$0xf0] }
 0x46a   :  { %10181 = vmatpush.bf16.msra.mxu3 %v14369_v11  ;;  %v13969_v11 = vor.u32 %v17960_v60, %v13968_v3  ;;  %v15529_v31 = vor.u32 %v18350_v10, %v15528_v47  ;;  %v15809_v3 = vor.u32 %v18420_v23, %v15808_v62  ;;  %v15448_v60 = vld [vmem:[#allocation11 + $0xba8] sm:$0xf]  ;;  %v14173_v47 = vor.u32 %v18005_v51, %v14170_v43  ;;  %v18310_v23 = vld [vmem:[#allocation11 + $0xb2c] sm:$0xf0]  ;;  %v17975_v43 = vld [vmem:[#allocation11 + $0xbc] sm:$0xf] }
 0x46b   :  { %10259 = vmatpush.bf16.msra.mxu2 %v16289_v57  ;;  %v10915_v57 = vmul.f32 0.5, %v10914_v14  ;;  %v15368_v62 = vld [vmem:[#allocation11 + $0xb08] sm:$0xf]  ;;  %v18390_v51 = vld [vmem:[#allocation11 + $0xdac] sm:$0xf0] }
 0x46d   :  { %10247 = vmatpush.bf16.msra.mxu0 %v15929_v40  ;;  %10169 = vmatpush.bf16.msra.mxu1 %v14009_v32  ;;  %v10916_v20 = vsub.f32 1.5, %v10915_v57  ;;  %v18095_v40 = vld [vmem:[#allocation11 + $0x47c] sm:$0xf]  ;;  %v15449_v57 = vor.u32 %v18330_v22, %v15448_v60  ;;  %v18300_v60 = vld [vmem:[#allocation11 + $0xadc] sm:$0xf0] }
 0x46e   :  { %10182 = vmatpush.bf16.msra.mxu3 %v14329_v6 }
 0x46f   :  { %10260 = vmatpush.bf16.msra.mxu2 %v16249_v34  ;;  %v10911_v34 = vsel %vm20049_vm10, %v20020_v27, %v10907_v7  ;;  %v10917_v32 = vmul.f32 %v20036_v38, %v10916_v20  ;;  %v14533_v27 = vor.u32 %v18095_v40, %v14530_v15  ;;  %v14493_v7 = vor.u32 %v18085_v42, %v14490_v13  ;;  %v15728_v20 = vld [vmem:[#allocation11 + $0xdd8] sm:$0xf]  ;;  %v17985_v15 = vld [vmem:[#allocation11 + $0x10c] sm:$0xf]  ;;  %v14050_v42 = vld [vmem:[#allocation11 + $0xe0] sm:$0xf0] }
 0x470   :  { %v10993_v14 = vrot.slane %v10911_v34, 6 }
 0x471   :  { %10248 = vmatpush.bf16.msra.mxu0 %v15889_v33  ;;  %10170 = vmatpush.bf16.msra.mxu1 %v13969_v11  ;;  %v10921_v6 = vsel %vm10920_vm13, %v20036_v38, %v10917_v32  ;;  %v15768_v38 = vld [vmem:[#allocation11 + $0xe28] sm:$0xf]  ;;  %v18410_v33 = vld [vmem:[#allocation11 + $0xe4c] sm:$0xf0]  ;;  %v15408_v11 = vld [vmem:[#allocation11 + $0xb58] sm:$0xf]  ;;  %v10042_v0 = vpop.f32.mrf.mxu0  ;;  %v9964_v59 = vpop.f32.mrf.mxu1 }
 0x472   :  { %10183 = vmatpush.bf16.msra.mxu3 %v14289_v52  ;;  %v10994_v1 = vrot.slane %v10921_v6, 5  ;;  %v15769_v44 = vor.u32 %v18410_v33, %v15768_v38  ;;  %v18400_v52 = vld [vmem:[#allocation11 + $0xdfc] sm:$0xf0]  ;;  %v9965_v40 = vadd.f32 %v9964_v59, %v20039_v2  ;;  %v14410_v32 = vld [vmem:[#allocation11 + $0x3b0] sm:$0xf0]  ;;  %v14093_v6 = vor.u32 %v17985_v15, %v14090_v35 }
 0x473   :  { %10261 = vmatpush.bf16.msra.mxu2 %v16209_v55  ;;  %v17995_v55 = vld [vmem:[#allocation11 + $0x15c] sm:$0xf]  ;;  %v15729_v34 = vor.u32 %v18400_v52, %v15728_v20  ;;  %v14330_v20 = vld [vmem:[#allocation11 + $0x310] sm:$0xf0]  ;;  %v15288_v52 = vld [vmem:[#allocation11 + $0xa68] sm:$0xf] }
 0x474   :  { %10249 = vmatmul.bf16.vlgmr.msra.gmra.mxu0 %v19755_v56  ;;  %10171 = vmatmul.bf16.vlgmr.msra.gmra.mxu1 %v19725_v8  ;;  %v11001_v63 = vsel %vm4403_vm15, %v10993_v14, %v10994_v1  ;;  %v18055_v2 = vld [vmem:[#allocation11 + $0x33c] sm:$0xf]  ;;  %v14370_v1 = vld [vmem:[#allocation11 + $0x360] sm:$0xf0]  ;;  %v15608_v59 = vld [vmem:[#allocation11 + $0xce8] sm:$0xf] }
 0x475   :  { %10293 = vmatpush.bf16.msrb.mxu0 %v14253_v39  ;;  %10215 = vmatpush.bf16.msrb.mxu1 %v15529_v31  ;;  %v20069_v10 = vsel %vm4405_vm1, %v19949_v30, %v11001_v63  ;;  %v14130_v39 = vld [vmem:[#allocation11 + $0x180] sm:$0xf0]  ;;  %v15648_v63 = vld [vmem:[#allocation11 + $0xd38] sm:$0xf] }
 0x476   :  { %10228 = vmatpush.bf16.msrb.mxu3 %v15849_v24  ;;  %10262 = vmatmul.bf16.vlgmr.msra.gmra.mxu2 %v19765_v46  ;;  %v14133_v31 = vor.u32 %v17995_v55, %v14130_v39  ;;  %v15409_v24 = vor.u32 %v18320_v26, %v15408_v11  ;;  %v14373_v39 = vor.u32 %v18055_v2, %v14370_v1  ;;  %v18045_v11 = vld [vmem:[#allocation11 + $0x2ec] sm:$0xf]  ;;  %v13970_v15 = vld [vmem:[#allocation11 + $0x40] sm:$0xf0]  ;;  %v15568_v2 = vld [vmem:[#allocation11 + $0xc98] sm:$0xf] }
 0x477   :  { %10306 = vmatpush.bf16.msrb.mxu2 %v14573_v36  ;;  %10184 = vmatmul.bf16.vlgmr.msra.gmra.mxu3 %v19727_v37  ;;  %v14450_v36 = vld [vmem:[#allocation11 + $0x400] sm:$0xf0]  ;;  %v18670_v1 = vld [vmem:[#allocation11 + $0x166c] sm:$0xf0] }
 0x478   :  { %v14453_v30 = vor.u32 %v18075_v12, %v14450_v36  ;;  %v14010_v36 = vld [vmem:[#allocation11 + $0x90] sm:$0xf0] }
 0x479   :  { %10294 = vmatpush.bf16.msrb.mxu0 %v14213_v18  ;;  %10216 = vmatpush.bf16.msrb.mxu1 %v15489_v49  ;;  %v15688_v18 = vld [vmem:[#allocation11 + $0xd88] sm:$0xf]  ;;  %v15369_v49 = vor.u32 %v18310_v23, %v15368_v62  ;;  %v10055_v13 = vpop.f32.mrf.mxu2  ;;  %v10044_v33 = vpop.f32.mrf.mxu0  ;;  %v14290_v62 = vld [vmem:[#allocation11 + $0x2c0] sm:$0xf0] }
 0x47a   :  { %10229 = vmatpush.bf16.msrb.mxu3 %v15809_v3  ;;  %v15689_v14 = vor.u32 %v18390_v51, %v15688_v18  ;;  %v15328_v3 = vld [vmem:[#allocation11 + $0xab8] sm:$0xf]  ;;  %v20072_v22 = vadd.f32 %v10055_v13, %v10042_v0  ;;  %v9977_v38 = vpop.f32.mrf.mxu3  ;;  %v9966_v55 = vpop.f32.mrf.mxu1  ;;  %v15530_v51 = vld [vmem:[#allocation11 + $0xc70] sm:$0xf0]  ;;  %v18360_v13 = vld [vmem:[#allocation11 + $0xcbc] sm:$0xf0] }
 0x47b   :  { %10307 = vmatpush.bf16.msrb.mxu2 %v14533_v27  ;;  %v14413_v27 = vor.u32 %v18065_v19, %v14410_v32  ;;  %v15329_v12 = vor.u32 %v18300_v60, %v15328_v3  ;;  %v14333_v19 = vor.u32 %v18045_v11, %v14330_v20  ;;  %v18035_v32 = vld [vmem:[#allocation11 + $0x29c] sm:$0xf]  ;;  %v18750_v33 = vld [vmem:[#allocation11 + $0x18ec] sm:$0xf0]  ;;  %v16768_v11 = vld [vmem:[#allocation11 + $0x15f8] sm:$0xf] }
 0x47c   :  { %v14293_v3 = vor.u32 %v18035_v32, %v14290_v62  ;;  %v18335_v55 = vld [vmem:[#allocation11 + $0xbfc] sm:$0xf]  ;;  %v18740_v20 = vld [vmem:[#allocation11 + $0x189c] sm:$0xf0]  ;;  %v18650_v32 = vld [vmem:[#allocation11 + $0x15cc] sm:$0xf0] }
 0x47d   :  { %10295 = vmatpush.bf16.msrb.mxu0 %v14173_v47  ;;  %10217 = vmatpush.bf16.msrb.mxu1 %v15449_v57  ;;  %v18380_v47 = vld [vmem:[#allocation11 + $0xd5c] sm:$0xf0]  ;;  %v14053_v57 = vor.u32 %v17975_v43, %v14050_v42  ;;  %v15248_v43 = vld [vmem:[#allocation11 + $0xa18] sm:$0xf]  ;;  %v17048_v62 = vld [vmem:[#allocation11 + $0x1828] sm:$0xf] }
 0x47e   :  { %10230 = vmatpush.bf16.msrb.mxu3 %v15769_v44  ;;  %v17965_v44 = vld [vmem:[#allocation11 + $0x6c] sm:$0xf]  ;;  %v15649_v0 = vor.u32 %v18380_v47, %v15648_v63  ;;  %v18280_v42 = vld [vmem:[#allocation11 + $0xa3c] sm:$0xf0] }
 0x47f   :  { %10308 = vmatpush.bf16.msrb.mxu2 %v14493_v7  ;;  %v9978_v7 = vadd.f32 %v9977_v38, %v9965_v40  ;;  %v14013_v40 = vor.u32 %v17965_v44, %v14010_v36  ;;  %v17128_v38 = vld [vmem:[#allocation11 + $0x18c8] sm:$0xf]  ;;  %v15249_v47 = vor.u32 %v18280_v42, %v15248_v43  ;;  %v15810_v36 = vld [vmem:[#allocation11 + $0xea0] sm:$0xf0] }
 0x480   :  { %v17129_v44 = vor.u32 %v18750_v33, %v17128_v38  ;;  %v15730_v42 = vld [vmem:[#allocation11 + $0xe00] sm:$0xf0] }
 0x481   :  { %10296 = vmatpush.bf16.msrb.mxu0 %v14133_v31  ;;  %10218 = vmatpush.bf16.msrb.mxu1 %v15409_v24  ;;  %v9991_v26 = vadd.f32 %v20025_v16, %v9978_v7  ;;  %v18290_v31 = vld [vmem:[#allocation11 + $0xa8c] sm:$0xf0]  ;;  %v17955_v24 = vld [vmem:[#allocation11 + $0x1c] sm:$0xf]  ;;  %v18345_v16 = vld [vmem:[#allocation11 + $0xc4c] sm:$0xf]  ;;  %v10057_v23 = vpop.f32.mrf.mxu2  ;;  %v15569_v7 = vor.u32 %v18360_v13, %v15568_v2 }
 0x482   :  { %10231 = vmatpush.bf16.msrb.mxu3 %v15729_v34  ;;  %v15289_v34 = vor.u32 %v18290_v31, %v15288_v52  ;;  %v15533_v60 = vor.u32 %v18345_v16, %v15530_v51  ;;  %v18730_v16 = vld [vmem:[#allocation11 + $0x184c] sm:$0xf0]  ;;  %v16688_v2 = vld [vmem:[#allocation11 + $0x1558] sm:$0xf] }
 0x483   :  { %10309 = vmatpush.bf16.msrb.mxu2 %v14453_v30  ;;  %v18370_v30 = vld [vmem:[#allocation11 + $0xd0c] sm:$0xf0]  ;;  %v20076_v35 = vadd.f32 %v20033_v25, %v9991_v26  ;;  %v13973_v25 = vor.u32 %v17955_v24, %v13970_v15  ;;  %v18660_v26 = vld [vmem:[#allocation11 + $0x161c] sm:$0xf0]  ;;  %v18405_v24 = vld [vmem:[#allocation11 + $0xe2c] sm:$0xf]  ;;  %v17049_v43 = vor.u32 %v18730_v16, %v17048_v62 }
 0x484   :  { %v15609_v18 = vor.u32 %v18370_v30, %v15608_v59  ;;  %v16769_v59 = vor.u32 %v18660_v26, %v16768_v11  ;;  %v18325_v30 = vld [vmem:[#allocation11 + $0xbac] sm:$0xf]  ;;  %v18710_v11 = vld [vmem:[#allocation11 + $0x17ac] sm:$0xf0]  ;;  %v18700_v62 = vld [vmem:[#allocation11 + $0x175c] sm:$0xf0] }
 0x485   :  { %10297 = vmatpush.bf16.msrb.mxu0 %v14093_v6  ;;  %10219 = vmatpush.bf16.msrb.mxu1 %v15369_v49  ;;  %v18425_v6 = vld [vmem:[#allocation11 + $0xecc] sm:$0xf]  ;;  %v9979_v49 = vpop.f32.mrf.mxu3 }
 0x486   :  { %10232 = vmatpush.bf16.msrb.mxu3 %v15689_v14  ;;  %v16808_v14 = vld [vmem:[#allocation11 + $0x1648] sm:$0xf]  ;;  %v18395_v49 = vld [vmem:[#allocation11 + $0xddc] sm:$0xf] }
 0x487   :  { %10310 = vmatpush.bf16.msrb.mxu2 %v14413_v27  ;;  %v15850_v27 = vld [vmem:[#allocation11 + $0xef0] sm:$0xf0]  ;;  %v15733_v38 = vor.u32 %v18395_v49, %v15730_v42 }
 0x488   :  { %v15853_v63 = vor.u32 %v18425_v6, %v15850_v27  ;;  %v18315_v6 = vld [vmem:[#allocation11 + $0xb5c] sm:$0xf]  ;;  %v15410_v27 = vld [vmem:[#allocation11 + $0xb80] sm:$0xf0]  ;;  %v15290_v49 = vld [vmem:[#allocation11 + $0xa90] sm:$0xf0] }
 0x489   :  { %10298 = vmatpush.bf16.msrb.mxu0 %v14053_v57  ;;  %10220 = vmatpush.bf16.msrb.mxu1 %v15329_v12  ;;  %v16809_v57 = vor.u32 %v18670_v1, %v16808_v14  ;;  %v18415_v12 = vld [vmem:[#allocation11 + $0xe7c] sm:$0xf]  ;;  %v17008_v14 = vld [vmem:[#allocation11 + $0x17d8] sm:$0xf]  ;;  %v18720_v1 = vld [vmem:[#allocation11 + $0x17fc] sm:$0xf0] }
 0x48a   :  { %10233 = vmatpush.bf16.msrb.mxu3 %v15649_v0  ;;  %v17088_v0 = vld [vmem:[#allocation11 + $0x1878] sm:$0xf]  ;;  %v15813_v31 = vor.u32 %v18415_v12, %v15810_v36  ;;  %v16648_v12 = vld [vmem:[#allocation11 + $0x1508] sm:$0xf] }
 0x48b   :  { %10311 = vmatpush.bf16.msrb.mxu2 %v14373_v39  ;;  %v15490_v39 = vld [vmem:[#allocation11 + $0xc20] sm:$0xf0]  ;;  %v17089_v15 = vor.u32 %v18740_v20, %v17088_v0  ;;  %v16968_v36 = vld [vmem:[#allocation11 + $0x1788] sm:$0xf] }
 0x48c   :  { %v15493_v52 = vor.u32 %v18335_v55, %v15490_v39  ;;  %v17009_v55 = vor.u32 %v18720_v1, %v17008_v14  ;;  %v15690_v39 = vld [vmem:[#allocation11 + $0xdb0] sm:$0xf0]  ;;  %v18610_v14 = vld [vmem:[#allocation11 + $0x148c] sm:$0xf0]  ;;  %v16888_v1 = vld [vmem:[#allocation11 + $0x16e8] sm:$0xf] }
 0x48d   :  { %10299 = vmatpush.bf16.msrb.mxu0 %v14013_v40  ;;  %10221 = vmatpush.bf16.msrb.mxu1 %v15289_v34  ;;  %v15450_v40 = vld [vmem:[#allocation11 + $0xbd0] sm:$0xf0]  ;;  %v16728_v34 = vld [vmem:[#allocation11 + $0x15a8] sm:$0xf] }
 0x48e   :  { %10234 = vmatpush.bf16.msrb.mxu3 %v15609_v18  ;;  %v15453_v23 = vor.u32 %v18325_v30, %v15450_v40  ;;  %v16729_v51 = vor.u32 %v18650_v32, %v16728_v34  ;;  %v16969_v30 = vor.u32 %v18710_v11, %v16968_v36  ;;  %v15650_v40 = vld [vmem:[#allocation11 + $0xd60] sm:$0xf0]  ;;  %v16928_v32 = vld [vmem:[#allocation11 + $0x1738] sm:$0xf]  ;;  %v18745_v36 = vld [vmem:[#allocation11 + $0x18cc] sm:$0xf] }
 0x48f   :  { %10312 = vmatpush.bf16.msrb.mxu2 %v14333_v19  ;;  %v15770_v19 = vld [vmem:[#allocation11 + $0xe50] sm:$0xf0]  ;;  %v16929_v42 = vor.u32 %v18700_v62, %v16928_v32 }
 0x490   :  { %v15773_v18 = vor.u32 %v18405_v24, %v15770_v19  ;;  %v16608_v24 = vld [vmem:[#allocation11 + $0x14b8] sm:$0xf]  ;;  %v17130_v11 = vld [vmem:[#allocation11 + $0x18f0] sm:$0xf0] }
 0x491   :  { %10300 = vmatpush.bf16.msrb.mxu0 %v13973_v25  ;;  %10222 = vmatpush.bf16.msrb.mxu1 %v15249_v47  ;;  %v18640_v25 = vld [vmem:[#allocation11 + $0x157c] sm:$0xf0]  ;;  %v20082_v13 = vpop.f32.mrf.mxu0  ;;  %v18305_v47 = vld [vmem:[#allocation11 + $0xb0c] sm:$0xf]  ;;  %v17133_v32 = vor.u32 %v18745_v36, %v17130_v11 }
 0x492   :  { %10235 = vmatpush.bf16.msrb.mxu3 %v15569_v7  ;;  %v15370_v7 = vld [vmem:[#allocation11 + $0xb30] sm:$0xf0] }
 0x493   :  { %10313 = vmatpush.bf16.msrb.mxu2 %v14293_v3  ;;  %v15413_v3 = vor.u32 %v18315_v6, %v15410_v27  ;;  %v15373_v26 = vor.u32 %v18305_v47, %v15370_v7  ;;  %v18285_v27 = vld [vmem:[#allocation11 + $0xa6c] sm:$0xf]  ;;  %v18355_v7 = vld [vmem:[#allocation11 + $0xc9c] sm:$0xf] }
 0x494   :  { %10301 = vmatmul.bf16.vlgmr.msrb.gmra.mxu0 %v19725_v8  ;;  %10223 = vmatmul.bf16.vlgmr.msrb.gmra.mxu1 %v19763_v41 }
 0x495   :  { %10345 = vmatpush.bf16.msra.mxu0 %v15533_v60  ;;  %10267 = vmatpush.bf16.msra.mxu1 %v16809_v57  ;;  %v10016_v60 = vpop.f32.mrf.mxu1  ;;  %v18385_v57 = vld [vmem:[#allocation11 + $0xd8c] sm:$0xf] }
 0x496   :  { %10280 = vmatpush.bf16.msra.mxu3 %v17129_v44  ;;  %10314 = vmatmul.bf16.vlgmr.msrb.gmra.mxu2 %v19727_v37  ;;  %v10017_v33 = vadd.f32 %v10016_v60, %v20076_v35  ;;  %v18630_v44 = vld [vmem:[#allocation11 + $0x152c] sm:$0xf0]  ;;  %v15693_v0 = vor.u32 %v18385_v57, %v15690_v39  ;;  %v18375_v35 = vld [vmem:[#allocation11 + $0xd3c] sm:$0xf]  ;;  %v15293_v60 = vor.u32 %v18285_v27, %v15290_v49  ;;  %v15570_v57 = vld [vmem:[#allocation11 + $0xcc0] sm:$0xf0] }
 0x497   :  { %10358 = vmatpush.bf16.msra.mxu2 %v15853_v63  ;;  %10236 = vmatmul.bf16.vlgmr.msrb.gmra.mxu3 %v19770_v9  ;;  %v16689_v63 = vor.u32 %v18640_v25, %v16688_v2  ;;  %v16649_v20 = vor.u32 %v18630_v44, %v16648_v12  ;;  %v15610_v2 = vld [vmem:[#allocation11 + $0xd10] sm:$0xf0]  ;;  %v16568_v25 = vld [vmem:[#allocation11 + $0x1468] sm:$0xf]  ;;  %v18735_v27 = vld [vmem:[#allocation11 + $0x187c] sm:$0xf] }
 0x498   :  { %v16569_v47 = vor.u32 %v18610_v14, %v16568_v25  ;;  %v16810_v44 = vld [vmem:[#allocation11 + $0x1670] sm:$0xf0]  ;;  %v18255_v25 = vld [vmem:[#allocation11 + $0x97c] sm:$0xf]  ;;  %v15170_v14 = vld [vmem:[#allocation11 + $0x9a0] sm:$0xf0] }
 0x499   :  { %10346 = vmatpush.bf16.msra.mxu0 %v15493_v52  ;;  %10268 = vmatpush.bf16.msra.mxu1 %v16769_v59  ;;  %v18295_v52 = vld [vmem:[#allocation11 + $0xabc] sm:$0xf]  ;;  %v20085_v59 = vpop.f32.mrf.mxu2  ;;  %v10096_v34 = vpop.f32.mrf.mxu0 }
 0x49a   :  { %10281 = vmatpush.bf16.msra.mxu3 %v17089_v15  ;;  %v18620_v15 = vld [vmem:[#allocation11 + $0x14dc] sm:$0xf0]  ;;  %v10029_v19 = vpop.f32.mrf.mxu3  ;;  %v15210_v34 = vld [vmem:[#allocation11 + $0x9f0] sm:$0xf0] }
 0x49b   :  { %10359 = vmatpush.bf16.msra.mxu2 %v15813_v31  ;;  %v15330_v31 = vld [vmem:[#allocation11 + $0xae0] sm:$0xf0]  ;;  %v20087_v16 = vadd.f32 %v10029_v19, %v10017_v33  ;;  %v16609_v6 = vor.u32 %v18620_v15, %v16608_v24  ;;  %v15573_v24 = vor.u32 %v18355_v7, %v15570_v57  ;;  %v18265_v19 = vld [vmem:[#allocation11 + $0x9cc] sm:$0xf]  ;;  %v17050_v7 = vld [vmem:[#allocation11 + $0x1850] sm:$0xf0] }
 0x49c   :  { %v15250_v33 = vld [vmem:[#allocation11 + $0xa40] sm:$0xf0]  ;;  %v15213_v49 = vor.u32 %v18265_v19, %v15210_v34  ;;  %v18165_v57 = vld [vmem:[#allocation11 + $0x6ac] sm:$0xf] }
 0x49d   :  { %10347 = vmatpush.bf16.msra.mxu0 %v15453_v23  ;;  %10269 = vmatpush.bf16.msra.mxu1 %v16729_v51  ;;  %v15333_v23 = vor.u32 %v18295_v52, %v15330_v31  ;;  %v15653_v51 = vor.u32 %v18375_v35, %v15650_v40  ;;  %v16848_v52 = vld [vmem:[#allocation11 + $0x1698] sm:$0xf]  ;;  %v18680_v35 = vld [vmem:[#allocation11 + $0x16bc] sm:$0xf0]  ;;  %v14890_v40 = vld [vmem:[#allocation11 + $0x770] sm:$0xf0] }
 0x49e   :  { %10282 = vmatpush.bf16.msra.mxu3 %v17049_v43  ;;  %v18365_v43 = vld [vmem:[#allocation11 + $0xcec] sm:$0xf] }
 0x49f   :  { %10360 = vmatpush.bf16.msra.mxu2 %v15773_v18  ;;  %v10018_v18 = vpop.f32.mrf.mxu1 }
 0x4a1   :  { %10348 = vmatpush.bf16.msra.mxu0 %v15413_v3  ;;  %10270 = vmatpush.bf16.msra.mxu1 %v16689_v63  ;;  %v18690_v3 = vld [vmem:[#allocation11 + $0x170c] sm:$0xf0]  ;;  %v15613_v63 = vor.u32 %v18365_v43, %v15610_v2  ;;  %v10109_v39 = vpop.f32.mrf.mxu2  ;;  %v17090_v43 = vld [vmem:[#allocation11 + $0x18a0] sm:$0xf0] }
 0x4a2   :  { %10283 = vmatpush.bf16.msra.mxu3 %v17009_v55  ;;  %v18665_v55 = vld [vmem:[#allocation11 + $0x164c] sm:$0xf]  ;;  %v16889_v12 = vor.u32 %v18690_v3, %v16888_v1  ;;  %v14850_v2 = vld [vmem:[#allocation11 + $0x720] sm:$0xf0]  ;;  %v17093_v3 = vor.u32 %v18735_v27, %v17090_v43 }
 0x4a3   :  { %10361 = vmatpush.bf16.msra.mxu2 %v15733_v38  ;;  %v18275_v38 = vld [vmem:[#allocation11 + $0xa1c] sm:$0xf]  ;;  %v16813_v15 = vor.u32 %v18665_v55, %v16810_v44  ;;  %v14810_v55 = vld [vmem:[#allocation11 + $0x6d0] sm:$0xf0]  ;;  %v18245_v39 = vld [vmem:[#allocation11 + $0x92c] sm:$0xf] }
 0x4a4   :  { %v15253_v31 = vor.u32 %v18275_v38, %v15250_v33  ;;  %v18645_v38 = vld [vmem:[#allocation11 + $0x15ac] sm:$0xf]  ;;  %v16730_v33 = vld [vmem:[#allocation11 + $0x15d0] sm:$0xf0]  ;;  %v14813_v11 = vor.u32 %v18165_v57, %v14810_v55  ;;  %v14690_v57 = vld [vmem:[#allocation11 + $0x5e0] sm:$0xf0] }
 0x4a5   :  { %10349 = vmatpush.bf16.msra.mxu0 %v15373_v26  ;;  %10271 = vmatpush.bf16.msra.mxu1 %v16649_v20  ;;  %v10031_v26 = vpop.f32.mrf.mxu3  ;;  %v18600_v20 = vld [vmem:[#allocation11 + $0x143c] sm:$0xf0]  ;;  %v16733_v44 = vor.u32 %v18645_v38, %v16730_v33  ;;  %v18145_v43 = vld [vmem:[#allocation11 + $0x60c] sm:$0xf]  ;;  %v16610_v38 = vld [vmem:[#allocation11 + $0x14e0] sm:$0xf0] }
 0x4a6   :  { %10284 = vmatpush.bf16.msra.mxu3 %v16969_v30  ;;  %v18185_v30 = vld [vmem:[#allocation11 + $0x74c] sm:$0xf]  ;;  %v18635_v26 = vld [vmem:[#allocation11 + $0x155c] sm:$0xf] }
 0x4a7   :  { %10362 = vmatpush.bf16.msra.mxu2 %v15693_v0  ;;  %v16528_v0 = vld [vmem:[#allocation11 + $0x1418] sm:$0xf]  ;;  %v14893_v18 = vor.u32 %v18185_v30, %v14890_v40  ;;  %v14770_v30 = vld [vmem:[#allocation11 + $0x680] sm:$0xf0] }
 0x4a8   :  { %v16529_v62 = vor.u32 %v18600_v20, %v16528_v0  ;;  %v16690_v0 = vld [vmem:[#allocation11 + $0x1580] sm:$0xf0]  ;;  %v18715_v20 = vld [vmem:[#allocation11 + $0x17dc] sm:$0xf] }
 0x4a9   :  { %10350 = vmatpush.bf16.msra.mxu0 %v15333_v23  ;;  %10272 = vmatpush.bf16.msra.mxu1 %v16609_v6  ;;  %v16849_v23 = vor.u32 %v18680_v35, %v16848_v52  ;;  %v16770_v6 = vld [vmem:[#allocation11 + $0x1620] sm:$0xf0]  ;;  %v18155_v35 = vld [vmem:[#allocation11 + $0x65c] sm:$0xf]  ;;  %v16693_v19 = vor.u32 %v18635_v26, %v16690_v0 }
 0x4aa   :  { %10285 = vmatpush.bf16.msra.mxu3 %v16929_v42  ;;  %v18175_v42 = vld [vmem:[#allocation11 + $0x6fc] sm:$0xf] }
 0x4ab   :  { %10363 = vmatpush.bf16.msra.mxu2 %v15653_v51  ;;  %v18655_v51 = vld [vmem:[#allocation11 + $0x15fc] sm:$0xf] }
 0x4ac   :  { %v16773_v1 = vor.u32 %v18655_v51, %v16770_v6  ;;  %v16650_v51 = vld [vmem:[#allocation11 + $0x1530] sm:$0xf0]  ;;  %v18705_v6 = vld [vmem:[#allocation11 + $0x178c] sm:$0xf] }
 0x4ad   :  { %10351 = vmatpush.bf16.msra.mxu0 %v15293_v60  ;;  %10273 = vmatpush.bf16.msra.mxu1 %v16569_v47  ;;  %v14853_v60 = vor.u32 %v18175_v42, %v14850_v2  ;;  %v15173_v47 = vor.u32 %v18255_v25, %v15170_v14  ;;  %v14730_v42 = vld [vmem:[#allocation11 + $0x630] sm:$0xf0]  ;;  %v18225_v2 = vld [vmem:[#allocation11 + $0x88c] sm:$0xf] }
 0x4ae   :  { %10286 = vmatpush.bf16.msra.mxu3 %v16889_v12  ;;  %v15130_v12 = vld [vmem:[#allocation11 + $0x950] sm:$0xf0] }
 0x4af   :  { %10364 = vmatpush.bf16.msra.mxu2 %v15613_v63  ;;  %v18725_v63 = vld [vmem:[#allocation11 + $0x182c] sm:$0xf]  ;;  %v15133_v52 = vor.u32 %v18245_v39, %v15130_v12  ;;  %v15050_v25 = vld [vmem:[#allocation11 + $0x8b0] sm:$0xf0]  ;;  %v18215_v12 = vld [vmem:[#allocation11 + $0x83c] sm:$0xf] }
 0x4b0   :  { %v17053_v36 = vor.u32 %v18725_v63, %v17050_v7  ;;  %v15053_v63 = vor.u32 %v18225_v2, %v15050_v25  ;;  %v18135_v7 = vld [vmem:[#allocation11 + $0x5bc] sm:$0xf] }
 0x4b1   :  { %10352 = vmatpush.bf16.msra.mxu0 %v15253_v31  ;;  %10274 = vmatpush.bf16.msra.mxu1 %v16529_v62  ;;  %v17010_v31 = vld [vmem:[#allocation11 + $0x1800] sm:$0xf0]  ;;  %v20093_v40 = vpop.f32.mrf.mxu0  ;;  %v10068_v34 = vpop.f32.mrf.mxu1 }
 0x4b2   :  { %10287 = vmatpush.bf16.msra.mxu3 %v16849_v23  ;;  %v10069_v62 = vadd.f32 %v10068_v34, %v20072_v22  ;;  %v14773_v23 = vor.u32 %v18155_v35, %v14770_v30  ;;  %v18695_v22 = vld [vmem:[#allocation11 + $0x173c] sm:$0xf]  ;;  %v18685_v35 = vld [vmem:[#allocation11 + $0x16ec] sm:$0xf]  ;;  %v14650_v34 = vld [vmem:[#allocation11 + $0x590] sm:$0xf0] }
 0x4b3   :  { %10365 = vmatpush.bf16.msra.mxu2 %v15573_v24  ;;  %v18235_v24 = vld [vmem:[#allocation11 + $0x8dc] sm:$0xf] }
 0x4b4   :  { %10353 = vmatmul.bf16.vlgmr.msra.gmra.mxu0 %v19763_v41  ;;  %10275 = vmatmul.bf16.vlgmr.msra.gmra.mxu1 %v19820_v50 }
 0x4b5   :  { %10397 = vmatpush.bf16.msrb.mxu0 %v16813_v15  ;;  %10319 = vmatpush.bf16.msrb.mxu1 %v14893_v18  ;;  %v15090_v15 = vld [vmem:[#allocation11 + $0x900] sm:$0xf0]  ;;  %v18625_v18 = vld [vmem:[#allocation11 + $0x150c] sm:$0xf] }
 0x4b6   :  { %10332 = vmatpush.bf16.msrb.mxu3 %v15213_v49  ;;  %10366 = vmatmul.bf16.vlgmr.msra.gmra.mxu2 %v19770_v9  ;;  %v15093_v27 = vor.u32 %v18235_v24, %v15090_v15  ;;  %v16970_v49 = vld [vmem:[#allocation11 + $0x17b0] sm:$0xf0]  ;;  %v16653_v14 = vor.u32 %v18625_v18, %v16650_v51  ;;  %v18595_v18 = vld [vmem:[#allocation11 + $0x141c] sm:$0xf]  ;;  %v16530_v51 = vld [vmem:[#allocation11 + $0x1440] sm:$0xf0] }
 0x4b7   :  { %10410 = vmatpush.bf16.msrb.mxu2 %v17133_v32  ;;  %10288 = vmatmul.bf16.vlgmr.msra.gmra.mxu3 %v19822_v53  ;;  %v17013_v32 = vor.u32 %v18715_v20, %v17010_v31  ;;  %v14693_v20 = vor.u32 %v18135_v7, %v14690_v57  ;;  %v16570_v31 = vld [vmem:[#allocation11 + $0x1490] sm:$0xf0]  ;;  %v18505_v7 = vld [vmem:[#allocation11 + $0x114c] sm:$0xf] }
 0x4b8   :  { %v16890_v15 = vld [vmem:[#allocation11 + $0x1710] sm:$0xf0] }
 0x4b9   :  { %10398 = vmatpush.bf16.msrb.mxu0 %v16773_v1  ;;  %10320 = vmatpush.bf16.msrb.mxu1 %v14853_v60  ;;  %v16973_v1 = vor.u32 %v18705_v6, %v16970_v49  ;;  %v18615_v60 = vld [vmem:[#allocation11 + $0x14bc] sm:$0xf]  ;;  %v20096_v33 = vpop.f32.mrf.mxu2  ;;  %v10148_v39 = vpop.f32.mrf.mxu0  ;;  %v16170_v57 = vld [vmem:[#allocation11 + $0x1170] sm:$0xf0] }
 0x4ba   :  { %10333 = vmatpush.bf16.msrb.mxu3 %v15173_v47  ;;  %v16930_v47 = vld [vmem:[#allocation11 + $0x1760] sm:$0xf0]  ;;  %v10081_v55 = vpop.f32.mrf.mxu3  ;;  %v10070_v26 = vpop.f32.mrf.mxu1 }
 0x4bb   :  { %10411 = vmatpush.bf16.msrb.mxu2 %v17093_v3  ;;  %v14733_v3 = vor.u32 %v18145_v43, %v14730_v42  ;;  %v16933_v0 = vor.u32 %v18695_v22, %v16930_v47  ;;  %v18675_v43 = vld [vmem:[#allocation11 + $0x169c] sm:$0xf]  ;;  %v16850_v42 = vld [vmem:[#allocation11 + $0x16c0] sm:$0xf0] }
 0x4bc   :  { %v14610_v22 = vld [vmem:[#allocation11 + $0x540] sm:$0xf0] }
 0x4bd   :  { %10399 = vmatpush.bf16.msrb.mxu0 %v16733_v44  ;;  %10321 = vmatpush.bf16.msrb.mxu1 %v14813_v11  ;;  %v15010_v44 = vld [vmem:[#allocation11 + $0x860] sm:$0xf0]  ;;  %v16613_v11 = vor.u32 %v18615_v60, %v16610_v38  ;;  %v18115_v38 = vld [vmem:[#allocation11 + $0x51c] sm:$0xf] }
 0x4be   :  { %10334 = vmatpush.bf16.msrb.mxu3 %v15133_v52  ;;  %v18605_v52 = vld [vmem:[#allocation11 + $0x146c] sm:$0xf]  ;;  %v15013_v24 = vor.u32 %v18215_v12, %v15010_v44  ;;  %v14930_v47 = vld [vmem:[#allocation11 + $0x7c0] sm:$0xf0]  ;;  %v16490_v44 = vld [vmem:[#allocation11 + $0x13f0] sm:$0xf0] }
 0x4bf   :  { %10412 = vmatpush.bf16.msrb.mxu2 %v17053_v36  ;;  %v10082_v36 = vadd.f32 %v10081_v55, %v10069_v62  ;;  %v16573_v62 = vor.u32 %v18605_v52, %v16570_v31  ;;  %v16853_v55 = vor.u32 %v18675_v43, %v16850_v42  ;;  %v18585_v12 = vld [vmem:[#allocation11 + $0x13cc] sm:$0xf]  ;;  %v18181_v52 = vld [vmem:[#allocation11 + $0x724] sm:$0xf0]  ;;  %v15176_v31 = vld [vmem:[#allocation11 + $0x980] sm:$0xf] }
 0x4c0   :  { %v18251_v43 = vld [vmem:[#allocation11 + $0x954] sm:$0xf0]  ;;  %v18485_v42 = vld [vmem:[#allocation11 + $0x10ac] sm:$0xf] }
 0x4c1   :  { %10400 = vmatpush.bf16.msrb.mxu0 %v16693_v19  ;;  %10322 = vmatpush.bf16.msrb.mxu1 %v14773_v23  ;;  %v10095_v30 = vadd.f32 %v20082_v13, %v10082_v36  ;;  %v18125_v19 = vld [vmem:[#allocation11 + $0x56c] sm:$0xf]  ;;  %v14970_v23 = vld [vmem:[#allocation11 + $0x810] sm:$0xf0]  ;;  %v14896_v13 = vld [vmem:[#allocation11 + $0x750] sm:$0xf]  ;;  %v10161_v2 = vpop.f32.mrf.mxu2 }
 0x4c2   :  { %10335 = vmatpush.bf16.msrb.mxu3 %v15093_v27  ;;  %v16893_v27 = vor.u32 %v18685_v35, %v16890_v15  ;;  %v14653_v49 = vor.u32 %v18125_v19, %v14650_v34  ;;  %v10083_v60 = vpop.f32.mrf.mxu3  ;;  %v16493_v35 = vor.u32 %v18585_v12, %v16490_v44  ;;  %v16130_v15 = vld [vmem:[#allocation11 + $0x1120] sm:$0xf0]  ;;  %v18575_v19 = vld [vmem:[#allocation11 + $0x137c] sm:$0xf]  ;;  %v18565_v2 = vld [vmem:[#allocation11 + $0x132c] sm:$0xf] }
 0x4c3   :  { %10413 = vmatpush.bf16.msrb.mxu2 %v17013_v32  ;;  %v18205_v32 = vld [vmem:[#allocation11 + $0x7ec] sm:$0xf]  ;;  %v20100_v6 = vadd.f32 %v20085_v59, %v10095_v30  ;;  %v16533_v59 = vor.u32 %v18595_v18, %v16530_v51  ;;  %v18261_v30 = vld [vmem:[#allocation11 + $0x9a4] sm:$0xf0]  ;;  %v16450_v34 = vld [vmem:[#allocation11 + $0x13a0] sm:$0xf0] }
 0x4c4   :  { %v14973_v25 = vor.u32 %v18205_v32, %v14970_v23  ;;  %v15177_v23 = vor.u32 %v18261_v30, %v15176_v31  ;;  %v14816_v18 = vld [vmem:[#allocation11 + $0x6b0] sm:$0xf]  ;;  %v18171_v51 = vld [vmem:[#allocation11 + $0x6d4] sm:$0xf0]  ;;  %v14776_v60 = vld [vmem:[#allocation11 + $0x660] sm:$0xf] }
 0x4c5   :  { %10401 = vmatpush.bf16.msrb.mxu0 %v16653_v14  ;;  %10323 = vmatpush.bf16.msrb.mxu1 %v14733_v3  ;;  %v18191_v14 = vld [vmem:[#allocation11 + $0x774] sm:$0xf0]  ;;  %v18465_v30 = vld [vmem:[#allocation11 + $0x100c] sm:$0xf] }
 0x4c6   :  { %10336 = vmatpush.bf16.msrb.mxu3 %v15053_v63  ;;  %v18271_v3 = vld [vmem:[#allocation11 + $0x9f4] sm:$0xf0]  ;;  %v18195_v63 = vld [vmem:[#allocation11 + $0x79c] sm:$0xf]  ;;  %v14897_v39 = vor.u32 %v18191_v14, %v14896_v13  ;;  %v16090_v13 = vld [vmem:[#allocation11 + $0x10d0] sm:$0xf0]  ;;  %v14817_v14 = vor.u32 %v18171_v51, %v14816_v18 }
 0x4c7   :  { %10414 = vmatpush.bf16.msrb.mxu2 %v16973_v1  ;;  %v15216_v1 = vld [vmem:[#allocation11 + $0x9d0] sm:$0xf]  ;;  %v14933_v26 = vor.u32 %v18195_v63, %v14930_v47  ;;  %v18475_v47 = vld [vmem:[#allocation11 + $0x105c] sm:$0xf]  ;;  %v18141_v18 = vld [vmem:[#allocation11 + $0x5e4] sm:$0xf0] }
 0x4c8   :  { %v15217_v36 = vor.u32 %v18271_v3, %v15216_v1  ;;  %v16093_v3 = vor.u32 %v18485_v42, %v16090_v13  ;;  %v15970_v42 = vld [vmem:[#allocation11 + $0xfe0] sm:$0xf0] }
 0x4c9   :  { %10402 = vmatpush.bf16.msrb.mxu0 %v16613_v11  ;;  %10324 = vmatpush.bf16.msrb.mxu1 %v14693_v20  ;;  %v14613_v11 = vor.u32 %v18115_v38, %v14610_v22  ;;  %v14856_v20 = vld [vmem:[#allocation11 + $0x700] sm:$0xf]  ;;  %v18161_v38 = vld [vmem:[#allocation11 + $0x684] sm:$0xf0] }
 0x4ca   :  { %10337 = vmatpush.bf16.msrb.mxu3 %v15013_v24  ;;  %v18495_v24 = vld [vmem:[#allocation11 + $0x10fc] sm:$0xf]  ;;  %v14857_v32 = vor.u32 %v18181_v52, %v14856_v20  ;;  %v15096_v22 = vld [vmem:[#allocation11 + $0x8e0] sm:$0xf]  ;;  %v14777_v12 = vor.u32 %v18161_v38, %v14776_v60  ;;  %v18151_v20 = vld [vmem:[#allocation11 + $0x634] sm:$0xf0] }
 0x4cb   :  { %10415 = vmatpush.bf16.msrb.mxu2 %v16933_v0  ;;  %v16173_v0 = vor.u32 %v18505_v7, %v16170_v57  ;;  %v16050_v7 = vld [vmem:[#allocation11 + $0x1080] sm:$0xf0]  ;;  %v15056_v52 = vld [vmem:[#allocation11 + $0x890] sm:$0xf] }
 0x4cd   :  { %10403 = vmatpush.bf16.msrb.mxu0 %v16573_v62  ;;  %10325 = vmatpush.bf16.msrb.mxu1 %v14653_v49  ;;  %v16133_v62 = vor.u32 %v18495_v24, %v16130_v15  ;;  %v16453_v49 = vor.u32 %v18575_v19, %v16450_v34  ;;  %v16010_v24 = vld [vmem:[#allocation11 + $0x1030] sm:$0xf0]  ;;  %v18545_v15 = vld [vmem:[#allocation11 + $0x128c] sm:$0xf] }
 0x4ce   :  { %10338 = vmatpush.bf16.msrb.mxu3 %v14973_v25  ;;  %v16410_v25 = vld [vmem:[#allocation11 + $0x1350] sm:$0xf0] }
 0x4cf   :  { %10416 = vmatpush.bf16.msrb.mxu2 %v16893_v27  ;;  %v15136_v27 = vld [vmem:[#allocation11 + $0x930] sm:$0xf]  ;;  %v16413_v63 = vor.u32 %v18565_v2, %v16410_v25  ;;  %v16330_v19 = vld [vmem:[#allocation11 + $0x12b0] sm:$0xf0]  ;;  %v18535_v25 = vld [vmem:[#allocation11 + $0x123c] sm:$0xf] }
 0x4d0   :  { %v15137_v1 = vor.u32 %v18251_v43, %v15136_v27  ;;  %v16333_v27 = vor.u32 %v18545_v15, %v16330_v19  ;;  %v18455_v43 = vld [vmem:[#allocation11 + $0xfbc] sm:$0xf] }
 0x4d1   :  { %10404 = vmatpush.bf16.msrb.mxu0 %v16533_v59  ;;  %10326 = vmatpush.bf16.msrb.mxu1 %v14613_v11  ;;  %v18241_v59 = vld [vmem:[#allocation11 + $0x904] sm:$0xf0]  ;;  %v20106_v57 = vpop.f32.mrf.mxu0  ;;  %v10120_v44 = vpop.f32.mrf.mxu1 }
 0x4d2   :  { %10339 = vmatpush.bf16.msrb.mxu3 %v14933_v26  ;;  %v10121_v11 = vadd.f32 %v10120_v44, %v20100_v6  ;;  %v16053_v26 = vor.u32 %v18475_v47, %v16050_v7  ;;  %v15016_v6 = vld [vmem:[#allocation11 + $0x840] sm:$0xf]  ;;  %v14976_v47 = vld [vmem:[#allocation11 + $0x7f0] sm:$0xf]  ;;  %v15930_v44 = vld [vmem:[#allocation11 + $0xf90] sm:$0xf0] }
 0x4d3   :  { %10417 = vmatpush.bf16.msrb.mxu2 %v16853_v55  ;;  %v18555_v55 = vld [vmem:[#allocation11 + $0x12dc] sm:$0xf] }
 0x4d4   :  { %10405 = vmatmul.bf16.vlgmr.msrb.gmra.mxu0 %v19820_v50  ;;  %10327 = vmatmul.bf16.vlgmr.msrb.gmra.mxu1 %v19729_v28 }
 0x4d5   :  { %10449 = vmatpush.bf16.msra.mxu0 %v14897_v39  ;;  %10371 = vmatpush.bf16.msra.mxu1 %v16173_v0  ;;  %v16370_v39 = vld [vmem:[#allocation11 + $0x1300] sm:$0xf0]  ;;  %v14736_v0 = vld [vmem:[#allocation11 + $0x610] sm:$0xf] }
 0x4d6   :  { %10384 = vmatpush.bf16.msra.mxu3 %v16493_v35  ;;  %10418 = vmatmul.bf16.vlgmr.msrb.gmra.mxu2 %v19822_v53  ;;  %v16373_v31 = vor.u32 %v18555_v55, %v16370_v39  ;;  %v18231_v35 = vld [vmem:[#allocation11 + $0x8b4] sm:$0xf0]  ;;  %v14737_v34 = vor.u32 %v18151_v20, %v14736_v0  ;;  %v14616_v20 = vld [vmem:[#allocation11 + $0x520] sm:$0xf] }
 0x4d7   :  { %10462 = vmatpush.bf16.msra.mxu2 %v15217_v36  ;;  %10340 = vmatmul.bf16.vlgmr.msrb.gmra.mxu3 %v19731_v45  ;;  %v15097_v36 = vor.u32 %v18241_v59, %v15096_v22  ;;  %v15973_v22 = vor.u32 %v18455_v43, %v15970_v42  ;;  %v18131_v59 = vld [vmem:[#allocation11 + $0x594] sm:$0xf0]  ;;  %v14256_v43 = vld [vmem:[#allocation11 + $0x250] sm:$0xf] }
 0x4d8   :  { %v18211_v39 = vld [vmem:[#allocation11 + $0x814] sm:$0xf0] }
 0x4d9   :  { %10450 = vmatpush.bf16.msra.mxu0 %v14857_v32  ;;  %10372 = vmatpush.bf16.msra.mxu1 %v16133_v62  ;;  %v15057_v32 = vor.u32 %v18231_v35, %v15056_v52  ;;  %v14696_v62 = vld [vmem:[#allocation11 + $0x5c0] sm:$0xf]  ;;  %v20109_v51 = vpop.f32.mrf.mxu2  ;;  %v10200_v2 = vpop.f32.mrf.mxu0  ;;  %v18121_v52 = vld [vmem:[#allocation11 + $0x544] sm:$0xf0]  ;;  %v18031_v42 = vld [vmem:[#allocation11 + $0x274] sm:$0xf0] }
 0x4da   :  { %10385 = vmatpush.bf16.msra.mxu3 %v16453_v49  ;;  %v18221_v49 = vld [vmem:[#allocation11 + $0x864] sm:$0xf0]  ;;  %v10133_v13 = vpop.f32.mrf.mxu3  ;;  %v10122_v60 = vpop.f32.mrf.mxu1 }
 0x4db   :  { %10463 = vmatpush.bf16.msra.mxu2 %v15177_v23  ;;  %v16013_v23 = vor.u32 %v18465_v30, %v16010_v24  ;;  %v15017_v38 = vor.u32 %v18221_v49, %v15016_v6  ;;  %v14936_v30 = vld [vmem:[#allocation11 + $0x7a0] sm:$0xf]  ;;  %v18201_v24 = vld [vmem:[#allocation11 + $0x7c4] sm:$0xf0]  ;;  %v18515_v6 = vld [vmem:[#allocation11 + $0x119c] sm:$0xf] }
 0x4dc   :  { %v16210_v49 = vld [vmem:[#allocation11 + $0x11c0] sm:$0xf0] }
 0x4dd   :  { %10451 = vmatpush.bf16.msra.mxu0 %v14817_v14  ;;  %10373 = vmatpush.bf16.msra.mxu1 %v16093_v3  ;;  %v16290_v14 = vld [vmem:[#allocation11 + $0x1260] sm:$0xf0]  ;;  %v14697_v3 = vor.u32 %v18141_v18, %v14696_v62  ;;  %v16213_v60 = vor.u32 %v18515_v6, %v16210_v49  ;;  %v14136_v49 = vld [vmem:[#allocation11 + $0x160] sm:$0xf] }
 0x4de   :  { %10386 = vmatpush.bf16.msra.mxu3 %v16413_v63  ;;  %v14656_v63 = vld [vmem:[#allocation11 + $0x570] sm:$0xf]  ;;  %v16293_v55 = vor.u32 %v18535_v25, %v16290_v14  ;;  %v15890_v18 = vld [vmem:[#allocation11 + $0xf40] sm:$0xf0]  ;;  %v18111_v14 = vld [vmem:[#allocation11 + $0x4f4] sm:$0xf0] }
 0x4df   :  { %10464 = vmatpush.bf16.msra.mxu2 %v15137_v1  ;;  %v10134_v1 = vadd.f32 %v10133_v13, %v10121_v11  ;;  %v14657_v0 = vor.u32 %v18131_v59, %v14656_v63  ;;  %v14937_v13 = vor.u32 %v18201_v24, %v14936_v30  ;;  %v14576_v25 = vld [vmem:[#allocation11 + $0x4d0] sm:$0xf]  ;;  %v18501_v63 = vld [vmem:[#allocation11 + $0x1124] sm:$0xf0]  ;;  %v16456_v59 = vld [vmem:[#allocation11 + $0x1380] sm:$0xf] }
 0x4e0   :  { %v18571_v30 = vld [vmem:[#allocation11 + $0x1354] sm:$0xf0]  ;;  %v14176_v24 = vld [vmem:[#allocation11 + $0x1b0] sm:$0xf] }
 0x4e1   :  { %10452 = vmatpush.bf16.msra.mxu0 %v14777_v12  ;;  %10374 = vmatpush.bf16.msra.mxu1 %v16053_v26  ;;  %v10147_v7 = vadd.f32 %v20093_v40, %v10134_v1  ;;  %v18445_v12 = vld [vmem:[#allocation11 + $0xf6c] sm:$0xf]  ;;  %v16250_v26 = vld [vmem:[#allocation11 + $0x1210] sm:$0xf0]  ;;  %v16176_v40 = vld [vmem:[#allocation11 + $0x1150] sm:$0xf]  ;;  %v10213_v15 = vpop.f32.mrf.mxu2 }
 0x4e2   :  { %10387 = vmatpush.bf16.msra.mxu3 %v16373_v31  ;;  %v14977_v31 = vor.u32 %v18211_v39, %v14976_v47  ;;  %v15933_v35 = vor.u32 %v18445_v12, %v15930_v44  ;;  %v10135_v62 = vpop.f32.mrf.mxu3  ;;  %v14577_v47 = vor.u32 %v18111_v14, %v14576_v25  ;;  %v18021_v39 = vld [vmem:[#allocation11 + $0x224] sm:$0xf0]  ;;  %v14536_v12 = vld [vmem:[#allocation11 + $0x480] sm:$0xf]  ;;  %v14496_v15 = vld [vmem:[#allocation11 + $0x430] sm:$0xf] }
 0x4e3   :  { %10465 = vmatpush.bf16.msra.mxu2 %v15097_v36  ;;  %v18525_v36 = vld [vmem:[#allocation11 + $0x11ec] sm:$0xf]  ;;  %v20113_v11 = vadd.f32 %v20096_v33, %v10147_v7  ;;  %v18435_v33 = vld [vmem:[#allocation11 + $0xf1c] sm:$0xf]  ;;  %v18581_v7 = vld [vmem:[#allocation11 + $0x13a4] sm:$0xf0] }
 0x4e4   :  { %v16253_v19 = vor.u32 %v18525_v36, %v16250_v26  ;;  %v18101_v44 = vld [vmem:[#allocation11 + $0x4a4] sm:$0xf0]  ;;  %v16457_v26 = vor.u32 %v18581_v7, %v16456_v59  ;;  %v16056_v62 = vld [vmem:[#allocation11 + $0x1060] sm:$0xf]  ;;  %v18551_v59 = vld [vmem:[#allocation11 + $0x12b4] sm:$0xf0] }
 0x4e5   :  { %10453 = vmatpush.bf16.msra.mxu0 %v14737_v34  ;;  %10375 = vmatpush.bf16.msra.mxu1 %v16013_v23  ;;  %20410 = vst [vmem:[#allocation28_spill] sm:$0xff] %v20113_v11  ;;  %v18511_v34 = vld [vmem:[#allocation11 + $0x1174] sm:$0xf0] }
 0x4e6   :  { %10388 = vmatpush.bf16.msra.mxu3 %v16333_v27  ;;  %v18591_v23 = vld [vmem:[#allocation11 + $0x13f4] sm:$0xf0]  ;;  %v14617_v27 = vor.u32 %v18121_v52, %v14616_v20  ;;  %v16177_v2 = vor.u32 %v18511_v34, %v16176_v40  ;;  %v16096_v20 = vld [vmem:[#allocation11 + $0x10b0] sm:$0xf] }
 0x4e7   :  { %10466 = vmatpush.bf16.msra.mxu2 %v15057_v32  ;;  %v16496_v32 = vld [vmem:[#allocation11 + $0x13d0] sm:$0xf]  ;;  %v18491_v52 = vld [vmem:[#allocation11 + $0x10d4] sm:$0xf0] }
 0x4e8   :  { %v16497_v1 = vor.u32 %v18591_v23, %v16496_v32  ;;  %v18011_v40 = vld [vmem:[#allocation11 + $0x1d4] sm:$0xf0]  ;;  %v16097_v34 = vor.u32 %v18491_v52, %v16096_v20  ;;  %v16296_v20 = vld [vmem:[#allocation11 + $0x1240] sm:$0xf] }
 0x4e9   :  { %10454 = vmatpush.bf16.msra.mxu0 %v14697_v3  ;;  %10376 = vmatpush.bf16.msra.mxu1 %v15973_v22  ;;  %v15893_v3 = vor.u32 %v18435_v33, %v15890_v18  ;;  %v16136_v22 = vld [vmem:[#allocation11 + $0x1100] sm:$0xf]  ;;  %v14177_v23 = vor.u32 %v18011_v40, %v14176_v24  ;;  %v18481_v33 = vld [vmem:[#allocation11 + $0x1084] sm:$0xf0]  ;;  %v17991_v7 = vld [vmem:[#allocation11 + $0x134] sm:$0xf0] }
 0x4ea   :  { %10389 = vmatpush.bf16.msra.mxu3 %v16293_v55  ;;  %v14216_v55 = vld [vmem:[#allocation11 + $0x200] sm:$0xf]  ;;  %v16137_v36 = vor.u32 %v18501_v63, %v16136_v22  ;;  %v16057_v25 = vor.u32 %v18481_v33, %v16056_v62  ;;  %v16336_v22 = vld [vmem:[#allocation11 + $0x1290] sm:$0xf]  ;;  %v17981_v24 = vld [vmem:[#allocation11 + $0xe4] sm:$0xf0] }
 0x4eb   :  { %10467 = vmatpush.bf16.msra.mxu2 %v15017_v38  ;;  %v14257_v38 = vor.u32 %v18031_v42, %v14256_v43  ;;  %v16376_v18 = vld [vmem:[#allocation11 + $0x12e0] sm:$0xf]  ;;  %v18001_v43 = vld [vmem:[#allocation11 + $0x184] sm:$0xf0] }
 0x4ed   :  { %10455 = vmatpush.bf16.msra.mxu0 %v14657_v0  ;;  %10377 = vmatpush.bf16.msra.mxu1 %v15933_v35  ;;  %v14217_v0 = vor.u32 %v18021_v39, %v14216_v55  ;;  %v14537_v35 = vor.u32 %v18101_v44, %v14536_v12  ;;  %v14416_v55 = vld [vmem:[#allocation11 + $0x390] sm:$0xf]  ;;  %v18071_v39 = vld [vmem:[#allocation11 + $0x3b4] sm:$0xf0]  ;;  %v16337_v44 = vor.u32 %v18551_v59, %v16336_v22  ;;  %v18441_v22 = vld [vmem:[#allocation11 + $0xf44] sm:$0xf0] }
 0x4ee   :  { %10390 = vmatpush.bf16.msra.mxu3 %v16253_v19  ;;  %v18091_v19 = vld [vmem:[#allocation11 + $0x454] sm:$0xf0] }
 0x4ef   :  { %10468 = vmatpush.bf16.msra.mxu2 %v14977_v31  ;;  %v16416_v31 = vld [vmem:[#allocation11 + $0x1330] sm:$0xf]  ;;  %v14497_v6 = vor.u32 %v18091_v19, %v14496_v15  ;;  %v14376_v19 = vld [vmem:[#allocation11 + $0x340] sm:$0xf] }
 0x4f0   :  { %v16417_v32 = vor.u32 %v18571_v30, %v16416_v31  ;;  %v14417_v31 = vor.u32 %v18071_v39, %v14416_v55  ;;  %v14056_v30 = vld [vmem:[#allocation11 + $0xc0] sm:$0xf]  ;;  %v18521_v55 = vld [vmem:[#allocation11 + $0x11c4] sm:$0xf0] }
 0x4f1   :  { %10456 = vmatpush.bf16.msra.mxu0 %v14617_v27  ;;  %10378 = vmatpush.bf16.msra.mxu1 %v15893_v3  ;;  %v18561_v27 = vld [vmem:[#allocation11 + $0x1304] sm:$0xf0]  ;;  %v20119_v42 = vpop.f32.mrf.mxu0  ;;  %v10172_v14 = vpop.f32.mrf.mxu1  ;;  %v14137_v3 = vor.u32 %v18001_v43, %v14136_v49  ;;  %v16256_v49 = vld [vmem:[#allocation11 + $0x11f0] sm:$0xf] }
 0x4f2   :  { %10391 = vmatpush.bf16.msra.mxu3 %v16213_v60  ;;  %v16016_v60 = vld [vmem:[#allocation11 + $0x1010] sm:$0xf] }
 0x4f3   :  { %10469 = vmatpush.bf16.msra.mxu2 %v14937_v13  ;;  %v14456_v13 = vld [vmem:[#allocation11 + $0x3e0] sm:$0xf] }
 0x4f4   :  { %10457 = vmatmul.bf16.vlgmr.msra.gmra.mxu0 %v19729_v28  ;;  %10379 = vmatmul.bf16.vlgmr.msra.gmra.mxu1 %v19755_v56 }
 0x4f5   :  { %10501 = vmatpush.bf16.msrb.mxu0 %v16177_v2  ;;  %10423 = vmatpush.bf16.msrb.mxu1 %v14257_v38  ;;  %v18081_v2 = vld [vmem:[#allocation11 + $0x404] sm:$0xf0]  ;;  %v18471_v38 = vld [vmem:[#allocation11 + $0x1034] sm:$0xf0] }
 0x4f6   :  { %10436 = vmatpush.bf16.msrb.mxu3 %v14577_v47  ;;  %10470 = vmatmul.bf16.vlgmr.msra.gmra.mxu2 %v19731_v45  ;;  %v14457_v63 = vor.u32 %v18081_v2, %v14456_v13  ;;  %v14096_v47 = vld [vmem:[#allocation11 + $0x110] sm:$0xf]  ;;  %v16017_v12 = vor.u32 %v18471_v38, %v16016_v60  ;;  %v18531_v2 = vld [vmem:[#allocation11 + $0x1214] sm:$0xf0]  ;;  %v15896_v38 = vld [vmem:[#allocation11 + $0xf20] sm:$0xf] }
 0x4f7   :  { %10514 = vmatpush.bf16.msrb.mxu2 %v16497_v1  ;;  %10392 = vmatmul.bf16.vlgmr.msra.gmra.mxu3 %v19765_v46  ;;  %v16377_v1 = vor.u32 %v18561_v27, %v16376_v18  ;;  %v14057_v18 = vor.u32 %v17981_v24, %v14056_v30  ;;  %v18451_v27 = vld [vmem:[#allocation11 + $0xf94] sm:$0xf0]  ;;  %v16257_v59 = vor.u32 %v18531_v2, %v16256_v49  ;;  %v18041_v30 = vld [vmem:[#allocation11 + $0x2c4] sm:$0xf0]  ;;  %v15536_v24 = vld [vmem:[#allocation11 + $0xc50] sm:$0xf] }
 0x4f8   :  { %v18051_v60 = vld [vmem:[#allocation11 + $0x314] sm:$0xf0]  ;;  %v18096_v49 = vld [vmem:[#allocation11 + $0x484] sm:$0xf]  ;;  %v15496_v2 = vld [vmem:[#allocation11 + $0xc00] sm:$0xf] }
 0x4f9   :  { %10502 = vmatpush.bf16.msrb.mxu0 %v16137_v36  ;;  %10424 = vmatpush.bf16.msrb.mxu1 %v14217_v0  ;;  %v14097_v36 = vor.u32 %v17991_v7, %v14096_v47  ;;  %v18461_v0 = vld [vmem:[#allocation11 + $0xfe4] sm:$0xf0]  ;;  %v20121_v52 = vpop.f32.mrf.mxu2  ;;  %v10252_v15 = vpop.f32.mrf.mxu0  ;;  %v16216_v7 = vld [vmem:[#allocation11 + $0x11a0] sm:$0xf] }
 0x4fa   :  { %10437 = vmatpush.bf16.msrb.mxu3 %v14537_v35  ;;  %v18541_v35 = vld [vmem:[#allocation11 + $0x1264] sm:$0xf0]  ;;  %v10185_v40 = vpop.f32.mrf.mxu3  ;;  %v10174_v62 = vpop.f32.mrf.mxu1  ;;  %v16217_v15 = vor.u32 %v18521_v55, %v16216_v7  ;;  %v14498_v55 = vld [vmem:[#allocation11 + $0x458] sm:$0xf0] }
 0x4fb   :  { %10515 = vmatpush.bf16.msrb.mxu2 %v16457_v26  ;;  %v15976_v26 = vld [vmem:[#allocation11 + $0xfc0] sm:$0xf]  ;;  %v16297_v33 = vor.u32 %v18541_v35, %v16296_v20 }
 0x4fc   :  { %v13976_v20 = vld [vmem:[#allocation11 + $0x20] sm:$0xf] }
 0x4fd   :  { %10503 = vmatpush.bf16.msrb.mxu0 %v16097_v34  ;;  %10425 = vmatpush.bf16.msrb.mxu1 %v14177_v23  ;;  %v18061_v34 = vld [vmem:[#allocation11 + $0x364] sm:$0xf0]  ;;  %v15977_v23 = vor.u32 %v18461_v0, %v15976_v26  ;;  %v14578_v26 = vld [vmem:[#allocation11 + $0x4f8] sm:$0xf0]  ;;  %v14296_v35 = vld [vmem:[#allocation11 + $0x2a0] sm:$0xf] }
 0x4fe   :  { %10438 = vmatpush.bf16.msrb.mxu3 %v14497_v6  ;;  %v15936_v6 = vld [vmem:[#allocation11 + $0xf70] sm:$0xf]  ;;  %v14377_v13 = vor.u32 %v18061_v34, %v14376_v19 }
 0x4ff   :  { %10516 = vmatpush.bf16.msrb.mxu2 %v16417_v32  ;;  %v10186_v32 = vadd.f32 %v10185_v40, %v10172_v14  ;;  %v15937_v14 = vor.u32 %v18451_v27, %v15936_v6  ;;  %v18351_v40 = vld [vmem:[#allocation11 + $0xc74] sm:$0xf0]  ;;  %v15856_v34 = vld [vmem:[#allocation11 + $0xed0] sm:$0xf]  ;;  %v18016_v6 = vld [vmem:[#allocation11 + $0x204] sm:$0xf] }
 0x500   :  { %v14218_v27 = vld [vmem:[#allocation11 + $0x228] sm:$0xf0] }
 0x501   :  { %10504 = vmatpush.bf16.msrb.mxu0 %v16057_v25  ;;  %10426 = vmatpush.bf16.msrb.mxu1 %v14137_v3  ;;  %v10199_v43 = vadd.f32 %v20106_v57, %v10186_v32  ;;  %v14016_v25 = vld [vmem:[#allocation11 + $0x70] sm:$0xf]  ;;  %v18026_v57 = vld [vmem:[#allocation11 + $0x254] sm:$0xf]  ;;  %v10265_v39 = vpop.f32.mrf.mxu2  ;;  %v18431_v32 = vld [vmem:[#allocation11 + $0xef4] sm:$0xf0] }
 0x502   :  { %10439 = vmatpush.bf16.msrb.mxu3 %v14457_v63  ;;  %v14336_v3 = vld [vmem:[#allocation11 + $0x2f0] sm:$0xf]  ;;  %v10187_v0 = vpop.f32.mrf.mxu3  ;;  %v18331_v39 = vld [vmem:[#allocation11 + $0xbd4] sm:$0xf0] }
 0x503   :  { %10517 = vmatpush.bf16.msrb.mxu2 %v16377_v1  ;;  %v17971_v1 = vld [vmem:[#allocation11 + $0x94] sm:$0xf0]  ;;  %v20125_v63 = vadd.f32 %v20109_v51, %v10199_v43  ;;  %v15897_v51 = vor.u32 %v18441_v22, %v15896_v38  ;;  %v15857_v43 = vor.u32 %v18431_v32, %v15856_v34  ;;  %v18006_v22 = vld [vmem:[#allocation11 + $0x1b4] sm:$0xf]  ;;  %v18401_v34 = vld [vmem:[#allocation11 + $0xe04] sm:$0xf0] }
 0x504   :  { %v14017_v47 = vor.u32 %v17971_v1, %v14016_v25  ;;  %v18341_v25 = vld [vmem:[#allocation11 + $0xc24] sm:$0xf0]  ;;  %v15816_v1 = vld [vmem:[#allocation11 + $0xe80] sm:$0xf] }
 0x505   :  { %10505 = vmatpush.bf16.msrb.mxu0 %v16017_v12  ;;  %10427 = vmatpush.bf16.msrb.mxu1 %v14097_v36  ;;  %v14337_v12 = vor.u32 %v18051_v60, %v14336_v3  ;;  %v18106_v36 = vld [vmem:[#allocation11 + $0x4d4] sm:$0xf]  ;;  %v18421_v3 = vld [vmem:[#allocation11 + $0xea4] sm:$0xf0]  ;;  %v14221_v60 = vor.u32 %v18016_v6, %v14218_v27  ;;  %v15497_v38 = vor.u32 %v18341_v25, %v15496_v2  ;;  %v14098_v27 = vld [vmem:[#allocation11 + $0x138] sm:$0xf0] }
 0x506   :  { %10440 = vmatpush.bf16.msrb.mxu3 %v14417_v31  ;;  %v17961_v31 = vld [vmem:[#allocation11 + $0x44] sm:$0xf0]  ;;  %v15817_v7 = vor.u32 %v18421_v3, %v15816_v1  ;;  %v17986_v6 = vld [vmem:[#allocation11 + $0x114] sm:$0xf]  ;;  %v15376_v2 = vld [vmem:[#allocation11 + $0xb10] sm:$0xf] }
 0x507   :  { %10518 = vmatpush.bf16.msrb.mxu2 %v16337_v44  ;;  %v14258_v44 = vld [vmem:[#allocation11 + $0x278] sm:$0xf0]  ;;  %v13977_v62 = vor.u32 %v17961_v31, %v13976_v20  ;;  %v17996_v20 = vld [vmem:[#allocation11 + $0x164] sm:$0xf]  ;;  %v14138_v31 = vld [vmem:[#allocation11 + $0x188] sm:$0xf0] }
 0x508   :  { %v14261_v19 = vor.u32 %v18026_v57, %v14258_v44  ;;  %v15456_v57 = vld [vmem:[#allocation11 + $0xbb0] sm:$0xf]  ;;  %v18411_v44 = vld [vmem:[#allocation11 + $0xe54] sm:$0xf0]  ;;  %v14141_v32 = vor.u32 %v17996_v20, %v14138_v31 }
 0x509   :  { %10506 = vmatpush.bf16.msrb.mxu0 %v15977_v23  ;;  %10428 = vmatpush.bf16.msrb.mxu1 %v14057_v18  ;;  %v14581_v23 = vor.u32 %v18106_v36, %v14578_v26  ;;  %v15537_v18 = vor.u32 %v18351_v40, %v15536_v24  ;;  %v15457_v0 = vor.u32 %v18331_v39, %v15456_v57  ;;  %v15416_v24 = vld [vmem:[#allocation11 + $0xb60] sm:$0xf]  ;;  %v18321_v40 = vld [vmem:[#allocation11 + $0xb84] sm:$0xf0]  ;;  %v18311_v25 = vld [vmem:[#allocation11 + $0xb34] sm:$0xf0] }
 0x50a   :  { %10441 = vmatpush.bf16.msrb.mxu3 %v14377_v13  ;;  %v14538_v13 = vld [vmem:[#allocation11 + $0x4a8] sm:$0xf0]  ;;  %v15696_v1 = vld [vmem:[#allocation11 + $0xd90] sm:$0xf]  ;;  %v18391_v3 = vld [vmem:[#allocation11 + $0xdb4] sm:$0xf0] }
 0x50b   :  { %10519 = vmatpush.bf16.msrb.mxu2 %v16297_v33  ;;  %v14297_v33 = vor.u32 %v18041_v30, %v14296_v35  ;;  %v18076_v35 = vld [vmem:[#allocation11 + $0x3e4] sm:$0xf]  ;;  %v14458_v30 = vld [vmem:[#allocation11 + $0x408] sm:$0xf0]  ;;  %v15336_v57 = vld [vmem:[#allocation11 + $0xac0] sm:$0xf] }
 0x50c   :  { %v18301_v39 = vld [vmem:[#allocation11 + $0xae4] sm:$0xf0] }
 0x50d   :  { %10507 = vmatpush.bf16.msrb.mxu0 %v15937_v14  ;;  %10429 = vmatpush.bf16.msrb.mxu1 %v14017_v47  ;;  %v14541_v14 = vor.u32 %v18096_v49, %v14538_v13  ;;  %v18086_v47 = vld [vmem:[#allocation11 + $0x434] sm:$0xf]  ;;  %v14418_v13 = vld [vmem:[#allocation11 + $0x3b8] sm:$0xf0] }
 0x50e   :  { %10442 = vmatpush.bf16.msrb.mxu3 %v14337_v12  ;;  %v15776_v12 = vld [vmem:[#allocation11 + $0xe30] sm:$0xf]  ;;  %v14501_v26 = vor.u32 %v18086_v47, %v14498_v55  ;;  %v18066_v49 = vld [vmem:[#allocation11 + $0x394] sm:$0xf]  ;;  %v14378_v55 = vld [vmem:[#allocation11 + $0x368] sm:$0xf0] }
 0x50f   :  { %10520 = vmatpush.bf16.msrb.mxu2 %v16257_v59  ;;  %v14178_v59 = vld [vmem:[#allocation11 + $0x1d8] sm:$0xf0] }
 0x510   :  { %v14181_v36 = vor.u32 %v18006_v22, %v14178_v59  ;;  %v17976_v22 = vld [vmem:[#allocation11 + $0xc4] sm:$0xf]  ;;  %v14058_v59 = vld [vmem:[#allocation11 + $0xe8] sm:$0xf0] }
 0x511   :  { %10508 = vmatpush.bf16.msrb.mxu0 %v15897_v51  ;;  %10430 = vmatpush.bf16.msrb.mxu1 %v13977_v62  ;;  %v15777_v51 = vor.u32 %v18411_v44, %v15776_v12  ;;  %v14461_v62 = vor.u32 %v18076_v35, %v14458_v30  ;;  %v14061_v31 = vor.u32 %v17976_v22, %v14058_v59  ;;  %v15858_v22 = vld [vmem:[#allocation11 + $0xef8] sm:$0xf0] }
 0x512   :  { %10443 = vmatpush.bf16.msrb.mxu3 %v14297_v33  ;;  %v15337_v30 = vor.u32 %v18301_v39, %v15336_v57  ;;  %v16816_v57 = vld [vmem:[#allocation11 + $0x1650] sm:$0xf]  ;;  %v18671_v39 = vld [vmem:[#allocation11 + $0x1674] sm:$0xf0] }
 0x513   :  { %10521 = vmatpush.bf16.msrb.mxu2 %v16217_v15  ;;  %v10302_v15 = vpop.f32.mrf.mxu0 }
 0x514   :  { %10509 = vmatmul.bf16.vlgmr.msrb.gmra.mxu0 %v19755_v56  ;;  %10431 = vmatmul.bf16.vlgmr.msrb.gmra.mxu1 %v19725_v8 }
 0x515   :  { %10553 = vmatpush.bf16.msra.mxu0 %v14261_v19  ;;  %10475 = vmatpush.bf16.msra.mxu1 %v15537_v18  ;;  %v15736_v19 = vld [vmem:[#allocation11 + $0xde0] sm:$0xf]  ;;  %v15417_v18 = vor.u32 %v18321_v40, %v15416_v24  ;;  %v17966_v24 = vld [vmem:[#allocation11 + $0x74] sm:$0xf]  ;;  %v14018_v40 = vld [vmem:[#allocation11 + $0x98] sm:$0xf0] }
 0x516   :  { %10488 = vmatpush.bf16.msra.mxu3 %v15857_v43  ;;  %10522 = vmatmul.bf16.vlgmr.msrb.gmra.mxu2 %v19765_v46  ;;  %v15737_v43 = vor.u32 %v18401_v34, %v15736_v19  ;;  %v18046_v19 = vld [vmem:[#allocation11 + $0x2f4] sm:$0xf] }
 0x517   :  { %10566 = vmatpush.bf16.msra.mxu2 %v14581_v23  ;;  %10444 = vmatmul.bf16.vlgmr.msrb.gmra.mxu3 %v19727_v37  ;;  %v10224_v23 = vpop.f32.mrf.mxu1 }
 0x518   :  { %v10225_v33 = vadd.f32 %v10224_v23, %v20125_v63  ;;  %v18056_v63 = vld [vmem:[#allocation11 + $0x344] sm:$0xf]  ;;  %v15296_v23 = vld [vmem:[#allocation11 + $0xa70] sm:$0xf] }
 0x519   :  { %10554 = vmatpush.bf16.msra.mxu0 %v14221_v60  ;;  %10476 = vmatpush.bf16.msra.mxu1 %v15497_v38  ;;  %v14101_v60 = vor.u32 %v17986_v6, %v14098_v27  ;;  %v15377_v38 = vor.u32 %v18311_v25, %v15376_v2  ;;  %v10315_v47 = vpop.f32.mrf.mxu2  ;;  %v18371_v6 = vld [vmem:[#allocation11 + $0xd14] sm:$0xf0]  ;;  %v17956_v27 = vld [vmem:[#allocation11 + $0x24] sm:$0xf] }
 0x51a   :  { %10489 = vmatpush.bf16.msra.mxu3 %v15817_v7  ;;  %v15697_v7 = vor.u32 %v18391_v3, %v15696_v1  ;;  %v20132_v12 = vadd.f32 %v10315_v47, %v10302_v15  ;;  %v10237_v44 = vpop.f32.mrf.mxu3  ;;  %v18036_v25 = vld [vmem:[#allocation11 + $0x2a4] sm:$0xf]  ;;  %v14298_v1 = vld [vmem:[#allocation11 + $0x2c8] sm:$0xf0]  ;;  %v18281_v47 = vld [vmem:[#allocation11 + $0xa44] sm:$0xf0] }
 0x51b   :  { %10567 = vmatpush.bf16.msra.mxu2 %v14541_v14  ;;  %v14421_v14 = vor.u32 %v18066_v49, %v14418_v13  ;;  %v10238_v20 = vadd.f32 %v10237_v44, %v10225_v33  ;;  %v14021_v33 = vor.u32 %v17966_v24, %v14018_v40  ;;  %v13978_v49 = vld [vmem:[#allocation11 + $0x48] sm:$0xf0]  ;;  %v14301_v44 = vor.u32 %v18036_v25, %v14298_v1  ;;  %v18416_v40 = vld [vmem:[#allocation11 + $0xe84] sm:$0xf]  ;;  %v15778_v25 = vld [vmem:[#allocation11 + $0xe58] sm:$0xf0] }
 0x51c   :  { %v15498_v24 = vld [vmem:[#allocation11 + $0xc28] sm:$0xf0]  ;;  %v16736_v1 = vld [vmem:[#allocation11 + $0x15b0] sm:$0xf] }
 0x51d   :  { %10555 = vmatpush.bf16.msra.mxu0 %v14181_v36  ;;  %10477 = vmatpush.bf16.msra.mxu1 %v15457_v0  ;;  %v10304_v36 = vpop.f32.mrf.mxu0  ;;  %v18381_v0 = vld [vmem:[#allocation11 + $0xd64] sm:$0xf0]  ;;  %v10251_v34 = vadd.f32 %v20119_v42, %v10238_v20  ;;  %v18346_v42 = vld [vmem:[#allocation11 + $0xc54] sm:$0xf] }
 0x51e   :  { %10490 = vmatpush.bf16.msra.mxu3 %v15777_v51  ;;  %v14381_v51 = vor.u32 %v18056_v63, %v14378_v55  ;;  %v15256_v63 = vld [vmem:[#allocation11 + $0xa20] sm:$0xf]  ;;  %v18361_v55 = vld [vmem:[#allocation11 + $0xcc4] sm:$0xf0] }
 0x51f   :  { %10568 = vmatpush.bf16.msra.mxu2 %v14501_v26  ;;  %v15656_v26 = vld [vmem:[#allocation11 + $0xd40] sm:$0xf]  ;;  %v10226_v35 = vpop.f32.mrf.mxu1 }
 0x520   :  { %v15657_v15 = vor.u32 %v18381_v0, %v15656_v26  ;;  %v17136_v26 = vld [vmem:[#allocation11 + $0x18d0] sm:$0xf]  ;;  %v18751_v0 = vld [vmem:[#allocation11 + $0x18f4] sm:$0xf0] }
 0x521   :  { %10556 = vmatpush.bf16.msra.mxu0 %v14141_v32  ;;  %10478 = vmatpush.bf16.msra.mxu1 %v15417_v18  ;;  %v14338_v32 = vld [vmem:[#allocation11 + $0x318] sm:$0xf0]  ;;  %v15616_v18 = vld [vmem:[#allocation11 + $0xcf0] sm:$0xf]  ;;  %v10317_v3 = vpop.f32.mrf.mxu2 }
 0x522   :  { %10491 = vmatpush.bf16.msra.mxu3 %v15737_v43  ;;  %v20136_v43 = vadd.f32 %v20121_v52, %v10251_v34  ;;  %v14341_v13 = vor.u32 %v18046_v19, %v14338_v32  ;;  %v10239_v59 = vpop.f32.mrf.mxu3  ;;  %v13981_v52 = vor.u32 %v17956_v27, %v13978_v49  ;;  %v17137_v19 = vor.u32 %v18751_v0, %v17136_v26  ;;  %v15818_v34 = vld [vmem:[#allocation11 + $0xea8] sm:$0xf0]  ;;  %v18661_v32 = vld [vmem:[#allocation11 + $0x1624] sm:$0xf0]  ;;  %v18326_v27 = vld [vmem:[#allocation11 + $0xbb4] sm:$0xf] }
 0x523   :  { %10569 = vmatpush.bf16.msra.mxu2 %v14461_v62  ;;  %v18291_v62 = vld [vmem:[#allocation11 + $0xa94] sm:$0xf0]  ;;  %v15458_v49 = vld [vmem:[#allocation11 + $0xbd8] sm:$0xf0]  ;;  %v17056_v3 = vld [vmem:[#allocation11 + $0x1830] sm:$0xf] }
 0x524   :  { %v15297_v2 = vor.u32 %v18291_v62, %v15296_v23  ;;  %v17096_v23 = vld [vmem:[#allocation11 + $0x1880] sm:$0xf]  ;;  %v18741_v62 = vld [vmem:[#allocation11 + $0x18a4] sm:$0xf0]  ;;  %v18316_v59 = vld [vmem:[#allocation11 + $0xb64] sm:$0xf] }
 0x525   :  { %10557 = vmatpush.bf16.msra.mxu0 %v14101_v60  ;;  %10479 = vmatpush.bf16.msra.mxu1 %v15377_v38  ;;  %v15617_v60 = vor.u32 %v18371_v6, %v15616_v18  ;;  %v18426_v38 = vld [vmem:[#allocation11 + $0xed4] sm:$0xf]  ;;  %v15821_v6 = vor.u32 %v18416_v40, %v15818_v34  ;;  %v16656_v40 = vld [vmem:[#allocation11 + $0x1510] sm:$0xf] }
 0x526   :  { %10492 = vmatpush.bf16.msra.mxu3 %v15697_v7  ;;  %v15576_v7 = vld [vmem:[#allocation11 + $0xca0] sm:$0xf]  ;;  %v15861_v20 = vor.u32 %v18426_v38, %v15858_v22  ;;  %v16976_v34 = vld [vmem:[#allocation11 + $0x1790] sm:$0xf] }
 0x527   :  { %10570 = vmatpush.bf16.msra.mxu2 %v14421_v14  ;;  %v15538_v14 = vld [vmem:[#allocation11 + $0xc78] sm:$0xf0]  ;;  %v15577_v35 = vor.u32 %v18361_v55, %v15576_v7  ;;  %v15738_v7 = vld [vmem:[#allocation11 + $0xe08] sm:$0xf0] }
 0x528   :  { %v15541_v36 = vor.u32 %v18346_v42, %v15538_v14  ;;  %v18651_v42 = vld [vmem:[#allocation11 + $0x15d4] sm:$0xf0]  ;;  %v15461_v14 = vor.u32 %v18326_v27, %v15458_v49  ;;  %v15658_v49 = vld [vmem:[#allocation11 + $0xd68] sm:$0xf0] }
 0x529   :  { %10558 = vmatpush.bf16.msra.mxu0 %v14061_v31  ;;  %10480 = vmatpush.bf16.msra.mxu1 %v15337_v30  ;;  %v15257_v31 = vor.u32 %v18281_v47, %v15256_v63  ;;  %v18336_v30 = vld [vmem:[#allocation11 + $0xc04] sm:$0xf]  ;;  %v16737_v22 = vor.u32 %v18651_v42, %v16736_v1  ;;  %v16936_v42 = vld [vmem:[#allocation11 + $0x1740] sm:$0xf] }
 0x52a   :  { %10493 = vmatpush.bf16.msra.mxu3 %v15657_v15  ;;  %v16776_v15 = vld [vmem:[#allocation11 + $0x1600] sm:$0xf]  ;;  %v15501_v18 = vor.u32 %v18336_v30, %v15498_v24  ;;  %v18396_v63 = vld [vmem:[#allocation11 + $0xde4] sm:$0xf]  ;;  %v15698_v24 = vld [vmem:[#allocation11 + $0xdb8] sm:$0xf0] }
 0x52b   :  { %10571 = vmatpush.bf16.msra.mxu2 %v14381_v51  ;;  %v16817_v51 = vor.u32 %v18671_v39, %v16816_v57  ;;  %v17016_v57 = vld [vmem:[#allocation11 + $0x17e0] sm:$0xf]  ;;  %v18721_v39 = vld [vmem:[#allocation11 + $0x1804] sm:$0xf0]  ;;  %v15741_v26 = vor.u32 %v18396_v63, %v15738_v7  ;;  %v15298_v63 = vld [vmem:[#allocation11 + $0xa98] sm:$0xf0] }
 0x52c   :  { %v17017_v30 = vor.u32 %v18721_v39, %v17016_v57  ;;  %v18611_v57 = vld [vmem:[#allocation11 + $0x1494] sm:$0xf0]  ;;  %v16896_v39 = vld [vmem:[#allocation11 + $0x16f0] sm:$0xf] }
 0x52d   :  { %10559 = vmatpush.bf16.msra.mxu0 %v14021_v33  ;;  %10481 = vmatpush.bf16.msra.mxu1 %v15297_v2  ;;  %v16777_v33 = vor.u32 %v18661_v32, %v16776_v15  ;;  %v17097_v2 = vor.u32 %v18741_v62, %v17096_v23  ;;  %v18711_v15 = vld [vmem:[#allocation11 + $0x17b4] sm:$0xf0] }
 0x52e   :  { %10494 = vmatpush.bf16.msra.mxu3 %v15617_v60  ;;  %v18731_v60 = vld [vmem:[#allocation11 + $0x1854] sm:$0xf0]  ;;  %v16977_v27 = vor.u32 %v18711_v15, %v16976_v34  ;;  %v18746_v34 = vld [vmem:[#allocation11 + $0x18d4] sm:$0xf]  ;;  %v17138_v15 = vld [vmem:[#allocation11 + $0x18f8] sm:$0xf0] }
 0x52f   :  { %10572 = vmatpush.bf16.msra.mxu2 %v14341_v13  ;;  %v18406_v13 = vld [vmem:[#allocation11 + $0xe34] sm:$0xf]  ;;  %v17057_v47 = vor.u32 %v18731_v60, %v17056_v3  ;;  %v18701_v3 = vld [vmem:[#allocation11 + $0x1764] sm:$0xf0] }
 0x530   :  { %v15781_v38 = vor.u32 %v18406_v13, %v15778_v25  ;;  %v16616_v13 = vld [vmem:[#allocation11 + $0x14c0] sm:$0xf]  ;;  %v16937_v7 = vor.u32 %v18701_v3, %v16936_v42  ;;  %v17141_v42 = vor.u32 %v18746_v34, %v17138_v15 }
 0x531   :  { %10560 = vmatpush.bf16.msra.mxu0 %v13981_v52  ;;  %10482 = vmatpush.bf16.msra.mxu1 %v15257_v31  ;;  %v16696_v52 = vld [vmem:[#allocation11 + $0x1560] sm:$0xf]  ;;  %v20142_v55 = vpop.f32.mrf.mxu0  ;;  %v18306_v31 = vld [vmem:[#allocation11 + $0xb14] sm:$0xf] }
 0x532   :  { %10495 = vmatpush.bf16.msra.mxu3 %v15577_v35  ;;  %v15378_v35 = vld [vmem:[#allocation11 + $0xb38] sm:$0xf0] }
 0x533   :  { %10573 = vmatpush.bf16.msra.mxu2 %v14301_v44  ;;  %v15381_v32 = vor.u32 %v18306_v31, %v15378_v35  ;;  %v18356_v35 = vld [vmem:[#allocation11 + $0xca4] sm:$0xf] }
 0x534   :  { %10561 = vmatmul.bf16.vlgmr.msra.gmra.mxu0 %v19725_v8  ;;  %10483 = vmatmul.bf16.vlgmr.msra.gmra.mxu1 %v19763_v41  ;;  %v15418_v8 = vld [vmem:[#allocation11 + $0xb88] sm:$0xf0] }
 0x535   :  { %10605 = vmatpush.bf16.msrb.mxu0 %v15541_v36  ;;  %10527 = vmatpush.bf16.msrb.mxu1 %v16817_v51  ;;  %v15421_v44 = vor.u32 %v18316_v59, %v15418_v8  ;;  %v10276_v36 = vpop.f32.mrf.mxu1  ;;  %v18386_v51 = vld [vmem:[#allocation11 + $0xd94] sm:$0xf] }
 0x536   :  { %10540 = vmatpush.bf16.msrb.mxu3 %v17137_v19  ;;  %10574 = vmatmul.bf16.vlgmr.msra.gmra.mxu2 %v19727_v37  ;;  %v18641_v37 = vld [vmem:[#allocation11 + $0x1584] sm:$0xf0]  ;;  %v10277_v0 = vadd.f32 %v10276_v36, %v20136_v43  ;;  %v18631_v19 = vld [vmem:[#allocation11 + $0x1534] sm:$0xf0]  ;;  %v15701_v23 = vor.u32 %v18386_v51, %v15698_v24  ;;  %v18376_v43 = vld [vmem:[#allocation11 + $0xd44] sm:$0xf] }
 0x537   :  { %10618 = vmatpush.bf16.msrb.mxu2 %v15861_v20  ;;  %10496 = vmatmul.bf16.vlgmr.msra.gmra.mxu3 %v19770_v9  ;;  %v16697_v20 = vor.u32 %v18641_v37, %v16696_v52  ;;  %v16657_v62 = vor.u32 %v18631_v19, %v16656_v40  ;;  %v18286_v8 = vld [vmem:[#allocation11 + $0xa74] sm:$0xf]  ;;  %v15618_v52 = vld [vmem:[#allocation11 + $0xd18] sm:$0xf0]  ;;  %v16576_v37 = vld [vmem:[#allocation11 + $0x1470] sm:$0xf] }
 0x538   :  { %v15301_v36 = vor.u32 %v18286_v8, %v15298_v63  ;;  %v16577_v31 = vor.u32 %v18611_v57, %v16576_v37  ;;  %v15578_v51 = vld [vmem:[#allocation11 + $0xcc8] sm:$0xf0]  ;;  %v16818_v19 = vld [vmem:[#allocation11 + $0x1678] sm:$0xf0]  ;;  %v18736_v8 = vld [vmem:[#allocation11 + $0x1884] sm:$0xf] }
 0x539   :  { %10606 = vmatpush.bf16.msrb.mxu0 %v15501_v18  ;;  %10528 = vmatpush.bf16.msrb.mxu1 %v16777_v33  ;;  %v18296_v18 = vld [vmem:[#allocation11 + $0xac4] sm:$0xf]  ;;  %v20145_v33 = vpop.f32.mrf.mxu2  ;;  %v10356_v1 = vpop.f32.mrf.mxu0  ;;  %v15178_v57 = vld [vmem:[#allocation11 + $0x9a8] sm:$0xf0] }
 0x53a   :  { %10541 = vmatpush.bf16.msrb.mxu3 %v17097_v2  ;;  %v18621_v2 = vld [vmem:[#allocation11 + $0x14e4] sm:$0xf0]  ;;  %v10289_v25 = vpop.f32.mrf.mxu3  ;;  %v15218_v1 = vld [vmem:[#allocation11 + $0x9f8] sm:$0xf0]  ;;  %v18256_v37 = vld [vmem:[#allocation11 + $0x984] sm:$0xf] }
 0x53b   :  { %10619 = vmatpush.bf16.msrb.mxu2 %v15821_v6  ;;  %v15338_v6 = vld [vmem:[#allocation11 + $0xae8] sm:$0xf0]  ;;  %v20147_v60 = vadd.f32 %v10289_v25, %v10277_v0  ;;  %v16617_v59 = vor.u32 %v18621_v2, %v16616_v13  ;;  %v15581_v13 = vor.u32 %v18356_v35, %v15578_v51  ;;  %v18266_v25 = vld [vmem:[#allocation11 + $0x9d4] sm:$0xf]  ;;  %v17058_v35 = vld [vmem:[#allocation11 + $0x1858] sm:$0xf0] }
 0x53c   :  { %v15258_v0 = vld [vmem:[#allocation11 + $0xa48] sm:$0xf0]  ;;  %v15221_v63 = vor.u32 %v18266_v25, %v15218_v1  ;;  %v18166_v51 = vld [vmem:[#allocation11 + $0x6b4] sm:$0xf] }
 0x53d   :  { %10607 = vmatpush.bf16.msrb.mxu0 %v15461_v14  ;;  %10529 = vmatpush.bf16.msrb.mxu1 %v16737_v22  ;;  %20411 = vst [vmem:[#allocation29_spill] sm:$0xff] %v20147_v60  ;;  %v15341_v14 = vor.u32 %v18296_v18, %v15338_v6  ;;  %v15661_v22 = vor.u32 %v18376_v43, %v15658_v49  ;;  %v16856_v18 = vld [vmem:[#allocation11 + $0x16a0] sm:$0xf]  ;;  %v18681_v43 = vld [vmem:[#allocation11 + $0x16c4] sm:$0xf0] }
 0x53e   :  { %10542 = vmatpush.bf16.msrb.mxu3 %v17057_v47  ;;  %v18366_v47 = vld [vmem:[#allocation11 + $0xcf4] sm:$0xf]  ;;  %v14898_v49 = vld [vmem:[#allocation11 + $0x778] sm:$0xf0] }
 0x53f   :  { %10620 = vmatpush.bf16.msrb.mxu2 %v15781_v38  ;;  %v10278_v38 = vpop.f32.mrf.mxu1 }
 0x541   :  { %10608 = vmatpush.bf16.msrb.mxu0 %v15421_v44  ;;  %10530 = vmatpush.bf16.msrb.mxu1 %v16697_v20  ;;  %v18691_v44 = vld [vmem:[#allocation11 + $0x1714] sm:$0xf0]  ;;  %v15621_v20 = vor.u32 %v18366_v47, %v15618_v52  ;;  %v10369_v24 = vpop.f32.mrf.mxu2  ;;  %v17098_v47 = vld [vmem:[#allocation11 + $0x18a8] sm:$0xf0] }
 0x542   :  { %10543 = vmatpush.bf16.msrb.mxu3 %v17017_v30  ;;  %v18666_v30 = vld [vmem:[#allocation11 + $0x1654] sm:$0xf]  ;;  %v16897_v40 = vor.u32 %v18691_v44, %v16896_v39  ;;  %v14858_v52 = vld [vmem:[#allocation11 + $0x728] sm:$0xf0]  ;;  %v17101_v44 = vor.u32 %v18736_v8, %v17098_v47  ;;  %v14738_v8 = vld [vmem:[#allocation11 + $0x638] sm:$0xf0]  ;;  %v10766_v47 = vmul.f32 %v20087_v16, %v20087_v16 }
 0x543   :  { %10621 = vmatpush.bf16.msrb.mxu2 %v15741_v26  ;;  %v18276_v26 = vld [vmem:[#allocation11 + $0xa24] sm:$0xf]  ;;  %v16821_v2 = vor.u32 %v18666_v30, %v16818_v19  ;;  %v14818_v30 = vld [vmem:[#allocation11 + $0x6d8] sm:$0xf0]  ;;  %v18246_v24 = vld [vmem:[#allocation11 + $0x934] sm:$0xf] }
 0x544   :  { %v15261_v6 = vor.u32 %v18276_v26, %v15258_v0  ;;  %v18646_v26 = vld [vmem:[#allocation11 + $0x15b4] sm:$0xf]  ;;  %v16738_v0 = vld [vmem:[#allocation11 + $0x15d8] sm:$0xf0]  ;;  %v14821_v15 = vor.u32 %v18166_v51, %v14818_v30  ;;  %v16938_v30 = vld [vmem:[#allocation11 + $0x1768] sm:$0xf0] }
 0x545   :  { %10609 = vmatpush.bf16.msrb.mxu0 %v15381_v32  ;;  %10531 = vmatpush.bf16.msrb.mxu1 %v16657_v62  ;;  %v10291_v32 = vpop.f32.mrf.mxu3  ;;  %v18601_v62 = vld [vmem:[#allocation11 + $0x1444] sm:$0xf0]  ;;  %v16741_v19 = vor.u32 %v18646_v26, %v16738_v0  ;;  %v18616_v0 = vld [vmem:[#allocation11 + $0x14c4] sm:$0xf] }
 0x546   :  { %10544 = vmatpush.bf16.msrb.mxu3 %v16977_v27  ;;  %v18186_v27 = vld [vmem:[#allocation11 + $0x754] sm:$0xf]  ;;  %v18636_v32 = vld [vmem:[#allocation11 + $0x1564] sm:$0xf] }
 0x547   :  { %10622 = vmatpush.bf16.msrb.mxu2 %v15701_v23  ;;  %v16536_v23 = vld [vmem:[#allocation11 + $0x1420] sm:$0xf]  ;;  %v14901_v38 = vor.u32 %v18186_v27, %v14898_v49  ;;  %v18236_v27 = vld [vmem:[#allocation11 + $0x8e4] sm:$0xf]  ;;  %v15098_v49 = vld [vmem:[#allocation11 + $0x908] sm:$0xf0] }
 0x548   :  { %v16537_v3 = vor.u32 %v18601_v62, %v16536_v23  ;;  %v18716_v23 = vld [vmem:[#allocation11 + $0x17e4] sm:$0xf] }
 0x549   :  { %10610 = vmatpush.bf16.msrb.mxu0 %v15341_v14  ;;  %10532 = vmatpush.bf16.msrb.mxu1 %v16617_v59  ;;  %v16857_v14 = vor.u32 %v18681_v43, %v16856_v18  ;;  %v16778_v59 = vld [vmem:[#allocation11 + $0x1628] sm:$0xf0] }
 0x54a   :  { %10545 = vmatpush.bf16.msrb.mxu3 %v16937_v7  ;;  %v18176_v7 = vld [vmem:[#allocation11 + $0x704] sm:$0xf]  ;;  %v17018_v18 = vld [vmem:[#allocation11 + $0x1808] sm:$0xf0] }
 0x54b   :  { %10623 = vmatpush.bf16.msrb.mxu2 %v15661_v22  ;;  %v18656_v22 = vld [vmem:[#allocation11 + $0x1604] sm:$0xf]  ;;  %v17021_v25 = vor.u32 %v18716_v23, %v17018_v18 }
 0x54c   :  { %v16781_v39 = vor.u32 %v18656_v22, %v16778_v59  ;;  %v16978_v22 = vld [vmem:[#allocation11 + $0x17b8] sm:$0xf0]  ;;  %v18146_v59 = vld [vmem:[#allocation11 + $0x614] sm:$0xf]  ;;  %v18216_v23 = vld [vmem:[#allocation11 + $0x844] sm:$0xf] }
 0x54d   :  { %10611 = vmatpush.bf16.msrb.mxu0 %v15301_v36  ;;  %10533 = vmatpush.bf16.msrb.mxu1 %v16577_v31  ;;  %v14861_v36 = vor.u32 %v18176_v7, %v14858_v52  ;;  %v15181_v31 = vor.u32 %v18256_v37, %v15178_v57  ;;  %v18226_v7 = vld [vmem:[#allocation11 + $0x894] sm:$0xf]  ;;  %v15058_v52 = vld [vmem:[#allocation11 + $0x8b8] sm:$0xf0]  ;;  %v10722_v37 = vrot.slane %v20113_v11, 4  ;;  %v10767_v57 = vmul.f32 %v20113_v11, %v20113_v11 }
 0x54e   :  { %10546 = vmatpush.bf16.msrb.mxu3 %v16897_v40  ;;  %v15138_v40 = vld [vmem:[#allocation11 + $0x958] sm:$0xf0]  ;;  %v14741_v26 = vor.u32 %v18146_v59, %v14738_v8  ;;  %v15061_v51 = vor.u32 %v18226_v7, %v15058_v52 }
 0x54f   :  { %10624 = vmatpush.bf16.msrb.mxu2 %v15621_v20  ;;  %v18726_v20 = vld [vmem:[#allocation11 + $0x1834] sm:$0xf]  ;;  %v15141_v62 = vor.u32 %v18246_v24, %v15138_v40  ;;  %v18136_v24 = vld [vmem:[#allocation11 + $0x5c4] sm:$0xf]  ;;  %v14698_v40 = vld [vmem:[#allocation11 + $0x5e8] sm:$0xf0]  ;;  %v10723_v18 = vadd.f32 %v10722_v37, %v20113_v11 }
 0x550   :  { %v17061_v34 = vor.u32 %v18726_v20, %v17058_v35  ;;  %v16618_v20 = vld [vmem:[#allocation11 + $0x14e8] sm:$0xf0]  ;;  %v14658_v59 = vld [vmem:[#allocation11 + $0x598] sm:$0xf0] }
 0x551   :  { %10612 = vmatpush.bf16.msrb.mxu0 %v15261_v6  ;;  %10534 = vmatpush.bf16.msrb.mxu1 %v16537_v3  ;;  %v18156_v6 = vld [vmem:[#allocation11 + $0x664] sm:$0xf]  ;;  %v20153_v43 = vpop.f32.mrf.mxu0  ;;  %v16658_v3 = vld [vmem:[#allocation11 + $0x1538] sm:$0xf0]  ;;  %v10724_v37 = vrot.slane %v10723_v18, 2 }
 0x552   :  { %10547 = vmatpush.bf16.msrb.mxu3 %v16857_v14  ;;  %v18706_v14 = vld [vmem:[#allocation11 + $0x1794] sm:$0xf]  ;;  %v14978_v7 = vld [vmem:[#allocation11 + $0x818] sm:$0xf0] }
 0x553   :  { %10625 = vmatpush.bf16.msrb.mxu2 %v15581_v13 }
 0x554   :  { %10613 = vmatmul.bf16.vlgmr.msrb.gmra.mxu0 %v19763_v41  ;;  %10535 = vmatmul.bf16.vlgmr.msrb.gmra.mxu1 %v19820_v50  ;;  %v16698_v41 = vld [vmem:[#allocation11 + $0x1588] sm:$0xf0] }
 0x555   :  { %10657 = vmatpush.bf16.msra.mxu0 %v16821_v2  ;;  %10579 = vmatpush.bf16.msra.mxu1 %v14901_v38  ;;  %v16701_v13 = vor.u32 %v18636_v32, %v16698_v41  ;;  %v20155_v2 = vpop.f32.mrf.mxu1  ;;  %v15101_v38 = vor.u32 %v18236_v27, %v15098_v49  ;;  %v16621_v27 = vor.u32 %v18616_v0, %v16618_v20 }
 0x556   :  { %10592 = vmatpush.bf16.msra.mxu3 %v15221_v63  ;;  %10626 = vmatmul.bf16.vlgmr.msrb.gmra.mxu2 %v19770_v9  ;;  %v14778_v9 = vld [vmem:[#allocation11 + $0x688] sm:$0xf0]  ;;  %v10716_v63 = vrot.slane %v20087_v16, 4 }
 0x557   :  { %10670 = vmatpush.bf16.msra.mxu2 %v17141_v42  ;;  %10548 = vmatmul.bf16.vlgmr.msrb.gmra.mxu3 %v19822_v53  ;;  %v14781_v1 = vor.u32 %v18156_v6, %v14778_v9  ;;  %v18626_v42 = vld [vmem:[#allocation11 + $0x1514] sm:$0xf]  ;;  %v10802_v6 = vrot.slane %v10767_v57, 4 }
 0x559   :  { %10658 = vmatpush.bf16.msra.mxu0 %v16781_v39  ;;  %10580 = vmatpush.bf16.msra.mxu1 %v14861_v36  ;;  %v10728_v39 = vrot.slane %v20147_v60, 4  ;;  %v16981_v36 = vor.u32 %v18706_v14, %v16978_v22  ;;  %v20164_v35 = vpop.f32.mrf.mxu2  ;;  %v10408_v41 = vpop.f32.mrf.mxu0  ;;  %v18126_v22 = vld [vmem:[#allocation11 + $0x574] sm:$0xf] }
 0x55a   :  { %10593 = vmatpush.bf16.msra.mxu3 %v15181_v31  ;;  %v18696_v31 = vld [vmem:[#allocation11 + $0x1744] sm:$0xf]  ;;  %v20171_v32 = vpop.f32.mrf.mxu3  ;;  %v14661_v20 = vor.u32 %v18126_v22, %v14658_v59 }
 0x55b   :  { %10671 = vmatpush.bf16.msra.mxu2 %v17101_v44  ;;  %v16661_v44 = vor.u32 %v18626_v42, %v16658_v3  ;;  %v10729_v9 = vadd.f32 %v10728_v39, %v20147_v60  ;;  %v16578_v42 = vld [vmem:[#allocation11 + $0x1498] sm:$0xf0]  ;;  %v18686_v3 = vld [vmem:[#allocation11 + $0x16f4] sm:$0xf] }
 0x55d   :  { %10659 = vmatpush.bf16.msra.mxu0 %v16741_v19  ;;  %10581 = vmatpush.bf16.msra.mxu1 %v14821_v15  ;;  %v20167_v19 = vadd.f32 %v10716_v63, %v20087_v16  ;;  %v10768_v15 = vmul.f32 %v20147_v60, %v20147_v60  ;;  %v10330_v49 = vpop.f32.mrf.mxu1  ;;  %v18206_v63 = vld [vmem:[#allocation11 + $0x7f4] sm:$0xf]  ;;  %v10730_v39 = vrot.slane %v10729_v9, 2 }
 0x55e   :  { %10594 = vmatpush.bf16.msra.mxu3 %v15141_v62  ;;  %v15018_v62 = vld [vmem:[#allocation11 + $0x868] sm:$0xf0]  ;;  %v14981_v41 = vor.u32 %v18206_v63, %v14978_v7  ;;  %v18196_v49 = vld [vmem:[#allocation11 + $0x7a4] sm:$0xf] }
 0x55f   :  { %10672 = vmatpush.bf16.msra.mxu2 %v17061_v34  ;;  %v10796_v34 = vrot.slane %v10766_v47, 4  ;;  %v15021_v14 = vor.u32 %v18216_v23, %v15018_v62  ;;  %v10808_v8 = vrot.slane %v10768_v15, 4  ;;  %v10718_v52 = vrot.slane %v20167_v19, 2  ;;  %v18116_v23 = vld [vmem:[#allocation11 + $0x524] sm:$0xf] }
 0x560   :  { %v14618_v62 = vld [vmem:[#allocation11 + $0x548] sm:$0xf0]  ;;  %v18496_v63 = vld [vmem:[#allocation11 + $0x1104] sm:$0xf] }
 0x561   :  { %10660 = vmatpush.bf16.msra.mxu0 %v16701_v13  ;;  %10582 = vmatpush.bf16.msra.mxu1 %v14781_v1  ;;  %v16941_v13 = vor.u32 %v18696_v31, %v16938_v30  ;;  %v18606_v1 = vld [vmem:[#allocation11 + $0x1474] sm:$0xf]  ;;  %v16538_v31 = vld [vmem:[#allocation11 + $0x1448] sm:$0xf0]  ;;  %v10809_v60 = vadd.f32 %v10808_v8, %v10768_v15  ;;  %v10719_v15 = vadd.f32 %v10718_v52, %v20167_v19  ;;  %v16098_v52 = vld [vmem:[#allocation11 + $0x10d8] sm:$0xf0] }
 0x562   :  { %10595 = vmatpush.bf16.msra.mxu3 %v15101_v38  ;;  %v16898_v38 = vld [vmem:[#allocation11 + $0x1718] sm:$0xf0]  ;;  %v16858_v30 = vld [vmem:[#allocation11 + $0x16c8] sm:$0xf0]  ;;  %v10343_v11 = vpop.f32.mrf.mxu3 }
 0x563   :  { %10673 = vmatpush.bf16.msra.mxu2 %v17021_v25  ;;  %v14701_v25 = vor.u32 %v18136_v24, %v14698_v40  ;;  %v16901_v0 = vor.u32 %v18686_v3, %v16898_v38  ;;  %v10803_v24 = vadd.f32 %v10802_v6, %v10767_v57  ;;  %v10421_v40 = vpop.f32.mrf.mxu2  ;;  %v14621_v57 = vor.u32 %v18116_v23, %v14618_v62  ;;  %v16138_v7 = vld [vmem:[#allocation11 + $0x1128] sm:$0xf0] }
 0x564   :  { %v10725_v6 = vadd.f32 %v10724_v37, %v10723_v18  ;;  %v10731_v11 = vadd.f32 %v10730_v39, %v10729_v9  ;;  %v10810_v59 = vrot.slane %v10809_v60, 2  ;;  %v16141_v18 = vor.u32 %v18496_v63, %v16138_v7  ;;  %v18486_v9 = vld [vmem:[#allocation11 + $0x10b4] sm:$0xf] }
 0x565   :  { %10661 = vmatpush.bf16.msra.mxu0 %v16661_v44  ;;  %10583 = vmatpush.bf16.msra.mxu1 %v14741_v26  ;;  %v16581_v44 = vor.u32 %v18606_v1, %v16578_v42  ;;  %v10797_v26 = vadd.f32 %v10796_v34, %v10766_v47  ;;  %v18506_v1 = vld [vmem:[#allocation11 + $0x1154] sm:$0xf]  ;;  %v16178_v42 = vld [vmem:[#allocation11 + $0x1178] sm:$0xf0]  ;;  %v10720_v37 = vrot.slane %v10719_v15, 1  ;;  %v10329_v39 = vadd.f32 %v20155_v2, %v20132_v12 }
 0x566   :  { %10596 = vmatpush.bf16.msra.mxu3 %v15061_v51  ;;  %v18676_v51 = vld [vmem:[#allocation11 + $0x16a4] sm:$0xf]  ;;  %v18586_v34 = vld [vmem:[#allocation11 + $0x13d4] sm:$0xf]  ;;  %v16181_v22 = vor.u32 %v18506_v1, %v16178_v42 }
 0x567   :  { %10674 = vmatpush.bf16.msra.mxu2 %v16981_v36  ;;  %v18596_v36 = vld [vmem:[#allocation11 + $0x1424] sm:$0xf]  ;;  %v16861_v3 = vor.u32 %v18676_v51, %v16858_v30  ;;  %v10732_v51 = vrot.slane %v10731_v11, 1  ;;  %v10811_v30 = vadd.f32 %v10810_v59, %v10809_v60  ;;  %v10342_v23 = vadd.f32 %v20171_v32, %v10329_v39 }
 0x568   :  { %v16541_v47 = vor.u32 %v18596_v36, %v16538_v31  ;;  %v16458_v36 = vld [vmem:[#allocation11 + $0x13a8] sm:$0xf0]  ;;  %v10721_v62 = vadd.f32 %v10720_v37, %v10719_v15  ;;  %v18476_v2 = vld [vmem:[#allocation11 + $0x1064] sm:$0xf]  ;;  %v18546_v15 = vld [vmem:[#allocation11 + $0x1294] sm:$0xf] }
 0x569   :  { %10662 = vmatpush.bf16.msra.mxu0 %v16621_v27  ;;  %10584 = vmatpush.bf16.msra.mxu1 %v14701_v25  ;;  %v14938_v27 = vld [vmem:[#allocation11 + $0x7c8] sm:$0xf0]  ;;  %v10798_v25 = vrot.slane %v10797_v26, 2  ;;  %v18556_v1 = vld [vmem:[#allocation11 + $0x12e4] sm:$0xf]  ;;  %v10355_v32 = vadd.f32 %v20142_v55, %v10342_v23 }
 0x56a   :  { %10597 = vmatpush.bf16.msra.mxu3 %v15021_v14  ;;  %v10804_v14 = vrot.slane %v10803_v24, 2  ;;  %v14941_v38 = vor.u32 %v18196_v49, %v14938_v27  ;;  %v10733_v49 = vadd.f32 %v10732_v51, %v10731_v11  ;;  %v10812_v27 = vrot.slane %v10811_v30, 1  ;;  %v16338_v11 = vld [vmem:[#allocation11 + $0x12b8] sm:$0xf0]  ;;  %v18446_v23 = vld [vmem:[#allocation11 + $0xf74] sm:$0xf] }
 0x56b   :  { %10675 = vmatpush.bf16.msra.mxu2 %v16941_v13  ;;  %v16498_v13 = vld [vmem:[#allocation11 + $0x13f8] sm:$0xf0]  ;;  %v10799_v31 = vadd.f32 %v10798_v25, %v10797_v26  ;;  %v18566_v26 = vld [vmem:[#allocation11 + $0x1334] sm:$0xf]  ;;  %v10368_v63 = vadd.f32 %v20145_v33, %v10355_v32  ;;  %v15898_v32 = vld [vmem:[#allocation11 + $0xf48] sm:$0xf0] }
 0x56c   :  { %v16501_v8 = vor.u32 %v18586_v34, %v16498_v13 }
 0x56d   :  { %10663 = vmatpush.bf16.msra.mxu0 %v16581_v44  ;;  %10585 = vmatpush.bf16.msra.mxu1 %v14661_v20  ;;  %v18576_v44 = vld [vmem:[#allocation11 + $0x1384] sm:$0xf]  ;;  %v10805_v20 = vadd.f32 %v10804_v14, %v10803_v24  ;;  %v16418_v24 = vld [vmem:[#allocation11 + $0x1358] sm:$0xf0]  ;;  %v10800_v40 = vrot.slane %v10799_v31, 1 }
 0x56e   :  { %10598 = vmatpush.bf16.msra.mxu3 %v14981_v41  ;;  %v16461_v19 = vor.u32 %v18576_v44, %v16458_v36  ;;  %v16421_v12 = vor.u32 %v18566_v26, %v16418_v24 }
 0x56f   :  { %10676 = vmatpush.bf16.msra.mxu2 %v16901_v0  ;;  %v10726_v0 = vrot.slane %v10725_v6, 1  ;;  %v10806_v60 = vrot.slane %v10805_v20, 1  ;;  %v10801_v42 = vadd.f32 %v10800_v40, %v10799_v31 }
 0x571   :  { %10664 = vmatpush.bf16.msra.mxu0 %v16541_v47  ;;  %10586 = vmatpush.bf16.msra.mxu1 %v14621_v57  ;;  %v10727_v41 = vadd.f32 %v10726_v0, %v10725_v6  ;;  %v20184_v47 = vpop.f32.mrf.mxu0  ;;  %v10807_v34 = vadd.f32 %v10806_v60, %v10805_v20  ;;  %v10380_v13 = vpop.f32.mrf.mxu1  ;;  %v20194_v57 = vmul.f32 %v10733_v49, %v19375_v54  ;;  %v18456_v20 = vld [vmem:[#allocation11 + $0xfc4] sm:$0xf]  ;;  %v18526_v49 = vld [vmem:[#allocation11 + $0x11f4] sm:$0xf] }
 0x572   :  { %10599 = vmatpush.bf16.msra.mxu3 %v14941_v38  ;;  %v10813_v6 = vadd.f32 %v10812_v27, %v10811_v30  ;;  %v18466_v38 = vld [vmem:[#allocation11 + $0x1014] sm:$0xf]  ;;  %v10836_v59 = vmul.f32 %v10801_v42, %v19375_v54  ;;  %v16341_v0 = vor.u32 %v18546_v15, %v16338_v11  ;;  %v10381_v37 = vadd.f32 %v10380_v13, %v10368_v63  ;;  %v18536_v30 = vld [vmem:[#allocation11 + $0x1244] sm:$0xf]  ;;  %v16258_v27 = vld [vmem:[#allocation11 + $0x1218] sm:$0xf0] }
 0x573   :  { %10677 = vmatpush.bf16.msra.mxu2 %v16861_v3  ;;  %v20191_v3 = vmul.f32 %v10721_v62, %v19375_v54  ;;  %v10837_v55 = vmul.f32 %v10807_v34, %v19375_v54  ;;  %v10848_v31 = vmul.f32 %v20194_v57, %v20194_v57  ;;  %v16261_v42 = vor.u32 %v18526_v49, %v16258_v27  ;;  %v18436_v34 = vld [vmem:[#allocation11 + $0xf24] sm:$0xf]  ;;  %v18772_v49 = vld [vmem:[#allocation17 + $0xa0] sm:$0xff] }
 0x574   :  { %10665 = vmatmul.bf16.vlgmr.msra.gmra.mxu0 %v19820_v50  ;;  %10587 = vmatmul.bf16.vlgmr.msra.gmra.mxu1 %v19729_v28  ;;  %v16101_v50 = vor.u32 %v18486_v9, %v16098_v52  ;;  %v16378_v28 = vld [vmem:[#allocation11 + $0x1308] sm:$0xf0]  ;;  %v10838_v36 = vmul.f32 %v10813_v6, %v19375_v54  ;;  %v18516_v6 = vld [vmem:[#allocation11 + $0x11a4] sm:$0xf] }
 0x575   :  { %10631 = vmatpush.bf16.msrb.mxu1 %v16181_v22  ;;  %10600 = vmatmul.bf16.vlgmr.msra.gmra.mxu3 %v19731_v45  ;;  %v20187_v45 = vmul.f32 %v10727_v41, %v19375_v54  ;;  %v16381_v14 = vor.u32 %v18556_v1, %v16378_v28  ;;  %v16018_v22 = vld [vmem:[#allocation11 + $0x1038] sm:$0xf0]  ;;  %v10846_v44 = vmul.f32 %v20191_v3, %v20191_v3 }
 0x576   :  { %10644 = vmatpush.bf16.msrb.mxu3 %v16501_v8  ;;  %10678 = vmatmul.bf16.vlgmr.msra.gmra.mxu2 %v19822_v53  ;;  %v16058_v53 = vld [vmem:[#allocation11 + $0x1088] sm:$0xf0]  ;;  %v16021_v7 = vor.u32 %v18466_v38, %v16018_v22  ;;  %v10858_v41 = vsub.f32 %v10838_v36, %v10848_v31  ;;  %v18775_v38 = vld [vmem:[#allocation17 + $0xb8] sm:$0xff] }
 0x577   :  { %v16061_v25 = vor.u32 %v18476_v2, %v16058_v53  ;;  %v10847_v8 = vmul.f32 %v20187_v45, %v20187_v45  ;;  %v10856_v40 = vsub.f32 %v10836_v59, %v10846_v44  ;;  %11845 = vmatpush.bf16.msrb.mxu0 %v18775_v38 }
 0x578   :  { %v10868_v28 = vmax.f32 %v10858_v41, 0.0  ;;  %v18757_v41 = vld [vmem:[#allocation17 + $0x28] sm:$0xff] }
 0x579   :  { %10632 = vmatpush.bf16.msrb.mxu1 %v16141_v18  ;;  %v15978_v18 = vld [vmem:[#allocation11 + $0xfe8] sm:$0xf0]  ;;  %v20206_v51 = vpop.f32.mrf.mxu2  ;;  %v10460_v9 = vpop.f32.mrf.mxu0  ;;  %v10857_v52 = vsub.f32 %v10837_v55, %v10847_v8  ;;  %v10866_v1 = vmax.f32 %v10856_v40, 0.0  ;;  %v15901_v55 = vor.u32 %v18436_v34, %v15898_v32 }
 0x57a   :  { %10645 = vmatpush.bf16.msrb.mxu3 %v16461_v19  ;;  %v16298_v19 = vld [vmem:[#allocation11 + $0x1268] sm:$0xf0]  ;;  %v10393_v33 = vpop.f32.mrf.mxu3  ;;  %v10382_v26 = vpop.f32.mrf.mxu1  ;;  %v15981_v24 = vor.u32 %v18456_v20, %v15978_v18  ;;  %v20220_v44 = vadd.f32 1e-05, %v10868_v28 }
 0x57b   :  { %v10394_v39 = vadd.f32 %v10393_v33, %v10381_v37  ;;  %v16301_v60 = vor.u32 %v18536_v30, %v16298_v19  ;;  %v20218_v8 = vadd.f32 1e-05, %v10866_v1  ;;  %v18774_v20 = vld [vmem:[#allocation17 + $0xb0] sm:$0xff]  ;;  %v18781_v26 = vld [vmem:[#allocation17 + $0xe8] sm:$0xff] }
 0x57c   :  { %v18782_v18 = vld [vmem:[#allocation17 + $0xf0] sm:$0xff]  ;;  %11846 = vmatpush.bf16.msrb.mxu0 %v18774_v20  ;;  %vm10948_vm12 = vweird.f32 %v20220_v44 }
 0x57d   :  { %10633 = vmatpush.bf16.msrb.mxu1 %v16101_v50  ;;  %v15938_v50 = vld [vmem:[#allocation11 + $0xf98] sm:$0xf0]  ;;  %v10407_v62 = vadd.f32 %v20153_v43, %v10394_v39  ;;  %v18758_v19 = vld [vmem:[#allocation17 + $0x30] sm:$0xff]  ;;  %v18773_v39 = vld [vmem:[#allocation17 + $0xa8] sm:$0xff]  ;;  %vm10928_vm9 = vweird.f32 %v20218_v8 }
 0x57e   :  { %10646 = vmatpush.bf16.msrb.mxu3 %v16421_v12  ;;  %v10867_v12 = vmax.f32 %v10857_v52, 0.0  ;;  %v15941_v53 = vor.u32 %v18446_v23, %v15938_v50  ;;  %v18766_v52 = vld [vmem:[#allocation17 + $0x70] sm:$0xff] }
 0x57f   :  { %v20210_v2 = vadd.f32 %v20164_v35, %v10407_v62  ;;  %v18783_v35 = vld [vmem:[#allocation17 + $0xf8] sm:$0xff]  ;;  %v18765_v62 = vld [vmem:[#allocation17 + $0x68] sm:$0xff] }
 0x580   :  { %v20215_v15 = vadd.f32 1e-05, %v10867_v12  ;;  %11858 = vmatpush.bf16.msrb.mxu2 %v18783_v35  ;;  %11847 = vmatpush.bf16.msrb.mxu0 %v18773_v39  ;;  %v18755_v35 = vld [vmem:[#allocation17 + $0x18] sm:$0xff]  ;;  %v18769_v39 = vld [vmem:[#allocation17 + $0x88] sm:$0xff] }
 0x581   :  { %10634 = vmatpush.bf16.msrb.mxu1 %v16061_v25  ;;  %v10734_v13 = vrot.slane %v20210_v2, 4  ;;  %v10769_v25 = vmul.f32 %v20210_v2, %v20210_v2  ;;  %v10473_v43 = vpop.f32.mrf.mxu2 }
 0x582   :  { %10647 = vmatpush.bf16.msrb.mxu3 %v16381_v14  ;;  %v16218_v14 = vld [vmem:[#allocation11 + $0x11c8] sm:$0xf0]  ;;  %v10395_v22 = vpop.f32.mrf.mxu3  ;;  %18880 = vrsqrt.f32 %v20215_v15  ;;  %v18771_v43 = vld [vmem:[#allocation17 + $0x98] sm:$0xff]  ;;  %vm10938_vm6 = vweird.f32 %v20215_v15 }
 0x583   :  { %v10735_v11 = vadd.f32 %v10734_v13, %v20210_v2  ;;  %v10814_v59 = vrot.slane %v10769_v25, 4  ;;  %v16221_v63 = vor.u32 %v18516_v6, %v16218_v14  ;;  %18882 = vrsqrt.f32 %v20218_v8  ;;  %v18779_v14 = vld [vmem:[#allocation17 + $0xd8] sm:$0xff] }
 0x584   :  { %18884 = vrsqrt.f32 %v20220_v44  ;;  %11859 = vmatpush.bf16.msrb.mxu2 %v18782_v18  ;;  %11848 = vmatpush.bf16.msrb.mxu0 %v18772_v49 }
 0x585   :  { %10635 = vmatpush.bf16.msrb.mxu1 %v16021_v7  ;;  %v18759_v7 = vld [vmem:[#allocation17 + $0x38] sm:$0xff]  ;;  %v10736_v36 = vrot.slane %v10735_v11, 2  ;;  %v10815_v31 = vadd.f32 %v10814_v59, %v10769_v25  ;;  %v18764_v25 = vld [vmem:[#allocation17 + $0x60] sm:$0xff] }
 0x586   :  { %10648 = vmatpush.bf16.msrb.mxu3 %v16341_v0  ;;  %v18767_v0 = vld [vmem:[#allocation17 + $0x78] sm:$0xff] }
 0x587   :  { %v10737_v37 = vadd.f32 %v10736_v36, %v10735_v11  ;;  %v10816_v30 = vrot.slane %v10815_v31, 2 }
 0x588   :  { %11860 = vmatpush.bf16.msrb.mxu2 %v18781_v26  ;;  %11849 = vmatpush.bf16.msrb.mxu0 %v18771_v43  ;;  %v18815_v43 = vld [vmem:[#allocation17 + $0x1f8] sm:$0xff] }
 0x589   :  { %10636 = vmatpush.bf16.msrb.mxu1 %v15981_v24  ;;  %v10738_v33 = vrot.slane %v10737_v37, 1  ;;  %v10817_v9 = vadd.f32 %v10816_v30, %v10815_v31  ;;  %v18778_v31 = vld [vmem:[#allocation17 + $0xd0] sm:$0xff] }
 0x58a   :  { %10649 = vmatpush.bf16.msrb.mxu3 %v16301_v60  ;;  %v20227_v60 = vpop.eup %18880 }
 0x58b   :  { %v10739_v24 = vadd.f32 %v10738_v33, %v10737_v37  ;;  %v10818_v40 = vrot.slane %v10817_v9, 1  ;;  %v20232_v27 = vpop.eup %18882  ;;  %v10933_v1 = vmul.f32 %v20227_v60, %v20215_v15  ;;  %v18754_v37 = vld [vmem:[#allocation17 + $0x10] sm:$0xff]  ;;  %vm10939_vm4 = vweird.f32 %v20227_v60 }
 0x58c   :  { %v20234_v12 = vpop.eup %18884  ;;  %v10923_v34 = vmul.f32 %v20232_v27, %v20218_v8  ;;  %vm10929_vm5 = vweird.f32 %v20232_v27  ;;  %vm20270_vm10 = vmor %vm10938_vm6, %vm10939_vm4 }
 0x58d   :  { %10637 = vmatpush.bf16.msrb.mxu1 %v15941_v53  ;;  %v20230_v23 = vmul.f32 %v10739_v24, %v19375_v54  ;;  %v10819_v50 = vadd.f32 %v10818_v40, %v10817_v9  ;;  %v10943_v6 = vmul.f32 %v20234_v12, %v20220_v44  ;;  %v10934_v22 = vmul.f32 %v20227_v60, %v10933_v1  ;;  %v18762_v9 = vld [vmem:[#allocation17 + $0x50] sm:$0xff]  ;;  %v18777_v24 = vld [vmem:[#allocation17 + $0xc8] sm:$0xff]  ;;  %v18768_v1 = vld [vmem:[#allocation17 + $0x80] sm:$0xff] }
 0x58e   :  { %10650 = vmatpush.bf16.msrb.mxu3 %v16261_v42  ;;  %v18756_v42 = vld [vmem:[#allocation17 + $0x20] sm:$0xff]  ;;  %v10924_v11 = vmul.f32 %v20232_v27, %v10923_v34  ;;  %vm10949_vm8 = vweird.f32 %v20234_v12  ;;  %vm20276_vm11 = vmor %vm10928_vm9, %vm10929_vm5 }
 0x58f   :  { %v10849_v53 = vmul.f32 %v20230_v23, %v20230_v23  ;;  %v18776_v34 = vld [vmem:[#allocation17 + $0xc0] sm:$0xff]  ;;  %vm20286_vm4 = vmor %vm10948_vm12, %vm10949_vm8 }
 0x590   :  { %v10925_v30 = vmul.f32 0.5, %v10924_v11  ;;  %v18799_v11 = vld [vmem:[#allocation17 + $0x178] sm:$0xff] }
 0x591   :  { %10638 = vmatpush.bf16.msrb.mxu1 %v15901_v55  ;;  %v20241_v28 = vpop.f32.mrf.mxu0  ;;  %v10432_v13 = vpop.f32.mrf.mxu1  ;;  %v18763_v55 = vld [vmem:[#allocation17 + $0x58] sm:$0xff] }
 0x592   :  { %10651 = vmatpush.bf16.msrb.mxu3 %v16221_v63  ;;  %v10944_v63 = vmul.f32 %v20234_v12, %v10943_v6 }
 0x594   :  { %10639 = vmatmul.bf16.vlgmr.msrb.gmra.mxu1 %v19755_v56  ;;  %v18780_v56 = vld [vmem:[#allocation17 + $0xe0] sm:$0xff] }
 0x595   :  { %11819 = vmatpush.bf16.msra.mxu1 %v18759_v7  ;;  %10652 = vmatmul.bf16.vlgmr.msrb.gmra.mxu3 %v19765_v46  ;;  %v10839_v46 = vmul.f32 %v10819_v50, %v19375_v54  ;;  %v18770_v7 = vld [vmem:[#allocation17 + $0x90] sm:$0xff] }
 0x596   :  { %11832 = vmatpush.bf16.msra.mxu3 %v18767_v0  ;;  %11861 = vmatpush.bf16.msrb.mxu2 %v18780_v56  ;;  %v10935_v0 = vmul.f32 0.5, %v10934_v22  ;;  %v18761_v56 = vld [vmem:[#allocation17 + $0x48] sm:$0xff] }
 0x597   :  { %v10859_v32 = vsub.f32 %v10839_v46, %v10849_v53  ;;  %11850 = vmatpush.bf16.msrb.mxu0 %v18770_v7  ;;  %v18814_v7 = vld [vmem:[#allocation17 + $0x1f0] sm:$0xff] }
 0x598   :  { %v10936_v40 = vsub.f32 1.5, %v10935_v0  ;;  %v18802_v0 = vld [vmem:[#allocation17 + $0x190] sm:$0xff] }
 0x599   :  { %11820 = vmatpush.bf16.msra.mxu1 %v18758_v19  ;;  %v10869_v38 = vmax.f32 %v10859_v32, 0.0  ;;  %v20253_v36 = vpop.f32.mrf.mxu2  ;;  %v10512_v18 = vpop.f32.mrf.mxu0 }
 0x59a   :  { %11833 = vmatpush.bf16.msra.mxu3 %v18766_v52  ;;  %11862 = vmatpush.bf16.msrb.mxu2 %v18779_v14  ;;  %v10445_v20 = vpop.f32.mrf.mxu3  ;;  %v10434_v33 = vpop.f32.mrf.mxu1  ;;  %v10945_v52 = vmul.f32 0.5, %v10944_v63  ;;  %v18760_v14 = vld [vmem:[#allocation17 + $0x40] sm:$0xff] }
 0x59b   :  { %v20249_v59 = vadd.f32 1e-05, %v10869_v38  ;;  %v10446_v19 = vadd.f32 %v10445_v20, %v10432_v13  ;;  %11851 = vmatpush.bf16.msrb.mxu0 %v18769_v39  ;;  %v18791_v38 = vld [vmem:[#allocation17 + $0x138] sm:$0xff]  ;;  %v18790_v20 = vld [vmem:[#allocation17 + $0x130] sm:$0xff]  ;;  %v18813_v33 = vld [vmem:[#allocation17 + $0x1e8] sm:$0xff] }
 0x59c   :  { %v10946_v46 = vsub.f32 1.5, %v10945_v52 }
 0x59d   :  { %11821 = vmatpush.bf16.msra.mxu1 %v18757_v41  ;;  %18886 = vrsqrt.f32 %v20249_v59  ;;  %v10459_v26 = vadd.f32 %v20184_v47, %v10446_v19  ;;  %v18753_v41 = vld [vmem:[#allocation17 + $0x8] sm:$0xff]  ;;  %v10937_v47 = vmul.f32 %v20227_v60, %v10936_v40  ;;  %vm10958_vm5 = vweird.f32 %v20249_v59 }
 0x59e   :  { %11834 = vmatpush.bf16.msra.mxu3 %v18765_v62  ;;  %11863 = vmatpush.bf16.msrb.mxu2 %v18778_v31  ;;  %v10926_v62 = vsub.f32 1.5, %v10925_v30  ;;  %v10947_v22 = vmul.f32 %v20234_v12, %v10946_v46  ;;  %v18805_v30 = vld [vmem:[#allocation17 + $0x1a8] sm:$0xff]  ;;  %v18788_v46 = vld [vmem:[#allocation17 + $0x120] sm:$0xff] }
 0x59f   :  { %v20257_v49 = vadd.f32 %v20206_v51, %v10459_v26  ;;  %11852 = vmatpush.bf16.msrb.mxu0 %v18768_v1  ;;  %v18807_v51 = vld [vmem:[#allocation17 + $0x1b8] sm:$0xff]  ;;  %v10941_v31 = vsel %vm20270_vm10, %v20227_v60, %v10937_v47  ;;  %v18789_v26 = vld [vmem:[#allocation17 + $0x128] sm:$0xff] }
 0x5a0   :  { %v10927_v6 = vmul.f32 %v20232_v27, %v10926_v62  ;;  %v10951_v44 = vsel %vm20286_vm4, %v20234_v12, %v10947_v22  ;;  %v10996_v19 = vrot.slane %v10941_v31, 3  ;;  %v18797_v12 = vld [vmem:[#allocation17 + $0x168] sm:$0xff]  ;;  %v18812_v62 = vld [vmem:[#allocation17 + $0x1e0] sm:$0xff]  ;;  %v18803_v47 = vld [vmem:[#allocation17 + $0x198] sm:$0xff] }
 0x5a1   :  { %11822 = vmatpush.bf16.msra.mxu1 %v18756_v42  ;;  %v10525_v42 = vpop.f32.mrf.mxu2  ;;  %v10997_v39 = vrot.slane %v10951_v44, 2  ;;  %v10683_v40 = vld [vmem:[#allocation13] sm:$0xff] }
 0x5a2   :  { %11835 = vmatpush.bf16.msra.mxu3 %v18764_v25  ;;  %11864 = vmatpush.bf16.msrb.mxu2 %v18777_v24  ;;  %v10447_v13 = vpop.f32.mrf.mxu3  ;;  %v18752_v25 = vld [vmem:[#allocation17] sm:$0xff]  ;;  %v10931_v18 = vsel %vm20276_vm11, %v20232_v27, %v10927_v6 }
 0x5a3   :  { %v18887_v50 = vpop.eup %18886  ;;  %11897 = vmatpush.bf16.msra.mxu0 %v18807_v51  ;;  %v10995_v52 = vrot.slane %v10931_v18, 4  ;;  %v18804_v24 = vld [vmem:[#allocation17 + $0x1a0] sm:$0xff]  ;;  %v18811_v13 = vld [vmem:[#allocation17 + $0x1d8] sm:$0xff] }
 0x5a4   :  { %v10953_v53 = vmul.f32 %v18887_v50, %v20249_v59  ;;  %vm10959_vm13 = vweird.f32 %v18887_v50 }
 0x5a5   :  { %11823 = vmatpush.bf16.msra.mxu1 %v18755_v35  ;;  %vm10960_vm6 = vmor %vm10958_vm5, %vm10959_vm13  ;;  %v11003_v59 = vsel %vm4407_vm14, %v10995_v52, %v10996_v19  ;;  %v18786_v19 = vld [vmem:[#allocation17 + $0x110] sm:$0xff] }
 0x5a6   :  { %11836 = vmatpush.bf16.msra.mxu3 %v18763_v55  ;;  %v10954_v32 = vmul.f32 %v18887_v50, %v10953_v53  ;;  %11865 = vmatpush.bf16.msrb.mxu2 %v18776_v34  ;;  %v18806_v55 = vld [vmem:[#allocation17 + $0x1b0] sm:$0xff]  ;;  %v18796_v34 = vld [vmem:[#allocation17 + $0x160] sm:$0xff] }
 0x5a7   :  { %11898 = vmatpush.bf16.msra.mxu0 %v18806_v55  ;;  %v10685_v53 = vld [vmem:[#allocation14] sm:$0xff] }
 0x5a8   :  { %v10955_v35 = vmul.f32 0.5, %v10954_v32  ;;  %v18794_v52 = vld [vmem:[#allocation17 + $0x150] sm:$0xff] }
 0x5a9   :  { %11824 = vmatpush.bf16.msra.mxu1 %v18754_v37  ;;  %v18798_v37 = vld [vmem:[#allocation17 + $0x170] sm:$0xff] }
 0x5aa   :  { %11837 = vmatpush.bf16.msra.mxu3 %v18762_v9  ;;  %11910 = vmatpush.bf16.msra.mxu2 %v18815_v43  ;;  %v10956_v8 = vsub.f32 1.5, %v10955_v35  ;;  %v20306_v43 = vmul.f32 5.0, %v10685_v53  ;;  %v18795_v35 = vld [vmem:[#allocation17 + $0x158] sm:$0xff] }
 0x5ab   :  { %11899 = vmatpush.bf16.msra.mxu0 %v18805_v30 }
 0x5ac   :  { %v10957_v60 = vmul.f32 %v18887_v50, %v10956_v8 }
 0x5ad   :  { %11825 = vmatpush.bf16.msra.mxu1 %v18753_v41 }
 0x5ae   :  { %11838 = vmatpush.bf16.msra.mxu3 %v18761_v56  ;;  %11911 = vmatpush.bf16.msra.mxu2 %v18814_v7  ;;  %v10961_v9 = vsel %vm10960_vm6, %v18887_v50, %v10957_v60 }
 0x5af   :  { %v10998_v27 = vrot.slane %v10961_v9, 1  ;;  %11900 = vmatpush.bf16.msra.mxu0 %v18804_v24 }
 0x5b1   :  { %11826 = vmatpush.bf16.msra.mxu1 %v18752_v25  ;;  %v11004_v41 = vsel %vm4409_vm0, %v10997_v39, %v10998_v27  ;;  %v10562_v42 = vpop.f32.mrf.mxu0  ;;  %v10484_v32 = vpop.f32.mrf.mxu1 }
 0x5b2   :  { %11839 = vmatpush.bf16.msra.mxu3 %v18760_v14  ;;  %11912 = vmatpush.bf16.msra.mxu2 %v18813_v33  ;;  %v11005_v56 = vsel %vm4411_vm2, %v11003_v59, %v11004_v41  ;;  %v10485_v51 = vadd.f32 %v10484_v32, %v20257_v49 }
 0x5b3   :  { %v11006_v50 = vsel %vm4413_vm3, %v20069_v10, %v11005_v56  ;;  %v18787_v10 = vld [vmem:[#allocation17 + $0x118] sm:$0xff]  ;;  %11901 = vmatpush.bf16.msra.mxu0 %v18803_v47  ;;  %v18801_v56 = vld [vmem:[#allocation17 + $0x188] sm:$0xff] }
 0x5b4   :  { %v11010_v1 = vmul.f32 %v11006_v50, %v10683_v40 }
 0x5b5   :  { %11871 = vmatpush.bf16.msrb.mxu1 %v18791_v38 }
 0x5b6   :  { %11884 = vmatpush.bf16.msrb.mxu3 %v18799_v11  ;;  %11913 = vmatpush.bf16.msra.mxu2 %v18812_v62  ;;  %v20303_v25 = vmul.f32 5.0, %v11010_v1  ;;  %v18785_v62 = vld [vmem:[#allocation17 + $0x108] sm:$0xff] }
 0x5b7   :  { %11902 = vmatpush.bf16.msra.mxu0 %v18802_v0 }
 0x5b8   :  { %v11018_v6 = vperm.slane %v20303_v25, 0  ;;  %v11019_v14 = vperm.slane %v20303_v25, 1  ;;  %v11020_v38 = vperm.slane %v20303_v25, 2  ;;  %v11021_v22 = vperm.slane %v20303_v25, 3 }
 0x5b9   :  { %11872 = vmatpush.bf16.msrb.mxu1 %v18790_v20  ;;  %v11022_v11 = vperm.slane %v20303_v25, 4  ;;  %v11023_v55 = vperm.slane %v20303_v25, 5  ;;  %v11024_v49 = vperm.slane %v20303_v25, 6  ;;  %v11025_v63 = vperm.slane %v20303_v25, 7  ;;  %v18810_v20 = vld [vmem:[#allocation17 + $0x1d0] sm:$0xff]  ;;  %v10575_v30 = vpop.f32.mrf.mxu2 }
 0x5ba   :  { %11885 = vmatpush.bf16.msrb.mxu3 %v18798_v37  ;;  %11914 = vmatpush.bf16.msra.mxu2 %v18811_v13  ;;  %v11038_v7 = vmul.f32 %v11018_v6, %v19878_v61  ;;  %v11039_v15 = vmul.f32 %v11019_v14, %v19900_v48  ;;  %v11040_v31 = vmul.f32 %v11020_v38, %v19991_v4  ;;  %v10497_v9 = vpop.f32.mrf.mxu3 }
 0x5bb   :  { %v11041_v8 = vmul.f32 %v11021_v22, %v20017_v29  ;;  %v11042_v18 = vmul.f32 %v11022_v11, %v20191_v3  ;;  %v11043_v44 = vmul.f32 %v11023_v55, %v20187_v45  ;;  %v11044_v60 = vmul.f32 %v11024_v49, %v20194_v57  ;;  %v10564_v29 = vpop.f32.mrf.mxu0  ;;  %v10486_v57 = vpop.f32.mrf.mxu1  ;;  %11903 = vmatpush.bf16.msra.mxu0 %v18801_v56 }
 0x5bc   :  { %v11045_v37 = vmul.f32 %v11025_v63, %v20230_v23  ;;  %v11058_v61 = vrot.slane %v11039_v15, 7  ;;  %v11059_v33 = vrot.slane %v11040_v31, 6  ;;  %v11085_v4 = vmul.f32 %v11025_v63, %v20210_v2 }
 0x5bd   :  { %11873 = vmatpush.bf16.msrb.mxu1 %v18789_v26  ;;  %v11060_v48 = vrot.slane %v11041_v8, 5  ;;  %v11061_v3 = vrot.slane %v11042_v18, 4  ;;  %v11062_v39 = vrot.slane %v11043_v44, 3  ;;  %v11063_v45 = vrot.slane %v11044_v60, 2 }
 0x5be   :  { %11886 = vmatpush.bf16.msrb.mxu3 %v18797_v12  ;;  %v11064_v27 = vrot.slane %v11045_v37, 1  ;;  %11915 = vmatpush.bf16.msra.mxu2 %v18810_v20  ;;  %v11066_v23 = vsel %vm4401_vm7, %v11038_v7, %v11058_v61  ;;  %v20327_v12 = vadd.f32 %v10575_v30, %v10562_v42  ;;  %v10498_v24 = vadd.f32 %v10497_v9, %v10485_v51  ;;  %v18793_v42 = vld [vmem:[#allocation17 + $0x148] sm:$0xff] }
 0x5bf   :  { %v11067_v26 = vsel %vm4403_vm15, %v11059_v33, %v11060_v48  ;;  %v11069_v59 = vsel %vm4407_vm14, %v11061_v3, %v11062_v39  ;;  %v11078_v41 = vmul.f32 %v11018_v6, %v19860_v5  ;;  %v11079_v53 = vmul.f32 %v11019_v14, %v19887_v58  ;;  %v18800_v58 = vld [vmem:[#allocation17 + $0x180] sm:$0xff]  ;;  %v20418_v51 = vld [vmem:[#allocation28_spill] sm:$0xff]  ;;  %v20419_v6 = vld [vmem:[#allocation29_spill] sm:$0xff] }
 0x5c0   :  { %v11068_v2 = vsel %vm4405_vm1, %v11066_v23, %v11067_v26  ;;  %v11070_v40 = vsel %vm4409_vm0, %v11063_v45, %v11064_v27  ;;  %v11080_v1 = vmul.f32 %v11020_v38, %v19968_v17  ;;  %v11081_v32 = vmul.f32 %v11021_v22, %v20004_v21  ;;  %11904 = vmatpush.bf16.msra.mxu0 %v18800_v58 }
 0x5c1   :  { %11874 = vmatpush.bf16.msrb.mxu1 %v18788_v46  ;;  %v11071_v50 = vsel %vm4411_vm2, %v11069_v59, %v11070_v40  ;;  %v10511_v46 = vadd.f32 %v20241_v28, %v10498_v24  ;;  %v10577_v25 = vpop.f32.mrf.mxu2  ;;  %v18784_v28 = vld [vmem:[#allocation17 + $0x100] sm:$0xff]  ;;  %v11082_v17 = vmul.f32 %v11022_v11, %v20087_v16  ;;  %v11084_v14 = vmul.f32 %v11024_v49, %v20419_v6 }
 0x5c2   :  { %11887 = vmatpush.bf16.msrb.mxu3 %v18796_v34  ;;  %v18809_v34 = vld [vmem:[#allocation17 + $0x1c8] sm:$0xff]  ;;  %v11072_v47 = vsel %vm4413_vm3, %v11068_v2, %v11071_v50  ;;  %v10688_v49 = vld [vmem:[#allocation16 + $0x8] sm:$0xff]  ;;  %v10690_v25 = vld [vmem:[#allocation16 + $0x18] sm:$0xff] }
 0x5c3   :  { %v11076_v5 = vsub.f32 %v20306_v43, %v11072_v47  ;;  %v20341_v13 = vadd.f32 %v20253_v36, %v10511_v46  ;;  %11916 = vmatpush.bf16.msra.mxu2 %v18809_v34  ;;  %v18792_v43 = vld [vmem:[#allocation17 + $0x140] sm:$0xff]  ;;  %v11147_v45 = vunpack.c.l.bf16 %v10688_v49  ;;  %v11148_v57 = vunpack.c.h.bf16 %v10688_v49 }
 0x5c4   :  { %v18808_v36 = vld [vmem:[#allocation17 + $0x1c0] sm:$0xff] }
 0x5c5   :  { %11875 = vmatpush.bf16.msrb.mxu1 %v18787_v10  ;;  %v11083_v10 = vmul.f32 %v11023_v55, %v20418_v51  ;;  %v11097_v38 = vperm.slane %v11076_v5, 7  ;;  %v11090_v21 = vperm.slane %v11076_v5, 0  ;;  %v11091_v22 = vperm.slane %v11076_v5, 1  ;;  %v10687_v55 = vld [vmem:[#allocation16] sm:$0xff] }
 0x5c6   :  { %11888 = vmatpush.bf16.msrb.mxu3 %v18795_v35  ;;  %v10499_v35 = vpop.f32.mrf.mxu3  ;;  %v11092_v63 = vperm.slane %v11076_v5, 2  ;;  %v11093_v7 = vperm.slane %v11076_v5, 3  ;;  %v11094_v15 = vperm.slane %v11076_v5, 4  ;;  %v11095_v31 = vperm.slane %v11076_v5, 5 }
 0x5c7   :  { %v11096_v8 = vperm.slane %v11076_v5, 6  ;;  %v11117_v0 = vadd.f32 %v11097_v38, %v11085_v4  ;;  %v11110_v20 = vadd.f32 %v11090_v21, %v11078_v41  ;;  %v11111_v16 = vadd.f32 %v11091_v22, %v11079_v53  ;;  %11917 = vmatpush.bf16.msra.mxu2 %v18808_v36  ;;  %v10689_v5 = vld [vmem:[#allocation16 + $0x10] sm:$0xff] }
 0x5c8   :  { %v11112_v11 = vadd.f32 %v11092_v63, %v11080_v1  ;;  %v11113_v18 = vadd.f32 %v11093_v7, %v11081_v32  ;;  %v11114_v44 = vadd.f32 %v11094_v15, %v11082_v17  ;;  %v11115_v60 = vadd.f32 %v11095_v31, %v11083_v10 }
 0x5c9   :  { %11876 = vmatpush.bf16.msrb.mxu1 %v18786_v19  ;;  %v11116_v37 = vadd.f32 %v11096_v8, %v11084_v14  ;;  %v11127_v30 = vmax.f32 %v11117_v0, 0.0  ;;  %v11120_v19 = vmax.f32 %v11110_v20, 0.0  ;;  %v11121_v61 = vmax.f32 %v11111_v16, 0.0 }
 0x5ca   :  { %11889 = vmatpush.bf16.msrb.mxu3 %v18794_v52  ;;  %v11122_v33 = vmax.f32 %v11112_v11, 0.0  ;;  %v11123_v48 = vmax.f32 %v11113_v18, 0.0  ;;  %v11124_v9 = vmax.f32 %v11114_v44, 0.0  ;;  %v11125_v29 = vmax.f32 %v11115_v60, 0.0 }
 0x5cb   :  { %v11126_v4 = vmax.f32 %v11116_v37, 0.0  ;;  %v11130_v52 = vpack.c.bf16 %v11121_v61, %v11120_v19  ;;  %v11145_v3 = vunpack.c.l.bf16 %v10687_v55  ;;  %v11146_v39 = vunpack.c.h.bf16 %v10687_v55 }
 0x5cc   :  { %v11131_v27 = vpack.c.bf16 %v11123_v48, %v11122_v33  ;;  %v11132_v23 = vpack.c.bf16 %v11125_v29, %v11124_v9  ;;  %v11149_v58 = vunpack.c.l.bf16 %v10689_v5  ;;  %v11150_v51 = vunpack.c.h.bf16 %v10689_v5 }
 0x5cd   :  { %11877 = vmatpush.bf16.msrb.mxu1 %v18785_v62  ;;  %v11133_v26 = vpack.c.bf16 %v11127_v30, %v11126_v4  ;;  %v11135_v24 = vunpack.c.l.bf16 %v11130_v52  ;;  %v11136_v2 = vunpack.c.h.bf16 %v11130_v52  ;;  %v11151_v14 = vunpack.c.l.bf16 %v10690_v25 }
 0x5ce   :  { %11890 = vmatpush.bf16.msrb.mxu3 %v18793_v42  ;;  %v11137_v59 = vunpack.c.l.bf16 %v11131_v27  ;;  %v11138_v40 = vunpack.c.h.bf16 %v11131_v27  ;;  %v11140_v17 = vunpack.c.h.bf16 %v11132_v23  ;;  %v11152_v35 = vunpack.c.h.bf16 %v10690_v25 }
 0x5cf   :  { %v11155_v41 = vmul.f32 %v11145_v3, %v11135_v24  ;;  %v11156_v62 = vmul.f32 %v11146_v39, %v11136_v2  ;;  %v11141_v6 = vunpack.c.l.bf16 %v11133_v26  ;;  %v11142_v38 = vunpack.c.h.bf16 %v11133_v26 }
 0x5d0   :  { %v11157_v56 = vmul.f32 %v11147_v45, %v11137_v59  ;;  %v11158_v50 = vmul.f32 %v11148_v57, %v11138_v40  ;;  %v11160_v7 = vmul.f32 %v11150_v51, %v11140_v17 }
 0x5d1   :  { %11878 = vmatpush.bf16.msrb.mxu1 %v18784_v28  ;;  %v11165_v46 = vpack.c.bf16 %v11155_v41, %v11155_v41  ;;  %v11166_v53 = vpack.c.bf16 %v11156_v62, %v11156_v62  ;;  %v10614_v34 = vpop.f32.mrf.mxu0  ;;  %v10536_v47 = vpop.f32.mrf.mxu1  ;;  %v11139_v28 = vunpack.c.l.bf16 %v11132_v23  ;;  %v11161_v15 = vmul.f32 %v11151_v14, %v11141_v6 }
 0x5d2   :  { %11891 = vmatpush.bf16.msrb.mxu3 %v18792_v43  ;;  %v11167_v1 = vpack.c.bf16 %v11157_v56, %v11157_v56  ;;  %v11168_v42 = vpack.c.bf16 %v11158_v50, %v11158_v50  ;;  %v10537_v32 = vadd.f32 %v10536_v47, %v20341_v13  ;;  %v11162_v13 = vmul.f32 %v11152_v35, %v11142_v38 }
 0x5d3   :  { %11827 = vmatmul.bf16.vlgmr.msra.gmra.mxu1 %v11165_v46  ;;  %11840 = vmatmul.bf16.vlgmr.msra.gmra.mxu3 %v11166_v53  ;;  %v11159_v36 = vmul.f32 %v11149_v58, %v11139_v28  ;;  %v11170_v8 = vpack.c.bf16 %v11160_v7, %v11160_v7  ;;  %v11171_v20 = vpack.c.bf16 %v11161_v15, %v11161_v15 }
 0x5d4   :  { %11853 = vmatmul.bf16.vlgmr.msrb.gmra.mxu0 %v11167_v1  ;;  %11866 = vmatmul.bf16.vlgmr.msrb.gmra.mxu2 %v11168_v42  ;;  %v11172_v16 = vpack.c.bf16 %v11162_v13, %v11162_v13 }
 0x5d5   :  { %v11169_v31 = vpack.c.bf16 %v11159_v36, %v11159_v36  ;;  %v18831_v36 = vld [vmem:[#allocation17 + $0x278] sm:$0xff] }
 0x5d6   :  { %11936 = vmatpush.bf16.msra.mxu3 %v18831_v36 }
 0x5d9   :  { %v10627_v10 = vpop.f32.mrf.mxu2  ;;  %v10616_v22 = vpop.f32.mrf.mxu0 }
 0x5da   :  { %v10549_v21 = vpop.f32.mrf.mxu3  ;;  %v10538_v43 = vpop.f32.mrf.mxu1 }
 0x5db   :  { %v20347_v63 = vadd.f32 %v10549_v21, %v10537_v32  ;;  %v18823_v43 = vld [vmem:[#allocation17 + $0x238] sm:$0xff] }
 0x5dc   :  { %11923 = vmatpush.bf16.msra.mxu1 %v18823_v43 }
 0x5dd   :  { %v10740_v30 = vrot.slane %v20347_v63, 4  ;;  %v10770_v19 = vmul.f32 %v20347_v63, %v20347_v63 }
 0x5df   :  { %v10741_v33 = vadd.f32 %v10740_v30, %v20347_v63  ;;  %v10820_v48 = vrot.slane %v10770_v19, 4  ;;  %v18819_v30 = vld [vmem:[#allocation17 + $0x218] sm:$0xff] }
 0x5e1   :  { %v10629_v0 = vpop.f32.mrf.mxu2  ;;  %v10742_v29 = vrot.slane %v10741_v33, 2  ;;  %v10821_v4 = vadd.f32 %v10820_v48, %v10770_v19  ;;  %v18827_v19 = vld [vmem:[#allocation17 + $0x258] sm:$0xff]  ;;  %v18826_v48 = vld [vmem:[#allocation17 + $0x250] sm:$0xff] }
 0x5e2   :  { %v10551_v11 = vpop.f32.mrf.mxu3  ;;  %v18830_v0 = vld [vmem:[#allocation17 + $0x270] sm:$0xff] }
 0x5e3   :  { %11879 = vmatmul.bf16.vlgmr.msrb.gmra.mxu1 %v11169_v31  ;;  %11892 = vmatmul.bf16.vlgmr.msrb.gmra.mxu3 %v11170_v8  ;;  %v10743_v52 = vadd.f32 %v10742_v29, %v10741_v33  ;;  %v10822_v3 = vrot.slane %v10821_v4, 2  ;;  %v18822_v8 = vld [vmem:[#allocation17 + $0x230] sm:$0xff] }
 0x5e4   :  { %11905 = vmatmul.bf16.vlgmr.msra.gmra.mxu0 %v11171_v20  ;;  %11918 = vmatmul.bf16.vlgmr.msra.gmra.mxu2 %v11172_v16  ;;  %v18818_v33 = vld [vmem:[#allocation17 + $0x210] sm:$0xff] }
 0x5e5   :  { %v10744_v27 = vrot.slane %v10743_v52, 1  ;;  %v10823_v57 = vadd.f32 %v10822_v3, %v10821_v4  ;;  %11924 = vmatpush.bf16.msra.mxu1 %v18822_v8  ;;  %11937 = vmatpush.bf16.msra.mxu3 %v18830_v0  ;;  %v18825_v3 = vld [vmem:[#allocation17 + $0x248] sm:$0xff] }
 0x5e7   :  { %v10745_v24 = vadd.f32 %v10744_v27, %v10743_v52  ;;  %v10824_v2 = vrot.slane %v10823_v57, 1  ;;  %v18817_v52 = vld [vmem:[#allocation17 + $0x208] sm:$0xff] }
 0x5e9   :  { %v20355_v40 = vmul.f32 %v10745_v24, %v19375_v54  ;;  %v10825_v41 = vadd.f32 %v10824_v2, %v10823_v57  ;;  %v18816_v57 = vld [vmem:[#allocation17 + $0x200] sm:$0xff] }
 0x5eb   :  { %v10840_v53 = vmul.f32 %v10825_v41, %v19375_v54 }
 0x5f1   :  { %v10666_v55 = vpop.f32.mrf.mxu0  ;;  %v10588_v49 = vpop.f32.mrf.mxu1 }
 0x5f2   :  { %v10589_v39 = vadd.f32 %v10588_v49, %v20327_v12  ;;  %v10850_v12 = vmul.f32 %v20355_v40, %v20355_v40  ;;  %v18829_v49 = vld [vmem:[#allocation17 + $0x268] sm:$0xff] }
 0x5f3   :  { %11938 = vmatpush.bf16.msra.mxu3 %v18829_v49 }
 0x5f8   :  { %v10601_v44 = vpop.f32.mrf.mxu3 }
 0x5f9   :  { %v10679_v18 = vpop.f32.mrf.mxu2  ;;  %v10668_v60 = vpop.f32.mrf.mxu0  ;;  %v10602_v45 = vadd.f32 %v10601_v44, %v10589_v39 }
 0x5fa   :  { %v10590_v37 = vpop.f32.mrf.mxu1  ;;  %v18820_v60 = vld [vmem:[#allocation17 + $0x220] sm:$0xff] }
 0x5fb   :  { %v10615_v23 = vadd.f32 %v10614_v34, %v10602_v45  ;;  %v10860_v34 = vsub.f32 %v10840_v53, %v10850_v12  ;;  %v10686_v53 = vld [vmem:[#allocation14 + $0x8] sm:$0x3] }
 0x5fd   :  { %v10628_v59 = vadd.f32 %v10627_v10, %v10615_v23  ;;  %v10870_v58 = vmax.f32 %v10860_v34, 0.0  ;;  %v18824_v23 = vld [vmem:[#allocation17 + $0x240] sm:$0xff] }
 0x5ff   :  { %v20366_v14 = vadd.f32 1e-05, %v10870_v58 }
 0x600   :  { %v10603_v9 = vpop.f32.mrf.mxu3 }
 0x601   :  { %v10681_v61 = vpop.f32.mrf.mxu2  ;;  %18888 = vrsqrt.f32 %v20366_v14  ;;  %vm10968_vm2 = vweird.f32 %v20366_v14 }
 0x607   :  { %v18889_v16 = vpop.eup %18888 }
 0x608   :  { %v10963_v44 = vmul.f32 %v18889_v16, %v20366_v14  ;;  %vm10969_vm1 = vweird.f32 %v18889_v16 }
 0x609   :  { %vm10970_vm3 = vmor %vm10968_vm2, %vm10969_vm1 }
 0x60a   :  { %v10964_v37 = vmul.f32 %v18889_v16, %v10963_v44 }
 0x60c   :  { %v10965_v9 = vmul.f32 0.5, %v10964_v37 }
 0x60e   :  { %v10966_v39 = vsub.f32 1.5, %v10965_v9 }
 0x611   :  { %v10640_v26 = vpop.f32.mrf.mxu1 }
 0x612   :  { %v10641_v62 = vadd.f32 %v10640_v26, %v10628_v59  ;;  %v10967_v26 = vmul.f32 %v18889_v16, %v10966_v39  ;;  %v10684_v59 = vld [vmem:[#allocation13 + $0x8] sm:$0x3] }
 0x618   :  { %v10653_v56 = vpop.f32.mrf.mxu3 }
 0x619   :  { %v10654_v50 = vadd.f32 %v10653_v56, %v10641_v62  ;;  %v10642_v46 = vpop.f32.mrf.mxu1  ;;  %v10971_v62 = vsel %vm10970_vm3, %v18889_v16, %v10967_v26 }
 0x61b   :  { %v10667_v1 = vadd.f32 %v10666_v55, %v10654_v50  ;;  %v18821_v55 = vld [vmem:[#allocation17 + $0x228] sm:$0xff] }
 0x61c   :  { %11925 = vmatpush.bf16.msra.mxu1 %v18821_v55 }
 0x61d   :  { %v20360_v42 = vadd.f32 %v10679_v18, %v10667_v1 }
 0x61f   :  { %v10746_v47 = vrot.slane %v20360_v42, 4  ;;  %v10771_v32 = vmul.f32 %v20360_v42, %v20360_v42 }
 0x620   :  { %v10655_v5 = vpop.f32.mrf.mxu3  ;;  %11926 = vmatpush.bf16.msra.mxu1 %v18820_v60 }
 0x621   :  { %v10747_v25 = vadd.f32 %v10746_v47, %v20360_v42  ;;  %v10826_v28 = vrot.slane %v10771_v32, 4 }
 0x623   :  { %v10748_v17 = vrot.slane %v10747_v25, 2  ;;  %v10827_v51 = vadd.f32 %v10826_v28, %v10771_v32 }
 0x624   :  { %11927 = vmatpush.bf16.msra.mxu1 %v18819_v30 }
 0x625   :  { %v10749_v10 = vadd.f32 %v10748_v17, %v10747_v25  ;;  %v10828_v6 = vrot.slane %v10827_v51, 2  ;;  %v11015_v25 = vmul.f32 5.0, %v10686_v53 }
 0x627   :  { %v10750_v38 = vrot.slane %v10749_v10, 1  ;;  %v10829_v35 = vadd.f32 %v10828_v6, %v10827_v51  ;;  %v18849_v51 = vld [vmem:[#allocation19] ss:$0 sm:$0xff] }
 0x628   :  { %11928 = vmatpush.bf16.msra.mxu1 %v18818_v33 }
 0x629   :  { %v10751_v21 = vadd.f32 %v10750_v38, %v10749_v10  ;;  %v10830_v22 = vrot.slane %v10829_v35, 1 }
 0x62b   :  { %v20370_v7 = vmul.f32 %v10751_v21, %v19375_v54  ;;  %v10831_v15 = vadd.f32 %v10830_v22, %v10829_v35 }
 0x62c   :  { %11929 = vmatpush.bf16.msra.mxu1 %v18817_v52 }
 0x62d   :  { %v10841_v13 = vmul.f32 %v10831_v15, %v19375_v54  ;;  %v10851_v31 = vmul.f32 %v20370_v7, %v20370_v7  ;;  %v18828_v54 = vld [vmem:[#allocation17 + $0x260] sm:$0xff] }
 0x62e   :  { %11939 = vmatpush.bf16.msra.mxu3 %v18828_v54 }
 0x62f   :  { %v10861_v20 = vsub.f32 %v10841_v13, %v10851_v31 }
 0x630   :  { %11930 = vmatpush.bf16.msra.mxu1 %v18816_v57 }
 0x631   :  { %v10871_v11 = vmax.f32 %v10861_v20, 0.0 }
 0x632   :  { %11940 = vmatpush.bf16.msra.mxu3 %v18827_v19 }
 0x633   :  { %v10881_v18 = vadd.f32 1e-05, %v10871_v11 }
 0x635   :  { %18890 = vrsqrt.f32 %v10881_v18  ;;  %vm10978_vm14 = vweird.f32 %v10881_v18 }
 0x636   :  { %11941 = vmatpush.bf16.msra.mxu3 %v18826_v48 }
 0x63a   :  { %11942 = vmatpush.bf16.msra.mxu3 %v18825_v3 }
 0x63b   :  { %v18891_v61 = vpop.eup %18890 }
 0x63c   :  { %v10973_v29 = vmul.f32 %v18891_v61, %v10881_v18  ;;  %vm10979_vm15 = vweird.f32 %v18891_v61 }
 0x63d   :  { %vm10980_vm0 = vmor %vm10978_vm14, %vm10979_vm15 }
 0x63e   :  { %v10974_v4 = vmul.f32 %v18891_v61, %v10973_v29  ;;  %11943 = vmatpush.bf16.msra.mxu3 %v18824_v23 }
 0x640   :  { %v10975_v45 = vmul.f32 0.5, %v10974_v4 }
 0x642   :  { %v10976_v27 = vsub.f32 1.5, %v10975_v45 }
 0x644   :  { %v10977_v24 = vmul.f32 %v18891_v61, %v10976_v27 }
 0x646   :  { %v10981_v2 = vsel %vm10980_vm0, %v18891_v61, %v10977_v24 }
 0x647   :  { %v10999_v41 = vrot.slane %v10981_v2, 7 }
 0x649   :  { %v11007_v56 = vsel %vm4401_vm7, %v10971_v62, %v10999_v41 }
 0x64a   :  { %v11011_v50 = vmul.f32 %v11007_v56, %v10684_v59 }
 0x64c   :  { %v11013_v46 = vmul.f32 5.0, %v11011_v50 }
 0x64e   :  { %v11026_v12 = vperm.slane %v11013_v46, 0  ;;  %v11027_v1 = vperm.slane %v11013_v46, 1 }
 0x650   :  { %v11046_v34 = vmul.f32 %v11026_v12, %v20355_v40  ;;  %v11047_v47 = vmul.f32 %v11027_v1, %v20370_v7  ;;  %v11086_v32 = vmul.f32 %v11026_v12, %v20347_v63  ;;  %v11087_v5 = vmul.f32 %v11027_v1, %v20360_v42  ;;  %v11828_v58 = vpop.f32.mrf.mxu1  ;;  %v10691_v7 = vld [vmem:[#allocation16 + $0x20] sm:$0xff] }
 0x651   :  { %v11854_v10 = vpop.f32.mrf.mxu0  ;;  %v11829_v35 = vadd.f32 %v18849_v51, %v11828_v58  ;;  %v11153_v0 = vunpack.c.l.bf16 %v10691_v7  ;;  %v11154_v20 = vunpack.c.h.bf16 %v10691_v7 }
 0x652   :  { %v11065_v28 = vrot.slane %v11047_v47, 7 }
 0x654   :  { %v11073_v17 = vsel %vm4401_vm7, %v11046_v34, %v11065_v28 }
 0x655   :  { %v11077_v6 = vsub.f32 %v11015_v25, %v11073_v17 }
 0x656   :  { %v11841_v22 = vpop.f32.mrf.mxu3 }
 0x657   :  { %v11098_v14 = vperm.slane %v11077_v6, 0  ;;  %v11099_v38 = vperm.slane %v11077_v6, 1  ;;  %v11842_v43 = vadd.f32 %v11841_v22, %v11829_v35  ;;  %v11867_v36 = vpop.f32.mrf.mxu2 }
 0x658   :  { %v11830_v15 = vpop.f32.mrf.mxu1 }
 0x659   :  { %v11119_v21 = vadd.f32 %v11099_v38, %v11087_v5  ;;  %v11118_v40 = vadd.f32 %v11098_v14, %v11086_v32  ;;  %v11855_v13 = vadd.f32 %v11854_v10, %v11842_v43  ;;  %v11856_v31 = vpop.f32.mrf.mxu0 }
 0x65b   :  { %v11129_v63 = vmax.f32 %v11119_v21, 0.0  ;;  %v11128_v42 = vmax.f32 %v11118_v40, 0.0  ;;  %v11868_v16 = vadd.f32 %v11867_v36, %v11855_v13 }
 0x65d   :  { %v11134_v8 = vpack.c.bf16 %v11129_v63, %v11128_v42 }
 0x65e   :  { %v11843_v49 = vpop.f32.mrf.mxu3 }
 0x65f   :  { %v11143_v11 = vunpack.c.l.bf16 %v11134_v8  ;;  %v11144_v55 = vunpack.c.h.bf16 %v11134_v8  ;;  %v11869_v60 = vpop.f32.mrf.mxu2 }
 0x660   :  { %v11880_v54 = vpop.f32.mrf.mxu1 }
 0x661   :  { %v11163_v18 = vmul.f32 %v11153_v0, %v11143_v11  ;;  %v11164_v44 = vmul.f32 %v11154_v20, %v11144_v55  ;;  %v11881_v19 = vadd.f32 %v11880_v54, %v11868_v16  ;;  %v11906_v61 = vpop.f32.mrf.mxu0 }
 0x663   :  { %v11173_v37 = vpack.c.bf16 %v11163_v18, %v11163_v18  ;;  %v11174_v30 = vpack.c.bf16 %v11164_v44, %v11164_v44 }
 0x665   :  { %11931 = vmatmul.bf16.vlgmr.msra.gmra.mxu1 %v11173_v37  ;;  %11944 = vmatmul.bf16.vlgmr.msra.gmra.mxu3 %v11174_v30 }
 0x666   :  { %v11893_v33 = vpop.f32.mrf.mxu3 }
 0x667   :  { %v11894_v48 = vadd.f32 %v11893_v33, %v11881_v19  ;;  %v11919_v9 = vpop.f32.mrf.mxu2 }
 0x668   :  { %v11882_v29 = vpop.f32.mrf.mxu1 }
 0x669   :  { %v11907_v4 = vadd.f32 %v11906_v61, %v11894_v48  ;;  %v11908_v52 = vpop.f32.mrf.mxu0 }
 0x66b   :  { %v11920_v3 = vadd.f32 %v11919_v9, %v11907_v4 }
 0x66e   :  { %v11895_v39 = vpop.f32.mrf.mxu3 }
 0x66f   :  { %v11921_v45 = vpop.f32.mrf.mxu2 }
 0x6e2   :  { %v11932_v27 = vpop.f32.mrf.mxu1 }
 0x6e3   :  { %v11933_v57 = vadd.f32 %v11932_v27, %v11920_v3 }
 0x6e8   :  { %v11945_v23 = vpop.f32.mrf.mxu3 }
 0x6e9   :  { %v11946_v26 = vadd.f32 %v11945_v23, %v11933_v57 }
 0x6ea   :  { %v11934_v24 = vpop.f32.mrf.mxu1 }
 0x6eb   :  { %11949 = vst [vmem:[#allocation20] sm:$0xff] %v11946_v26 }
 0x6ec   :  { %11960 = dma.vmem_to_hbm [thread:$0]  %s11956_s10, 128, %s11958_s26, [#allocation4]  }
 0x6f0   :  { %v11947_v2 = vpop.f32.mrf.mxu3 }
 0x6f1   :  { %19192 = dma.done.wait [#allocation4], 128  }
 0x6f2   :  { %19193 = vsyncadd [#allocation4], 4294967168 }
 0x6f3   :  { %11965 = vsyncpa [#allocation3], 1 }
 0x6f4   :  { %11966 = vsyncpa [#allocation6], 1 }
 0x6f5   :  { %11967 = vsyncpa [#allocation9], 1 }
 0x6f6   :  { %11968 = vsyncpa [#allocation12], 1 }
 0x6f7   :  { %11969 = vsyncpa [#allocation15], 1 }
 0x6f8   :  { %11970 = vsyncpa [#allocation18], 1 }
 0x6f9   :  { %11971 = vsyncpa [#allocation4], 1 }

</bundles_post_ra>
